<compile_context>
chip_gen: v6e
topology: v6e:2x2x1
jax: 0.10.0
libtpu: 0.0.40
codegen_flags: <defaults>
</compile_context>

<pallas_src>
import jax
import jax.numpy as jnp
import numpy as np
from jax.experimental import pallas as pl
from jax.experimental.pallas import tpu as pltpu

D_TXT = 312     # TinyBERT_General_4L_312D hidden size
D_IMG = 1024    # densenet121 features.norm5.num_features
D_HID = 512     # img_featrs_fc / text_features_fc out dim
L_IMG = 1       # densenet pooled output viewed as (B, -1, 1024) -> one token


def _round_up(x, m):
    return (x + m - 1) // m * m


# --------------------------------------------------------------------------
# Pallas kernel: CDBert head for one batch tile (L == 1 specialization).
# --------------------------------------------------------------------------
def _cdbert_head_kernel(text_ref, img_ref,
                        wv_ref, bv_ref, wif_ref, bif_ref,
                        wtf_ref, btf_ref, wci_ref, wct_ref, bc_ref,
                        out_ref):
    f32 = jnp.float32
    text = text_ref[...]                                   # (Bt, T, 384) f32
    img = img_ref[...]                                      # (Bt, 1024)   f32

    # CrossAttention with a single image token: softmax over the length-1 key
    # axis is exactly 1.0, so attention_outputs == broadcast(V) and
    # attention_outputs.mean(dim=1) == V = img @ Wv + bv.  Q/K/scores/softmax
    # are skipped (algebraically identical, ~60% fewer FLOPs, ~5 MB less weight
    # traffic).
    attn_mean = (jnp.dot(img, wv_ref[...].astype(f32), preferred_element_type=f32)
                 + bv_ref[...].astype(f32))                 # (Bt, 1024)

    # img_featrs_fc
    img_feat = (jnp.dot(attn_mean, wif_ref[...].astype(f32), preferred_element_type=f32)
                + bif_ref[...].astype(f32))                 # (Bt, 512)

    # text_features.mean(dim=1) -> text_features_fc  (padded feature cols are 0)
    txt_mean = jnp.mean(text, axis=1)                       # (Bt, 384)
    txt_feat = (jnp.dot(txt_mean, wtf_ref[...].astype(f32), preferred_element_type=f32)
                + btf_ref[...].astype(f32))                 # (Bt, 512)

    # classifier(cat([img_feat, txt_feat], dim=1)) as a split matmul; the weight
    # is split outside the kernel (wci = wc[:512], wct = wc[512:], PyTorch cat
    # order [img, txt]) to avoid in-kernel slice materialization.
    logits = (jnp.dot(img_feat, wci_ref[...].astype(f32), preferred_element_type=f32)
              + jnp.dot(txt_feat, wct_ref[...].astype(f32), preferred_element_type=f32)
              + bc_ref[...].astype(f32))                    # (Bt, C_pad)
    out_ref[...] = logits


def cdbert_head(text_features, image_features, params, num_classes):
    B, T, dt = text_features.shape
    _, L, di = image_features.shape
    assert dt == D_TXT and di == D_IMG
    # densenet pooled features .view(B, -1, 1024) always yield L == 1.
    assert L == L_IMG, "kernel specializes the single-image-token (L==1) case"
    # TODO(synk): general L>1 cross-attention path not implemented (never hit by this model).

    c_pad = _round_up(num_classes, 128)          # lane-dense output block
    dt_pad = _round_up(D_TXT, 128)               # 312 -> 384: unmasked loads, aligned MXU K

    # Batch tiling: fill MXU rows and amortize per-grid-step overhead.
    b_tile = min(_round_up(B, 8), 256)
    bp = _round_up(B, b_tile)

    text_p = jnp.zeros((bp, T, dt_pad), jnp.float32).at[:B, :, :D_TXT].set(
        text_features.astype(jnp.float32))
    img_p = jnp.zeros((bp, D_IMG), jnp.float32).at[:B].set(
        image_features.reshape(B, D_IMG).astype(jnp.float32))

    # Head weights stored bf16 (halves weight DMA / VMEM); upcast to f32 in-kernel.
    bf16 = jnp.bfloat16
    wv, bv = params['wv'].astype(bf16), params['bv'].astype(bf16)
    wif, bif = params['wif'].astype(bf16), params['bif'].astype(bf16)
    wtf = jnp.zeros((dt_pad, D_HID), bf16).at[:D_TXT].set(params['wtf'].astype(bf16))
    btf = params['btf'].astype(bf16)
    wc = params['wc'].astype(bf16)
    wci = jnp.zeros((D_HID, c_pad), bf16).at[:, :num_classes].set(wc[:D_HID])
    wct = jnp.zeros((D_HID, c_pad), bf16).at[:, :num_classes].set(wc[D_HID:])
    bc = jnp.zeros((1, c_pad), bf16).at[:, :num_classes].set(params['bc'].astype(bf16))

    weights = [wv, bv, wif, bif, wtf, btf, wci, wct, bc]
    # Constant index maps -> Pallas fetches each weight block once (revisited
    # across grid steps); bf16 keeps the resident footprint ~4 MB.
    weight_specs = [pl.BlockSpec(w.shape, lambda b: (0, 0)) for w in weights]

    in_specs = [
        pl.BlockSpec((b_tile, T, dt_pad), lambda b: (b, 0, 0)),
        pl.BlockSpec((b_tile, D_IMG), lambda b: (b, 0)),
    ] + weight_specs
    out_specs = pl.BlockSpec((b_tile, c_pad), lambda b: (b, 0))

    out = pl.pallas_call(
        _cdbert_head_kernel,
        grid=(bp // b_tile,),
        in_specs=in_specs,
        out_specs=out_specs,
        out_shape=jax.ShapeDtypeStruct((bp, c_pad), jnp.float32),
        compiler_params=pltpu.CompilerParams(
            # Batch tiles are independent -> shard across v7x's two TensorCores.
            dimension_semantics=("parallel",),
            # ~4 MB bf16 weights (x2 buffers) + ~17 KB/row f32 activations (x2):
            # well under 48 MiB even at b_tile=256; leaves v7x headroom.
            vmem_limit_bytes=48 * 1024 * 1024),
    )(text_p, img_p, *weights)
    return out[:B, :num_classes]


# --------------------------------------------------------------------------
# Frozen backbone stand-ins (plain JAX glue).
# --------------------------------------------------------------------------
def densenet_standin(images, proj):
    # TODO(synk): pretrained DenseNet121 feature extractor not translated;
    # stand-in = global average pool over H,W + fixed linear projection to 1024.
    pooled = jnp.mean(images, axis=(2, 3))                       # (B, C_in)
    feats = pooled @ proj                                        # (B, 1024)
    return feats.reshape(images.shape[0], L_IMG, D_IMG)          # .view(B, -1, 1024)


def tinybert_standin(input_ids, attention_mask, emb_table):
    # TODO(synk): pretrained TinyBERT encoder not translated; stand-in =
    # token-embedding lookup gated by attention_mask (shape-faithful (B, T, 312)).
    emb = emb_table[input_ids]                                   # (B, T, 312)
    return emb * attention_mask[..., None].astype(emb.dtype)


def cdbert_forward(images, input_ids, attention_mask, params, proj, emb_table,
                   num_classes):
    image_features = densenet_standin(images, proj)              # (B, 1, 1024)
    text_features = tinybert_standin(input_ids, attention_mask, emb_table)
    return cdbert_head(text_features, image_features, params, num_classes)


# --------------------------------------------------------------------------
# Pure-JAX reference (full attention math, no L==1 shortcut) for verification.
# --------------------------------------------------------------------------
def reference_head(text_features, image_features, p):
    f32 = jnp.float32
    w = {k: v.astype(f32) for k, v in p.items()}
    # TODO(synk): CrossAttention source was not provided; implemented as standard
    # Q(text)/K,V(image) scaled-dot-product cross attention with image-dim output.
    q = text_features @ w['wq'] + w['bq'][0]
    k = image_features @ w['wk'] + w['bk'][0]
    v = image_features @ w['wv'] + w['bv'][0]
    scores = jnp.einsum('btd,bld->btl', q, k) / jnp.sqrt(jnp.float32(D_IMG))
    a = jax.nn.softmax(scores, axis=-1)
    attn = jnp.einsum('btl,bld->btd', a, v)
    img_feat = attn.mean(axis=1) @ w['wif'] + w['bif'][0]
    txt_feat = text_features.mean(axis=1) @ w['wtf'] + w['btf'][0]
    combined = jnp.concatenate([img_feat, txt_feat], axis=1)
    return combined @ w['wc'] + w['bc'][0]


def reference_forward(images, input_ids, attention_mask, params, proj, emb_table):
    image_features = densenet_standin(images, proj)
    text_features = tinybert_standin(input_ids, attention_mask, emb_table)
    return reference_head(text_features, image_features, params)


# --------------------------------------------------------------------------
# Deterministic parameter initialization (shapes from CDBert.__init__).
# --------------------------------------------------------------------------
def init_params(key, num_classes):
    ks = jax.random.split(key, 12)
    s = 0.05
    return {
        # CrossAttention(img_dim=1024, text_dim=312)
        'wq': jax.random.normal(ks[0], (D_TXT, D_IMG), jnp.float32) * s,
        'bq': jax.random.normal(ks[1], (1, D_IMG), jnp.float32) * s,
        'wk': jax.random.normal(ks[2], (D_IMG, D_IMG), jnp.float32) * s,
        'bk': jax.random.normal(ks[3], (1, D_IMG), jnp.float32) * s,
        'wv': jax.random.normal(ks[4], (D_IMG, D_IMG), jnp.float32) * s,
        'bv': jax.random.normal(ks[5], (1, D_IMG), jnp.float32) * s,
        # img_featrs_fc: Linear(1024, 512)
        'wif': jax.random.normal(ks[6], (D_IMG, D_HID), jnp.float32) * s,
        'bif': jax.random.normal(ks[7], (1, D_HID), jnp.float32) * s,
        # text_features_fc: Linear(312, 512)
        'wtf': jax.random.normal(ks[8], (D_TXT, D_HID), jnp.float32) * s,
        'btf': jax.random.normal(ks[9], (1, D_HID), jnp.float32) * s,
        # classifier: Linear(1024, num_classes), rows ordered [img_feat, txt_feat]
        'wc': jax.random.normal(ks[10], (2 * D_HID, num_classes), jnp.float32) * s,
        'bc': jax.random.normal(ks[11], (1, num_classes), jnp.float32) * s,
    }


if __name__ == "__main__":
    key = jax.random.PRNGKey(0)
    k_img, k_ids, k_param, k_proj, k_emb = jax.random.split(key, 5)

    B, T, C_IN, H, W = 2, 8, 3, 32, 32
    NUM_CLASSES = 10
    VOCAB = 100

    images = jax.random.normal(k_img, (B, C_IN, H, W), jnp.float32)          # NCHW
    input_ids = jax.random.randint(k_ids, (B, T), 0, VOCAB, dtype=jnp.int32)
    attention_mask = jnp.ones((B, T), dtype=jnp.int32)

    params = init_params(k_param, NUM_CLASSES)
    # Store the trainable-head weights in bf16 (halves weight DMA/VMEM); both the
    # Pallas kernel and the reference consume the same bf16-rounded values and
    # compute in f32, so they stay bit-comparable within f32 matmul tolerance.
    params = jax.tree_util.tree_map(lambda x: x.astype(jnp.bfloat16), params)

    proj = jax.random.normal(k_proj, (C_IN, D_IMG), jnp.float32) * 5.0
    emb_table = jax.random.normal(k_emb, (VOCAB, D_TXT), jnp.float32)

    logits = cdbert_forward(images, input_ids, attention_mask, params, proj,
                            emb_table, NUM_CLASSES)
    logits = jax.block_until_ready(logits)

    ref = jax.block_until_ready(
        reference_forward(images, input_ids, attention_mask, params, proj,
                          emb_table))

    assert logits.shape == (B, NUM_CLASSES), logits.shape
    np.testing.assert_allclose(np.asarray(logits), np.asarray(ref),
                               rtol=2e-3, atol=2e-3)
    print("KERNEL_OK")
</pallas_src>

<mosaic_0001>
module attributes {stable_mosaic.version = 11 : i64} {
  func.func @_cdbert_head_kernel(%arg0: i32, %arg1: memref<8x8x384xf32, #tpu.memory_space<vmem>>, %arg2: memref<8x1024xf32, #tpu.memory_space<vmem>>, %arg3: memref<1024x1024xbf16, #tpu.memory_space<vmem>>, %arg4: memref<1x1024xbf16, #tpu.memory_space<vmem>>, %arg5: memref<1024x512xbf16, #tpu.memory_space<vmem>>, %arg6: memref<1x512xbf16, #tpu.memory_space<vmem>>, %arg7: memref<384x512xbf16, #tpu.memory_space<vmem>>, %arg8: memref<1x512xbf16, #tpu.memory_space<vmem>>, %arg9: memref<512x128xbf16, #tpu.memory_space<vmem>>, %arg10: memref<512x128xbf16, #tpu.memory_space<vmem>>, %arg11: memref<1x128xbf16, #tpu.memory_space<vmem>>, %arg12: memref<8x128xf32, #tpu.memory_space<vmem>>) attributes {dimension_semantics = [#tpu.dimension_semantics<parallel>], iteration_bounds = array<i64: 1>, scalar_prefetch = 0 : i64, scratch_operands = 0 : i64, tpu.core_type = #tpu.core_type<tc>, window_params = [{transform_indices = @transform_0, window_bounds = array<i64: 8, 8, 384>}, {transform_indices = @transform_1, window_bounds = array<i64: 8, 1024>}, {pipeline_mode = #tpu.pipeline_mode<synchronous>, transform_indices = @transform_2, window_bounds = array<i64: 1024, 1024>}, {pipeline_mode = #tpu.pipeline_mode<synchronous>, transform_indices = @transform_3, window_bounds = array<i64: 1, 1024>}, {pipeline_mode = #tpu.pipeline_mode<synchronous>, transform_indices = @transform_4, window_bounds = array<i64: 1024, 512>}, {pipeline_mode = #tpu.pipeline_mode<synchronous>, transform_indices = @transform_5, window_bounds = array<i64: 1, 512>}, {pipeline_mode = #tpu.pipeline_mode<synchronous>, transform_indices = @transform_6, window_bounds = array<i64: 384, 512>}, {pipeline_mode = #tpu.pipeline_mode<synchronous>, transform_indices = @transform_7, window_bounds = array<i64: 1, 512>}, {pipeline_mode = #tpu.pipeline_mode<synchronous>, transform_indices = @transform_8, window_bounds = array<i64: 512, 128>}, {pipeline_mode = #tpu.pipeline_mode<synchronous>, transform_indices = @transform_9, window_bounds = array<i64: 512, 128>}, {pipeline_mode = #tpu.pipeline_mode<synchronous>, transform_indices = @transform_10, window_bounds = array<i64: 1, 128>}, {transform_indices = @transform_11, window_bounds = array<i64: 8, 128>}]} {
    %c0 = arith.constant 0 : index
    %c0_0 = arith.constant 0 : index
    %c0_1 = arith.constant 0 : index
    %0 = vector.load %arg1[%c0, %c0_0, %c0_1] : memref<8x8x384xf32, #tpu.memory_space<vmem>>, vector<8x8x384xf32>
    %c0_2 = arith.constant 0 : index
    %c0_3 = arith.constant 0 : index
    %1 = vector.load %arg2[%c0_2, %c0_3] : memref<8x1024xf32, #tpu.memory_space<vmem>>, vector<8x1024xf32>
    %c0_4 = arith.constant 0 : index
    %c0_5 = arith.constant 0 : index
    %2 = vector.load %arg3[%c0_4, %c0_5] : memref<1024x1024xbf16, #tpu.memory_space<vmem>>, vector<1024x1024xbf16>
    %3 = arith.extf %2 : vector<1024x1024xbf16> to vector<1024x1024xf32>
    %cst = arith.constant dense<0.000000e+00> : vector<8x1024xf32>
    %4 = tpu.matmul %1, %3, %cst {dimension_numbers = #tpu.dot_dimension_numbers<[1], [0], [0], [1], [0, 0, 1, 1], [], []>} : vector<8x1024xf32>, vector<1024x1024xf32>, vector<8x1024xf32> -> vector<8x1024xf32>
    %c0_6 = arith.constant 0 : index
    %c0_7 = arith.constant 0 : index
    %5 = vector.load %arg4[%c0_6, %c0_7] : memref<1x1024xbf16, #tpu.memory_space<vmem>>, vector<1x1024xbf16>
    %6 = arith.extf %5 : vector<1x1024xbf16> to vector<1x1024xf32>
    %7 = vector.broadcast %6 : vector<1x1024xf32> to vector<8x1024xf32>
    %8 = arith.addf %4, %7 : vector<8x1024xf32>
    %c0_8 = arith.constant 0 : index
    %c0_9 = arith.constant 0 : index
    %9 = vector.load %arg5[%c0_8, %c0_9] : memref<1024x512xbf16, #tpu.memory_space<vmem>>, vector<1024x512xbf16>
    %10 = arith.extf %9 : vector<1024x512xbf16> to vector<1024x512xf32>
    %cst_10 = arith.constant dense<0.000000e+00> : vector<8x512xf32>
    %11 = tpu.matmul %8, %10, %cst_10 {dimension_numbers = #tpu.dot_dimension_numbers<[1], [0], [0], [1], [0, 0, 1, 1], [], []>} : vector<8x1024xf32>, vector<1024x512xf32>, vector<8x512xf32> -> vector<8x512xf32>
    %c0_11 = arith.constant 0 : index
    %c0_12 = arith.constant 0 : index
    %12 = vector.load %arg6[%c0_11, %c0_12] : memref<1x512xbf16, #tpu.memory_space<vmem>>, vector<1x512xbf16>
    %13 = arith.extf %12 : vector<1x512xbf16> to vector<1x512xf32>
    %14 = vector.broadcast %13 : vector<1x512xf32> to vector<8x512xf32>
    %15 = arith.addf %11, %14 : vector<8x512xf32>
    %cst_13 = arith.constant dense<0.000000e+00> : vector<8x384xf32>
    %16 = vector.multi_reduction <add>, %0, %cst_13 [1] : vector<8x8x384xf32> to vector<8x384xf32>
    %cst_14 = arith.constant 8.000000e+00 : f32
    %17 = vector.broadcast %cst_14 : f32 to vector<8x384xf32>
    %18 = arith.divf %16, %17 : vector<8x384xf32>
    %c0_15 = arith.constant 0 : index
    %c0_16 = arith.constant 0 : index
    %19 = vector.load %arg7[%c0_15, %c0_16] : memref<384x512xbf16, #tpu.memory_space<vmem>>, vector<384x512xbf16>
    %20 = arith.extf %19 : vector<384x512xbf16> to vector<384x512xf32>
    %cst_17 = arith.constant dense<0.000000e+00> : vector<8x512xf32>
    %21 = tpu.matmul %18, %20, %cst_17 {dimension_numbers = #tpu.dot_dimension_numbers<[1], [0], [0], [1], [0, 0, 1, 1], [], []>} : vector<8x384xf32>, vector<384x512xf32>, vector<8x512xf32> -> vector<8x512xf32>
    %c0_18 = arith.constant 0 : index
    %c0_19 = arith.constant 0 : index
    %22 = vector.load %arg8[%c0_18, %c0_19] : memref<1x512xbf16, #tpu.memory_space<vmem>>, vector<1x512xbf16>
    %23 = arith.extf %22 : vector<1x512xbf16> to vector<1x512xf32>
    %24 = vector.broadcast %23 : vector<1x512xf32> to vector<8x512xf32>
    %25 = arith.addf %21, %24 : vector<8x512xf32>
    %c0_20 = arith.constant 0 : index
    %c0_21 = arith.constant 0 : index
    %26 = vector.load %arg9[%c0_20, %c0_21] : memref<512x128xbf16, #tpu.memory_space<vmem>>, vector<512x128xbf16>
    %27 = arith.extf %26 : vector<512x128xbf16> to vector<512x128xf32>
    %cst_22 = arith.constant dense<0.000000e+00> : vector<8x128xf32>
    %28 = tpu.matmul %15, %27, %cst_22 {dimension_numbers = #tpu.dot_dimension_numbers<[1], [0], [0], [1], [0, 0, 1, 1], [], []>} : vector<8x512xf32>, vector<512x128xf32>, vector<8x128xf32> -> vector<8x128xf32>
    %c0_23 = arith.constant 0 : index
    %c0_24 = arith.constant 0 : index
    %29 = vector.load %arg10[%c0_23, %c0_24] : memref<512x128xbf16, #tpu.memory_space<vmem>>, vector<512x128xbf16>
    %30 = arith.extf %29 : vector<512x128xbf16> to vector<512x128xf32>
    %cst_25 = arith.constant dense<0.000000e+00> : vector<8x128xf32>
    %31 = tpu.matmul %25, %30, %cst_25 {dimension_numbers = #tpu.dot_dimension_numbers<[1], [0], [0], [1], [0, 0, 1, 1], [], []>} : vector<8x512xf32>, vector<512x128xf32>, vector<8x128xf32> -> vector<8x128xf32>
    %32 = arith.addf %28, %31 : vector<8x128xf32>
    %c0_26 = arith.constant 0 : index
    %c0_27 = arith.constant 0 : index
    %33 = vector.load %arg11[%c0_26, %c0_27] : memref<1x128xbf16, #tpu.memory_space<vmem>>, vector<1x128xbf16>
    %34 = arith.extf %33 : vector<1x128xbf16> to vector<1x128xf32>
    %35 = vector.broadcast %34 : vector<1x128xf32> to vector<8x128xf32>
    %36 = arith.addf %32, %35 : vector<8x128xf32>
    %c0_28 = arith.constant 0 : index
    %c0_29 = arith.constant 0 : index
    %37 = vector.load %arg12[%c0_28, %c0_29] : memref<8x128xf32, #tpu.memory_space<vmem>>, vector<8x128xf32>
    tpu.vector_store %arg12[%c0_28, %c0_29], %36 {strides = array<i32>} : memref<8x128xf32, #tpu.memory_space<vmem>>, vector<8x128xf32>,
    return
  }
  func.func @transform_0(%arg0: i32) -> (i32, i32, i32) {
    %c0_i32 = arith.constant 0 : i32
    %c0_i32_0 = arith.constant 0 : i32
    %c0_i32_1 = arith.constant 0 : i32
    return %arg0, %c0_i32, %c0_i32_0 : i32, i32, i32
  }
  func.func @transform_1(%arg0: i32) -> (i32, i32) {
    %c0_i32 = arith.constant 0 : i32
    %c0_i32_0 = arith.constant 0 : i32
    return %arg0, %c0_i32 : i32, i32
  }
  func.func @transform_2(%arg0: i32) -> (i32, i32) {
    %c0_i32 = arith.constant 0 : i32
    %c0_i32_0 = arith.constant 0 : i32
    %c0_i32_1 = arith.constant 0 : i32
    return %c0_i32, %c0_i32_0 : i32, i32
  }
  func.func @transform_3(%arg0: i32) -> (i32, i32) {
    %c0_i32 = arith.constant 0 : i32
    %c0_i32_0 = arith.constant 0 : i32
    %c0_i32_1 = arith.constant 0 : i32
    return %c0_i32, %c0_i32_0 : i32, i32
  }
  func.func @transform_4(%arg0: i32) -> (i32, i32) {
    %c0_i32 = arith.constant 0 : i32
    %c0_i32_0 = arith.constant 0 : i32
    %c0_i32_1 = arith.constant 0 : i32
    return %c0_i32, %c0_i32_0 : i32, i32
  }
  func.func @transform_5(%arg0: i32) -> (i32, i32) {
    %c0_i32 = arith.constant 0 : i32
    %c0_i32_0 = arith.constant 0 : i32
    %c0_i32_1 = arith.constant 0 : i32
    return %c0_i32, %c0_i32_0 : i32, i32
  }
  func.func @transform_6(%arg0: i32) -> (i32, i32) {
    %c0_i32 = arith.constant 0 : i32
    %c0_i32_0 = arith.constant 0 : i32
    %c0_i32_1 = arith.constant 0 : i32
    return %c0_i32, %c0_i32_0 : i32, i32
  }
  func.func @transform_7(%arg0: i32) -> (i32, i32) {
    %c0_i32 = arith.constant 0 : i32
    %c0_i32_0 = arith.constant 0 : i32
    %c0_i32_1 = arith.constant 0 : i32
    return %c0_i32, %c0_i32_0 : i32, i32
  }
  func.func @transform_8(%arg0: i32) -> (i32, i32) {
    %c0_i32 = arith.constant 0 : i32
    %c0_i32_0 = arith.constant 0 : i32
    %c0_i32_1 = arith.constant 0 : i32
    return %c0_i32, %c0_i32_0 : i32, i32
  }
  func.func @transform_9(%arg0: i32) -> (i32, i32) {
    %c0_i32 = arith.constant 0 : i32
    %c0_i32_0 = arith.constant 0 : i32
    %c0_i32_1 = arith.constant 0 : i32
    return %c0_i32, %c0_i32_0 : i32, i32
  }
  func.func @transform_10(%arg0: i32) -> (i32, i32) {
    %c0_i32 = arith.constant 0 : i32
    %c0_i32_0 = arith.constant 0 : i32
    %c0_i32_1 = arith.constant 0 : i32
    return %c0_i32, %c0_i32_0 : i32, i32
  }
  func.func @transform_11(%arg0: i32) -> (i32, i32) {
    %c0_i32 = arith.constant 0 : i32
    %c0_i32_0 = arith.constant 0 : i32
    return %arg0, %c0_i32 : i32, i32
  }
}

</mosaic_0001>

<bundles_post_ra>
// kernel: tpu_custom_call.1
= control target key start
LH: loop header
LB: loop body
LE: loop exit
PB: predicated region body
PF: predicated region fallthrough
CT: control target
= control target key end

     0   :  { %16 = vsyncpa [#allocation3], 0  ;;  %s7251_s0 = inlined_call_operand.hbm [shape: f32[8,8,384], index: 0, kind: input, shape index: {}]   ;;  %s7252_s1 = inlined_call_operand.hbm [shape: f32[8,1024], index: 1, kind: input, shape index: {}]   ;;  %s7253_s2 = inlined_call_operand.hbm [shape: bf16[1024,1024], index: 2, kind: input, shape index: {}]   ;;  %s7254_s3 = inlined_call_operand.hbm [shape: bf16[1,1024], index: 3, kind: input, shape index: {}]   ;;  %s7255_s4 = inlined_call_operand.hbm [shape: bf16[1024,512], index: 4, kind: input, shape index: {}]   ;;  %s7256_s5 = inlined_call_operand.hbm [shape: bf16[1,512], index: 5, kind: input, shape index: {}]   ;;  %s7257_s6 = inlined_call_operand.hbm [shape: bf16[384,512], index: 6, kind: input, shape index: {}]   ;;  %s7258_s7 = inlined_call_operand.hbm [shape: bf16[1,512], index: 7, kind: input, shape index: {}]   ;;  %s7259_s8 = inlined_call_operand.hbm [shape: bf16[512,128], index: 8, kind: input, shape index: {}]   ;;  %s7260_s9 = inlined_call_operand.hbm [shape: bf16[512,128], index: 9, kind: input, shape index: {}]   ;;  %s7261_s10 = inlined_call_operand.hbm [shape: bf16[1,128], index: 10, kind: input, shape index: {}]   ;;  %s7262_s11 = inlined_call_operand.hbm [shape: f32[8,128], index: 11, kind: output, shape index: {}]  }
   0x1   :  { %17 = vsyncpa [#allocation6], 0 }
   0x2   :  { %18 = vsyncpa [#allocation9], 0 }
   0x3   :  { %19 = vsyncpa [#allocation12], 0 }
   0x4   :  { %20 = vsyncpa [#allocation15], 0 }
   0x5   :  { %21 = vsyncpa [#allocation18], 0 }
   0x6   :  { %22 = vsyncpa [#allocation4], 0  ;;  %s6491_s17 = smov [#allocation5]   ;;  %s6492_s19 = smov [#allocation8]  }
   0x7   :  { %s41_s18 = sshll.u32 %s6491_s17, 4  ;;  %s63_s20 = sshll.u32 %s6492_s19, 4  ;;  %s42_s18 = int_to_ptr.vmem [resolvable:$true] %s41_s18  ;;  %s64_s20 = int_to_ptr.vmem [resolvable:$true] %s63_s20 }
   0x8   :  { %s6245_s21 = scalar_lea.vmem %s42_s18, 1024  ;;  %p6250_p1 = scmp.lt.s32.totalorder %s42_s18, %s42_s18 }
   0x9   :  { %p6246_p0 = scmp.ne.s32.totalorder %s42_s18, %s6245_s21  ;;  %p6251_p2 = scmp.lt.s32.totalorder %s6245_s21, %s6245_s21 }
   0xb   :  { %p6252_p3 = por %p6251_p2, %p6250_p1 }
   0xd   :  { %p6253_p4 = pnand %p6252_p3, %p6246_p0 }
   0xf   :  { %6256 = shalt.err (!%p6253_p4)
}
  0x10   :  { %44 = dma.hbm_to_vmem [thread:$0]  %s7252_s1, 1024, %s42_s18, [#allocation6]  }
  0x11   :  { %s6265_s24 = scalar_lea.vmem %s64_s20, 128  ;;  %p6270_p6 = scmp.lt.s32.totalorder %s64_s20, %s64_s20 }
  0x12   :  { %p6266_p5 = scmp.ne.s32.totalorder %s64_s20, %s6265_s24  ;;  %p6271_p7 = scmp.lt.s32.totalorder %s6265_s24, %s6265_s24 }
  0x14   :  { %p6272_p8 = por %p6271_p7, %p6270_p6 }
  0x16   :  { %p6273_p9 = pnand %p6272_p8, %p6266_p5 }
  0x18   :  { %6276 = shalt.err (!%p6273_p9)
}
  0x19   :  { %66 = dma.hbm_to_vmem [thread:$0]  %s7254_s3, 128, %s64_s20, [#allocation9]  }
  0x1a   :  { %s6493_s27 = smov [#allocation11]   ;;  %s6494_s29 = smov [#allocation14]  }
  0x1b   :  { %s85_s28 = sshll.u32 %s6493_s27, 4  ;;  %s107_s30 = sshll.u32 %s6494_s29, 4  ;;  %s86_s28 = int_to_ptr.vmem [resolvable:$true] %s85_s28  ;;  %s108_s30 = int_to_ptr.vmem [resolvable:$true] %s107_s30 }
  0x1c   :  { %s6285_s12 = scalar_lea.vmem %s86_s28, 64  ;;  %p6290_p11 = scmp.lt.s32.totalorder %s86_s28, %s86_s28 }
  0x1d   :  { %p6286_p10 = scmp.ne.s32.totalorder %s86_s28, %s6285_s12  ;;  %p6291_p12 = scmp.lt.s32.totalorder %s6285_s12, %s6285_s12 }
  0x1f   :  { %p6292_p13 = por %p6291_p12, %p6290_p11 }
  0x21   :  { %p6293_p0 = pnand %p6292_p13, %p6286_p10 }
  0x23   :  { %6296 = shalt.err (!%p6293_p0)
}
  0x24   :  { %88 = dma.hbm_to_vmem [thread:$0]  %s7256_s5, 64, %s86_s28, [#allocation12]  }
  0x25   :  { %s6305_s14 = scalar_lea.vmem %s108_s30, 64  ;;  %p6310_p2 = scmp.lt.s32.totalorder %s108_s30, %s108_s30 }
  0x26   :  { %p6306_p1 = scmp.ne.s32.totalorder %s108_s30, %s6305_s14  ;;  %p6311_p3 = scmp.lt.s32.totalorder %s6305_s14, %s6305_s14 }
  0x28   :  { %p6312_p4 = por %p6311_p3, %p6310_p2 }
  0x2a   :  { %p6313_p5 = pnand %p6312_p4, %p6306_p1 }
  0x2c   :  { %6316 = shalt.err (!%p6313_p5)
}
  0x2d   :  { %110 = dma.hbm_to_vmem [thread:$0]  %s7258_s7, 64, %s108_s30, [#allocation15]  }
  0x2e   :  { %s6495_s16 = smov [#allocation17]   ;;  %s6496_s18 = smov [#allocation2]  }
  0x2f   :  { %s128_s17 = sshll.u32 %s6495_s16, 4  ;;  %s28_s19 = sshll.u32 %s6496_s18, 4  ;;  %s129_s17 = int_to_ptr.vmem [resolvable:$true] %s128_s17  ;;  %s29_s19 = int_to_ptr.vmem [resolvable:$true] %s28_s19 }
  0x30   :  { %s6325_s20 = scalar_lea.vmem %s129_s17, 4096  ;;  %p6330_p7 = scmp.lt.s32.totalorder %s129_s17, %s129_s17 }
  0x31   :  { %p6326_p6 = scmp.ne.s32.totalorder %s129_s17, %s6325_s20  ;;  %p6331_p8 = scmp.lt.s32.totalorder %s6325_s20, %s6325_s20 }
  0x33   :  { %p6332_p9 = por %p6331_p8, %p6330_p7 }
  0x35   :  { %p6333_p10 = pnand %p6332_p9, %p6326_p6 }
  0x37   :  { %6336 = shalt.err (!%p6333_p10)
}
  0x38   :  { %s6497_s5 = smov 64   ;;  %s6498_s21 = smov 4  }
  0x39   :  { %134 = dma.hbm_to_vmem [thread:$0]  %s7260_s9, 4096, %s129_s17, [#allocation18], %s6497_s5, %s6497_s5, %s6498_s21  }
  0x3a   :  { %s6345_s23 = scalar_lea.vmem %s29_s19, 3072  ;;  %p6350_p12 = scmp.lt.s32.totalorder %s29_s19, %s29_s19 }
  0x3b   :  { %p6346_p11 = scmp.ne.s32.totalorder %s29_s19, %s6345_s23  ;;  %p6351_p13 = scmp.lt.s32.totalorder %s6345_s23, %s6345_s23 }
  0x3d   :  { %p6352_p0 = por %p6351_p13, %p6350_p12 }
  0x3f   :  { %p6353_p1 = pnand %p6352_p0, %p6346_p11 }
  0x41   :  { %6356 = shalt.err (!%p6353_p1)
}
  0x42   :  { %s6499_s24 = smov 384   ;;  %s6500_s25 = smov 24  }
  0x43   :  { %34 = dma.hbm_to_vmem [thread:$0]  %s7251_s0, 3072, %s29_s19, [#allocation3], %s6499_s24, %s6499_s24, %s6500_s25  }
  0x44   :  { %s6501_s28 = smov [#allocation7]  }
  0x45   :  { %s50_s29 = sshll.u32 %s6501_s28, 4  ;;  %s51_s29 = int_to_ptr.vmem [resolvable:$true] %s50_s29 }
  0x46   :  { %s6365_s30 = scalar_lea.vmem %s51_s29, 65536  ;;  %p6370_p3 = scmp.lt.s32.totalorder %s51_s29, %s51_s29 }
  0x47   :  { %p6366_p2 = scmp.ne.s32.totalorder %s51_s29, %s6365_s30  ;;  %p6371_p4 = scmp.lt.s32.totalorder %s6365_s30, %s6365_s30 }
  0x49   :  { %p6372_p5 = por %p6371_p4, %p6370_p3 }
  0x4b   :  { %p6373_p6 = pnand %p6372_p5, %p6366_p2 }
  0x4d   :  { %6376 = shalt.err (!%p6373_p6)
}
  0x4e   :  { %s6502_s9 = smov 512   ;;  %s6503_s12 = smov 32  }
  0x4f   :  { %56 = dma.hbm_to_vmem [thread:$0]  %s7253_s2, 65536, %s51_s29, [#allocation6], %s6502_s9, %s6502_s9, %s6503_s12  }
  0x50   :  { %s6504_s14 = smov [#allocation10]  }
  0x51   :  { %s72_s3 = sshll.u32 %s6504_s14, 4  ;;  %s73_s3 = int_to_ptr.vmem [resolvable:$true] %s72_s3 }
  0x52   :  { %s6385_s0 = scalar_lea.vmem %s73_s3, 32768  ;;  %p6390_p8 = scmp.lt.s32.totalorder %s73_s3, %s73_s3 }
  0x53   :  { %p6386_p7 = scmp.ne.s32.totalorder %s73_s3, %s6385_s0  ;;  %p6391_p9 = scmp.lt.s32.totalorder %s6385_s0, %s6385_s0 }
  0x55   :  { %p6392_p10 = por %p6391_p9, %p6390_p8 }
  0x57   :  { %p6393_p11 = pnand %p6392_p10, %p6386_p7 }
  0x59   :  { %6396 = shalt.err (!%p6393_p11)
}
  0x5a   :  { %s6505_s15 = smov 256   ;;  %s6506_s16 = smov 16  }
  0x5b   :  { %78 = dma.hbm_to_vmem [thread:$0]  %s7255_s4, 32768, %s73_s3, [#allocation9], %s6505_s15, %s6505_s15, %s6506_s16  }
  0x5c   :  { %s6507_s19 = smov [#allocation13]   ;;  %s6508_s22 = smov [#allocation16]  }
  0x5d   :  { %s94_s20 = sshll.u32 %s6507_s19, 4  ;;  %s116_s2 = sshll.u32 %s6508_s22, 4  ;;  %s95_s20 = int_to_ptr.vmem [resolvable:$true] %s94_s20  ;;  %s117_s2 = int_to_ptr.vmem [resolvable:$true] %s116_s2 }
  0x5e   :  { %s6405_s7 = scalar_lea.vmem %s95_s20, 12288  ;;  %p6410_p13 = scmp.lt.s32.totalorder %s95_s20, %s95_s20 }
  0x5f   :  { %p6406_p12 = scmp.ne.s32.totalorder %s95_s20, %s6405_s7  ;;  %p6411_p0 = scmp.lt.s32.totalorder %s6405_s7, %s6405_s7 }
  0x61   :  { %p6412_p1 = por %p6411_p0, %p6410_p13 }
  0x63   :  { %p6413_p2 = pnand %p6412_p1, %p6406_p12 }
  0x65   :  { %6416 = shalt.err (!%p6413_p2)
}
  0x66   :  { %100 = dma.hbm_to_vmem [thread:$0]  %s7257_s6, 12288, %s95_s20, [#allocation12], %s6505_s15, %s6505_s15, %s6506_s16  }
  0x67   :  { %s6425_s25 = scalar_lea.vmem %s117_s2, 4096  ;;  %p6430_p4 = scmp.lt.s32.totalorder %s117_s2, %s117_s2 }
  0x68   :  { %p6426_p3 = scmp.ne.s32.totalorder %s117_s2, %s6425_s25  ;;  %p6431_p5 = scmp.lt.s32.totalorder %s6425_s25, %s6425_s25 }
  0x6a   :  { %p6432_p6 = por %p6431_p5, %p6430_p4 }
  0x6c   :  { %p6433_p7 = pnand %p6432_p6, %p6426_p3 }
  0x6e   :  { %6436 = shalt.err (!%p6433_p7)
}
  0x6f   :  { %122 = dma.hbm_to_vmem [thread:$0]  %s7259_s8, 4096, %s117_s2, [#allocation15], %s6497_s5, %s6497_s5, %s6498_s21  }
  0x70   :  { %s6509_s27 = smov [#allocation19]  }
  0x71   :  { %s141_s28 = sshll.u32 %s6509_s27, 4  ;;  %s142_s28 = int_to_ptr.vmem [resolvable:$true] %s141_s28 }
  0x72   :  { %s6445_s29 = scalar_lea.vmem %s142_s28, 16  ;;  %s6449_s6 = scalar_lea.vmem %s142_s28, 32 }
  0x73   :  { %p6446_p8 = scmp.ne.s32.totalorder %s142_s28, %s6445_s29  ;;  %p6450_p9 = scmp.lt.s32.totalorder %s142_s28, %s142_s28 }
  0x74   :  { %p6451_p10 = scmp.lt.s32.totalorder %s6449_s6, %s6445_s29 }
  0x76   :  { %p6452_p11 = por %p6451_p10, %p6450_p9 }
  0x78   :  { %p6453_p12 = pnand %p6452_p11, %p6446_p8 }
  0x7a   :  { %6456 = shalt.err (!%p6453_p12)
}
  0x7b   :  { %144 = dma.hbm_to_vmem [thread:$0]  %s7261_s10, 16, %s142_s28, [#allocation18]  }
  0x7c   :  { %6477 = dma.done.wait [#allocation3], 3072  }
  0x7d   :  { %6478 = vsyncadd [#allocation3], 4294964224 }
  0x7e   :  { %6479 = dma.done.wait [#allocation6], 66560  }
  0x7f   :  { %6480 = vsyncadd [#allocation6], 4294900736 }
  0x80   :  { %6481 = dma.done.wait [#allocation9], 32896  }
  0x81   :  { %6482 = vsyncadd [#allocation9], 4294934400 }
  0x82   :  { %6483 = dma.done.wait [#allocation12], 12352  }
  0x83   :  { %6484 = vsyncadd [#allocation12], 4294954944 }
  0x84   :  { %6485 = dma.done.wait [#allocation15], 4160  }
  0x85   :  { %6486 = vsyncadd [#allocation15], 4294963136 }
  0x86   :  { %6487 = dma.done.wait [#allocation18], 4112  }
  0x87   :  { %6488 = vsyncadd [#allocation18], 4294963184  ;;  %v270_v0 = vld [vmem:[#allocation7 + $0x1e0] sm:$0xff]  ;;  %vm4854_vm0 = vcmask 1041409   ;;  %vm4856_vm1 = vcmask 1042434   ;;  %vm4858_vm2 = vcmask 1043459  }
  0x88   :  { %v398_v1 = vld [vmem:[#allocation7 + $0x5e0] sm:$0xff]  ;;  %v843_v3 = vunpack.c.h.bf16 %v270_v0  ;;  %v842_v5 = vunpack.c.l.bf16 %v270_v0  ;;  %vm4860_vm3 = vcmask 1044484   ;;  %vm4862_vm4 = vcmask 1045509   ;;  %s6511_s8 = smov [#allocation20]  }
  0x89   :  { %v266_v2 = vld [vmem:[#allocation7 + $0x1c0] sm:$0xff]  ;;  %v1099_v4 = vunpack.c.h.bf16 %v398_v1  ;;  %v1098_v6 = vunpack.c.l.bf16 %v398_v1  ;;  %vm4864_vm5 = vcmask 1046534   ;;  %vm4866_vm6 = vcmask 1047559   ;;  %s5719_s10 = sshll.u32 %s6511_s8, 4  ;;  %s5720_s10 = int_to_ptr.vmem [resolvable:$true] %s5719_s10 }
  0x8a   :  { %v394_v7 = vld [vmem:[#allocation7 + $0x5c0] sm:$0xff]  ;;  %v835_v10 = vunpack.c.h.bf16 %v266_v2  ;;  %v834_v12 = vunpack.c.l.bf16 %v266_v2  ;;  %1823 = vmatprep.subr.mxu0 %v843_v3  ;;  %s6457_s5 = scalar_lea.vmem %s5720_s10, 128  ;;  %p6462_p0 = scmp.lt.s32.totalorder %s5720_s10, %s5720_s10 }
  0x8b   :  { %v262_v8 = vld [vmem:[#allocation7 + $0x1a0] sm:$0xff]  ;;  %v1091_v11 = vunpack.c.h.bf16 %v394_v7  ;;  %v1090_v13 = vunpack.c.l.bf16 %v394_v7  ;;  %1894 = vmatprep.subr.mxu1 %v1099_v4  ;;  %1824 = vmatpush1.msra.mxu0 %v842_v5  ;;  %p6458_p13 = scmp.ne.s32.totalorder %s5720_s10, %s6457_s5  ;;  %p6463_p1 = scmp.lt.s32.totalorder %s6457_s5, %s6457_s5 }
  0x8c   :  { %v390_v9 = vld [vmem:[#allocation7 + $0x5a0] sm:$0xff]  ;;  %v827_v16 = vunpack.c.h.bf16 %v262_v8  ;;  %1895 = vmatpush1.msra.mxu1 %v1098_v6  ;;  %v826_v18 = vunpack.c.l.bf16 %v262_v8  ;;  %1825 = vmatprep.subr.mxu0 %v835_v10 }
  0x8d   :  { %v258_v14 = vld [vmem:[#allocation7 + $0x180] sm:$0xff]  ;;  %v1083_v17 = vunpack.c.h.bf16 %v390_v9  ;;  %v1082_v19 = vunpack.c.l.bf16 %v390_v9  ;;  %1896 = vmatprep.subr.mxu1 %v1091_v11  ;;  %1826 = vmatpush1.msra.mxu0 %v834_v12  ;;  %p6464_p2 = por %p6463_p1, %p6462_p0 }
  0x8e   :  { %v386_v15 = vld [vmem:[#allocation7 + $0x580] sm:$0xff]  ;;  %v819_v22 = vunpack.c.h.bf16 %v258_v14  ;;  %1897 = vmatpush1.msra.mxu1 %v1090_v13  ;;  %v818_v24 = vunpack.c.l.bf16 %v258_v14  ;;  %1827 = vmatprep.subr.mxu0 %v827_v16 }
  0x8f   :  { %v254_v20 = vld [vmem:[#allocation7 + $0x160] sm:$0xff]  ;;  %v1075_v23 = vunpack.c.h.bf16 %v386_v15  ;;  %v1074_v25 = vunpack.c.l.bf16 %v386_v15  ;;  %1898 = vmatprep.subr.mxu1 %v1083_v17  ;;  %1828 = vmatpush1.msra.mxu0 %v826_v18  ;;  %p6465_p3 = pnand %p6464_p2, %p6458_p13 }
  0x90   :  { %v382_v21 = vld [vmem:[#allocation7 + $0x560] sm:$0xff]  ;;  %v811_v28 = vunpack.c.h.bf16 %v254_v20  ;;  %1899 = vmatpush1.msra.mxu1 %v1082_v19  ;;  %v810_v30 = vunpack.c.l.bf16 %v254_v20  ;;  %1829 = vmatprep.subr.mxu0 %v819_v22 }
  0x91   :  { %v250_v26 = vld [vmem:[#allocation7 + $0x140] sm:$0xff]  ;;  %v1067_v29 = vunpack.c.h.bf16 %v382_v21  ;;  %v1066_v31 = vunpack.c.l.bf16 %v382_v21  ;;  %1900 = vmatprep.subr.mxu1 %v1075_v23  ;;  %1830 = vmatpush1.msra.mxu0 %v818_v24 }
  0x92   :  { %v378_v27 = vld [vmem:[#allocation7 + $0x540] sm:$0xff]  ;;  %v803_v34 = vunpack.c.h.bf16 %v250_v26  ;;  %1901 = vmatpush1.msra.mxu1 %v1074_v25  ;;  %v802_v36 = vunpack.c.l.bf16 %v250_v26  ;;  %1831 = vmatprep.subr.mxu0 %v811_v28 }
  0x93   :  { %v246_v32 = vld [vmem:[#allocation7 + $0x120] sm:$0xff]  ;;  %v1059_v35 = vunpack.c.h.bf16 %v378_v27  ;;  %v1058_v37 = vunpack.c.l.bf16 %v378_v27  ;;  %1902 = vmatprep.subr.mxu1 %v1067_v29  ;;  %1832 = vmatpush1.msra.mxu0 %v810_v30 }
  0x94   :  { %v374_v33 = vld [vmem:[#allocation7 + $0x520] sm:$0xff]  ;;  %v795_v40 = vunpack.c.h.bf16 %v246_v32  ;;  %1903 = vmatpush1.msra.mxu1 %v1066_v31  ;;  %v794_v42 = vunpack.c.l.bf16 %v246_v32  ;;  %1833 = vmatprep.subr.mxu0 %v803_v34 }
  0x95   :  { %v242_v38 = vld [vmem:[#allocation7 + $0x100] sm:$0xff]  ;;  %v1051_v41 = vunpack.c.h.bf16 %v374_v33  ;;  %v1050_v43 = vunpack.c.l.bf16 %v374_v33  ;;  %1904 = vmatprep.subr.mxu1 %v1059_v35  ;;  %1834 = vmatpush1.msra.mxu0 %v802_v36 }
  0x96   :  { %v370_v39 = vld [vmem:[#allocation7 + $0x500] sm:$0xff]  ;;  %v787_v46 = vunpack.c.h.bf16 %v242_v38  ;;  %1905 = vmatpush1.msra.mxu1 %v1058_v37  ;;  %v786_v48 = vunpack.c.l.bf16 %v242_v38  ;;  %1835 = vmatprep.subr.mxu0 %v795_v40 }
  0x97   :  { %v238_v44 = vld [vmem:[#allocation7 + $0xe0] sm:$0xff]  ;;  %v1043_v47 = vunpack.c.h.bf16 %v370_v39  ;;  %v1042_v49 = vunpack.c.l.bf16 %v370_v39  ;;  %1906 = vmatprep.subr.mxu1 %v1051_v41  ;;  %1836 = vmatpush1.msra.mxu0 %v794_v42 }
  0x98   :  { %v366_v45 = vld [vmem:[#allocation7 + $0x4e0] sm:$0xff]  ;;  %v779_v52 = vunpack.c.h.bf16 %v238_v44  ;;  %1907 = vmatpush1.msra.mxu1 %v1050_v43  ;;  %v778_v54 = vunpack.c.l.bf16 %v238_v44  ;;  %1837 = vmatprep.subr.mxu0 %v787_v46 }
  0x99   :  { %v234_v50 = vld [vmem:[#allocation7 + $0xc0] sm:$0xff]  ;;  %v1035_v53 = vunpack.c.h.bf16 %v366_v45  ;;  %v1034_v55 = vunpack.c.l.bf16 %v366_v45  ;;  %1908 = vmatprep.subr.mxu1 %v1043_v47  ;;  %1838 = vmatpush1.msra.mxu0 %v786_v48 }
  0x9a   :  { %v362_v51 = vld [vmem:[#allocation7 + $0x4c0] sm:$0xff]  ;;  %v771_v58 = vunpack.c.h.bf16 %v234_v50  ;;  %1909 = vmatpush1.msra.mxu1 %v1042_v49  ;;  %v770_v60 = vunpack.c.l.bf16 %v234_v50  ;;  %1839 = vmatprep.subr.mxu0 %v779_v52 }
  0x9b   :  { %v230_v56 = vld [vmem:[#allocation7 + $0xa0] sm:$0xff]  ;;  %v1027_v59 = vunpack.c.h.bf16 %v362_v51  ;;  %v1026_v61 = vunpack.c.l.bf16 %v362_v51  ;;  %1910 = vmatprep.subr.mxu1 %v1035_v53  ;;  %1840 = vmatpush1.msra.mxu0 %v778_v54 }
  0x9c   :  { %v358_v57 = vld [vmem:[#allocation7 + $0x4a0] sm:$0xff]  ;;  %v763_v0 = vunpack.c.h.bf16 %v230_v56  ;;  %1911 = vmatpush1.msra.mxu1 %v1034_v55  ;;  %v762_v2 = vunpack.c.l.bf16 %v230_v56  ;;  %1841 = vmatprep.subr.mxu0 %v771_v58 }
  0x9d   :  { %v226_v62 = vld [vmem:[#allocation7 + $0x80] sm:$0xff]  ;;  %v1019_v1 = vunpack.c.h.bf16 %v358_v57  ;;  %v1018_v3 = vunpack.c.l.bf16 %v358_v57  ;;  %1912 = vmatprep.subr.mxu1 %v1027_v59  ;;  %1842 = vmatpush1.msra.mxu0 %v770_v60 }
  0x9e   :  { %v354_v63 = vld [vmem:[#allocation7 + $0x480] sm:$0xff]  ;;  %v755_v6 = vunpack.c.h.bf16 %v226_v62  ;;  %1913 = vmatpush1.msra.mxu1 %v1026_v61  ;;  %v754_v8 = vunpack.c.l.bf16 %v226_v62  ;;  %1843 = vmatprep.subr.mxu0 %v763_v0 }
  0x9f   :  { %v222_v4 = vld [vmem:[#allocation7 + $0x60] sm:$0xff]  ;;  %v1011_v7 = vunpack.c.h.bf16 %v354_v63  ;;  %v1010_v9 = vunpack.c.l.bf16 %v354_v63  ;;  %1914 = vmatprep.subr.mxu1 %v1019_v1  ;;  %1844 = vmatpush1.msra.mxu0 %v762_v2 }
  0xa0   :  { %v350_v5 = vld [vmem:[#allocation7 + $0x460] sm:$0xff]  ;;  %v747_v12 = vunpack.c.h.bf16 %v222_v4  ;;  %1915 = vmatpush1.msra.mxu1 %v1018_v3  ;;  %v746_v14 = vunpack.c.l.bf16 %v222_v4  ;;  %1845 = vmatprep.subr.mxu0 %v755_v6 }
  0xa1   :  { %v218_v10 = vld [vmem:[#allocation7 + $0x40] sm:$0xff]  ;;  %v1003_v13 = vunpack.c.h.bf16 %v350_v5  ;;  %v1002_v15 = vunpack.c.l.bf16 %v350_v5  ;;  %1916 = vmatprep.subr.mxu1 %v1011_v7  ;;  %1846 = vmatpush1.msra.mxu0 %v754_v8 }
  0xa2   :  { %v346_v11 = vld [vmem:[#allocation7 + $0x440] sm:$0xff]  ;;  %v739_v18 = vunpack.c.h.bf16 %v218_v10  ;;  %1917 = vmatpush1.msra.mxu1 %v1010_v9  ;;  %v738_v20 = vunpack.c.l.bf16 %v218_v10  ;;  %1847 = vmatprep.subr.mxu0 %v747_v12 }
  0xa3   :  { %v214_v16 = vld [vmem:[#allocation7 + $0x20] sm:$0xff]  ;;  %v995_v19 = vunpack.c.h.bf16 %v346_v11  ;;  %v994_v21 = vunpack.c.l.bf16 %v346_v11  ;;  %1918 = vmatprep.subr.mxu1 %v1003_v13  ;;  %1848 = vmatpush1.msra.mxu0 %v746_v14 }
  0xa4   :  { %v342_v17 = vld [vmem:[#allocation7 + $0x420] sm:$0xff]  ;;  %v731_v24 = vunpack.c.h.bf16 %v214_v16  ;;  %1919 = vmatpush1.msra.mxu1 %v1002_v15  ;;  %v730_v26 = vunpack.c.l.bf16 %v214_v16  ;;  %1849 = vmatprep.subr.mxu0 %v739_v18 }
  0xa5   :  { %v210_v22 = vld [vmem:[#allocation7] sm:$0xff]  ;;  %v987_v25 = vunpack.c.h.bf16 %v342_v17  ;;  %v986_v27 = vunpack.c.l.bf16 %v342_v17  ;;  %1920 = vmatprep.subr.mxu1 %v995_v19  ;;  %1850 = vmatpush1.msra.mxu0 %v738_v20 }
  0xa6   :  { %v338_v23 = vld [vmem:[#allocation7 + $0x400] sm:$0xff]  ;;  %v723_v30 = vunpack.c.h.bf16 %v210_v22  ;;  %1921 = vmatpush1.msra.mxu1 %v994_v21  ;;  %v722_v32 = vunpack.c.l.bf16 %v210_v22  ;;  %1851 = vmatprep.subr.mxu0 %v731_v24 }
  0xa7   :  { %v334_v28 = vld [vmem:[#allocation7 + $0x3e0] sm:$0xff]  ;;  %v979_v31 = vunpack.c.h.bf16 %v338_v23  ;;  %v978_v33 = vunpack.c.l.bf16 %v338_v23  ;;  %1922 = vmatprep.subr.mxu1 %v987_v25  ;;  %1852 = vmatpush1.msra.mxu0 %v730_v26 }
  0xa8   :  { %v462_v29 = vld [vmem:[#allocation7 + $0x7e0] sm:$0xff]  ;;  %v971_v36 = vunpack.c.h.bf16 %v334_v28  ;;  %1923 = vmatpush1.msra.mxu1 %v986_v27  ;;  %v970_v38 = vunpack.c.l.bf16 %v334_v28  ;;  %1853 = vmatprep.subr.mxu0 %v723_v30 }
  0xa9   :  { %v330_v34 = vld [vmem:[#allocation7 + $0x3c0] sm:$0xff]  ;;  %v1227_v37 = vunpack.c.h.bf16 %v462_v29  ;;  %v1226_v39 = vunpack.c.l.bf16 %v462_v29  ;;  %1924 = vmatprep.subr.mxu1 %v979_v31  ;;  %1854 = vmatpush1.msra.mxu0 %v722_v32 }
  0xaa   :  { %v458_v35 = vld [vmem:[#allocation7 + $0x7c0] sm:$0xff]  ;;  %v963_v42 = vunpack.c.h.bf16 %v330_v34  ;;  %1925 = vmatpush1.msra.mxu1 %v978_v33  ;;  %v962_v44 = vunpack.c.l.bf16 %v330_v34  ;;  %1855 = vmatprep.subr.mxu0 %v971_v36 }
  0xab   :  { %v326_v40 = vld [vmem:[#allocation7 + $0x3a0] sm:$0xff]  ;;  %v1219_v43 = vunpack.c.h.bf16 %v458_v35  ;;  %v1218_v45 = vunpack.c.l.bf16 %v458_v35  ;;  %1926 = vmatprep.subr.mxu1 %v1227_v37  ;;  %1856 = vmatpush2.msra.mxu0 %v970_v38 }
  0xac   :  { %v454_v41 = vld [vmem:[#allocation7 + $0x7a0] sm:$0xff]  ;;  %v955_v48 = vunpack.c.h.bf16 %v326_v40  ;;  %1927 = vmatpush2.msra.mxu1 %v1226_v39  ;;  %v954_v50 = vunpack.c.l.bf16 %v326_v40  ;;  %1857 = vmatprep.subr.mxu0 %v963_v42 }
  0xad   :  { %v322_v46 = vld [vmem:[#allocation7 + $0x380] sm:$0xff]  ;;  %v1211_v49 = vunpack.c.h.bf16 %v454_v41  ;;  %v1210_v51 = vunpack.c.l.bf16 %v454_v41  ;;  %1928 = vmatprep.subr.mxu1 %v1219_v43  ;;  %1858 = vmatpush2.msra.mxu0 %v962_v44 }
  0xae   :  { %v450_v47 = vld [vmem:[#allocation7 + $0x780] sm:$0xff]  ;;  %v947_v54 = vunpack.c.h.bf16 %v322_v46  ;;  %1929 = vmatpush2.msra.mxu1 %v1218_v45  ;;  %v946_v56 = vunpack.c.l.bf16 %v322_v46  ;;  %1859 = vmatprep.subr.mxu0 %v955_v48 }
  0xaf   :  { %v318_v52 = vld [vmem:[#allocation7 + $0x360] sm:$0xff]  ;;  %v1203_v55 = vunpack.c.h.bf16 %v450_v47  ;;  %v1202_v57 = vunpack.c.l.bf16 %v450_v47  ;;  %1930 = vmatprep.subr.mxu1 %v1211_v49  ;;  %1860 = vmatpush2.msra.mxu0 %v954_v50 }
  0xb0   :  { %v446_v53 = vld [vmem:[#allocation7 + $0x760] sm:$0xff]  ;;  %v939_v60 = vunpack.c.h.bf16 %v318_v52  ;;  %1931 = vmatpush2.msra.mxu1 %v1210_v51  ;;  %v938_v62 = vunpack.c.l.bf16 %v318_v52  ;;  %1861 = vmatprep.subr.mxu0 %v947_v54 }
  0xb1   :  { %v314_v58 = vld [vmem:[#allocation7 + $0x340] sm:$0xff]  ;;  %v1195_v61 = vunpack.c.h.bf16 %v446_v53  ;;  %v1194_v63 = vunpack.c.l.bf16 %v446_v53  ;;  %1932 = vmatprep.subr.mxu1 %v1203_v55  ;;  %1862 = vmatpush2.msra.mxu0 %v946_v56 }
  0xb2   :  { %v442_v59 = vld [vmem:[#allocation7 + $0x740] sm:$0xff]  ;;  %v931_v2 = vunpack.c.h.bf16 %v314_v58  ;;  %1933 = vmatpush2.msra.mxu1 %v1202_v57  ;;  %v930_v4 = vunpack.c.l.bf16 %v314_v58  ;;  %1863 = vmatprep.subr.mxu0 %v939_v60 }
  0xb3   :  { %v310_v0 = vld [vmem:[#allocation7 + $0x320] sm:$0xff]  ;;  %v1187_v3 = vunpack.c.h.bf16 %v442_v59  ;;  %v1186_v5 = vunpack.c.l.bf16 %v442_v59  ;;  %1934 = vmatprep.subr.mxu1 %v1195_v61  ;;  %1864 = vmatpush2.msra.mxu0 %v938_v62 }
  0xb4   :  { %v438_v1 = vld [vmem:[#allocation7 + $0x720] sm:$0xff]  ;;  %v923_v8 = vunpack.c.h.bf16 %v310_v0  ;;  %1935 = vmatpush2.msra.mxu1 %v1194_v63  ;;  %v922_v10 = vunpack.c.l.bf16 %v310_v0  ;;  %1865 = vmatprep.subr.mxu0 %v931_v2 }
  0xb5   :  { %v306_v6 = vld [vmem:[#allocation7 + $0x300] sm:$0xff]  ;;  %v1179_v9 = vunpack.c.h.bf16 %v438_v1  ;;  %v1178_v11 = vunpack.c.l.bf16 %v438_v1  ;;  %1936 = vmatprep.subr.mxu1 %v1187_v3  ;;  %1866 = vmatpush2.msra.mxu0 %v930_v4  ;;  %v203_v1 = vld [vmem:[#allocation5 + $0x8] sm:$0xff] }
  0xb6   :  { %v434_v7 = vld [vmem:[#allocation7 + $0x700] sm:$0xff]  ;;  %v915_v14 = vunpack.c.h.bf16 %v306_v6  ;;  %1937 = vmatpush2.msra.mxu1 %v1186_v5  ;;  %v914_v16 = vunpack.c.l.bf16 %v306_v6  ;;  %1867 = vmatprep.subr.mxu0 %v923_v8 }
  0xb7   :  { %v302_v12 = vld [vmem:[#allocation7 + $0x2e0] sm:$0xff]  ;;  %v1171_v15 = vunpack.c.h.bf16 %v434_v7  ;;  %v1170_v17 = vunpack.c.l.bf16 %v434_v7  ;;  %1938 = vmatprep.subr.mxu1 %v1179_v9  ;;  %1868 = vmatpush2.msra.mxu0 %v922_v10  ;;  %v205_v7 = vld [vmem:[#allocation5 + $0x18] sm:$0xff] }
  0xb8   :  { %v430_v13 = vld [vmem:[#allocation7 + $0x6e0] sm:$0xff]  ;;  %v907_v20 = vunpack.c.h.bf16 %v302_v12  ;;  %1939 = vmatpush2.msra.mxu1 %v1178_v11  ;;  %v906_v22 = vunpack.c.l.bf16 %v302_v12  ;;  %1869 = vmatprep.subr.mxu0 %v915_v14  ;;  %v204_v11 = vld [vmem:[#allocation5 + $0x10] sm:$0xff] }
  0xb9   :  { %v298_v18 = vld [vmem:[#allocation7 + $0x2c0] sm:$0xff]  ;;  %v1163_v21 = vunpack.c.h.bf16 %v430_v13  ;;  %v1162_v23 = vunpack.c.l.bf16 %v430_v13  ;;  %1940 = vmatprep.subr.mxu1 %v1171_v15  ;;  %1870 = vmatpush2.msra.mxu0 %v914_v16 }
  0xba   :  { %v426_v19 = vld [vmem:[#allocation7 + $0x6c0] sm:$0xff]  ;;  %v899_v26 = vunpack.c.h.bf16 %v298_v18  ;;  %1941 = vmatpush2.msra.mxu1 %v1170_v17  ;;  %v898_v28 = vunpack.c.l.bf16 %v298_v18  ;;  %1871 = vmatprep.subr.mxu0 %v907_v20 }
  0xbb   :  { %v294_v24 = vld [vmem:[#allocation7 + $0x2a0] sm:$0xff]  ;;  %v1155_v27 = vunpack.c.h.bf16 %v426_v19  ;;  %v1154_v29 = vunpack.c.l.bf16 %v426_v19  ;;  %1942 = vmatprep.subr.mxu1 %v1163_v21  ;;  %1872 = vmatpush2.msra.mxu0 %v906_v22 }
  0xbc   :  { %v422_v25 = vld [vmem:[#allocation7 + $0x6a0] sm:$0xff]  ;;  %v891_v32 = vunpack.c.h.bf16 %v294_v24  ;;  %1943 = vmatpush2.msra.mxu1 %v1162_v23  ;;  %v890_v34 = vunpack.c.l.bf16 %v294_v24  ;;  %1873 = vmatprep.subr.mxu0 %v899_v26 }
  0xbd   :  { %v290_v30 = vld [vmem:[#allocation7 + $0x280] sm:$0xff]  ;;  %v1147_v33 = vunpack.c.h.bf16 %v422_v25  ;;  %v1146_v35 = vunpack.c.l.bf16 %v422_v25  ;;  %1944 = vmatprep.subr.mxu1 %v1155_v27  ;;  %1874 = vmatpush2.msra.mxu0 %v898_v28 }
  0xbe   :  { %v418_v31 = vld [vmem:[#allocation7 + $0x680] sm:$0xff]  ;;  %v883_v38 = vunpack.c.h.bf16 %v290_v30  ;;  %1945 = vmatpush2.msra.mxu1 %v1154_v29  ;;  %v882_v40 = vunpack.c.l.bf16 %v290_v30  ;;  %1875 = vmatprep.subr.mxu0 %v891_v32 }
  0xbf   :  { %v286_v36 = vld [vmem:[#allocation7 + $0x260] sm:$0xff]  ;;  %v1139_v39 = vunpack.c.h.bf16 %v418_v31  ;;  %v1138_v41 = vunpack.c.l.bf16 %v418_v31  ;;  %1946 = vmatprep.subr.mxu1 %v1147_v33  ;;  %1876 = vmatpush2.msra.mxu0 %v890_v34 }
  0xc0   :  { %v414_v37 = vld [vmem:[#allocation7 + $0x660] sm:$0xff]  ;;  %v875_v44 = vunpack.c.h.bf16 %v286_v36  ;;  %1947 = vmatpush2.msra.mxu1 %v1146_v35  ;;  %v874_v46 = vunpack.c.l.bf16 %v286_v36  ;;  %1877 = vmatprep.subr.mxu0 %v883_v38 }
  0xc1   :  { %v282_v42 = vld [vmem:[#allocation7 + $0x240] sm:$0xff]  ;;  %v1131_v45 = vunpack.c.h.bf16 %v414_v37  ;;  %v1130_v47 = vunpack.c.l.bf16 %v414_v37  ;;  %1948 = vmatprep.subr.mxu1 %v1139_v39  ;;  %1878 = vmatpush2.msra.mxu0 %v882_v40 }
  0xc2   :  { %v410_v43 = vld [vmem:[#allocation7 + $0x640] sm:$0xff]  ;;  %v867_v50 = vunpack.c.h.bf16 %v282_v42  ;;  %1949 = vmatpush2.msra.mxu1 %v1138_v41  ;;  %v866_v52 = vunpack.c.l.bf16 %v282_v42  ;;  %1879 = vmatprep.subr.mxu0 %v875_v44 }
  0xc3   :  { %v278_v48 = vld [vmem:[#allocation7 + $0x220] sm:$0xff]  ;;  %v1123_v51 = vunpack.c.h.bf16 %v410_v43  ;;  %v1122_v53 = vunpack.c.l.bf16 %v410_v43  ;;  %1950 = vmatprep.subr.mxu1 %v1131_v45  ;;  %1880 = vmatpush2.msra.mxu0 %v874_v46 }
  0xc4   :  { %v406_v49 = vld [vmem:[#allocation7 + $0x620] sm:$0xff]  ;;  %v859_v56 = vunpack.c.h.bf16 %v278_v48  ;;  %1951 = vmatpush2.msra.mxu1 %v1130_v47  ;;  %v858_v58 = vunpack.c.l.bf16 %v278_v48  ;;  %1881 = vmatprep.subr.mxu0 %v867_v50 }
  0xc5   :  { %v274_v54 = vld [vmem:[#allocation7 + $0x200] sm:$0xff]  ;;  %v1115_v57 = vunpack.c.h.bf16 %v406_v49  ;;  %v1114_v59 = vunpack.c.l.bf16 %v406_v49  ;;  %1952 = vmatprep.subr.mxu1 %v1123_v51  ;;  %1882 = vmatpush2.msra.mxu0 %v866_v52 }
  0xc6   :  { %v402_v55 = vld [vmem:[#allocation7 + $0x600] sm:$0xff]  ;;  %v851_v60 = vunpack.c.h.bf16 %v274_v54  ;;  %1953 = vmatpush2.msra.mxu1 %v1122_v53  ;;  %v850_v63 = vunpack.c.l.bf16 %v274_v54  ;;  %1883 = vmatprep.subr.mxu0 %v859_v56 }
  0xc7   :  { %v1107_v61 = vunpack.c.h.bf16 %v402_v55  ;;  %v526_v62 = vld [vmem:[#allocation7 + $0x9e0] sm:$0xff]  ;;  %1954 = vmatprep.subr.mxu1 %v1115_v57  ;;  %v1106_v2 = vunpack.c.l.bf16 %v402_v55  ;;  %1884 = vmatpush2.msra.mxu0 %v858_v58 }
  0xc8   :  { %v654_v0 = vld [vmem:[#allocation7 + $0xde0] sm:$0xff]  ;;  %1955 = vmatpush2.msra.mxu1 %v1114_v59  ;;  %v1355_v4 = vunpack.c.h.bf16 %v526_v62  ;;  %1885 = vmatprep.subr.mxu0 %v851_v60  ;;  %v1354_v9 = vunpack.c.l.bf16 %v526_v62 }
  0xc9   :  { %v202_v3 = vld [vmem:[#allocation5] sm:$0xff]  ;;  %1956 = vmatprep.subr.mxu1 %v1107_v61  ;;  %v1611_v8 = vunpack.c.h.bf16 %v654_v0  ;;  %1886 = vmatpush2.msra.mxu0 %v850_v63  ;;  %v1610_v10 = vunpack.c.l.bf16 %v654_v0 }
  0xca   :  { %v522_v5 = vld [vmem:[#allocation7 + $0x9c0] sm:$0xff]  ;;  %1887 = vmatprep.mubr.f32.mxu0 %v203_v1  ;;  %1957 = vmatpush2.msra.mxu1 %v1106_v2 }
  0xcb   :  { %v650_v6 = vld [vmem:[#allocation7 + $0xdc0] sm:$0xff]  ;;  %1888 = vmatmul.mubr.f32.vlgmr.msra.gmra.mxu0 %v202_v3  ;;  %v1347_v14 = vunpack.c.h.bf16 %v522_v5  ;;  %1958 = vmatprep.mubr.f32.mxu1 %v205_v7  ;;  %v1346_v16 = vunpack.c.l.bf16 %v522_v5 }
  0xcc   :  { %v518_v12 = vld [vmem:[#allocation7 + $0x9a0] sm:$0xff]  ;;  %v1603_v15 = vunpack.c.h.bf16 %v650_v6  ;;  %1965 = vmatprep.subr.mxu0 %v1355_v4  ;;  %v1602_v17 = vunpack.c.l.bf16 %v650_v6  ;;  %2036 = vmatprep.subr.mxu1 %v1611_v8 }
  0xcd   :  { %v646_v13 = vld [vmem:[#allocation7 + $0xda0] sm:$0xff]  ;;  %1959 = vmatmul.mubr.f32.vlgmr.msra.gmra.mxu1 %v204_v11  ;;  %v1339_v20 = vunpack.c.h.bf16 %v518_v12  ;;  %1966 = vmatpush1.msra.mxu0 %v1354_v9  ;;  %v1338_v22 = vunpack.c.l.bf16 %v518_v12 }
  0xce   :  { %v514_v18 = vld [vmem:[#allocation7 + $0x980] sm:$0xff]  ;;  %v1595_v21 = vunpack.c.h.bf16 %v646_v13  ;;  %2037 = vmatpush1.msra.mxu1 %v1610_v10  ;;  %v1594_v23 = vunpack.c.l.bf16 %v646_v13  ;;  %1967 = vmatprep.subr.mxu0 %v1347_v14 }
  0xcf   :  { %v642_v19 = vld [vmem:[#allocation7 + $0xd80] sm:$0xff]  ;;  %2038 = vmatprep.subr.mxu1 %v1603_v15  ;;  %v1331_v26 = vunpack.c.h.bf16 %v514_v18  ;;  %1968 = vmatpush1.msra.mxu0 %v1346_v16  ;;  %v1330_v28 = vunpack.c.l.bf16 %v514_v18 }
  0xd0   :  { %v510_v24 = vld [vmem:[#allocation7 + $0x960] sm:$0xff]  ;;  %v1587_v27 = vunpack.c.h.bf16 %v642_v19  ;;  %2039 = vmatpush1.msra.mxu1 %v1602_v17  ;;  %v1586_v29 = vunpack.c.l.bf16 %v642_v19  ;;  %1969 = vmatprep.subr.mxu0 %v1339_v20 }
  0xd1   :  { %v638_v25 = vld [vmem:[#allocation7 + $0xd60] sm:$0xff]  ;;  %2040 = vmatprep.subr.mxu1 %v1595_v21  ;;  %v1323_v32 = vunpack.c.h.bf16 %v510_v24  ;;  %1970 = vmatpush1.msra.mxu0 %v1338_v22  ;;  %v1322_v34 = vunpack.c.l.bf16 %v510_v24 }
  0xd2   :  { %v506_v30 = vld [vmem:[#allocation7 + $0x940] sm:$0xff]  ;;  %v1579_v33 = vunpack.c.h.bf16 %v638_v25  ;;  %2041 = vmatpush1.msra.mxu1 %v1594_v23  ;;  %v1578_v35 = vunpack.c.l.bf16 %v638_v25  ;;  %1971 = vmatprep.subr.mxu0 %v1331_v26 }
  0xd3   :  { %v634_v31 = vld [vmem:[#allocation7 + $0xd40] sm:$0xff]  ;;  %2042 = vmatprep.subr.mxu1 %v1587_v27  ;;  %v1315_v38 = vunpack.c.h.bf16 %v506_v30  ;;  %1972 = vmatpush1.msra.mxu0 %v1330_v28  ;;  %v1314_v40 = vunpack.c.l.bf16 %v506_v30 }
  0xd4   :  { %v502_v36 = vld [vmem:[#allocation7 + $0x920] sm:$0xff]  ;;  %v1571_v39 = vunpack.c.h.bf16 %v634_v31  ;;  %2043 = vmatpush1.msra.mxu1 %v1586_v29  ;;  %v1570_v41 = vunpack.c.l.bf16 %v634_v31  ;;  %1973 = vmatprep.subr.mxu0 %v1323_v32 }
  0xd5   :  { %v630_v37 = vld [vmem:[#allocation7 + $0xd20] sm:$0xff]  ;;  %2044 = vmatprep.subr.mxu1 %v1579_v33  ;;  %v1307_v44 = vunpack.c.h.bf16 %v502_v36  ;;  %1974 = vmatpush1.msra.mxu0 %v1322_v34  ;;  %v1306_v46 = vunpack.c.l.bf16 %v502_v36 }
  0xd6   :  { %v498_v42 = vld [vmem:[#allocation7 + $0x900] sm:$0xff]  ;;  %v1563_v45 = vunpack.c.h.bf16 %v630_v37  ;;  %2045 = vmatpush1.msra.mxu1 %v1578_v35  ;;  %v1562_v47 = vunpack.c.l.bf16 %v630_v37  ;;  %1975 = vmatprep.subr.mxu0 %v1315_v38 }
  0xd7   :  { %v626_v43 = vld [vmem:[#allocation7 + $0xd00] sm:$0xff]  ;;  %2046 = vmatprep.subr.mxu1 %v1571_v39  ;;  %v1299_v50 = vunpack.c.h.bf16 %v498_v42  ;;  %1976 = vmatpush1.msra.mxu0 %v1314_v40  ;;  %v1298_v52 = vunpack.c.l.bf16 %v498_v42 }
  0xd8   :  { %v494_v48 = vld [vmem:[#allocation7 + $0x8e0] sm:$0xff]  ;;  %v1555_v51 = vunpack.c.h.bf16 %v626_v43  ;;  %2047 = vmatpush1.msra.mxu1 %v1570_v41  ;;  %v1554_v53 = vunpack.c.l.bf16 %v626_v43  ;;  %1977 = vmatprep.subr.mxu0 %v1307_v44 }
  0xd9   :  { %v622_v49 = vld [vmem:[#allocation7 + $0xce0] sm:$0xff]  ;;  %2048 = vmatprep.subr.mxu1 %v1563_v45  ;;  %v1291_v56 = vunpack.c.h.bf16 %v494_v48  ;;  %1978 = vmatpush1.msra.mxu0 %v1306_v46  ;;  %v1290_v58 = vunpack.c.l.bf16 %v494_v48 }
  0xda   :  { %v490_v54 = vld [vmem:[#allocation7 + $0x8c0] sm:$0xff]  ;;  %v1547_v57 = vunpack.c.h.bf16 %v622_v49  ;;  %2049 = vmatpush1.msra.mxu1 %v1562_v47  ;;  %v1546_v59 = vunpack.c.l.bf16 %v622_v49  ;;  %1979 = vmatprep.subr.mxu0 %v1299_v50 }
  0xdb   :  { %v618_v55 = vld [vmem:[#allocation7 + $0xcc0] sm:$0xff]  ;;  %2050 = vmatprep.subr.mxu1 %v1555_v51  ;;  %v1283_v62 = vunpack.c.h.bf16 %v490_v54  ;;  %1980 = vmatpush1.msra.mxu0 %v1298_v52  ;;  %v1282_v0 = vunpack.c.l.bf16 %v490_v54 }
  0xdc   :  { %v486_v60 = vld [vmem:[#allocation7 + $0x8a0] sm:$0xff]  ;;  %v1539_v63 = vunpack.c.h.bf16 %v618_v55  ;;  %2051 = vmatpush1.msra.mxu1 %v1554_v53  ;;  %v1538_v1 = vunpack.c.l.bf16 %v618_v55  ;;  %1981 = vmatprep.subr.mxu0 %v1291_v56 }
  0xdd   :  { %v614_v61 = vld [vmem:[#allocation7 + $0xca0] sm:$0xff]  ;;  %2052 = vmatprep.subr.mxu1 %v1547_v57  ;;  %v1275_v4 = vunpack.c.h.bf16 %v486_v60  ;;  %1982 = vmatpush1.msra.mxu0 %v1290_v58  ;;  %v1274_v6 = vunpack.c.l.bf16 %v486_v60 }
  0xde   :  { %v482_v2 = vld [vmem:[#allocation7 + $0x880] sm:$0xff]  ;;  %v1531_v5 = vunpack.c.h.bf16 %v614_v61  ;;  %2053 = vmatpush1.msra.mxu1 %v1546_v59  ;;  %v1530_v7 = vunpack.c.l.bf16 %v614_v61  ;;  %1983 = vmatprep.subr.mxu0 %v1283_v62 }
  0xdf   :  { %v610_v3 = vld [vmem:[#allocation7 + $0xc80] sm:$0xff]  ;;  %2054 = vmatprep.subr.mxu1 %v1539_v63  ;;  %v1267_v10 = vunpack.c.h.bf16 %v482_v2  ;;  %1984 = vmatpush1.msra.mxu0 %v1282_v0  ;;  %v1266_v12 = vunpack.c.l.bf16 %v482_v2 }
  0xe0   :  { %v478_v8 = vld [vmem:[#allocation7 + $0x860] sm:$0xff]  ;;  %v1523_v11 = vunpack.c.h.bf16 %v610_v3  ;;  %2055 = vmatpush1.msra.mxu1 %v1538_v1  ;;  %v1522_v13 = vunpack.c.l.bf16 %v610_v3  ;;  %1985 = vmatprep.subr.mxu0 %v1275_v4 }
  0xe1   :  { %v606_v9 = vld [vmem:[#allocation7 + $0xc60] sm:$0xff]  ;;  %2056 = vmatprep.subr.mxu1 %v1531_v5  ;;  %v1259_v16 = vunpack.c.h.bf16 %v478_v8  ;;  %1986 = vmatpush1.msra.mxu0 %v1274_v6  ;;  %v1258_v18 = vunpack.c.l.bf16 %v478_v8 }
  0xe2   :  { %v474_v14 = vld [vmem:[#allocation7 + $0x840] sm:$0xff]  ;;  %v1515_v17 = vunpack.c.h.bf16 %v606_v9  ;;  %2057 = vmatpush1.msra.mxu1 %v1530_v7  ;;  %v1514_v19 = vunpack.c.l.bf16 %v606_v9  ;;  %1987 = vmatprep.subr.mxu0 %v1267_v10 }
  0xe3   :  { %v602_v15 = vld [vmem:[#allocation7 + $0xc40] sm:$0xff]  ;;  %2058 = vmatprep.subr.mxu1 %v1523_v11  ;;  %v1251_v22 = vunpack.c.h.bf16 %v474_v14  ;;  %1988 = vmatpush1.msra.mxu0 %v1266_v12  ;;  %v1250_v24 = vunpack.c.l.bf16 %v474_v14 }
  0xe4   :  { %v470_v20 = vld [vmem:[#allocation7 + $0x820] sm:$0xff]  ;;  %v1507_v23 = vunpack.c.h.bf16 %v602_v15  ;;  %2059 = vmatpush1.msra.mxu1 %v1522_v13  ;;  %v1506_v25 = vunpack.c.l.bf16 %v602_v15  ;;  %1989 = vmatprep.subr.mxu0 %v1259_v16 }
  0xe5   :  { %v598_v21 = vld [vmem:[#allocation7 + $0xc20] sm:$0xff]  ;;  %2060 = vmatprep.subr.mxu1 %v1515_v17  ;;  %v1243_v28 = vunpack.c.h.bf16 %v470_v20  ;;  %1990 = vmatpush1.msra.mxu0 %v1258_v18  ;;  %v1242_v30 = vunpack.c.l.bf16 %v470_v20 }
  0xe6   :  { %v466_v26 = vld [vmem:[#allocation7 + $0x800] sm:$0xff]  ;;  %v1499_v29 = vunpack.c.h.bf16 %v598_v21  ;;  %2061 = vmatpush1.msra.mxu1 %v1514_v19  ;;  %v1498_v31 = vunpack.c.l.bf16 %v598_v21  ;;  %1991 = vmatprep.subr.mxu0 %v1251_v22 }
  0xe7   :  { %v594_v27 = vld [vmem:[#allocation7 + $0xc00] sm:$0xff]  ;;  %2062 = vmatprep.subr.mxu1 %v1507_v23  ;;  %v1235_v34 = vunpack.c.h.bf16 %v466_v26  ;;  %1992 = vmatpush1.msra.mxu0 %v1250_v24  ;;  %v1234_v36 = vunpack.c.l.bf16 %v466_v26 }
  0xe8   :  { %v590_v32 = vld [vmem:[#allocation7 + $0xbe0] sm:$0xff]  ;;  %v1491_v35 = vunpack.c.h.bf16 %v594_v27  ;;  %2063 = vmatpush1.msra.mxu1 %v1506_v25  ;;  %v1490_v37 = vunpack.c.l.bf16 %v594_v27  ;;  %1993 = vmatprep.subr.mxu0 %v1243_v28 }
  0xe9   :  { %v718_v33 = vld [vmem:[#allocation7 + $0xfe0] sm:$0xff]  ;;  %2064 = vmatprep.subr.mxu1 %v1499_v29  ;;  %v1483_v40 = vunpack.c.h.bf16 %v590_v32  ;;  %1994 = vmatpush1.msra.mxu0 %v1242_v30  ;;  %v1482_v42 = vunpack.c.l.bf16 %v590_v32 }
  0xea   :  { %v586_v38 = vld [vmem:[#allocation7 + $0xbc0] sm:$0xff]  ;;  %v1739_v41 = vunpack.c.h.bf16 %v718_v33  ;;  %2065 = vmatpush1.msra.mxu1 %v1498_v31  ;;  %v1738_v43 = vunpack.c.l.bf16 %v718_v33  ;;  %1995 = vmatprep.subr.mxu0 %v1235_v34 }
  0xeb   :  { %v714_v39 = vld [vmem:[#allocation7 + $0xfc0] sm:$0xff]  ;;  %2066 = vmatprep.subr.mxu1 %v1491_v35  ;;  %v1475_v46 = vunpack.c.h.bf16 %v586_v38  ;;  %1996 = vmatpush1.msra.mxu0 %v1234_v36  ;;  %v1474_v48 = vunpack.c.l.bf16 %v586_v38 }
  0xec   :  { %v582_v44 = vld [vmem:[#allocation7 + $0xba0] sm:$0xff]  ;;  %v1731_v47 = vunpack.c.h.bf16 %v714_v39  ;;  %2067 = vmatpush1.msra.mxu1 %v1490_v37  ;;  %v1730_v49 = vunpack.c.l.bf16 %v714_v39  ;;  %1997 = vmatprep.subr.mxu0 %v1483_v40 }
  0xed   :  { %v710_v45 = vld [vmem:[#allocation7 + $0xfa0] sm:$0xff]  ;;  %2068 = vmatprep.subr.mxu1 %v1739_v41  ;;  %v1467_v52 = vunpack.c.h.bf16 %v582_v44  ;;  %1998 = vmatpush2.msra.mxu0 %v1482_v42  ;;  %v1466_v54 = vunpack.c.l.bf16 %v582_v44 }
  0xee   :  { %v578_v50 = vld [vmem:[#allocation7 + $0xb80] sm:$0xff]  ;;  %v1723_v53 = vunpack.c.h.bf16 %v710_v45  ;;  %2069 = vmatpush2.msra.mxu1 %v1738_v43  ;;  %v1722_v55 = vunpack.c.l.bf16 %v710_v45  ;;  %1999 = vmatprep.subr.mxu0 %v1475_v46 }
  0xef   :  { %v706_v51 = vld [vmem:[#allocation7 + $0xf80] sm:$0xff]  ;;  %2070 = vmatprep.subr.mxu1 %v1731_v47  ;;  %v1459_v58 = vunpack.c.h.bf16 %v578_v50  ;;  %2000 = vmatpush2.msra.mxu0 %v1474_v48  ;;  %v1458_v60 = vunpack.c.l.bf16 %v578_v50 }
  0xf0   :  { %v574_v56 = vld [vmem:[#allocation7 + $0xb60] sm:$0xff]  ;;  %v1715_v59 = vunpack.c.h.bf16 %v706_v51  ;;  %2071 = vmatpush2.msra.mxu1 %v1730_v49  ;;  %v1714_v61 = vunpack.c.l.bf16 %v706_v51  ;;  %2001 = vmatprep.subr.mxu0 %v1467_v52 }
  0xf1   :  { %v702_v57 = vld [vmem:[#allocation7 + $0xf60] sm:$0xff]  ;;  %2072 = vmatprep.subr.mxu1 %v1723_v53  ;;  %v1451_v0 = vunpack.c.h.bf16 %v574_v56  ;;  %2002 = vmatpush2.msra.mxu0 %v1466_v54  ;;  %v1450_v2 = vunpack.c.l.bf16 %v574_v56 }
  0xf2   :  { %v570_v62 = vld [vmem:[#allocation7 + $0xb40] sm:$0xff]  ;;  %v1707_v1 = vunpack.c.h.bf16 %v702_v57  ;;  %2073 = vmatpush2.msra.mxu1 %v1722_v55  ;;  %v1706_v3 = vunpack.c.l.bf16 %v702_v57  ;;  %2003 = vmatprep.subr.mxu0 %v1459_v58 }
  0xf3   :  { %v698_v63 = vld [vmem:[#allocation7 + $0xf40] sm:$0xff]  ;;  %2074 = vmatprep.subr.mxu1 %v1715_v59  ;;  %v1443_v6 = vunpack.c.h.bf16 %v570_v62  ;;  %2004 = vmatpush2.msra.mxu0 %v1458_v60  ;;  %v1442_v8 = vunpack.c.l.bf16 %v570_v62 }
  0xf4   :  { %v566_v4 = vld [vmem:[#allocation7 + $0xb20] sm:$0xff]  ;;  %v1699_v7 = vunpack.c.h.bf16 %v698_v63  ;;  %2075 = vmatpush2.msra.mxu1 %v1714_v61  ;;  %v1698_v9 = vunpack.c.l.bf16 %v698_v63  ;;  %2005 = vmatprep.subr.mxu0 %v1451_v0 }
  0xf5   :  { %v694_v5 = vld [vmem:[#allocation7 + $0xf20] sm:$0xff]  ;;  %2076 = vmatprep.subr.mxu1 %v1707_v1  ;;  %v1435_v12 = vunpack.c.h.bf16 %v566_v4  ;;  %2006 = vmatpush2.msra.mxu0 %v1450_v2  ;;  %v1434_v14 = vunpack.c.l.bf16 %v566_v4  ;;  %v271_v2 = vld [vmem:[#allocation7 + $0x1e8] sm:$0xff] }
  0xf6   :  { %v562_v10 = vld [vmem:[#allocation7 + $0xb00] sm:$0xff]  ;;  %v1691_v13 = vunpack.c.h.bf16 %v694_v5  ;;  %2077 = vmatpush2.msra.mxu1 %v1706_v3  ;;  %v1690_v15 = vunpack.c.l.bf16 %v694_v5  ;;  %2007 = vmatprep.subr.mxu0 %v1443_v6  ;;  %v399_v4 = vld [vmem:[#allocation7 + $0x5e8] sm:$0xff] }
  0xf7   :  { %v690_v11 = vld [vmem:[#allocation7 + $0xf00] sm:$0xff]  ;;  %2078 = vmatprep.subr.mxu1 %v1699_v7  ;;  %v1427_v18 = vunpack.c.h.bf16 %v562_v10  ;;  %2008 = vmatpush2.msra.mxu0 %v1442_v8  ;;  %v1426_v20 = vunpack.c.l.bf16 %v562_v10  ;;  %v207_v6 = vld [vmem:[#allocation5 + $0x28] sm:$0xff]  ;;  %v845_v8 = vunpack.c.h.bf16 %v271_v2 }
  0xf8   :  { %v558_v16 = vld [vmem:[#allocation7 + $0xae0] sm:$0xff]  ;;  %v1683_v19 = vunpack.c.h.bf16 %v690_v11  ;;  %2079 = vmatpush2.msra.mxu1 %v1698_v9  ;;  %v1682_v21 = vunpack.c.l.bf16 %v690_v11  ;;  %2009 = vmatprep.subr.mxu0 %v1435_v12  ;;  %v267_v9 = vld [vmem:[#allocation7 + $0x1c8] sm:$0xff]  ;;  %v209_v11 = vld [vmem:[#allocation5 + $0x38] sm:$0xff]  ;;  %v1101_v12 = vunpack.c.h.bf16 %v399_v4 }
  0xf9   :  { %v686_v17 = vld [vmem:[#allocation7 + $0xee0] sm:$0xff]  ;;  %2080 = vmatprep.subr.mxu1 %v1691_v13  ;;  %v1419_v24 = vunpack.c.h.bf16 %v558_v16  ;;  %2010 = vmatpush2.msra.mxu0 %v1434_v14  ;;  %v1418_v26 = vunpack.c.l.bf16 %v558_v16  ;;  %v395_v10 = vld [vmem:[#allocation7 + $0x5c8] sm:$0xff]  ;;  %v844_v13 = vunpack.c.l.bf16 %v271_v2  ;;  %v1100_v14 = vunpack.c.l.bf16 %v399_v4 }
  0xfa   :  { %v554_v22 = vld [vmem:[#allocation7 + $0xac0] sm:$0xff]  ;;  %v1675_v25 = vunpack.c.h.bf16 %v686_v17  ;;  %2081 = vmatpush2.msra.mxu1 %v1690_v15  ;;  %v1674_v27 = vunpack.c.l.bf16 %v686_v17  ;;  %2011 = vmatprep.subr.mxu0 %v1427_v18  ;;  %v208_v15 = vld [vmem:[#allocation5 + $0x30] sm:$0xff]  ;;  %v263_v16 = vld [vmem:[#allocation7 + $0x1a8] sm:$0xff]  ;;  %v837_v18 = vunpack.c.h.bf16 %v267_v9 }
  0xfb   :  { %v682_v23 = vld [vmem:[#allocation7 + $0xec0] sm:$0xff]  ;;  %2082 = vmatprep.subr.mxu1 %v1683_v19  ;;  %v1411_v30 = vunpack.c.h.bf16 %v554_v22  ;;  %2012 = vmatpush2.msra.mxu0 %v1426_v20  ;;  %v1410_v32 = vunpack.c.l.bf16 %v554_v22  ;;  %v391_v17 = vld [vmem:[#allocation7 + $0x5a8] sm:$0xff]  ;;  %v1093_v19 = vunpack.c.h.bf16 %v395_v10  ;;  %v836_v20 = vunpack.c.l.bf16 %v267_v9 }
  0xfc   :  { %v550_v28 = vld [vmem:[#allocation7 + $0xaa0] sm:$0xff]  ;;  %v1667_v31 = vunpack.c.h.bf16 %v682_v23  ;;  %2083 = vmatpush2.msra.mxu1 %v1682_v21  ;;  %v1666_v33 = vunpack.c.l.bf16 %v682_v23  ;;  %2013 = vmatprep.subr.mxu0 %v1419_v24  ;;  %v1092_v21 = vunpack.c.l.bf16 %v395_v10  ;;  %v259_v22 = vld [vmem:[#allocation7 + $0x188] sm:$0xff]  ;;  %v829_v24 = vunpack.c.h.bf16 %v263_v16 }
  0xfd   :  { %v678_v29 = vld [vmem:[#allocation7 + $0xea0] sm:$0xff]  ;;  %2084 = vmatprep.subr.mxu1 %v1675_v25  ;;  %v1403_v36 = vunpack.c.h.bf16 %v550_v28  ;;  %2014 = vmatpush2.msra.mxu0 %v1418_v26  ;;  %v1402_v38 = vunpack.c.l.bf16 %v550_v28  ;;  %v387_v23 = vld [vmem:[#allocation7 + $0x588] sm:$0xff]  ;;  %v1085_v25 = vunpack.c.h.bf16 %v391_v17  ;;  %v828_v26 = vunpack.c.l.bf16 %v263_v16 }
  0xfe   :  { %v546_v34 = vld [vmem:[#allocation7 + $0xa80] sm:$0xff]  ;;  %v1659_v37 = vunpack.c.h.bf16 %v678_v29  ;;  %2085 = vmatpush2.msra.mxu1 %v1674_v27  ;;  %v1658_v39 = vunpack.c.l.bf16 %v678_v29  ;;  %2015 = vmatprep.subr.mxu0 %v1411_v30  ;;  %v1084_v27 = vunpack.c.l.bf16 %v391_v17  ;;  %v255_v28 = vld [vmem:[#allocation7 + $0x168] sm:$0xff]  ;;  %v821_v30 = vunpack.c.h.bf16 %v259_v22 }
  0xff   :  { %v674_v35 = vld [vmem:[#allocation7 + $0xe80] sm:$0xff]  ;;  %2086 = vmatprep.subr.mxu1 %v1667_v31  ;;  %v1395_v42 = vunpack.c.h.bf16 %v546_v34  ;;  %2016 = vmatpush2.msra.mxu0 %v1410_v32  ;;  %v1394_v44 = vunpack.c.l.bf16 %v546_v34  ;;  %v383_v29 = vld [vmem:[#allocation7 + $0x568] sm:$0xff]  ;;  %v1077_v31 = vunpack.c.h.bf16 %v387_v23  ;;  %v820_v32 = vunpack.c.l.bf16 %v259_v22 }
 0x100   :  { %v542_v40 = vld [vmem:[#allocation7 + $0xa60] sm:$0xff]  ;;  %v1651_v43 = vunpack.c.h.bf16 %v674_v35  ;;  %2087 = vmatpush2.msra.mxu1 %v1666_v33  ;;  %v1650_v45 = vunpack.c.l.bf16 %v674_v35  ;;  %2017 = vmatprep.subr.mxu0 %v1403_v36  ;;  %v1076_v33 = vunpack.c.l.bf16 %v387_v23  ;;  %v251_v34 = vld [vmem:[#allocation7 + $0x148] sm:$0xff]  ;;  %v813_v36 = vunpack.c.h.bf16 %v255_v28 }
 0x101   :  { %v670_v41 = vld [vmem:[#allocation7 + $0xe60] sm:$0xff]  ;;  %2088 = vmatprep.subr.mxu1 %v1659_v37  ;;  %v1387_v48 = vunpack.c.h.bf16 %v542_v40  ;;  %2018 = vmatpush2.msra.mxu0 %v1402_v38  ;;  %v1386_v50 = vunpack.c.l.bf16 %v542_v40  ;;  %v379_v35 = vld [vmem:[#allocation7 + $0x548] sm:$0xff]  ;;  %v1069_v37 = vunpack.c.h.bf16 %v383_v29  ;;  %v812_v38 = vunpack.c.l.bf16 %v255_v28 }
 0x102   :  { %v538_v46 = vld [vmem:[#allocation7 + $0xa40] sm:$0xff]  ;;  %v1643_v49 = vunpack.c.h.bf16 %v670_v41  ;;  %2089 = vmatpush2.msra.mxu1 %v1658_v39  ;;  %v1642_v51 = vunpack.c.l.bf16 %v670_v41  ;;  %2019 = vmatprep.subr.mxu0 %v1395_v42  ;;  %v1068_v39 = vunpack.c.l.bf16 %v383_v29  ;;  %v247_v40 = vld [vmem:[#allocation7 + $0x128] sm:$0xff]  ;;  %v805_v42 = vunpack.c.h.bf16 %v251_v34 }
 0x103   :  { %v666_v47 = vld [vmem:[#allocation7 + $0xe40] sm:$0xff]  ;;  %2090 = vmatprep.subr.mxu1 %v1651_v43  ;;  %v1379_v54 = vunpack.c.h.bf16 %v538_v46  ;;  %2020 = vmatpush2.msra.mxu0 %v1394_v44  ;;  %v1378_v56 = vunpack.c.l.bf16 %v538_v46  ;;  %v375_v41 = vld [vmem:[#allocation7 + $0x528] sm:$0xff]  ;;  %v1061_v43 = vunpack.c.h.bf16 %v379_v35  ;;  %v804_v44 = vunpack.c.l.bf16 %v251_v34 }
 0x104   :  { %v534_v52 = vld [vmem:[#allocation7 + $0xa20] sm:$0xff]  ;;  %v1635_v55 = vunpack.c.h.bf16 %v666_v47  ;;  %2091 = vmatpush2.msra.mxu1 %v1650_v45  ;;  %v1634_v57 = vunpack.c.l.bf16 %v666_v47  ;;  %2021 = vmatprep.subr.mxu0 %v1387_v48  ;;  %v1060_v45 = vunpack.c.l.bf16 %v379_v35  ;;  %v243_v46 = vld [vmem:[#allocation7 + $0x108] sm:$0xff]  ;;  %v797_v48 = vunpack.c.h.bf16 %v247_v40 }
 0x105   :  { %v662_v53 = vld [vmem:[#allocation7 + $0xe20] sm:$0xff]  ;;  %2092 = vmatprep.subr.mxu1 %v1643_v49  ;;  %v1371_v60 = vunpack.c.h.bf16 %v534_v52  ;;  %2022 = vmatpush2.msra.mxu0 %v1386_v50  ;;  %v1370_v62 = vunpack.c.l.bf16 %v534_v52  ;;  %v371_v47 = vld [vmem:[#allocation7 + $0x508] sm:$0xff]  ;;  %v1053_v49 = vunpack.c.h.bf16 %v375_v41  ;;  %v796_v50 = vunpack.c.l.bf16 %v247_v40 }
 0x106   :  { %v530_v58 = vld [vmem:[#allocation7 + $0xa00] sm:$0xff]  ;;  %v1627_v61 = vunpack.c.h.bf16 %v662_v53  ;;  %2093 = vmatpush2.msra.mxu1 %v1642_v51  ;;  %v1626_v63 = vunpack.c.l.bf16 %v662_v53  ;;  %2023 = vmatprep.subr.mxu0 %v1379_v54  ;;  %v1052_v51 = vunpack.c.l.bf16 %v375_v41  ;;  %v239_v52 = vld [vmem:[#allocation7 + $0xe8] sm:$0xff]  ;;  %v789_v54 = vunpack.c.h.bf16 %v243_v46 }
 0x107   :  { %v658_v59 = vld [vmem:[#allocation7 + $0xe00] sm:$0xff]  ;;  %2094 = vmatprep.subr.mxu1 %v1635_v55  ;;  %v1363_v0 = vunpack.c.h.bf16 %v530_v58  ;;  %2024 = vmatpush2.msra.mxu0 %v1378_v56  ;;  %v1362_v3 = vunpack.c.l.bf16 %v530_v58  ;;  %v367_v53 = vld [vmem:[#allocation7 + $0x4e8] sm:$0xff]  ;;  %v1045_v55 = vunpack.c.h.bf16 %v371_v47  ;;  %v788_v56 = vunpack.c.l.bf16 %v243_v46 }
 0x108   :  { %v1619_v1 = vunpack.c.h.bf16 %v658_v59  ;;  %2095 = vmatpush2.msra.mxu1 %v1634_v57  ;;  %2025 = vmatprep.subr.mxu0 %v1371_v60  ;;  %v1618_v5 = vunpack.c.l.bf16 %v658_v59  ;;  %v206_v7 = vld [vmem:[#allocation5 + $0x20] sm:$0xff]  ;;  %v1044_v57 = vunpack.c.l.bf16 %v371_v47  ;;  %v235_v58 = vld [vmem:[#allocation7 + $0xc8] sm:$0xff]  ;;  %v781_v60 = vunpack.c.h.bf16 %v239_v52 }
 0x109   :  { %2096 = vmatprep.subr.mxu1 %v1627_v61  ;;  %2026 = vmatpush2.msra.mxu0 %v1370_v62  ;;  %v363_v59 = vld [vmem:[#allocation7 + $0x4c8] sm:$0xff]  ;;  %v1037_v61 = vunpack.c.h.bf16 %v367_v53  ;;  %v780_v62 = vunpack.c.l.bf16 %v239_v52  ;;  %v773_v2 = vunpack.c.h.bf16 %v235_v58  ;;  %v772_v4 = vunpack.c.l.bf16 %v235_v58 }
 0x10a   :  { %2097 = vmatpush2.msra.mxu1 %v1626_v63  ;;  %2027 = vmatprep.subr.mxu0 %v1363_v0  ;;  %v1036_v63 = vunpack.c.l.bf16 %v367_v53  ;;  %v231_v0 = vld [vmem:[#allocation7 + $0xa8] sm:$0xff] }
 0x10b   :  { %2098 = vmatprep.subr.mxu1 %v1619_v1  ;;  %2028 = vmatpush2.msra.mxu0 %v1362_v3  ;;  %v359_v1 = vld [vmem:[#allocation7 + $0x4a8] sm:$0xff]  ;;  %v1029_v3 = vunpack.c.h.bf16 %v363_v59  ;;  %v764_v10 = vunpack.c.l.bf16 %v231_v0 }
 0x10c   :  { %2029 = vmatprep.mubr.f32.mxu0 %v207_v6  ;;  %2099 = vmatpush2.msra.mxu1 %v1618_v5  ;;  %v1028_v5 = vunpack.c.l.bf16 %v363_v59  ;;  %v227_v6 = vld [vmem:[#allocation7 + $0x88] sm:$0xff]  ;;  %v1021_v9 = vunpack.c.h.bf16 %v359_v1 }
 0x10d   :  { %2030 = vmatmul.mubr.f32.vlgmr.msra.gmra.mxu0 %v206_v7  ;;  %2100 = vmatprep.mubr.f32.mxu1 %v209_v11  ;;  %v355_v7 = vld [vmem:[#allocation7 + $0x488] sm:$0xff]  ;;  %v1020_v11 = vunpack.c.l.bf16 %v359_v1  ;;  %v756_v16 = vunpack.c.l.bf16 %v227_v6 }
 0x10e   :  { %2107 = vmatprep.subr.mxu0 %v845_v8  ;;  %2178 = vmatprep.subr.mxu1 %v1101_v12  ;;  %v765_v8 = vunpack.c.h.bf16 %v231_v0  ;;  %v223_v12 = vld [vmem:[#allocation7 + $0x68] sm:$0xff]  ;;  %v1012_v17 = vunpack.c.l.bf16 %v355_v7 }
 0x10f   :  { %2101 = vmatmul.mubr.f32.vlgmr.msra.gmra.mxu1 %v208_v15  ;;  %2108 = vmatpush1.msra.mxu0 %v844_v13  ;;  %v351_v13 = vld [vmem:[#allocation7 + $0x468] sm:$0xff]  ;;  %v1013_v15 = vunpack.c.h.bf16 %v355_v7  ;;  %v748_v22 = vunpack.c.l.bf16 %v223_v12 }
 0x110   :  { %2179 = vmatpush1.msra.mxu1 %v1100_v14  ;;  %2109 = vmatprep.subr.mxu0 %v837_v18  ;;  %v757_v14 = vunpack.c.h.bf16 %v227_v6  ;;  %v219_v18 = vld [vmem:[#allocation7 + $0x48] sm:$0xff]  ;;  %v1004_v23 = vunpack.c.l.bf16 %v351_v13 }
 0x111   :  { %2180 = vmatprep.subr.mxu1 %v1093_v19  ;;  %2110 = vmatpush1.msra.mxu0 %v836_v20  ;;  %v347_v19 = vld [vmem:[#allocation7 + $0x448] sm:$0xff]  ;;  %v749_v20 = vunpack.c.h.bf16 %v223_v12  ;;  %v740_v28 = vunpack.c.l.bf16 %v219_v18 }
 0x112   :  { %2181 = vmatpush1.msra.mxu1 %v1092_v21  ;;  %2111 = vmatprep.subr.mxu0 %v829_v24  ;;  %v1005_v21 = vunpack.c.h.bf16 %v351_v13  ;;  %v215_v24 = vld [vmem:[#allocation7 + $0x28] sm:$0xff]  ;;  %v996_v29 = vunpack.c.l.bf16 %v347_v19 }
 0x113   :  { %2182 = vmatprep.subr.mxu1 %v1085_v25  ;;  %2112 = vmatpush1.msra.mxu0 %v828_v26  ;;  %v343_v25 = vld [vmem:[#allocation7 + $0x428] sm:$0xff]  ;;  %v741_v26 = vunpack.c.h.bf16 %v219_v18  ;;  %v732_v34 = vunpack.c.l.bf16 %v215_v24 }
 0x114   :  { %2183 = vmatpush1.msra.mxu1 %v1084_v27  ;;  %2113 = vmatprep.subr.mxu0 %v821_v30  ;;  %v997_v27 = vunpack.c.h.bf16 %v347_v19  ;;  %v211_v30 = vld [vmem:[#allocation7 + $0x8] sm:$0xff]  ;;  %v988_v35 = vunpack.c.l.bf16 %v343_v25 }
 0x115   :  { %2184 = vmatprep.subr.mxu1 %v1077_v31  ;;  %2114 = vmatpush1.msra.mxu0 %v820_v32  ;;  %v339_v31 = vld [vmem:[#allocation7 + $0x408] sm:$0xff]  ;;  %v733_v32 = vunpack.c.h.bf16 %v215_v24  ;;  %v724_v40 = vunpack.c.l.bf16 %v211_v30 }
 0x116   :  { %2185 = vmatpush1.msra.mxu1 %v1076_v33  ;;  %2115 = vmatprep.subr.mxu0 %v813_v36  ;;  %v989_v33 = vunpack.c.h.bf16 %v343_v25  ;;  %v335_v36 = vld [vmem:[#allocation7 + $0x3e8] sm:$0xff]  ;;  %v980_v41 = vunpack.c.l.bf16 %v339_v31 }
 0x117   :  { %2186 = vmatprep.subr.mxu1 %v1069_v37  ;;  %2116 = vmatpush1.msra.mxu0 %v812_v38  ;;  %v463_v37 = vld [vmem:[#allocation7 + $0x7e8] sm:$0xff]  ;;  %v725_v38 = vunpack.c.h.bf16 %v211_v30  ;;  %v972_v46 = vunpack.c.l.bf16 %v335_v36 }
 0x118   :  { %2187 = vmatpush1.msra.mxu1 %v1068_v39  ;;  %2117 = vmatprep.subr.mxu0 %v805_v42  ;;  %v981_v39 = vunpack.c.h.bf16 %v339_v31  ;;  %v331_v42 = vld [vmem:[#allocation7 + $0x3c8] sm:$0xff]  ;;  %v1228_v47 = vunpack.c.l.bf16 %v463_v37 }
 0x119   :  { %2188 = vmatprep.subr.mxu1 %v1061_v43  ;;  %2118 = vmatpush1.msra.mxu0 %v804_v44  ;;  %v459_v43 = vld [vmem:[#allocation7 + $0x7c8] sm:$0xff]  ;;  %v973_v44 = vunpack.c.h.bf16 %v335_v36  ;;  %v964_v52 = vunpack.c.l.bf16 %v331_v42 }
 0x11a   :  { %2189 = vmatpush1.msra.mxu1 %v1060_v45  ;;  %2119 = vmatprep.subr.mxu0 %v797_v48  ;;  %v1229_v45 = vunpack.c.h.bf16 %v463_v37  ;;  %v327_v48 = vld [vmem:[#allocation7 + $0x3a8] sm:$0xff]  ;;  %v1220_v53 = vunpack.c.l.bf16 %v459_v43 }
 0x11b   :  { %2190 = vmatprep.subr.mxu1 %v1053_v49  ;;  %2120 = vmatpush1.msra.mxu0 %v796_v50  ;;  %v455_v49 = vld [vmem:[#allocation7 + $0x7a8] sm:$0xff]  ;;  %v965_v50 = vunpack.c.h.bf16 %v331_v42  ;;  %v956_v58 = vunpack.c.l.bf16 %v327_v48 }
 0x11c   :  { %2191 = vmatpush1.msra.mxu1 %v1052_v51  ;;  %2121 = vmatprep.subr.mxu0 %v789_v54  ;;  %v1221_v51 = vunpack.c.h.bf16 %v459_v43  ;;  %v323_v54 = vld [vmem:[#allocation7 + $0x388] sm:$0xff]  ;;  %v1212_v59 = vunpack.c.l.bf16 %v455_v49 }
 0x11d   :  { %2192 = vmatprep.subr.mxu1 %v1045_v55  ;;  %2122 = vmatpush1.msra.mxu0 %v788_v56  ;;  %v451_v55 = vld [vmem:[#allocation7 + $0x788] sm:$0xff]  ;;  %v957_v56 = vunpack.c.h.bf16 %v327_v48  ;;  %v948_v0 = vunpack.c.l.bf16 %v323_v54 }
 0x11e   :  { %2193 = vmatpush1.msra.mxu1 %v1044_v57  ;;  %2123 = vmatprep.subr.mxu0 %v781_v60  ;;  %v1213_v57 = vunpack.c.h.bf16 %v455_v49  ;;  %v319_v60 = vld [vmem:[#allocation7 + $0x368] sm:$0xff]  ;;  %v1204_v1 = vunpack.c.l.bf16 %v451_v55 }
 0x11f   :  { %2194 = vmatprep.subr.mxu1 %v1037_v61  ;;  %2124 = vmatpush1.msra.mxu0 %v780_v62  ;;  %v447_v61 = vld [vmem:[#allocation7 + $0x768] sm:$0xff]  ;;  %v949_v62 = vunpack.c.h.bf16 %v323_v54  ;;  %v940_v6 = vunpack.c.l.bf16 %v319_v60 }
 0x120   :  { %2195 = vmatpush1.msra.mxu1 %v1036_v63  ;;  %2125 = vmatprep.subr.mxu0 %v773_v2  ;;  %v1205_v63 = vunpack.c.h.bf16 %v451_v55  ;;  %v315_v2 = vld [vmem:[#allocation7 + $0x348] sm:$0xff]  ;;  %v1196_v7 = vunpack.c.l.bf16 %v447_v61 }
 0x121   :  { %2196 = vmatprep.subr.mxu1 %v1029_v3  ;;  %2126 = vmatpush1.msra.mxu0 %v772_v4  ;;  %v443_v3 = vld [vmem:[#allocation7 + $0x748] sm:$0xff]  ;;  %v941_v4 = vunpack.c.h.bf16 %v319_v60  ;;  %v932_v12 = vunpack.c.l.bf16 %v315_v2 }
 0x122   :  { %2197 = vmatpush1.msra.mxu1 %v1028_v5  ;;  %2127 = vmatprep.subr.mxu0 %v765_v8  ;;  %v1197_v5 = vunpack.c.h.bf16 %v447_v61  ;;  %v311_v8 = vld [vmem:[#allocation7 + $0x328] sm:$0xff]  ;;  %v1188_v13 = vunpack.c.l.bf16 %v443_v3 }
 0x123   :  { %2198 = vmatprep.subr.mxu1 %v1021_v9  ;;  %2128 = vmatpush1.msra.mxu0 %v764_v10  ;;  %v439_v9 = vld [vmem:[#allocation7 + $0x728] sm:$0xff]  ;;  %v933_v10 = vunpack.c.h.bf16 %v315_v2  ;;  %v924_v18 = vunpack.c.l.bf16 %v311_v8 }
 0x124   :  { %2199 = vmatpush1.msra.mxu1 %v1020_v11  ;;  %2129 = vmatprep.subr.mxu0 %v757_v14  ;;  %v1189_v11 = vunpack.c.h.bf16 %v443_v3  ;;  %v307_v14 = vld [vmem:[#allocation7 + $0x308] sm:$0xff]  ;;  %v1180_v19 = vunpack.c.l.bf16 %v439_v9 }
 0x125   :  { %2200 = vmatprep.subr.mxu1 %v1013_v15  ;;  %2130 = vmatpush1.msra.mxu0 %v756_v16  ;;  %v435_v15 = vld [vmem:[#allocation7 + $0x708] sm:$0xff]  ;;  %v925_v16 = vunpack.c.h.bf16 %v311_v8  ;;  %v916_v24 = vunpack.c.l.bf16 %v307_v14 }
 0x126   :  { %2201 = vmatpush1.msra.mxu1 %v1012_v17  ;;  %2131 = vmatprep.subr.mxu0 %v749_v20  ;;  %v1181_v17 = vunpack.c.h.bf16 %v439_v9  ;;  %v303_v20 = vld [vmem:[#allocation7 + $0x2e8] sm:$0xff]  ;;  %v1172_v25 = vunpack.c.l.bf16 %v435_v15 }
 0x127   :  { %2202 = vmatprep.subr.mxu1 %v1005_v21  ;;  %2132 = vmatpush1.msra.mxu0 %v748_v22  ;;  %v431_v21 = vld [vmem:[#allocation7 + $0x6e8] sm:$0xff]  ;;  %v917_v22 = vunpack.c.h.bf16 %v307_v14  ;;  %v908_v30 = vunpack.c.l.bf16 %v303_v20 }
 0x128   :  { %2203 = vmatpush1.msra.mxu1 %v1004_v23  ;;  %2133 = vmatprep.subr.mxu0 %v741_v26  ;;  %v1173_v23 = vunpack.c.h.bf16 %v435_v15  ;;  %v299_v26 = vld [vmem:[#allocation7 + $0x2c8] sm:$0xff]  ;;  %v1164_v31 = vunpack.c.l.bf16 %v431_v21 }
 0x129   :  { %2204 = vmatprep.subr.mxu1 %v997_v27  ;;  %2134 = vmatpush1.msra.mxu0 %v740_v28  ;;  %v427_v27 = vld [vmem:[#allocation7 + $0x6c8] sm:$0xff]  ;;  %v909_v28 = vunpack.c.h.bf16 %v303_v20  ;;  %v900_v36 = vunpack.c.l.bf16 %v299_v26 }
 0x12a   :  { %2205 = vmatpush1.msra.mxu1 %v996_v29  ;;  %2135 = vmatprep.subr.mxu0 %v733_v32  ;;  %v1165_v29 = vunpack.c.h.bf16 %v431_v21  ;;  %v295_v32 = vld [vmem:[#allocation7 + $0x2a8] sm:$0xff]  ;;  %v1156_v37 = vunpack.c.l.bf16 %v427_v27 }
 0x12b   :  { %2206 = vmatprep.subr.mxu1 %v989_v33  ;;  %2136 = vmatpush1.msra.mxu0 %v732_v34  ;;  %v423_v33 = vld [vmem:[#allocation7 + $0x6a8] sm:$0xff]  ;;  %v901_v34 = vunpack.c.h.bf16 %v299_v26  ;;  %v892_v42 = vunpack.c.l.bf16 %v295_v32 }
 0x12c   :  { %2207 = vmatpush1.msra.mxu1 %v988_v35  ;;  %2137 = vmatprep.subr.mxu0 %v725_v38  ;;  %v1157_v35 = vunpack.c.h.bf16 %v427_v27  ;;  %v291_v38 = vld [vmem:[#allocation7 + $0x288] sm:$0xff]  ;;  %v1148_v43 = vunpack.c.l.bf16 %v423_v33  ;;  %v6215_v27 = vld [vmem:[#allocation5 + $0x10] sm:$0xff] }
 0x12d   :  { %2208 = vmatprep.subr.mxu1 %v981_v39  ;;  %2138 = vmatpush1.msra.mxu0 %v724_v40  ;;  %v419_v39 = vld [vmem:[#allocation7 + $0x688] sm:$0xff]  ;;  %v893_v40 = vunpack.c.h.bf16 %v295_v32  ;;  %v884_v48 = vunpack.c.l.bf16 %v291_v38 }
 0x12e   :  { %2209 = vmatpush1.msra.mxu1 %v980_v41  ;;  %2139 = vmatprep.subr.mxu0 %v973_v44  ;;  %v1149_v41 = vunpack.c.h.bf16 %v423_v33  ;;  %v287_v44 = vld [vmem:[#allocation7 + $0x268] sm:$0xff]  ;;  %v1140_v49 = vunpack.c.l.bf16 %v419_v39 }
 0x12f   :  { %2210 = vmatprep.subr.mxu1 %v1229_v45  ;;  %2140 = vmatpush2.msra.mxu0 %v972_v46  ;;  %v415_v45 = vld [vmem:[#allocation7 + $0x668] sm:$0xff]  ;;  %v885_v46 = vunpack.c.h.bf16 %v291_v38  ;;  %v876_v54 = vunpack.c.l.bf16 %v287_v44 }
 0x130   :  { %2211 = vmatpush2.msra.mxu1 %v1228_v47  ;;  %2141 = vmatprep.subr.mxu0 %v965_v50  ;;  %v1141_v47 = vunpack.c.h.bf16 %v419_v39  ;;  %v283_v50 = vld [vmem:[#allocation7 + $0x248] sm:$0xff]  ;;  %v1132_v55 = vunpack.c.l.bf16 %v415_v45 }
 0x131   :  { %2212 = vmatprep.subr.mxu1 %v1221_v51  ;;  %2142 = vmatpush2.msra.mxu0 %v964_v52  ;;  %v411_v51 = vld [vmem:[#allocation7 + $0x648] sm:$0xff]  ;;  %v877_v52 = vunpack.c.h.bf16 %v287_v44  ;;  %v868_v60 = vunpack.c.l.bf16 %v283_v50 }
 0x132   :  { %2213 = vmatpush2.msra.mxu1 %v1220_v53  ;;  %2143 = vmatprep.subr.mxu0 %v957_v56  ;;  %v1133_v53 = vunpack.c.h.bf16 %v415_v45  ;;  %v279_v56 = vld [vmem:[#allocation7 + $0x228] sm:$0xff]  ;;  %v1124_v61 = vunpack.c.l.bf16 %v411_v51 }
 0x133   :  { %2214 = vmatprep.subr.mxu1 %v1213_v57  ;;  %2144 = vmatpush2.msra.mxu0 %v956_v58  ;;  %v407_v57 = vld [vmem:[#allocation7 + $0x628] sm:$0xff]  ;;  %v869_v58 = vunpack.c.h.bf16 %v283_v50  ;;  %v860_v2 = vunpack.c.l.bf16 %v279_v56 }
 0x134   :  { %2215 = vmatpush2.msra.mxu1 %v1212_v59  ;;  %2145 = vmatprep.subr.mxu0 %v949_v62  ;;  %v1125_v59 = vunpack.c.h.bf16 %v411_v51  ;;  %v275_v62 = vld [vmem:[#allocation7 + $0x208] sm:$0xff]  ;;  %v1116_v3 = vunpack.c.l.bf16 %v407_v57 }
 0x135   :  { %2216 = vmatprep.subr.mxu1 %v1205_v63  ;;  %2146 = vmatpush2.msra.mxu0 %v948_v0  ;;  %v403_v63 = vld [vmem:[#allocation7 + $0x608] sm:$0xff]  ;;  %v861_v0 = vunpack.c.h.bf16 %v279_v56 }
 0x136   :  { %2217 = vmatpush2.msra.mxu1 %v1204_v1  ;;  %2147 = vmatprep.subr.mxu0 %v941_v4  ;;  %v1117_v1 = vunpack.c.h.bf16 %v407_v57  ;;  %v853_v4 = vunpack.c.h.bf16 %v275_v62  ;;  %v655_v8 = vld [vmem:[#allocation7 + $0xde8] sm:$0xff]  ;;  %v1108_v9 = vunpack.c.l.bf16 %v403_v63 }
 0x137   :  { %2218 = vmatprep.subr.mxu1 %v1197_v5  ;;  %2148 = vmatpush2.msra.mxu0 %v940_v6  ;;  %v1109_v5 = vunpack.c.h.bf16 %v403_v63  ;;  %v527_v6 = vld [vmem:[#allocation7 + $0x9e8] sm:$0xff] }
 0x138   :  { %2219 = vmatpush2.msra.mxu1 %v1196_v7  ;;  %2149 = vmatprep.subr.mxu0 %v933_v10  ;;  %v852_v7 = vunpack.c.l.bf16 %v275_v62  ;;  %v1357_v10 = vunpack.c.h.bf16 %v527_v6  ;;  %v6212_v14 = vld [vmem:[#allocation5 + $0x8] sm:$0xff]  ;;  %v1356_v15 = vunpack.c.l.bf16 %v527_v6 }
 0x139   :  { %2220 = vmatprep.subr.mxu1 %v1189_v11  ;;  %2150 = vmatpush2.msra.mxu0 %v932_v12  ;;  %v523_v11 = vld [vmem:[#allocation7 + $0x9c8] sm:$0xff] }
 0x13a   :  { %2221 = vmatpush2.msra.mxu1 %v1188_v13  ;;  %2151 = vmatprep.subr.mxu0 %v925_v16  ;;  %v651_v12 = vld [vmem:[#allocation7 + $0xdc8] sm:$0xff]  ;;  %v1613_v13 = vunpack.c.h.bf16 %v655_v8  ;;  %v1612_v16 = vunpack.c.l.bf16 %v655_v8  ;;  %v1349_v20 = vunpack.c.h.bf16 %v523_v11 }
 0x13b   :  { %2222 = vmatprep.subr.mxu1 %v1181_v17  ;;  %2152 = vmatpush2.msra.mxu0 %v924_v18  ;;  %v519_v17 = vld [vmem:[#allocation7 + $0x9a8] sm:$0xff]  ;;  %v1605_v21 = vunpack.c.h.bf16 %v651_v12 }
 0x13c   :  { %2223 = vmatpush2.msra.mxu1 %v1180_v19  ;;  %2153 = vmatprep.subr.mxu0 %v917_v22  ;;  %v647_v18 = vld [vmem:[#allocation7 + $0xda8] sm:$0xff]  ;;  %v6213_v19 = vld [vmem:[#allocation5] sm:$0xff]  ;;  %v6214_v22 = vld [vmem:[#allocation5 + $0x18] sm:$0xff] }
 0x13d   :  { %2224 = vmatprep.subr.mxu1 %v1173_v23  ;;  %2154 = vmatpush2.msra.mxu0 %v916_v24  ;;  %v1348_v23 = vunpack.c.l.bf16 %v523_v11  ;;  %v1604_v24 = vunpack.c.l.bf16 %v651_v12  ;;  %v643_v26 = vld [vmem:[#allocation7 + $0xd88] sm:$0xff] }
 0x13e   :  { %2225 = vmatpush2.msra.mxu1 %v1172_v25  ;;  %2155 = vmatprep.subr.mxu0 %v909_v28  ;;  %v515_v25 = vld [vmem:[#allocation7 + $0x988] sm:$0xff]  ;;  %v1341_v28 = vunpack.c.h.bf16 %v519_v17 }
 0x13f   :  { %2226 = vmatprep.subr.mxu1 %v1165_v29  ;;  %2156 = vmatpush2.msra.mxu0 %v908_v30  ;;  %v1597_v29 = vunpack.c.h.bf16 %v647_v18  ;;  %v1340_v30 = vunpack.c.l.bf16 %v519_v17  ;;  %v511_v32 = vld [vmem:[#allocation7 + $0x968] sm:$0xff] }
 0x140   :  { %2227 = vmatpush2.msra.mxu1 %v1164_v31  ;;  %2157 = vmatprep.subr.mxu0 %v901_v34  ;;  %v1596_v31 = vunpack.c.l.bf16 %v647_v18  ;;  %v639_v33 = vld [vmem:[#allocation7 + $0xd68] sm:$0xff]  ;;  %v1333_v34 = vunpack.c.h.bf16 %v515_v25 }
 0x141   :  { %2228 = vmatprep.subr.mxu1 %v1157_v35  ;;  %2158 = vmatpush2.msra.mxu0 %v900_v36  ;;  %v1589_v35 = vunpack.c.h.bf16 %v643_v26  ;;  %v1332_v36 = vunpack.c.l.bf16 %v515_v25  ;;  %v507_v38 = vld [vmem:[#allocation7 + $0x948] sm:$0xff] }
 0x142   :  { %2229 = vmatpush2.msra.mxu1 %v1156_v37  ;;  %2159 = vmatprep.subr.mxu0 %v893_v40  ;;  %v1588_v37 = vunpack.c.l.bf16 %v643_v26  ;;  %v635_v39 = vld [vmem:[#allocation7 + $0xd48] sm:$0xff]  ;;  %v1325_v40 = vunpack.c.h.bf16 %v511_v32 }
 0x143   :  { %2230 = vmatprep.subr.mxu1 %v1149_v41  ;;  %2160 = vmatpush2.msra.mxu0 %v892_v42  ;;  %v1581_v41 = vunpack.c.h.bf16 %v639_v33  ;;  %v1324_v42 = vunpack.c.l.bf16 %v511_v32  ;;  %v503_v44 = vld [vmem:[#allocation7 + $0x928] sm:$0xff] }
 0x144   :  { %2231 = vmatpush2.msra.mxu1 %v1148_v43  ;;  %2161 = vmatprep.subr.mxu0 %v885_v46  ;;  %v1580_v43 = vunpack.c.l.bf16 %v639_v33  ;;  %v631_v45 = vld [vmem:[#allocation7 + $0xd28] sm:$0xff]  ;;  %v1317_v46 = vunpack.c.h.bf16 %v507_v38 }
 0x145   :  { %2232 = vmatprep.subr.mxu1 %v1141_v47  ;;  %2162 = vmatpush2.msra.mxu0 %v884_v48  ;;  %v1573_v47 = vunpack.c.h.bf16 %v635_v39  ;;  %v1316_v48 = vunpack.c.l.bf16 %v507_v38  ;;  %v499_v50 = vld [vmem:[#allocation7 + $0x908] sm:$0xff] }
 0x146   :  { %2233 = vmatpush2.msra.mxu1 %v1140_v49  ;;  %2163 = vmatprep.subr.mxu0 %v877_v52  ;;  %v1572_v49 = vunpack.c.l.bf16 %v635_v39  ;;  %v627_v51 = vld [vmem:[#allocation7 + $0xd08] sm:$0xff]  ;;  %v1309_v52 = vunpack.c.h.bf16 %v503_v44 }
 0x147   :  { %2234 = vmatprep.subr.mxu1 %v1133_v53  ;;  %2164 = vmatpush2.msra.mxu0 %v876_v54  ;;  %v1565_v53 = vunpack.c.h.bf16 %v631_v45  ;;  %v1308_v54 = vunpack.c.l.bf16 %v503_v44  ;;  %v495_v56 = vld [vmem:[#allocation7 + $0x8e8] sm:$0xff] }
 0x148   :  { %2235 = vmatpush2.msra.mxu1 %v1132_v55  ;;  %2165 = vmatprep.subr.mxu0 %v869_v58  ;;  %v1564_v55 = vunpack.c.l.bf16 %v631_v45  ;;  %v623_v57 = vld [vmem:[#allocation7 + $0xce8] sm:$0xff]  ;;  %v1301_v58 = vunpack.c.h.bf16 %v499_v50 }
 0x149   :  { %2236 = vmatprep.subr.mxu1 %v1125_v59  ;;  %2166 = vmatpush2.msra.mxu0 %v868_v60  ;;  %v1557_v59 = vunpack.c.h.bf16 %v627_v51  ;;  %v1300_v60 = vunpack.c.l.bf16 %v499_v50  ;;  %v491_v62 = vld [vmem:[#allocation7 + $0x8c8] sm:$0xff] }
 0x14a   :  { %2237 = vmatpush2.msra.mxu1 %v1124_v61  ;;  %2167 = vmatprep.subr.mxu0 %v861_v0  ;;  %v1556_v61 = vunpack.c.l.bf16 %v627_v51  ;;  %v619_v63 = vld [vmem:[#allocation7 + $0xcc8] sm:$0xff]  ;;  %v1293_v0 = vunpack.c.h.bf16 %v495_v56  ;;  %v1285_v6 = vunpack.c.h.bf16 %v491_v62  ;;  %v1284_v8 = vunpack.c.l.bf16 %v491_v62 }
 0x14b   :  { %2238 = vmatprep.subr.mxu1 %v1117_v1  ;;  %2168 = vmatpush2.msra.mxu0 %v860_v2  ;;  %v1549_v1 = vunpack.c.h.bf16 %v623_v57  ;;  %v1292_v2 = vunpack.c.l.bf16 %v495_v56  ;;  %v611_v11 = vld [vmem:[#allocation7 + $0xc88] sm:$0xff] }
 0x14c   :  { %2239 = vmatpush2.msra.mxu1 %v1116_v3  ;;  %2169 = vmatprep.subr.mxu0 %v853_v4  ;;  %v1548_v3 = vunpack.c.l.bf16 %v623_v57  ;;  %v487_v4 = vld [vmem:[#allocation7 + $0x8a8] sm:$0xff] }
 0x14d   :  { %2240 = vmatprep.subr.mxu1 %v1109_v5  ;;  %2170 = vmatpush2.msra.mxu0 %v852_v7  ;;  %v615_v5 = vld [vmem:[#allocation7 + $0xca8] sm:$0xff]  ;;  %v1541_v7 = vunpack.c.h.bf16 %v619_v63  ;;  %v1277_v12 = vunpack.c.h.bf16 %v487_v4 }
 0x14e   :  { %2171 = vmatprep.mubr.f32.mxu0 %v6212_v14  ;;  %2241 = vmatpush2.msra.mxu1 %v1108_v9  ;;  %v1540_v9 = vunpack.c.l.bf16 %v619_v63  ;;  %v1276_v14 = vunpack.c.l.bf16 %v487_v4  ;;  %v607_v17 = vld [vmem:[#allocation7 + $0xc68] sm:$0xff] }
 0x14f   :  { %2172 = vmatmul.mubr.f32.vlgmr.msra.gmra.mxu0 %v6213_v19  ;;  %2242 = vmatprep.mubr.f32.mxu1 %v6214_v22  ;;  %v1525_v19 = vunpack.c.h.bf16 %v611_v11  ;;  %v475_v22 = vld [vmem:[#allocation7 + $0x848] sm:$0xff]  ;;  %v1517_v25 = vunpack.c.h.bf16 %v607_v17 }
 0x150   :  { %2249 = vmatprep.subr.mxu0 %v1357_v10  ;;  %2320 = vmatprep.subr.mxu1 %v1613_v13  ;;  %v483_v10 = vld [vmem:[#allocation7 + $0x888] sm:$0xff]  ;;  %v1533_v13 = vunpack.c.h.bf16 %v615_v5  ;;  %v1252_v32 = vunpack.c.l.bf16 %v475_v22 }
 0x151   :  { %2243 = vmatmul.mubr.f32.vlgmr.msra.gmra.mxu1 %v6215_v27  ;;  %2250 = vmatpush1.msra.mxu0 %v1356_v15  ;;  %v1532_v15 = vunpack.c.l.bf16 %v615_v5  ;;  %v1269_v18 = vunpack.c.h.bf16 %v483_v10  ;;  %v1516_v27 = vunpack.c.l.bf16 %v607_v17 }
 0x152   :  { %2321 = vmatpush1.msra.mxu1 %v1612_v16  ;;  %2251 = vmatprep.subr.mxu0 %v1349_v20  ;;  %v479_v16 = vld [vmem:[#allocation7 + $0x868] sm:$0xff]  ;;  %v1268_v20 = vunpack.c.l.bf16 %v483_v10 }
 0x153   :  { %2322 = vmatprep.subr.mxu1 %v1605_v21  ;;  %2252 = vmatpush1.msra.mxu0 %v1348_v23  ;;  %v1524_v21 = vunpack.c.l.bf16 %v611_v11  ;;  %v603_v23 = vld [vmem:[#allocation7 + $0xc48] sm:$0xff]  ;;  %v1260_v26 = vunpack.c.l.bf16 %v479_v16 }
 0x154   :  { %2323 = vmatpush1.msra.mxu1 %v1604_v24  ;;  %2253 = vmatprep.subr.mxu0 %v1341_v28  ;;  %v1261_v24 = vunpack.c.h.bf16 %v479_v16  ;;  %v471_v28 = vld [vmem:[#allocation7 + $0x828] sm:$0xff]  ;;  %v1508_v33 = vunpack.c.l.bf16 %v603_v23 }
 0x155   :  { %2324 = vmatprep.subr.mxu1 %v1597_v29  ;;  %2254 = vmatpush1.msra.mxu0 %v1340_v30  ;;  %v599_v29 = vld [vmem:[#allocation7 + $0xc28] sm:$0xff]  ;;  %v1253_v30 = vunpack.c.h.bf16 %v475_v22  ;;  %v1244_v38 = vunpack.c.l.bf16 %v471_v28 }
 0x156   :  { %2325 = vmatpush1.msra.mxu1 %v1596_v31  ;;  %2255 = vmatprep.subr.mxu0 %v1333_v34  ;;  %v1509_v31 = vunpack.c.h.bf16 %v603_v23  ;;  %v467_v34 = vld [vmem:[#allocation7 + $0x808] sm:$0xff]  ;;  %v1500_v39 = vunpack.c.l.bf16 %v599_v29 }
 0x157   :  { %2326 = vmatprep.subr.mxu1 %v1589_v35  ;;  %2256 = vmatpush1.msra.mxu0 %v1332_v36  ;;  %v595_v35 = vld [vmem:[#allocation7 + $0xc08] sm:$0xff]  ;;  %v1245_v36 = vunpack.c.h.bf16 %v471_v28  ;;  %v1236_v44 = vunpack.c.l.bf16 %v467_v34 }
 0x158   :  { %2327 = vmatpush1.msra.mxu1 %v1588_v37  ;;  %2257 = vmatprep.subr.mxu0 %v1325_v40  ;;  %v1501_v37 = vunpack.c.h.bf16 %v599_v29  ;;  %v591_v40 = vld [vmem:[#allocation7 + $0xbe8] sm:$0xff]  ;;  %v1492_v45 = vunpack.c.l.bf16 %v595_v35 }
 0x159   :  { %2328 = vmatprep.subr.mxu1 %v1581_v41  ;;  %2258 = vmatpush1.msra.mxu0 %v1324_v42  ;;  %v719_v41 = vld [vmem:[#allocation7 + $0xfe8] sm:$0xff]  ;;  %v1237_v42 = vunpack.c.h.bf16 %v467_v34  ;;  %v1484_v50 = vunpack.c.l.bf16 %v591_v40 }
 0x15a   :  { %2329 = vmatpush1.msra.mxu1 %v1580_v43  ;;  %2259 = vmatprep.subr.mxu0 %v1317_v46  ;;  %v1493_v43 = vunpack.c.h.bf16 %v595_v35  ;;  %v587_v46 = vld [vmem:[#allocation7 + $0xbc8] sm:$0xff]  ;;  %v1740_v51 = vunpack.c.l.bf16 %v719_v41 }
 0x15b   :  { %2330 = vmatprep.subr.mxu1 %v1573_v47  ;;  %2260 = vmatpush1.msra.mxu0 %v1316_v48  ;;  %v715_v47 = vld [vmem:[#allocation7 + $0xfc8] sm:$0xff]  ;;  %v1485_v48 = vunpack.c.h.bf16 %v591_v40  ;;  %v1476_v56 = vunpack.c.l.bf16 %v587_v46 }
 0x15c   :  { %2331 = vmatpush1.msra.mxu1 %v1572_v49  ;;  %2261 = vmatprep.subr.mxu0 %v1309_v52  ;;  %v1741_v49 = vunpack.c.h.bf16 %v719_v41  ;;  %v583_v52 = vld [vmem:[#allocation7 + $0xba8] sm:$0xff]  ;;  %v1732_v57 = vunpack.c.l.bf16 %v715_v47 }
 0x15d   :  { %2332 = vmatprep.subr.mxu1 %v1565_v53  ;;  %2262 = vmatpush1.msra.mxu0 %v1308_v54  ;;  %v711_v53 = vld [vmem:[#allocation7 + $0xfa8] sm:$0xff]  ;;  %v1477_v54 = vunpack.c.h.bf16 %v587_v46  ;;  %v1468_v62 = vunpack.c.l.bf16 %v583_v52 }
 0x15e   :  { %2333 = vmatpush1.msra.mxu1 %v1564_v55  ;;  %2263 = vmatprep.subr.mxu0 %v1301_v58  ;;  %v1733_v55 = vunpack.c.h.bf16 %v715_v47  ;;  %v579_v58 = vld [vmem:[#allocation7 + $0xb88] sm:$0xff]  ;;  %v1724_v63 = vunpack.c.l.bf16 %v711_v53 }
 0x15f   :  { %2334 = vmatprep.subr.mxu1 %v1557_v59  ;;  %2264 = vmatpush1.msra.mxu0 %v1300_v60  ;;  %v707_v59 = vld [vmem:[#allocation7 + $0xf88] sm:$0xff]  ;;  %v1469_v60 = vunpack.c.h.bf16 %v583_v52  ;;  %v1460_v4 = vunpack.c.l.bf16 %v579_v58 }
 0x160   :  { %2335 = vmatpush1.msra.mxu1 %v1556_v61  ;;  %2265 = vmatprep.subr.mxu0 %v1293_v0  ;;  %v1725_v61 = vunpack.c.h.bf16 %v711_v53  ;;  %v575_v0 = vld [vmem:[#allocation7 + $0xb68] sm:$0xff]  ;;  %v1716_v5 = vunpack.c.l.bf16 %v707_v59 }
 0x161   :  { %2336 = vmatprep.subr.mxu1 %v1549_v1  ;;  %2266 = vmatpush1.msra.mxu0 %v1292_v2  ;;  %v703_v1 = vld [vmem:[#allocation7 + $0xf68] sm:$0xff]  ;;  %v1461_v2 = vunpack.c.h.bf16 %v579_v58  ;;  %v1452_v10 = vunpack.c.l.bf16 %v575_v0 }
 0x162   :  { %2337 = vmatpush1.msra.mxu1 %v1548_v3  ;;  %2267 = vmatprep.subr.mxu0 %v1285_v6  ;;  %v1717_v3 = vunpack.c.h.bf16 %v707_v59  ;;  %v571_v6 = vld [vmem:[#allocation7 + $0xb48] sm:$0xff]  ;;  %v1708_v11 = vunpack.c.l.bf16 %v703_v1 }
 0x163   :  { %2338 = vmatprep.subr.mxu1 %v1541_v7  ;;  %2268 = vmatpush1.msra.mxu0 %v1284_v8  ;;  %v699_v7 = vld [vmem:[#allocation7 + $0xf48] sm:$0xff]  ;;  %v1453_v8 = vunpack.c.h.bf16 %v575_v0  ;;  %v1444_v16 = vunpack.c.l.bf16 %v571_v6 }
 0x164   :  { %2339 = vmatpush1.msra.mxu1 %v1540_v9  ;;  %2269 = vmatprep.subr.mxu0 %v1277_v12  ;;  %v1709_v9 = vunpack.c.h.bf16 %v703_v1  ;;  %v567_v12 = vld [vmem:[#allocation7 + $0xb28] sm:$0xff]  ;;  %v1700_v17 = vunpack.c.l.bf16 %v699_v7 }
 0x165   :  { %2340 = vmatprep.subr.mxu1 %v1533_v13  ;;  %2270 = vmatpush1.msra.mxu0 %v1276_v14  ;;  %v695_v13 = vld [vmem:[#allocation7 + $0xf28] sm:$0xff]  ;;  %v1445_v14 = vunpack.c.h.bf16 %v571_v6  ;;  %v1436_v23 = vunpack.c.l.bf16 %v567_v12 }
 0x166   :  { %2341 = vmatpush1.msra.mxu1 %v1532_v15  ;;  %2271 = vmatprep.subr.mxu0 %v1269_v18  ;;  %v1701_v15 = vunpack.c.h.bf16 %v699_v7  ;;  %v563_v18 = vld [vmem:[#allocation7 + $0xb08] sm:$0xff]  ;;  %v1693_v22 = vunpack.c.h.bf16 %v695_v13 }
 0x167   :  { %2342 = vmatprep.subr.mxu1 %v1525_v19  ;;  %2272 = vmatpush1.msra.mxu0 %v1268_v20  ;;  %v691_v19 = vld [vmem:[#allocation7 + $0xf08] sm:$0xff]  ;;  %v1751_v20 = vlaneseq  ;;  %v1428_v29 = vunpack.c.l.bf16 %v563_v18 }
 0x168   :  { %2343 = vmatpush1.msra.mxu1 %v1524_v21  ;;  %2273 = vmatprep.subr.mxu0 %v1261_v24  ;;  %v1437_v21 = vunpack.c.h.bf16 %v567_v12  ;;  %v1692_v24 = vunpack.c.l.bf16 %v695_v13  ;;  %v1685_v28 = vunpack.c.h.bf16 %v691_v19  ;;  %v679_v40 = vld [vmem:[#allocation7 + $0xea8] sm:$0xff] }
 0x169   :  { %2344 = vmatprep.subr.mxu1 %v1517_v25  ;;  %2274 = vmatpush1.msra.mxu0 %v1260_v26  ;;  %v559_v25 = vld [vmem:[#allocation7 + $0xae8] sm:$0xff]  ;;  %v1660_v52 = vunpack.c.l.bf16 %v679_v40 }
 0x16a   :  { %2345 = vmatpush1.msra.mxu1 %v1516_v27  ;;  %2275 = vmatprep.subr.mxu0 %v1253_v30  ;;  %v687_v26 = vld [vmem:[#allocation7 + $0xee8] sm:$0xff]  ;;  %v1429_v27 = vunpack.c.h.bf16 %v563_v18  ;;  %v1684_v30 = vunpack.c.l.bf16 %v691_v19  ;;  %v1421_v34 = vunpack.c.h.bf16 %v559_v25  ;;  %v272_v18 = vld [vmem:[#allocation7 + $0x1f0] sm:$0xff] }
 0x16b   :  { %2346 = vmatprep.subr.mxu1 %v1509_v31  ;;  %2276 = vmatpush1.msra.mxu0 %v1252_v32  ;;  %v555_v31 = vld [vmem:[#allocation7 + $0xac8] sm:$0xff]  ;;  %v1677_v35 = vunpack.c.h.bf16 %v687_v26 }
 0x16c   :  { %2347 = vmatpush1.msra.mxu1 %v1508_v33  ;;  %2277 = vmatprep.subr.mxu0 %v1245_v36  ;;  %v683_v32 = vld [vmem:[#allocation7 + $0xec8] sm:$0xff]  ;;  %v6611_v33 = vshrl.u32 %v1751_v20, 7  ;;  %v1746_v36 = vld [vmem:[#allocation8] sm:$0xff]  ;;  %v1413_v41 = vunpack.c.h.bf16 %v555_v31 }
 0x16d   :  { %2348 = vmatprep.subr.mxu1 %v1501_v37  ;;  %2278 = vmatpush1.msra.mxu0 %v1244_v38  ;;  %v1420_v37 = vunpack.c.l.bf16 %v559_v25  ;;  %v1676_v38 = vunpack.c.l.bf16 %v687_v26  ;;  %v675_v46 = vld [vmem:[#allocation7 + $0xe88] sm:$0xff]  ;;  %v6613_v47 = vunpack.c.l.bf16 %v1746_v36  ;;  %v268_v26 = vld [vmem:[#allocation7 + $0x1d0] sm:$0xff] }
 0x16e   :  { %2349 = vmatpush1.msra.mxu1 %v1500_v39  ;;  %2279 = vmatprep.subr.mxu0 %v1237_v42  ;;  %v551_v39 = vld [vmem:[#allocation7 + $0xaa8] sm:$0xff]  ;;  %v1669_v42 = vunpack.c.h.bf16 %v683_v32  ;;  %v1652_v58 = vunpack.c.l.bf16 %v675_v46  ;;  %v839_v36 = vunpack.c.h.bf16 %v268_v26 }
 0x16f   :  { %2350 = vmatprep.subr.mxu1 %v1493_v43  ;;  %2280 = vmatpush1.msra.mxu0 %v1236_v44  ;;  %v1412_v43 = vunpack.c.l.bf16 %v555_v31  ;;  %v1668_v44 = vunpack.c.l.bf16 %v683_v32  ;;  %v543_v53 = vld [vmem:[#allocation7 + $0xa68] sm:$0xff]  ;;  %v264_v32 = vld [vmem:[#allocation7 + $0x1b0] sm:$0xff] }
 0x170   :  { %2351 = vmatpush1.msra.mxu1 %v1492_v45  ;;  %2281 = vmatprep.subr.mxu0 %v1485_v48  ;;  %v547_v45 = vld [vmem:[#allocation7 + $0xa88] sm:$0xff]  ;;  %v6616_v48 = vsub.s32 0, %v6611_v33  ;;  %v1388_v0 = vunpack.c.l.bf16 %v543_v53 }
 0x171   :  { %2352 = vmatprep.subr.mxu1 %v1741_v49  ;;  %2282 = vmatpush2.msra.mxu0 %v1484_v50  ;;  %v1405_v49 = vunpack.c.h.bf16 %v551_v39  ;;  %v1661_v50 = vunpack.c.h.bf16 %v679_v40  ;;  %v539_v59 = vld [vmem:[#allocation7 + $0xa48] sm:$0xff] }
 0x172   :  { %2353 = vmatpush2.msra.mxu1 %v1740_v51  ;;  %2283 = vmatprep.subr.mxu0 %v1477_v54  ;;  %7272 = vst [vmem:[#allocation28_spill] sm:$0xff] %v6616_v48  ;;  %v1404_v51 = vunpack.c.l.bf16 %v551_v39  ;;  %v671_v54 = vld [vmem:[#allocation7 + $0xe68] sm:$0xff]  ;;  %v1380_v6 = vunpack.c.l.bf16 %v539_v59  ;;  %v838_v39 = vunpack.c.l.bf16 %v268_v26 }
 0x173   :  { %2354 = vmatprep.subr.mxu1 %v1733_v55  ;;  %2284 = vmatpush2.msra.mxu0 %v1476_v56  ;;  %v1397_v55 = vunpack.c.h.bf16 %v547_v45  ;;  %v1653_v56 = vunpack.c.h.bf16 %v675_v46  ;;  %v1644_v1 = vunpack.c.l.bf16 %v671_v54  ;;  %v830_v46 = vunpack.c.l.bf16 %v264_v32 }
 0x174   :  { %2355 = vmatpush2.msra.mxu1 %v1732_v57  ;;  %2285 = vmatprep.subr.mxu0 %v1469_v60  ;;  %v1396_v57 = vunpack.c.l.bf16 %v547_v45  ;;  %v667_v60 = vld [vmem:[#allocation7 + $0xe48] sm:$0xff] }
 0x175   :  { %2356 = vmatprep.subr.mxu1 %v1725_v61  ;;  %2286 = vmatpush2.msra.mxu0 %v1468_v62  ;;  %v1754_v61 = vrot.slane %v6613_v47, %v6616_v48  ;;  %v1389_v62 = vunpack.c.h.bf16 %v543_v53  ;;  %v1636_v7 = vunpack.c.l.bf16 %v667_v60 }
 0x176   :  { %2357 = vmatpush2.msra.mxu1 %v1724_v63  ;;  %2287 = vmatprep.subr.mxu0 %v1461_v2  ;;  %v1645_v63 = vunpack.c.h.bf16 %v671_v54  ;;  %v535_v2 = vld [vmem:[#allocation7 + $0xa28] sm:$0xff] }
 0x177   :  { %2358 = vmatprep.subr.mxu1 %v1717_v3  ;;  %2288 = vmatpush2.msra.mxu0 %v1460_v4  ;;  %v663_v3 = vld [vmem:[#allocation7 + $0xe28] sm:$0xff]  ;;  %v1381_v4 = vunpack.c.h.bf16 %v539_v59  ;;  %v1372_v13 = vunpack.c.l.bf16 %v535_v2 }
 0x178   :  { %2359 = vmatpush2.msra.mxu1 %v1716_v5  ;;  %2289 = vmatprep.subr.mxu0 %v1453_v8  ;;  %v1637_v5 = vunpack.c.h.bf16 %v667_v60  ;;  %v531_v8 = vld [vmem:[#allocation7 + $0xa08] sm:$0xff]  ;;  %v1629_v12 = vunpack.c.h.bf16 %v663_v3 }
 0x179   :  { %2360 = vmatprep.subr.mxu1 %v1709_v9  ;;  %2290 = vmatpush2.msra.mxu0 %v1452_v10  ;;  %v659_v9 = vld [vmem:[#allocation7 + $0xe08] sm:$0xff]  ;;  %v1794_v10 = vrot.slane %v1754_v61, %v6616_v48  ;;  %v1364_v19 = vunpack.c.l.bf16 %v531_v8 }
 0x17a   :  { %2361 = vmatpush2.msra.mxu1 %v1708_v11  ;;  %2291 = vmatprep.subr.mxu0 %v1445_v14  ;;  %v1373_v11 = vunpack.c.h.bf16 %v535_v2  ;;  %v1628_v14 = vunpack.c.l.bf16 %v663_v3 }
 0x17b   :  { %2362 = vmatprep.subr.mxu1 %v1701_v15  ;;  %2292 = vmatpush2.msra.mxu0 %v1444_v16  ;;  %v1365_v15 = vunpack.c.h.bf16 %v531_v8  ;;  %v1621_v16 = vunpack.c.h.bf16 %v659_v9 }
 0x17c   :  { %2363 = vmatpush2.msra.mxu1 %v1700_v17  ;;  %2293 = vmatprep.subr.mxu0 %v1437_v21  ;;  %v400_v21 = vld [vmem:[#allocation7 + $0x5f0] sm:$0xff] }
 0x17d   :  { %2364 = vmatprep.subr.mxu1 %v1693_v22  ;;  %2294 = vmatpush2.msra.mxu0 %v1436_v23  ;;  %v1620_v22 = vunpack.c.l.bf16 %v659_v9  ;;  %v1102_v31 = vunpack.c.l.bf16 %v400_v21 }
 0x17e   :  { %2365 = vmatpush2.msra.mxu1 %v1692_v24  ;;  %2295 = vmatprep.subr.mxu0 %v1429_v27  ;;  %v847_v24 = vunpack.c.h.bf16 %v272_v18  ;;  %v396_v27 = vld [vmem:[#allocation7 + $0x5d0] sm:$0xff] }
 0x17f   :  { %2366 = vmatprep.subr.mxu1 %v1685_v28  ;;  %2296 = vmatpush2.msra.mxu0 %v1428_v29  ;;  %v1103_v28 = vunpack.c.h.bf16 %v400_v21  ;;  %v6216_v29 = vld [vmem:[#allocation5 + $0x28] sm:$0xff]  ;;  %v1094_v40 = vunpack.c.l.bf16 %v396_v27 }
 0x180   :  { %2367 = vmatpush2.msra.mxu1 %v1684_v30  ;;  %2297 = vmatprep.subr.mxu0 %v1421_v34  ;;  %v846_v30 = vunpack.c.l.bf16 %v272_v18  ;;  %v392_v34 = vld [vmem:[#allocation7 + $0x5b0] sm:$0xff] }
 0x181   :  { %2368 = vmatprep.subr.mxu1 %v1677_v35  ;;  %2298 = vmatpush2.msra.mxu0 %v1420_v37  ;;  %v6217_v35 = vld [vmem:[#allocation5 + $0x20] sm:$0xff]  ;;  %v1095_v37 = vunpack.c.h.bf16 %v396_v27  ;;  %v1087_v45 = vunpack.c.h.bf16 %v392_v34 }
 0x182   :  { %2369 = vmatpush2.msra.mxu1 %v1676_v38  ;;  %2299 = vmatprep.subr.mxu0 %v1413_v41  ;;  %v6218_v38 = vld [vmem:[#allocation5 + $0x38] sm:$0xff]  ;;  %v260_v41 = vld [vmem:[#allocation7 + $0x190] sm:$0xff] }
 0x183   :  { %2370 = vmatprep.subr.mxu1 %v1669_v42  ;;  %2300 = vmatpush2.msra.mxu0 %v1412_v43  ;;  %v388_v42 = vld [vmem:[#allocation7 + $0x590] sm:$0xff]  ;;  %v822_v54 = vunpack.c.l.bf16 %v260_v41 }
 0x184   :  { %2371 = vmatpush2.msra.mxu1 %v1668_v44  ;;  %2301 = vmatprep.subr.mxu0 %v1405_v49  ;;  %v6219_v43 = vld [vmem:[#allocation5 + $0x30] sm:$0xff]  ;;  %v831_v44 = vunpack.c.h.bf16 %v264_v32  ;;  %v1086_v49 = vunpack.c.l.bf16 %v392_v34  ;;  %v1079_v53 = vunpack.c.h.bf16 %v388_v42 }
 0x185   :  { %2372 = vmatprep.subr.mxu1 %v1661_v50  ;;  %2302 = vmatpush2.msra.mxu0 %v1404_v51  ;;  %v256_v50 = vld [vmem:[#allocation7 + $0x170] sm:$0xff] }
 0x186   :  { %2373 = vmatpush2.msra.mxu1 %v1660_v52  ;;  %2303 = vmatprep.subr.mxu0 %v1397_v55  ;;  %v384_v51 = vld [vmem:[#allocation7 + $0x570] sm:$0xff]  ;;  %v823_v52 = vunpack.c.h.bf16 %v260_v41  ;;  %v1078_v55 = vunpack.c.l.bf16 %v388_v42  ;;  %v814_v60 = vunpack.c.l.bf16 %v256_v50 }
 0x187   :  { %2374 = vmatprep.subr.mxu1 %v1653_v56  ;;  %2304 = vmatpush2.msra.mxu0 %v1396_v57  ;;  %v252_v56 = vld [vmem:[#allocation7 + $0x150] sm:$0xff]  ;;  %v1071_v59 = vunpack.c.h.bf16 %v384_v51  ;;  %v1070_v61 = vunpack.c.l.bf16 %v384_v51 }
 0x188   :  { %2375 = vmatpush2.msra.mxu1 %v1652_v58  ;;  %2305 = vmatprep.subr.mxu0 %v1389_v62  ;;  %v380_v57 = vld [vmem:[#allocation7 + $0x550] sm:$0xff]  ;;  %v815_v58 = vunpack.c.h.bf16 %v256_v50  ;;  %v806_v2 = vunpack.c.l.bf16 %v252_v56 }
 0x189   :  { %2376 = vmatprep.subr.mxu1 %v1645_v63  ;;  %2306 = vmatpush2.msra.mxu0 %v1388_v0  ;;  %v248_v62 = vld [vmem:[#allocation7 + $0x130] sm:$0xff]  ;;  %v807_v0 = vunpack.c.h.bf16 %v252_v56  ;;  %v1062_v3 = vunpack.c.l.bf16 %v380_v57 }
 0x18a   :  { %2377 = vmatpush2.msra.mxu1 %v1644_v1  ;;  %2307 = vmatprep.subr.mxu0 %v1381_v4  ;;  %v376_v63 = vld [vmem:[#allocation7 + $0x530] sm:$0xff]  ;;  %v1063_v1 = vunpack.c.h.bf16 %v380_v57  ;;  %v798_v8 = vunpack.c.l.bf16 %v248_v62 }
 0x18b   :  { %2378 = vmatprep.subr.mxu1 %v1637_v5  ;;  %v1889_v17 = vpop.f32.mrf.mxu0  ;;  %2308 = vmatpush2.msra.mxu0 %v1380_v6  ;;  %v244_v4 = vld [vmem:[#allocation7 + $0x110] sm:$0xff]  ;;  %v799_v6 = vunpack.c.h.bf16 %v248_v62  ;;  %v1054_v9 = vunpack.c.l.bf16 %v376_v63 }
 0x18c   :  { %2379 = vmatpush2.msra.mxu1 %v1636_v7  ;;  %v1890_v20 = vadd.f32 %v1889_v17, %v1794_v10  ;;  %2309 = vmatprep.subr.mxu0 %v1373_v11  ;;  %v372_v5 = vld [vmem:[#allocation7 + $0x510] sm:$0xff]  ;;  %v1055_v7 = vunpack.c.h.bf16 %v376_v63 }
 0x18d   :  { %2380 = vmatprep.subr.mxu1 %v1629_v12  ;;  %v1960_v23 = vpop.f32.mrf.mxu1  ;;  %2310 = vmatpush2.msra.mxu0 %v1372_v13  ;;  %v240_v10 = vld [vmem:[#allocation7 + $0xf0] sm:$0xff]  ;;  %v791_v12 = vunpack.c.h.bf16 %v244_v4  ;;  %v1047_v13 = vunpack.c.h.bf16 %v372_v5 }
 0x18e   :  { %2381 = vmatpush2.msra.mxu1 %v1628_v14  ;;  %v6621_v25 = vadd.f32 %v1960_v23, %v1890_v20  ;;  %2311 = vmatprep.subr.mxu0 %v1365_v15  ;;  %v368_v11 = vld [vmem:[#allocation7 + $0x4f0] sm:$0xff]  ;;  %v790_v14 = vunpack.c.l.bf16 %v244_v4  ;;  %v1046_v15 = vunpack.c.l.bf16 %v372_v5  ;;  %v783_v18 = vunpack.c.h.bf16 %v240_v10 }
 0x18f   :  { %2382 = vmatprep.subr.mxu1 %v1621_v16  ;;  %2312 = vmatpush2.msra.mxu0 %v1364_v19  ;;  %v236_v16 = vld [vmem:[#allocation7 + $0xd0] sm:$0xff]  ;;  %v1039_v19 = vunpack.c.h.bf16 %v368_v11  ;;  %v782_v20 = vunpack.c.l.bf16 %v240_v10  ;;  %v1038_v21 = vunpack.c.l.bf16 %v368_v11 }
 0x190   :  { %2313 = vmatprep.mubr.f32.mxu0 %v6216_v29  ;;  %2383 = vmatpush2.msra.mxu1 %v1620_v22  ;;  %v364_v17 = vld [vmem:[#allocation7 + $0x4d0] sm:$0xff]  ;;  %v774_v27 = vunpack.c.l.bf16 %v236_v16 }
 0x191   :  { %2314 = vmatmul.mubr.f32.vlgmr.msra.gmra.mxu0 %v6217_v35  ;;  %2384 = vmatprep.mubr.f32.mxu1 %v6218_v38  ;;  %v232_v22 = vld [vmem:[#allocation7 + $0xb0] sm:$0xff]  ;;  %v1031_v26 = vunpack.c.h.bf16 %v364_v17 }
 0x192   :  { %2391 = vmatprep.subr.mxu0 %v847_v24  ;;  %2462 = vmatprep.subr.mxu1 %v1103_v28  ;;  %v360_v23 = vld [vmem:[#allocation7 + $0x4b0] sm:$0xff]  ;;  %v775_v24 = vunpack.c.h.bf16 %v236_v16  ;;  %v1030_v28 = vunpack.c.l.bf16 %v364_v17  ;;  %v766_v34 = vunpack.c.l.bf16 %v232_v22 }
 0x193   :  { %2385 = vmatmul.mubr.f32.vlgmr.msra.gmra.mxu1 %v6219_v43  ;;  %2392 = vmatpush1.msra.mxu0 %v846_v30  ;;  %v228_v29 = vld [vmem:[#allocation7 + $0x90] sm:$0xff]  ;;  %v1023_v32 = vunpack.c.h.bf16 %v360_v23  ;;  %v1022_v35 = vunpack.c.l.bf16 %v360_v23 }
 0x194   :  { %2463 = vmatpush1.msra.mxu1 %v1102_v31  ;;  %2393 = vmatprep.subr.mxu0 %v839_v36  ;;  %v356_v30 = vld [vmem:[#allocation7 + $0x490] sm:$0xff]  ;;  %v767_v31 = vunpack.c.h.bf16 %v232_v22  ;;  %v759_v38 = vunpack.c.h.bf16 %v228_v29 }
 0x195   :  { %2464 = vmatprep.subr.mxu1 %v1095_v37  ;;  %2394 = vmatpush1.msra.mxu0 %v838_v39  ;;  %v224_v36 = vld [vmem:[#allocation7 + $0x70] sm:$0xff]  ;;  %v1015_v39 = vunpack.c.h.bf16 %v356_v30  ;;  %v1014_v41 = vunpack.c.l.bf16 %v356_v30 }
 0x196   :  { %2465 = vmatpush1.msra.mxu1 %v1094_v40  ;;  %2395 = vmatprep.subr.mxu0 %v831_v44  ;;  %v352_v37 = vld [vmem:[#allocation7 + $0x470] sm:$0xff]  ;;  %v758_v40 = vunpack.c.l.bf16 %v228_v29  ;;  %v751_v44 = vunpack.c.h.bf16 %v224_v36 }
 0x197   :  { %2466 = vmatprep.subr.mxu1 %v1087_v45  ;;  %2396 = vmatpush1.msra.mxu0 %v830_v46  ;;  %v220_v42 = vld [vmem:[#allocation7 + $0x50] sm:$0xff]  ;;  %v1007_v45 = vunpack.c.h.bf16 %v352_v37  ;;  %v750_v46 = vunpack.c.l.bf16 %v224_v36 }
 0x198   :  { %2467 = vmatpush1.msra.mxu1 %v1086_v49  ;;  %2397 = vmatprep.subr.mxu0 %v823_v52  ;;  %v348_v43 = vld [vmem:[#allocation7 + $0x450] sm:$0xff]  ;;  %v1006_v49 = vunpack.c.l.bf16 %v352_v37  ;;  %v743_v52 = vunpack.c.h.bf16 %v220_v42 }
 0x199   :  { %2468 = vmatprep.subr.mxu1 %v1079_v53  ;;  %2398 = vmatpush1.msra.mxu0 %v822_v54  ;;  %v216_v50 = vld [vmem:[#allocation7 + $0x30] sm:$0xff]  ;;  %v999_v53 = vunpack.c.h.bf16 %v348_v43  ;;  %v742_v54 = vunpack.c.l.bf16 %v220_v42 }
 0x19a   :  { %2469 = vmatpush1.msra.mxu1 %v1078_v55  ;;  %2399 = vmatprep.subr.mxu0 %v815_v58  ;;  %v344_v51 = vld [vmem:[#allocation7 + $0x430] sm:$0xff]  ;;  %v998_v55 = vunpack.c.l.bf16 %v348_v43  ;;  %v735_v58 = vunpack.c.h.bf16 %v216_v50 }
 0x19b   :  { %2470 = vmatprep.subr.mxu1 %v1071_v59  ;;  %2400 = vmatpush1.msra.mxu0 %v814_v60  ;;  %v212_v56 = vld [vmem:[#allocation7 + $0x10] sm:$0xff]  ;;  %v991_v59 = vunpack.c.h.bf16 %v344_v51  ;;  %v734_v60 = vunpack.c.l.bf16 %v216_v50 }
 0x19c   :  { %2471 = vmatpush1.msra.mxu1 %v1070_v61  ;;  %2401 = vmatprep.subr.mxu0 %v807_v0  ;;  %v340_v57 = vld [vmem:[#allocation7 + $0x410] sm:$0xff]  ;;  %v990_v61 = vunpack.c.l.bf16 %v344_v51  ;;  %v727_v0 = vunpack.c.h.bf16 %v212_v56 }
 0x19d   :  { %2472 = vmatprep.subr.mxu1 %v1063_v1  ;;  %2402 = vmatpush1.msra.mxu0 %v806_v2  ;;  %v336_v62 = vld [vmem:[#allocation7 + $0x3f0] sm:$0xff]  ;;  %v983_v1 = vunpack.c.h.bf16 %v340_v57  ;;  %v726_v2 = vunpack.c.l.bf16 %v212_v56 }
 0x19e   :  { %2473 = vmatpush1.msra.mxu1 %v1062_v3  ;;  %2403 = vmatprep.subr.mxu0 %v799_v6  ;;  %v464_v63 = vld [vmem:[#allocation7 + $0x7f0] sm:$0xff]  ;;  %v982_v3 = vunpack.c.l.bf16 %v340_v57  ;;  %v975_v6 = vunpack.c.h.bf16 %v336_v62 }
 0x19f   :  { %2474 = vmatprep.subr.mxu1 %v1055_v7  ;;  %2404 = vmatpush1.msra.mxu0 %v798_v8  ;;  %v332_v4 = vld [vmem:[#allocation7 + $0x3d0] sm:$0xff]  ;;  %v1231_v7 = vunpack.c.h.bf16 %v464_v63  ;;  %v974_v8 = vunpack.c.l.bf16 %v336_v62 }
 0x1a0   :  { %2475 = vmatpush1.msra.mxu1 %v1054_v9  ;;  %2405 = vmatprep.subr.mxu0 %v791_v12  ;;  %v460_v5 = vld [vmem:[#allocation7 + $0x7d0] sm:$0xff]  ;;  %v1230_v9 = vunpack.c.l.bf16 %v464_v63  ;;  %v967_v12 = vunpack.c.h.bf16 %v332_v4 }
 0x1a1   :  { %2476 = vmatprep.subr.mxu1 %v1047_v13  ;;  %2406 = vmatpush1.msra.mxu0 %v790_v14  ;;  %v328_v10 = vld [vmem:[#allocation7 + $0x3b0] sm:$0xff]  ;;  %v1223_v13 = vunpack.c.h.bf16 %v460_v5  ;;  %v966_v14 = vunpack.c.l.bf16 %v332_v4 }
 0x1a2   :  { %2477 = vmatpush1.msra.mxu1 %v1046_v15  ;;  %2407 = vmatprep.subr.mxu0 %v783_v18  ;;  %v456_v11 = vld [vmem:[#allocation7 + $0x7b0] sm:$0xff]  ;;  %v1222_v15 = vunpack.c.l.bf16 %v460_v5  ;;  %v959_v18 = vunpack.c.h.bf16 %v328_v10 }
 0x1a3   :  { %2478 = vmatprep.subr.mxu1 %v1039_v19  ;;  %2408 = vmatpush1.msra.mxu0 %v782_v20  ;;  %v324_v16 = vld [vmem:[#allocation7 + $0x390] sm:$0xff]  ;;  %v1215_v19 = vunpack.c.h.bf16 %v456_v11  ;;  %v958_v20 = vunpack.c.l.bf16 %v328_v10 }
 0x1a4   :  { %2479 = vmatpush1.msra.mxu1 %v1038_v21  ;;  %2409 = vmatprep.subr.mxu0 %v775_v24  ;;  %v452_v17 = vld [vmem:[#allocation7 + $0x790] sm:$0xff]  ;;  %v1214_v21 = vunpack.c.l.bf16 %v456_v11  ;;  %v951_v24 = vunpack.c.h.bf16 %v324_v16 }
 0x1a5   :  { %2480 = vmatprep.subr.mxu1 %v1031_v26  ;;  %2410 = vmatpush1.msra.mxu0 %v774_v27  ;;  %v320_v22 = vld [vmem:[#allocation7 + $0x370] sm:$0xff]  ;;  %v1207_v26 = vunpack.c.h.bf16 %v452_v17  ;;  %v950_v27 = vunpack.c.l.bf16 %v324_v16 }
 0x1a6   :  { %2481 = vmatpush1.msra.mxu1 %v1030_v28  ;;  %2411 = vmatprep.subr.mxu0 %v767_v31  ;;  %v448_v23 = vld [vmem:[#allocation7 + $0x770] sm:$0xff]  ;;  %v1206_v28 = vunpack.c.l.bf16 %v452_v17  ;;  %v943_v31 = vunpack.c.h.bf16 %v320_v22 }
 0x1a7   :  { %2482 = vmatprep.subr.mxu1 %v1023_v32  ;;  %2412 = vmatpush1.msra.mxu0 %v766_v34  ;;  %v316_v29 = vld [vmem:[#allocation7 + $0x350] sm:$0xff]  ;;  %v1199_v32 = vunpack.c.h.bf16 %v448_v23  ;;  %v942_v34 = vunpack.c.l.bf16 %v320_v22 }
 0x1a8   :  { %2483 = vmatpush1.msra.mxu1 %v1022_v35  ;;  %2413 = vmatprep.subr.mxu0 %v759_v38  ;;  %v444_v30 = vld [vmem:[#allocation7 + $0x750] sm:$0xff]  ;;  %v1198_v35 = vunpack.c.l.bf16 %v448_v23  ;;  %v935_v38 = vunpack.c.h.bf16 %v316_v29 }
 0x1a9   :  { %2484 = vmatprep.subr.mxu1 %v1015_v39  ;;  %2414 = vmatpush1.msra.mxu0 %v758_v40  ;;  %v312_v36 = vld [vmem:[#allocation7 + $0x330] sm:$0xff]  ;;  %v1191_v39 = vunpack.c.h.bf16 %v444_v30  ;;  %v934_v40 = vunpack.c.l.bf16 %v316_v29 }
 0x1aa   :  { %2485 = vmatpush1.msra.mxu1 %v1014_v41  ;;  %2415 = vmatprep.subr.mxu0 %v751_v44  ;;  %v440_v37 = vld [vmem:[#allocation7 + $0x730] sm:$0xff]  ;;  %v1190_v41 = vunpack.c.l.bf16 %v444_v30  ;;  %v927_v44 = vunpack.c.h.bf16 %v312_v36 }
 0x1ab   :  { %2486 = vmatprep.subr.mxu1 %v1007_v45  ;;  %2416 = vmatpush1.msra.mxu0 %v750_v46  ;;  %v308_v42 = vld [vmem:[#allocation7 + $0x310] sm:$0xff]  ;;  %v1183_v45 = vunpack.c.h.bf16 %v440_v37  ;;  %v926_v46 = vunpack.c.l.bf16 %v312_v36 }
 0x1ac   :  { %2487 = vmatpush1.msra.mxu1 %v1006_v49  ;;  %2417 = vmatprep.subr.mxu0 %v743_v52  ;;  %v436_v43 = vld [vmem:[#allocation7 + $0x710] sm:$0xff]  ;;  %v1182_v49 = vunpack.c.l.bf16 %v440_v37  ;;  %v919_v52 = vunpack.c.h.bf16 %v308_v42  ;;  %v6625_v37 = vpop.f32.mrf.mxu1 }
 0x1ad   :  { %2488 = vmatprep.subr.mxu1 %v999_v53  ;;  %2418 = vmatpush1.msra.mxu0 %v742_v54  ;;  %v304_v50 = vld [vmem:[#allocation7 + $0x2f0] sm:$0xff]  ;;  %v1175_v53 = vunpack.c.h.bf16 %v436_v43  ;;  %v918_v54 = vunpack.c.l.bf16 %v308_v42 }
 0x1ae   :  { %2489 = vmatpush1.msra.mxu1 %v998_v55  ;;  %2419 = vmatprep.subr.mxu0 %v735_v58  ;;  %v432_v51 = vld [vmem:[#allocation7 + $0x6f0] sm:$0xff]  ;;  %v1174_v55 = vunpack.c.l.bf16 %v436_v43  ;;  %v911_v58 = vunpack.c.h.bf16 %v304_v50 }
 0x1af   :  { %2490 = vmatprep.subr.mxu1 %v991_v59  ;;  %2420 = vmatpush1.msra.mxu0 %v734_v60  ;;  %v300_v56 = vld [vmem:[#allocation7 + $0x2d0] sm:$0xff]  ;;  %v1167_v59 = vunpack.c.h.bf16 %v432_v51  ;;  %v910_v60 = vunpack.c.l.bf16 %v304_v50 }
 0x1b0   :  { %2491 = vmatpush1.msra.mxu1 %v990_v61  ;;  %2421 = vmatprep.subr.mxu0 %v727_v0  ;;  %v428_v57 = vld [vmem:[#allocation7 + $0x6d0] sm:$0xff]  ;;  %v1166_v61 = vunpack.c.l.bf16 %v432_v51  ;;  %v903_v0 = vunpack.c.h.bf16 %v300_v56 }
 0x1b1   :  { %2492 = vmatprep.subr.mxu1 %v983_v1  ;;  %2422 = vmatpush1.msra.mxu0 %v726_v2  ;;  %v296_v62 = vld [vmem:[#allocation7 + $0x2b0] sm:$0xff]  ;;  %v1159_v1 = vunpack.c.h.bf16 %v428_v57  ;;  %v902_v2 = vunpack.c.l.bf16 %v300_v56 }
 0x1b2   :  { %2493 = vmatpush1.msra.mxu1 %v982_v3  ;;  %2423 = vmatprep.subr.mxu0 %v975_v6  ;;  %v424_v63 = vld [vmem:[#allocation7 + $0x6b0] sm:$0xff]  ;;  %v1158_v3 = vunpack.c.l.bf16 %v428_v57  ;;  %v895_v6 = vunpack.c.h.bf16 %v296_v62 }
 0x1b3   :  { %2494 = vmatprep.subr.mxu1 %v1231_v7  ;;  %2424 = vmatpush2.msra.mxu0 %v974_v8  ;;  %v292_v4 = vld [vmem:[#allocation7 + $0x290] sm:$0xff]  ;;  %v1151_v7 = vunpack.c.h.bf16 %v424_v63  ;;  %v894_v8 = vunpack.c.l.bf16 %v296_v62 }
 0x1b4   :  { %2495 = vmatpush2.msra.mxu1 %v1230_v9  ;;  %2425 = vmatprep.subr.mxu0 %v967_v12  ;;  %v420_v5 = vld [vmem:[#allocation7 + $0x690] sm:$0xff]  ;;  %v1150_v9 = vunpack.c.l.bf16 %v424_v63  ;;  %v887_v12 = vunpack.c.h.bf16 %v292_v4 }
 0x1b5   :  { %2496 = vmatprep.subr.mxu1 %v1223_v13  ;;  %2426 = vmatpush2.msra.mxu0 %v966_v14  ;;  %v288_v10 = vld [vmem:[#allocation7 + $0x270] sm:$0xff]  ;;  %v1143_v13 = vunpack.c.h.bf16 %v420_v5  ;;  %v886_v14 = vunpack.c.l.bf16 %v292_v4 }
 0x1b6   :  { %2497 = vmatpush2.msra.mxu1 %v1222_v15  ;;  %2427 = vmatprep.subr.mxu0 %v959_v18  ;;  %v416_v11 = vld [vmem:[#allocation7 + $0x670] sm:$0xff]  ;;  %v1142_v15 = vunpack.c.l.bf16 %v420_v5  ;;  %v879_v18 = vunpack.c.h.bf16 %v288_v10 }
 0x1b7   :  { %2498 = vmatprep.subr.mxu1 %v1215_v19  ;;  %2428 = vmatpush2.msra.mxu0 %v958_v20  ;;  %v284_v16 = vld [vmem:[#allocation7 + $0x250] sm:$0xff]  ;;  %v1135_v19 = vunpack.c.h.bf16 %v416_v11  ;;  %v878_v20 = vunpack.c.l.bf16 %v288_v10 }
 0x1b8   :  { %2499 = vmatpush2.msra.mxu1 %v1214_v21  ;;  %2429 = vmatprep.subr.mxu0 %v951_v24  ;;  %v412_v17 = vld [vmem:[#allocation7 + $0x650] sm:$0xff]  ;;  %v1134_v21 = vunpack.c.l.bf16 %v416_v11  ;;  %v871_v24 = vunpack.c.h.bf16 %v284_v16 }
 0x1b9   :  { %2500 = vmatprep.subr.mxu1 %v1207_v26  ;;  %2430 = vmatpush2.msra.mxu0 %v950_v27  ;;  %v280_v22 = vld [vmem:[#allocation7 + $0x230] sm:$0xff]  ;;  %v1127_v26 = vunpack.c.h.bf16 %v412_v17  ;;  %v870_v27 = vunpack.c.l.bf16 %v284_v16 }
 0x1ba   :  { %2501 = vmatpush2.msra.mxu1 %v1206_v28  ;;  %2431 = vmatprep.subr.mxu0 %v943_v31  ;;  %v408_v23 = vld [vmem:[#allocation7 + $0x630] sm:$0xff]  ;;  %v1126_v28 = vunpack.c.l.bf16 %v412_v17  ;;  %v6623_v31 = vpop.f32.mrf.mxu0 }
 0x1bb   :  { %2502 = vmatprep.subr.mxu1 %v1199_v32  ;;  %2432 = vmatpush2.msra.mxu0 %v942_v34  ;;  %v276_v29 = vld [vmem:[#allocation7 + $0x210] sm:$0xff]  ;;  %v863_v32 = vunpack.c.h.bf16 %v280_v22  ;;  %v1119_v34 = vunpack.c.h.bf16 %v408_v23  ;;  %v1118_v36 = vunpack.c.l.bf16 %v408_v23 }
 0x1bc   :  { %2503 = vmatpush2.msra.mxu1 %v1198_v35  ;;  %2433 = vmatprep.subr.mxu0 %v935_v38  ;;  %v404_v30 = vld [vmem:[#allocation7 + $0x610] sm:$0xff]  ;;  %v862_v35 = vunpack.c.l.bf16 %v280_v22  ;;  %v855_v38 = vunpack.c.h.bf16 %v276_v29  ;;  %v854_v42 = vunpack.c.l.bf16 %v276_v29 }
 0x1bd   :  { %2504 = vmatprep.subr.mxu1 %v1191_v39  ;;  %2434 = vmatpush2.msra.mxu0 %v934_v40  ;;  %v1111_v39 = vunpack.c.h.bf16 %v404_v30  ;;  %v524_v51 = vld [vmem:[#allocation7 + $0x9d0] sm:$0xff] }
 0x1be   :  { %2505 = vmatpush2.msra.mxu1 %v1190_v41  ;;  %2435 = vmatprep.subr.mxu0 %v927_v44  ;;  %v528_v41 = vld [vmem:[#allocation7 + $0x9f0] sm:$0xff]  ;;  %v1350_v62 = vunpack.c.l.bf16 %v524_v51 }
 0x1bf   :  { %2506 = vmatprep.subr.mxu1 %v1183_v45  ;;  %2436 = vmatpush2.msra.mxu0 %v926_v46  ;;  %v656_v44 = vld [vmem:[#allocation7 + $0xdf0] sm:$0xff]  ;;  %v1110_v45 = vunpack.c.l.bf16 %v404_v30 }
 0x1c0   :  { %2507 = vmatpush2.msra.mxu1 %v1182_v49  ;;  %2437 = vmatprep.subr.mxu0 %v919_v52  ;;  %v1359_v49 = vunpack.c.h.bf16 %v528_v41  ;;  %v652_v52 = vld [vmem:[#allocation7 + $0xdd0] sm:$0xff] }
 0x1c1   :  { %2508 = vmatprep.subr.mxu1 %v1175_v53  ;;  %2438 = vmatpush2.msra.mxu0 %v918_v54  ;;  %v1615_v53 = vunpack.c.h.bf16 %v656_v44  ;;  %v6220_v54 = vld [vmem:[#allocation5 + $0x8] sm:$0xff]  ;;  %v520_v56 = vld [vmem:[#allocation7 + $0x9b0] sm:$0xff]  ;;  %v1606_v63 = vunpack.c.l.bf16 %v652_v52 }
 0x1c2   :  { %2509 = vmatpush2.msra.mxu1 %v1174_v55  ;;  %2439 = vmatprep.subr.mxu0 %v911_v58  ;;  %v1358_v55 = vunpack.c.l.bf16 %v528_v41  ;;  %v648_v57 = vld [vmem:[#allocation7 + $0xdb0] sm:$0xff]  ;;  %v6221_v58 = vld [vmem:[#allocation5] sm:$0xff]  ;;  %v1342_v5 = vunpack.c.l.bf16 %v520_v56 }
 0x1c3   :  { %2510 = vmatprep.subr.mxu1 %v1167_v59  ;;  %2440 = vmatpush2.msra.mxu0 %v910_v60  ;;  %v1351_v59 = vunpack.c.h.bf16 %v524_v51  ;;  %v1607_v60 = vunpack.c.h.bf16 %v652_v52  ;;  %v1599_v4 = vunpack.c.h.bf16 %v648_v57  ;;  %v492_v41 = vld [vmem:[#allocation7 + $0x8d0] sm:$0xff] }
 0x1c4   :  { %2511 = vmatpush2.msra.mxu1 %v1166_v61  ;;  %2441 = vmatprep.subr.mxu0 %v903_v0  ;;  %v6222_v61 = vld [vmem:[#allocation5 + $0x18] sm:$0xff]  ;;  %v516_v0 = vld [vmem:[#allocation7 + $0x990] sm:$0xff]  ;;  %v1287_v52 = vunpack.c.h.bf16 %v492_v41 }
 0x1c5   :  { %2512 = vmatprep.subr.mxu1 %v1159_v1  ;;  %2442 = vmatpush2.msra.mxu0 %v902_v2  ;;  %v644_v1 = vld [vmem:[#allocation7 + $0xd90] sm:$0xff]  ;;  %v1334_v11 = vunpack.c.l.bf16 %v516_v0 }
 0x1c6   :  { %2513 = vmatpush2.msra.mxu1 %v1158_v3  ;;  %2443 = vmatprep.subr.mxu0 %v895_v6  ;;  %v6223_v2 = vld [vmem:[#allocation5 + $0x10] sm:$0xff]  ;;  %v1343_v3 = vunpack.c.h.bf16 %v520_v56  ;;  %v1598_v6 = vunpack.c.l.bf16 %v648_v57  ;;  %v1591_v10 = vunpack.c.h.bf16 %v644_v1 }
 0x1c7   :  { %2514 = vmatprep.subr.mxu1 %v1151_v7  ;;  %2444 = vmatpush2.msra.mxu0 %v894_v8  ;;  %v512_v7 = vld [vmem:[#allocation7 + $0x970] sm:$0xff] }
 0x1c8   :  { %2515 = vmatpush2.msra.mxu1 %v1150_v9  ;;  %2445 = vmatprep.subr.mxu0 %v887_v12  ;;  %v640_v8 = vld [vmem:[#allocation7 + $0xd70] sm:$0xff]  ;;  %v1335_v9 = vunpack.c.h.bf16 %v516_v0  ;;  %v1590_v12 = vunpack.c.l.bf16 %v644_v1  ;;  %v1326_v17 = vunpack.c.l.bf16 %v512_v7 }
 0x1c9   :  { %2516 = vmatprep.subr.mxu1 %v1143_v13  ;;  %2446 = vmatpush2.msra.mxu0 %v886_v14  ;;  %v508_v13 = vld [vmem:[#allocation7 + $0x950] sm:$0xff]  ;;  %v1583_v16 = vunpack.c.h.bf16 %v640_v8 }
 0x1ca   :  { %2517 = vmatpush2.msra.mxu1 %v1142_v15  ;;  %2447 = vmatprep.subr.mxu0 %v879_v18  ;;  %v636_v14 = vld [vmem:[#allocation7 + $0xd50] sm:$0xff]  ;;  %v1327_v15 = vunpack.c.h.bf16 %v512_v7  ;;  %v1582_v18 = vunpack.c.l.bf16 %v640_v8  ;;  %v1318_v23 = vunpack.c.l.bf16 %v508_v13 }
 0x1cb   :  { %2518 = vmatprep.subr.mxu1 %v1135_v19  ;;  %2448 = vmatpush2.msra.mxu0 %v878_v20  ;;  %v504_v19 = vld [vmem:[#allocation7 + $0x930] sm:$0xff]  ;;  %v1575_v22 = vunpack.c.h.bf16 %v636_v14 }
 0x1cc   :  { %2519 = vmatpush2.msra.mxu1 %v1134_v21  ;;  %2449 = vmatprep.subr.mxu0 %v871_v24  ;;  %v632_v20 = vld [vmem:[#allocation7 + $0xd30] sm:$0xff]  ;;  %v1319_v21 = vunpack.c.h.bf16 %v508_v13  ;;  %v1574_v24 = vunpack.c.l.bf16 %v636_v14  ;;  %v1310_v30 = vunpack.c.l.bf16 %v504_v19 }
 0x1cd   :  { %2520 = vmatprep.subr.mxu1 %v1127_v26  ;;  %v2031_v40 = vpop.f32.mrf.mxu0  ;;  %2450 = vmatpush2.msra.mxu0 %v870_v27  ;;  %v500_v26 = vld [vmem:[#allocation7 + $0x910] sm:$0xff]  ;;  %v1567_v29 = vunpack.c.h.bf16 %v632_v20 }
 0x1ce   :  { %2521 = vmatpush2.msra.mxu1 %v1126_v28  ;;  %v2032_v43 = vadd.f32 %v2031_v40, %v6621_v25  ;;  %2451 = vmatprep.subr.mxu0 %v863_v32  ;;  %v1614_v25 = vunpack.c.l.bf16 %v656_v44  ;;  %v628_v27 = vld [vmem:[#allocation7 + $0xd10] sm:$0xff]  ;;  %v1311_v28 = vunpack.c.h.bf16 %v504_v19  ;;  %v1566_v32 = vunpack.c.l.bf16 %v632_v20 }
 0x1cf   :  { %2522 = vmatprep.subr.mxu1 %v1119_v34  ;;  %v2102_v46 = vpop.f32.mrf.mxu1  ;;  %2452 = vmatpush2.msra.mxu0 %v862_v35  ;;  %v496_v34 = vld [vmem:[#allocation7 + $0x8f0] sm:$0xff]  ;;  %v1558_v40 = vunpack.c.l.bf16 %v628_v27 }
 0x1d0   :  { %2523 = vmatpush2.msra.mxu1 %v1118_v36  ;;  %v6628_v50 = vadd.f32 %v2102_v46, %v2032_v43  ;;  %2453 = vmatprep.subr.mxu0 %v855_v38  ;;  %v624_v35 = vld [vmem:[#allocation7 + $0xcf0] sm:$0xff]  ;;  %v1303_v36 = vunpack.c.h.bf16 %v500_v26  ;;  %v1559_v38 = vunpack.c.h.bf16 %v628_v27  ;;  %v1295_v43 = vunpack.c.h.bf16 %v496_v34 }
 0x1d1   :  { %2524 = vmatprep.subr.mxu1 %v1111_v39  ;;  %2454 = vmatpush2.msra.mxu0 %v854_v42  ;;  %v1302_v39 = vunpack.c.l.bf16 %v500_v26  ;;  %v620_v42 = vld [vmem:[#allocation7 + $0xcd0] sm:$0xff]  ;;  %v1551_v44 = vunpack.c.h.bf16 %v624_v35  ;;  %v1550_v46 = vunpack.c.l.bf16 %v624_v35 }
 0x1d2   :  { %2455 = vmatprep.mubr.f32.mxu0 %v6220_v54  ;;  %2525 = vmatpush2.msra.mxu1 %v1110_v45  ;;  %v1294_v45 = vunpack.c.l.bf16 %v496_v34  ;;  %v616_v51 = vld [vmem:[#allocation7 + $0xcb0] sm:$0xff]  ;;  %v1286_v54 = vunpack.c.l.bf16 %v492_v41 }
 0x1d3   :  { %2456 = vmatmul.mubr.f32.vlgmr.msra.gmra.mxu0 %v6221_v58  ;;  %2526 = vmatprep.mubr.f32.mxu1 %v6222_v61  ;;  %v612_v56 = vld [vmem:[#allocation7 + $0xc90] sm:$0xff]  ;;  %v1535_v58 = vunpack.c.h.bf16 %v616_v51 }
 0x1d4   :  { %2533 = vmatprep.subr.mxu0 %v1359_v49  ;;  %2604 = vmatprep.subr.mxu1 %v1615_v53  ;;  %v488_v49 = vld [vmem:[#allocation7 + $0x8b0] sm:$0xff]  ;;  %v1543_v53 = vunpack.c.h.bf16 %v620_v42  ;;  %v1527_v0 = vunpack.c.h.bf16 %v612_v56 }
 0x1d5   :  { %2527 = vmatmul.mubr.f32.vlgmr.msra.gmra.mxu1 %v6223_v2  ;;  %2534 = vmatpush1.msra.mxu0 %v1358_v55  ;;  %v1542_v55 = vunpack.c.l.bf16 %v620_v42  ;;  %v1279_v57 = vunpack.c.h.bf16 %v488_v49  ;;  %v480_v61 = vld [vmem:[#allocation7 + $0x870] sm:$0xff]  ;;  %v1526_v2 = vunpack.c.l.bf16 %v612_v56 }
 0x1d6   :  { %2605 = vmatpush1.msra.mxu1 %v1614_v25  ;;  %2535 = vmatprep.subr.mxu0 %v1351_v59  ;;  %v484_v25 = vld [vmem:[#allocation7 + $0x890] sm:$0xff]  ;;  %v1278_v59 = vunpack.c.l.bf16 %v488_v49  ;;  %v1262_v7 = vunpack.c.l.bf16 %v480_v61 }
 0x1d7   :  { %2606 = vmatprep.subr.mxu1 %v1607_v60  ;;  %2536 = vmatpush1.msra.mxu0 %v1350_v62  ;;  %v1534_v60 = vunpack.c.l.bf16 %v616_v51  ;;  %v608_v62 = vld [vmem:[#allocation7 + $0xc70] sm:$0xff]  ;;  %v1270_v1 = vunpack.c.l.bf16 %v484_v25 }
 0x1d8   :  { %2607 = vmatpush1.msra.mxu1 %v1606_v63  ;;  %2537 = vmatprep.subr.mxu0 %v1343_v3  ;;  %v1271_v63 = vunpack.c.h.bf16 %v484_v25  ;;  %v476_v3 = vld [vmem:[#allocation7 + $0x850] sm:$0xff]  ;;  %v1518_v8 = vunpack.c.l.bf16 %v608_v62 }
 0x1d9   :  { %2608 = vmatprep.subr.mxu1 %v1599_v4  ;;  %2538 = vmatpush1.msra.mxu0 %v1342_v5  ;;  %v604_v4 = vld [vmem:[#allocation7 + $0xc50] sm:$0xff]  ;;  %v1263_v5 = vunpack.c.h.bf16 %v480_v61  ;;  %v1254_v13 = vunpack.c.l.bf16 %v476_v3 }
 0x1da   :  { %2609 = vmatpush1.msra.mxu1 %v1598_v6  ;;  %2539 = vmatprep.subr.mxu0 %v1335_v9  ;;  %v1519_v6 = vunpack.c.h.bf16 %v608_v62  ;;  %v472_v9 = vld [vmem:[#allocation7 + $0x830] sm:$0xff]  ;;  %v1510_v14 = vunpack.c.l.bf16 %v604_v4 }
 0x1db   :  { %2610 = vmatprep.subr.mxu1 %v1591_v10  ;;  %2540 = vmatpush1.msra.mxu0 %v1334_v11  ;;  %v600_v10 = vld [vmem:[#allocation7 + $0xc30] sm:$0xff]  ;;  %v1255_v11 = vunpack.c.h.bf16 %v476_v3  ;;  %v1246_v19 = vunpack.c.l.bf16 %v472_v9 }
 0x1dc   :  { %2611 = vmatpush1.msra.mxu1 %v1590_v12  ;;  %2541 = vmatprep.subr.mxu0 %v1327_v15  ;;  %v1511_v12 = vunpack.c.h.bf16 %v604_v4  ;;  %v468_v15 = vld [vmem:[#allocation7 + $0x810] sm:$0xff]  ;;  %v1502_v20 = vunpack.c.l.bf16 %v600_v10 }
 0x1dd   :  { %2612 = vmatprep.subr.mxu1 %v1583_v16  ;;  %2542 = vmatpush1.msra.mxu0 %v1326_v17  ;;  %v596_v16 = vld [vmem:[#allocation7 + $0xc10] sm:$0xff]  ;;  %v1247_v17 = vunpack.c.h.bf16 %v472_v9  ;;  %v1238_v26 = vunpack.c.l.bf16 %v468_v15 }
 0x1de   :  { %2613 = vmatpush1.msra.mxu1 %v1582_v18  ;;  %2543 = vmatprep.subr.mxu0 %v1319_v21  ;;  %v1503_v18 = vunpack.c.h.bf16 %v600_v10  ;;  %v592_v21 = vld [vmem:[#allocation7 + $0xbf0] sm:$0xff]  ;;  %v1494_v27 = vunpack.c.l.bf16 %v596_v16 }
 0x1df   :  { %2614 = vmatprep.subr.mxu1 %v1575_v22  ;;  %2544 = vmatpush1.msra.mxu0 %v1318_v23  ;;  %v720_v22 = vld [vmem:[#allocation7 + $0xff0] sm:$0xff]  ;;  %v1239_v23 = vunpack.c.h.bf16 %v468_v15  ;;  %v1486_v34 = vunpack.c.l.bf16 %v592_v21 }
 0x1e0   :  { %2615 = vmatpush1.msra.mxu1 %v1574_v24  ;;  %2545 = vmatprep.subr.mxu0 %v1311_v28  ;;  %v1495_v24 = vunpack.c.h.bf16 %v596_v16  ;;  %v588_v28 = vld [vmem:[#allocation7 + $0xbd0] sm:$0xff]  ;;  %v1742_v35 = vunpack.c.l.bf16 %v720_v22 }
 0x1e1   :  { %2616 = vmatprep.subr.mxu1 %v1567_v29  ;;  %2546 = vmatpush1.msra.mxu0 %v1310_v30  ;;  %v716_v29 = vld [vmem:[#allocation7 + $0xfd0] sm:$0xff]  ;;  %v1487_v30 = vunpack.c.h.bf16 %v592_v21  ;;  %v1478_v41 = vunpack.c.l.bf16 %v588_v28 }
 0x1e2   :  { %2617 = vmatpush1.msra.mxu1 %v1566_v32  ;;  %2547 = vmatprep.subr.mxu0 %v1303_v36  ;;  %v1743_v32 = vunpack.c.h.bf16 %v720_v22  ;;  %v584_v36 = vld [vmem:[#allocation7 + $0xbb0] sm:$0xff]  ;;  %v1734_v42 = vunpack.c.l.bf16 %v716_v29 }
 0x1e3   :  { %2618 = vmatprep.subr.mxu1 %v1559_v38  ;;  %2548 = vmatpush1.msra.mxu0 %v1302_v39  ;;  %v712_v38 = vld [vmem:[#allocation7 + $0xfb0] sm:$0xff]  ;;  %v1479_v39 = vunpack.c.h.bf16 %v588_v28  ;;  %v1470_v49 = vunpack.c.l.bf16 %v584_v36 }
 0x1e4   :  { %2619 = vmatpush1.msra.mxu1 %v1558_v40  ;;  %2549 = vmatprep.subr.mxu0 %v1295_v43  ;;  %v1735_v40 = vunpack.c.h.bf16 %v716_v29  ;;  %v580_v43 = vld [vmem:[#allocation7 + $0xb90] sm:$0xff]  ;;  %v1726_v51 = vunpack.c.l.bf16 %v712_v38 }
 0x1e5   :  { %2620 = vmatprep.subr.mxu1 %v1551_v44  ;;  %2550 = vmatpush1.msra.mxu0 %v1294_v45  ;;  %v708_v44 = vld [vmem:[#allocation7 + $0xf90] sm:$0xff]  ;;  %v1471_v45 = vunpack.c.h.bf16 %v584_v36  ;;  %v1462_v25 = vunpack.c.l.bf16 %v580_v43 }
 0x1e6   :  { %2621 = vmatpush1.msra.mxu1 %v1550_v46  ;;  %2551 = vmatprep.subr.mxu0 %v1287_v52  ;;  %v1727_v46 = vunpack.c.h.bf16 %v712_v38  ;;  %v576_v52 = vld [vmem:[#allocation7 + $0xb70] sm:$0xff]  ;;  %v1718_v56 = vunpack.c.l.bf16 %v708_v44 }
 0x1e7   :  { %2622 = vmatprep.subr.mxu1 %v1543_v53  ;;  %2552 = vmatpush1.msra.mxu0 %v1286_v54  ;;  %v704_v53 = vld [vmem:[#allocation7 + $0xf70] sm:$0xff]  ;;  %v1463_v54 = vunpack.c.h.bf16 %v580_v43  ;;  %v1454_v61 = vunpack.c.l.bf16 %v576_v52 }
 0x1e8   :  { %2623 = vmatpush1.msra.mxu1 %v1542_v55  ;;  %2553 = vmatprep.subr.mxu0 %v1279_v57  ;;  %v1719_v55 = vunpack.c.h.bf16 %v708_v44  ;;  %v572_v57 = vld [vmem:[#allocation7 + $0xb50] sm:$0xff]  ;;  %v1710_v62 = vunpack.c.l.bf16 %v704_v53 }
 0x1e9   :  { %2624 = vmatprep.subr.mxu1 %v1535_v58  ;;  %2554 = vmatpush1.msra.mxu0 %v1278_v59  ;;  %v700_v58 = vld [vmem:[#allocation7 + $0xf50] sm:$0xff]  ;;  %v1455_v59 = vunpack.c.h.bf16 %v576_v52  ;;  %v1446_v3 = vunpack.c.l.bf16 %v572_v57 }
 0x1ea   :  { %2625 = vmatpush1.msra.mxu1 %v1534_v60  ;;  %2555 = vmatprep.subr.mxu0 %v1271_v63  ;;  %v1711_v60 = vunpack.c.h.bf16 %v704_v53  ;;  %v568_v63 = vld [vmem:[#allocation7 + $0xb30] sm:$0xff]  ;;  %v1702_v4 = vunpack.c.l.bf16 %v700_v58 }
 0x1eb   :  { %2626 = vmatprep.subr.mxu1 %v1527_v0  ;;  %2556 = vmatpush1.msra.mxu0 %v1270_v1  ;;  %v696_v0 = vld [vmem:[#allocation7 + $0xf30] sm:$0xff]  ;;  %v1447_v1 = vunpack.c.h.bf16 %v572_v57  ;;  %v1438_v9 = vunpack.c.l.bf16 %v568_v63 }
 0x1ec   :  { %2627 = vmatpush1.msra.mxu1 %v1526_v2  ;;  %2557 = vmatprep.subr.mxu0 %v1263_v5  ;;  %v1703_v2 = vunpack.c.h.bf16 %v700_v58  ;;  %v564_v5 = vld [vmem:[#allocation7 + $0xb10] sm:$0xff]  ;;  %v1694_v10 = vunpack.c.l.bf16 %v696_v0 }
 0x1ed   :  { %2628 = vmatprep.subr.mxu1 %v1519_v6  ;;  %2558 = vmatpush1.msra.mxu0 %v1262_v7  ;;  %v692_v6 = vld [vmem:[#allocation7 + $0xf10] sm:$0xff]  ;;  %v1439_v7 = vunpack.c.h.bf16 %v568_v63  ;;  %v1430_v15 = vunpack.c.l.bf16 %v564_v5 }
 0x1ee   :  { %2629 = vmatpush1.msra.mxu1 %v1518_v8  ;;  %2559 = vmatprep.subr.mxu0 %v1255_v11  ;;  %v1695_v8 = vunpack.c.h.bf16 %v696_v0  ;;  %v560_v11 = vld [vmem:[#allocation7 + $0xaf0] sm:$0xff]  ;;  %v1686_v16 = vunpack.c.l.bf16 %v692_v6  ;;  %v6636_v0 = vpop.f32.mrf.mxu0 }
 0x1ef   :  { %2630 = vmatprep.subr.mxu1 %v1511_v12  ;;  %2560 = vmatpush1.msra.mxu0 %v1254_v13  ;;  %v688_v12 = vld [vmem:[#allocation7 + $0xef0] sm:$0xff]  ;;  %v1431_v13 = vunpack.c.h.bf16 %v564_v5  ;;  %v1422_v21 = vunpack.c.l.bf16 %v560_v11  ;;  %v6638_v5 = vpop.f32.mrf.mxu1 }
 0x1f0   :  { %2631 = vmatpush1.msra.mxu1 %v1510_v14  ;;  %2561 = vmatprep.subr.mxu0 %v1247_v17  ;;  %v1687_v14 = vunpack.c.h.bf16 %v692_v6  ;;  %v556_v17 = vld [vmem:[#allocation7 + $0xad0] sm:$0xff]  ;;  %v1678_v22 = vunpack.c.l.bf16 %v688_v12 }
 0x1f1   :  { %2632 = vmatprep.subr.mxu1 %v1503_v18  ;;  %2562 = vmatpush1.msra.mxu0 %v1246_v19  ;;  %v684_v18 = vld [vmem:[#allocation7 + $0xed0] sm:$0xff]  ;;  %v1423_v19 = vunpack.c.h.bf16 %v560_v11  ;;  %v1414_v28 = vunpack.c.l.bf16 %v556_v17 }
 0x1f2   :  { %2633 = vmatpush1.msra.mxu1 %v1502_v20  ;;  %2563 = vmatprep.subr.mxu0 %v1239_v23  ;;  %v1679_v20 = vunpack.c.h.bf16 %v688_v12  ;;  %v552_v23 = vld [vmem:[#allocation7 + $0xab0] sm:$0xff]  ;;  %v1670_v29 = vunpack.c.l.bf16 %v684_v18  ;;  %v401_v12 = vld [vmem:[#allocation7 + $0x5f8] sm:$0xff] }
 0x1f3   :  { %2634 = vmatprep.subr.mxu1 %v1495_v24  ;;  %2564 = vmatpush1.msra.mxu0 %v1238_v26  ;;  %v680_v24 = vld [vmem:[#allocation7 + $0xeb0] sm:$0xff]  ;;  %v1415_v26 = vunpack.c.h.bf16 %v556_v17  ;;  %v1406_v38 = vunpack.c.l.bf16 %v552_v23  ;;  %v269_v17 = vld [vmem:[#allocation7 + $0x1d8] sm:$0xff] }
 0x1f4   :  { %2635 = vmatpush1.msra.mxu1 %v1494_v27  ;;  %2565 = vmatprep.subr.mxu0 %v1487_v30  ;;  %v1671_v27 = vunpack.c.h.bf16 %v684_v18  ;;  %v548_v30 = vld [vmem:[#allocation7 + $0xa90] sm:$0xff]  ;;  %v1663_v36 = vunpack.c.h.bf16 %v680_v24  ;;  %v397_v18 = vld [vmem:[#allocation7 + $0x5d8] sm:$0xff] }
 0x1f5   :  { %2636 = vmatprep.subr.mxu1 %v1743_v32  ;;  %2566 = vmatpush2.msra.mxu0 %v1486_v34  ;;  %v676_v32 = vld [vmem:[#allocation7 + $0xe90] sm:$0xff]  ;;  %v6631_v34 = vsub.s32 4, %v6611_v33  ;;  %v1398_v44 = vunpack.c.l.bf16 %v548_v30 }
 0x1f6   :  { %2637 = vmatpush2.msra.mxu1 %v1742_v35  ;;  %2567 = vmatprep.subr.mxu0 %v1479_v39  ;;  %v1407_v35 = vunpack.c.h.bf16 %v552_v23  ;;  %v1662_v39 = vunpack.c.l.bf16 %v680_v24  ;;  %v1655_v43 = vunpack.c.h.bf16 %v676_v32  ;;  %v265_v23 = vld [vmem:[#allocation7 + $0x1b8] sm:$0xff] }
 0x1f7   :  { %2638 = vmatprep.subr.mxu1 %v1735_v40  ;;  %2568 = vmatpush2.msra.mxu0 %v1478_v41  ;;  %7273 = vst [vmem:[#allocation29_spill] sm:$0xff] %v6631_v34  ;;  %v544_v40 = vld [vmem:[#allocation7 + $0xa70] sm:$0xff]  ;;  %v393_v24 = vld [vmem:[#allocation7 + $0x5b8] sm:$0xff] }
 0x1f8   :  { %2639 = vmatpush2.msra.mxu1 %v1734_v42  ;;  %2569 = vmatprep.subr.mxu0 %v1471_v45  ;;  %v672_v41 = vld [vmem:[#allocation7 + $0xe70] sm:$0xff]  ;;  %v1399_v42 = vunpack.c.h.bf16 %v548_v30  ;;  %v1654_v45 = vunpack.c.l.bf16 %v676_v32  ;;  %v1391_v52 = vunpack.c.h.bf16 %v544_v40  ;;  %v840_v30 = vunpack.c.l.bf16 %v269_v17 }
 0x1f9   :  { %2640 = vmatprep.subr.mxu1 %v1727_v46  ;;  %2570 = vmatpush2.msra.mxu0 %v1470_v49  ;;  %v540_v46 = vld [vmem:[#allocation7 + $0xa50] sm:$0xff]  ;;  %v1647_v53 = vunpack.c.h.bf16 %v672_v41  ;;  %v1096_v32 = vunpack.c.l.bf16 %v397_v18 }
 0x1fa   :  { %2641 = vmatpush2.msra.mxu1 %v1726_v51  ;;  %2571 = vmatprep.subr.mxu0 %v1463_v54  ;;  %v668_v49 = vld [vmem:[#allocation7 + $0xe50] sm:$0xff]  ;;  %v1762_v51 = vrot.slane %v6613_v47, %v6631_v34  ;;  %v1390_v54 = vunpack.c.l.bf16 %v544_v40  ;;  %v1383_v57 = vunpack.c.h.bf16 %v540_v46  ;;  %v1089_v40 = vunpack.c.h.bf16 %v393_v24 }
 0x1fb   :  { %2642 = vmatprep.subr.mxu1 %v1719_v55  ;;  %2572 = vmatpush2.msra.mxu0 %v1462_v25  ;;  %v1646_v55 = vunpack.c.l.bf16 %v672_v41  ;;  %v536_v25 = vld [vmem:[#allocation7 + $0xa30] sm:$0xff]  ;;  %v1639_v58 = vunpack.c.h.bf16 %v668_v49  ;;  %v832_v41 = vunpack.c.l.bf16 %v265_v23 }
 0x1fc   :  { %2643 = vmatpush2.msra.mxu1 %v1718_v56  ;;  %2573 = vmatprep.subr.mxu0 %v1455_v59  ;;  %v664_v56 = vld [vmem:[#allocation7 + $0xe30] sm:$0xff]  ;;  %v1382_v59 = vunpack.c.l.bf16 %v540_v46  ;;  %v1802_v63 = vrot.slane %v1762_v51, %v6616_v48 }
 0x1fd   :  { %2644 = vmatprep.subr.mxu1 %v1711_v60  ;;  %2574 = vmatpush2.msra.mxu0 %v1454_v61  ;;  %v1638_v60 = vunpack.c.l.bf16 %v668_v49  ;;  %v532_v61 = vld [vmem:[#allocation7 + $0xa10] sm:$0xff] }
 0x1fe   :  { %2645 = vmatpush2.msra.mxu1 %v1710_v62  ;;  %2575 = vmatprep.subr.mxu0 %v1447_v1  ;;  %v660_v62 = vld [vmem:[#allocation7 + $0xe10] sm:$0xff]  ;;  %v1375_v1 = vunpack.c.h.bf16 %v536_v25  ;;  %v1367_v6 = vunpack.c.h.bf16 %v532_v61 }
 0x1ff   :  { %2646 = vmatprep.subr.mxu1 %v1703_v2  ;;  %2576 = vmatpush2.msra.mxu0 %v1446_v3  ;;  %v1631_v2 = vunpack.c.h.bf16 %v664_v56  ;;  %v1374_v3 = vunpack.c.l.bf16 %v536_v25 }
 0x200   :  { %2647 = vmatpush2.msra.mxu1 %v1702_v4  ;;  %2577 = vmatprep.subr.mxu0 %v1439_v7  ;;  %v1630_v4 = vunpack.c.l.bf16 %v664_v56  ;;  %v1623_v7 = vunpack.c.h.bf16 %v660_v62 }
 0x201   :  { %2648 = vmatprep.subr.mxu1 %v1695_v8  ;;  %2578 = vmatpush2.msra.mxu0 %v1438_v9  ;;  %v273_v9 = vld [vmem:[#allocation7 + $0x1f8] sm:$0xff] }
 0x202   :  { %2649 = vmatpush2.msra.mxu1 %v1694_v10  ;;  %2579 = vmatprep.subr.mxu0 %v1431_v13  ;;  %v1366_v10 = vunpack.c.l.bf16 %v532_v61  ;;  %v1622_v13 = vunpack.c.l.bf16 %v660_v62 }
 0x203   :  { %2650 = vmatprep.subr.mxu1 %v1687_v14  ;;  %2580 = vmatpush2.msra.mxu0 %v1430_v15  ;;  %v849_v15 = vunpack.c.h.bf16 %v273_v9 }
 0x204   :  { %2651 = vmatpush2.msra.mxu1 %v1686_v16  ;;  %2581 = vmatprep.subr.mxu0 %v1423_v19  ;;  %v1105_v19 = vunpack.c.h.bf16 %v401_v12 }
 0x205   :  { %2652 = vmatprep.subr.mxu1 %v1679_v20  ;;  %2582 = vmatpush2.msra.mxu0 %v1422_v21  ;;  %v6224_v20 = vld [vmem:[#allocation5 + $0x28] sm:$0xff]  ;;  %v848_v21 = vunpack.c.l.bf16 %v273_v9 }
 0x206   :  { %2653 = vmatpush2.msra.mxu1 %v1678_v22  ;;  %2583 = vmatprep.subr.mxu0 %v1415_v26  ;;  %v1104_v22 = vunpack.c.l.bf16 %v401_v12  ;;  %v6225_v26 = vld [vmem:[#allocation5 + $0x20] sm:$0xff] }
 0x207   :  { %2654 = vmatprep.subr.mxu1 %v1671_v27  ;;  %2584 = vmatpush2.msra.mxu0 %v1414_v28  ;;  %v841_v27 = vunpack.c.h.bf16 %v269_v17  ;;  %v1097_v28 = vunpack.c.h.bf16 %v397_v18 }
 0x208   :  { %2655 = vmatpush2.msra.mxu1 %v1670_v29  ;;  %2585 = vmatprep.subr.mxu0 %v1407_v35  ;;  %v6226_v29 = vld [vmem:[#allocation5 + $0x38] sm:$0xff] }
 0x209   :  { %2656 = vmatprep.subr.mxu1 %v1663_v36  ;;  %2586 = vmatpush2.msra.mxu0 %v1406_v38  ;;  %v261_v35 = vld [vmem:[#allocation7 + $0x198] sm:$0xff]  ;;  %v6227_v38 = vld [vmem:[#allocation5 + $0x30] sm:$0xff] }
 0x20a   :  { %2657 = vmatpush2.msra.mxu1 %v1662_v39  ;;  %2587 = vmatprep.subr.mxu0 %v1399_v42  ;;  %v389_v36 = vld [vmem:[#allocation7 + $0x598] sm:$0xff]  ;;  %v833_v39 = vunpack.c.h.bf16 %v265_v23  ;;  %v1088_v42 = vunpack.c.l.bf16 %v393_v24  ;;  %v824_v49 = vunpack.c.l.bf16 %v261_v35 }
 0x20b   :  { %2658 = vmatprep.subr.mxu1 %v1655_v43  ;;  %2588 = vmatpush2.msra.mxu0 %v1398_v44  ;;  %v257_v43 = vld [vmem:[#allocation7 + $0x178] sm:$0xff]  ;;  %v1081_v46 = vunpack.c.h.bf16 %v389_v36  ;;  %v1080_v51 = vunpack.c.l.bf16 %v389_v36 }
 0x20c   :  { %2659 = vmatpush2.msra.mxu1 %v1654_v45  ;;  %2589 = vmatprep.subr.mxu0 %v1391_v52  ;;  %v385_v44 = vld [vmem:[#allocation7 + $0x578] sm:$0xff]  ;;  %v825_v45 = vunpack.c.h.bf16 %v261_v35  ;;  %v816_v25 = vunpack.c.l.bf16 %v257_v43 }
 0x20d   :  { %2660 = vmatprep.subr.mxu1 %v1647_v53  ;;  %2590 = vmatpush2.msra.mxu0 %v1390_v54  ;;  %v253_v52 = vld [vmem:[#allocation7 + $0x158] sm:$0xff]  ;;  %v817_v54 = vunpack.c.h.bf16 %v257_v43  ;;  %v1072_v56 = vunpack.c.l.bf16 %v385_v44 }
 0x20e   :  { %2661 = vmatpush2.msra.mxu1 %v1646_v55  ;;  %2591 = vmatprep.subr.mxu0 %v1383_v57  ;;  %v381_v53 = vld [vmem:[#allocation7 + $0x558] sm:$0xff]  ;;  %v1073_v55 = vunpack.c.h.bf16 %v385_v44  ;;  %v808_v61 = vunpack.c.l.bf16 %v253_v52 }
 0x20f   :  { %2662 = vmatprep.subr.mxu1 %v1639_v58  ;;  %v2173_v8 = vpop.f32.mrf.mxu0  ;;  %2592 = vmatpush2.msra.mxu0 %v1382_v59  ;;  %v249_v57 = vld [vmem:[#allocation7 + $0x138] sm:$0xff]  ;;  %v809_v59 = vunpack.c.h.bf16 %v253_v52  ;;  %v1064_v62 = vunpack.c.l.bf16 %v381_v53 }
 0x210   :  { %2663 = vmatpush2.msra.mxu1 %v1638_v60  ;;  %v2174_v11 = vadd.f32 %v2173_v8, %v1802_v63  ;;  %2593 = vmatprep.subr.mxu0 %v1375_v1  ;;  %v377_v58 = vld [vmem:[#allocation7 + $0x538] sm:$0xff]  ;;  %v1065_v60 = vunpack.c.h.bf16 %v381_v53 }
 0x211   :  { %2664 = vmatprep.subr.mxu1 %v1631_v2  ;;  %v2244_v14 = vpop.f32.mrf.mxu1  ;;  %2594 = vmatpush2.msra.mxu0 %v1374_v3  ;;  %v245_v63 = vld [vmem:[#allocation7 + $0x118] sm:$0xff]  ;;  %v801_v2 = vunpack.c.h.bf16 %v249_v57  ;;  %v1057_v3 = vunpack.c.h.bf16 %v377_v58 }
 0x212   :  { %2665 = vmatpush2.msra.mxu1 %v1630_v4  ;;  %v6640_v16 = vadd.f32 %v2244_v14, %v2174_v11  ;;  %2595 = vmatprep.subr.mxu0 %v1367_v6  ;;  %v373_v1 = vld [vmem:[#allocation7 + $0x518] sm:$0xff]  ;;  %v800_v4 = vunpack.c.l.bf16 %v249_v57  ;;  %v1056_v6 = vunpack.c.l.bf16 %v377_v58  ;;  %v793_v9 = vunpack.c.h.bf16 %v245_v63 }
 0x213   :  { %2666 = vmatprep.subr.mxu1 %v1623_v7  ;;  %2596 = vmatpush2.msra.mxu0 %v1366_v10  ;;  %v241_v7 = vld [vmem:[#allocation7 + $0xf8] sm:$0xff]  ;;  %v1049_v10 = vunpack.c.h.bf16 %v373_v1  ;;  %v792_v11 = vunpack.c.l.bf16 %v245_v63  ;;  %v1048_v12 = vunpack.c.l.bf16 %v373_v1 }
 0x214   :  { %2597 = vmatprep.mubr.f32.mxu0 %v6224_v20  ;;  %2667 = vmatpush2.msra.mxu1 %v1622_v13  ;;  %v369_v8 = vld [vmem:[#allocation7 + $0x4f8] sm:$0xff]  ;;  %v784_v18 = vunpack.c.l.bf16 %v241_v7 }
 0x215   :  { %2598 = vmatmul.mubr.f32.vlgmr.msra.gmra.mxu0 %v6225_v26  ;;  %2668 = vmatprep.mubr.f32.mxu1 %v6226_v29  ;;  %v237_v13 = vld [vmem:[#allocation7 + $0xd8] sm:$0xff]  ;;  %v1041_v17 = vunpack.c.h.bf16 %v369_v8 }
 0x216   :  { %2675 = vmatprep.subr.mxu0 %v849_v15  ;;  %2746 = vmatprep.subr.mxu1 %v1105_v19  ;;  %v365_v14 = vld [vmem:[#allocation7 + $0x4d8] sm:$0xff]  ;;  %v785_v15 = vunpack.c.h.bf16 %v241_v7  ;;  %v1040_v19 = vunpack.c.l.bf16 %v369_v8  ;;  %v776_v24 = vunpack.c.l.bf16 %v237_v13 }
 0x217   :  { %2669 = vmatmul.mubr.f32.vlgmr.msra.gmra.mxu1 %v6227_v38  ;;  %2676 = vmatpush1.msra.mxu0 %v848_v21  ;;  %v233_v20 = vld [vmem:[#allocation7 + $0xb8] sm:$0xff]  ;;  %v1033_v23 = vunpack.c.h.bf16 %v365_v14  ;;  %v1032_v26 = vunpack.c.l.bf16 %v365_v14 }
 0x218   :  { %2747 = vmatpush1.msra.mxu1 %v1104_v22  ;;  %2677 = vmatprep.subr.mxu0 %v841_v27  ;;  %v361_v21 = vld [vmem:[#allocation7 + $0x4b8] sm:$0xff]  ;;  %v777_v22 = vunpack.c.h.bf16 %v237_v13  ;;  %v769_v29 = vunpack.c.h.bf16 %v233_v20 }
 0x219   :  { %2748 = vmatprep.subr.mxu1 %v1097_v28  ;;  %2678 = vmatpush1.msra.mxu0 %v840_v30  ;;  %v229_v27 = vld [vmem:[#allocation7 + $0x98] sm:$0xff]  ;;  %v1025_v30 = vunpack.c.h.bf16 %v361_v21  ;;  %v1024_v35 = vunpack.c.l.bf16 %v361_v21 }
 0x21a   :  { %2749 = vmatpush1.msra.mxu1 %v1096_v32  ;;  %2679 = vmatprep.subr.mxu0 %v833_v39  ;;  %v357_v28 = vld [vmem:[#allocation7 + $0x498] sm:$0xff]  ;;  %v768_v32 = vunpack.c.l.bf16 %v233_v20  ;;  %v761_v39 = vunpack.c.h.bf16 %v229_v27 }
 0x21b   :  { %2750 = vmatprep.subr.mxu1 %v1089_v40  ;;  %2680 = vmatpush1.msra.mxu0 %v832_v41  ;;  %v225_v36 = vld [vmem:[#allocation7 + $0x78] sm:$0xff]  ;;  %v1017_v40 = vunpack.c.h.bf16 %v357_v28  ;;  %v760_v41 = vunpack.c.l.bf16 %v229_v27 }
 0x21c   :  { %2751 = vmatpush1.msra.mxu1 %v1088_v42  ;;  %2681 = vmatprep.subr.mxu0 %v825_v45  ;;  %v353_v38 = vld [vmem:[#allocation7 + $0x478] sm:$0xff]  ;;  %v1016_v42 = vunpack.c.l.bf16 %v357_v28  ;;  %v753_v45 = vunpack.c.h.bf16 %v225_v36 }
 0x21d   :  { %2752 = vmatprep.subr.mxu1 %v1081_v46  ;;  %2682 = vmatpush1.msra.mxu0 %v824_v49  ;;  %v221_v43 = vld [vmem:[#allocation7 + $0x58] sm:$0xff]  ;;  %v1009_v46 = vunpack.c.h.bf16 %v353_v38  ;;  %v752_v49 = vunpack.c.l.bf16 %v225_v36 }
 0x21e   :  { %2753 = vmatpush1.msra.mxu1 %v1080_v51  ;;  %2683 = vmatprep.subr.mxu0 %v817_v54  ;;  %v349_v44 = vld [vmem:[#allocation7 + $0x458] sm:$0xff]  ;;  %v1008_v51 = vunpack.c.l.bf16 %v353_v38  ;;  %v745_v54 = vunpack.c.h.bf16 %v221_v43 }
 0x21f   :  { %2754 = vmatprep.subr.mxu1 %v1073_v55  ;;  %2684 = vmatpush1.msra.mxu0 %v816_v25  ;;  %v217_v52 = vld [vmem:[#allocation7 + $0x38] sm:$0xff]  ;;  %v1001_v55 = vunpack.c.h.bf16 %v349_v44  ;;  %v744_v25 = vunpack.c.l.bf16 %v221_v43 }
 0x220   :  { %2755 = vmatpush1.msra.mxu1 %v1072_v56  ;;  %2685 = vmatprep.subr.mxu0 %v809_v59  ;;  %v345_v53 = vld [vmem:[#allocation7 + $0x438] sm:$0xff]  ;;  %v1000_v56 = vunpack.c.l.bf16 %v349_v44  ;;  %v737_v59 = vunpack.c.h.bf16 %v217_v52 }
 0x221   :  { %2756 = vmatprep.subr.mxu1 %v1065_v60  ;;  %2686 = vmatpush1.msra.mxu0 %v808_v61  ;;  %v213_v57 = vld [vmem:[#allocation7 + $0x18] sm:$0xff]  ;;  %v993_v60 = vunpack.c.h.bf16 %v345_v53  ;;  %v736_v61 = vunpack.c.l.bf16 %v217_v52 }
 0x222   :  { %2757 = vmatpush1.msra.mxu1 %v1064_v62  ;;  %2687 = vmatprep.subr.mxu0 %v801_v2  ;;  %v341_v58 = vld [vmem:[#allocation7 + $0x418] sm:$0xff]  ;;  %v992_v62 = vunpack.c.l.bf16 %v345_v53  ;;  %v729_v2 = vunpack.c.h.bf16 %v213_v57 }
 0x223   :  { %2758 = vmatprep.subr.mxu1 %v1057_v3  ;;  %2688 = vmatpush1.msra.mxu0 %v800_v4  ;;  %v337_v63 = vld [vmem:[#allocation7 + $0x3f8] sm:$0xff]  ;;  %v985_v3 = vunpack.c.h.bf16 %v341_v58  ;;  %v728_v4 = vunpack.c.l.bf16 %v213_v57 }
 0x224   :  { %2759 = vmatpush1.msra.mxu1 %v1056_v6  ;;  %2689 = vmatprep.subr.mxu0 %v793_v9  ;;  %v465_v1 = vld [vmem:[#allocation7 + $0x7f8] sm:$0xff]  ;;  %v984_v6 = vunpack.c.l.bf16 %v341_v58  ;;  %v977_v9 = vunpack.c.h.bf16 %v337_v63 }
 0x225   :  { %2760 = vmatprep.subr.mxu1 %v1049_v10  ;;  %2690 = vmatpush1.msra.mxu0 %v792_v11  ;;  %v333_v7 = vld [vmem:[#allocation7 + $0x3d8] sm:$0xff]  ;;  %v1233_v10 = vunpack.c.h.bf16 %v465_v1  ;;  %v976_v11 = vunpack.c.l.bf16 %v337_v63 }
 0x226   :  { %2761 = vmatpush1.msra.mxu1 %v1048_v12  ;;  %2691 = vmatprep.subr.mxu0 %v785_v15  ;;  %v461_v8 = vld [vmem:[#allocation7 + $0x7d8] sm:$0xff]  ;;  %v1232_v12 = vunpack.c.l.bf16 %v465_v1  ;;  %v969_v15 = vunpack.c.h.bf16 %v333_v7 }
 0x227   :  { %2762 = vmatprep.subr.mxu1 %v1041_v17  ;;  %2692 = vmatpush1.msra.mxu0 %v784_v18  ;;  %v329_v13 = vld [vmem:[#allocation7 + $0x3b8] sm:$0xff]  ;;  %v1225_v17 = vunpack.c.h.bf16 %v461_v8  ;;  %v968_v18 = vunpack.c.l.bf16 %v333_v7 }
 0x228   :  { %2763 = vmatpush1.msra.mxu1 %v1040_v19  ;;  %2693 = vmatprep.subr.mxu0 %v777_v22  ;;  %v457_v14 = vld [vmem:[#allocation7 + $0x7b8] sm:$0xff]  ;;  %v1224_v19 = vunpack.c.l.bf16 %v461_v8  ;;  %v961_v22 = vunpack.c.h.bf16 %v329_v13 }
 0x229   :  { %2764 = vmatprep.subr.mxu1 %v1033_v23  ;;  %2694 = vmatpush1.msra.mxu0 %v776_v24  ;;  %v325_v20 = vld [vmem:[#allocation7 + $0x398] sm:$0xff]  ;;  %v1217_v23 = vunpack.c.h.bf16 %v457_v14  ;;  %v960_v24 = vunpack.c.l.bf16 %v329_v13 }
 0x22a   :  { %2765 = vmatpush1.msra.mxu1 %v1032_v26  ;;  %2695 = vmatprep.subr.mxu0 %v769_v29  ;;  %v453_v21 = vld [vmem:[#allocation7 + $0x798] sm:$0xff]  ;;  %v1216_v26 = vunpack.c.l.bf16 %v457_v14  ;;  %v953_v29 = vunpack.c.h.bf16 %v325_v20 }
 0x22b   :  { %2766 = vmatprep.subr.mxu1 %v1025_v30  ;;  %2696 = vmatpush1.msra.mxu0 %v768_v32  ;;  %v321_v27 = vld [vmem:[#allocation7 + $0x378] sm:$0xff]  ;;  %v1209_v30 = vunpack.c.h.bf16 %v453_v21  ;;  %v952_v32 = vunpack.c.l.bf16 %v325_v20 }
 0x22c   :  { %2767 = vmatpush1.msra.mxu1 %v1024_v35  ;;  %2697 = vmatprep.subr.mxu0 %v761_v39  ;;  %v449_v28 = vld [vmem:[#allocation7 + $0x778] sm:$0xff]  ;;  %v1208_v35 = vunpack.c.l.bf16 %v453_v21  ;;  %v945_v39 = vunpack.c.h.bf16 %v321_v27 }
 0x22d   :  { %2768 = vmatprep.subr.mxu1 %v1017_v40  ;;  %2698 = vmatpush1.msra.mxu0 %v760_v41  ;;  %v317_v36 = vld [vmem:[#allocation7 + $0x358] sm:$0xff]  ;;  %v1201_v40 = vunpack.c.h.bf16 %v449_v28  ;;  %v944_v41 = vunpack.c.l.bf16 %v321_v27 }
 0x22e   :  { %2769 = vmatpush1.msra.mxu1 %v1016_v42  ;;  %2699 = vmatprep.subr.mxu0 %v753_v45  ;;  %v445_v38 = vld [vmem:[#allocation7 + $0x758] sm:$0xff]  ;;  %v1200_v42 = vunpack.c.l.bf16 %v449_v28  ;;  %v937_v45 = vunpack.c.h.bf16 %v317_v36 }
 0x22f   :  { %2770 = vmatprep.subr.mxu1 %v1009_v46  ;;  %2700 = vmatpush1.msra.mxu0 %v752_v49  ;;  %v313_v43 = vld [vmem:[#allocation7 + $0x338] sm:$0xff]  ;;  %v1193_v46 = vunpack.c.h.bf16 %v445_v38  ;;  %v936_v49 = vunpack.c.l.bf16 %v317_v36 }
 0x230   :  { %2771 = vmatpush1.msra.mxu1 %v1008_v51  ;;  %2701 = vmatprep.subr.mxu0 %v745_v54  ;;  %v441_v44 = vld [vmem:[#allocation7 + $0x738] sm:$0xff]  ;;  %v1192_v51 = vunpack.c.l.bf16 %v445_v38  ;;  %v929_v54 = vunpack.c.h.bf16 %v313_v43 }
 0x231   :  { %2772 = vmatprep.subr.mxu1 %v1001_v55  ;;  %2702 = vmatpush1.msra.mxu0 %v744_v25  ;;  %v309_v52 = vld [vmem:[#allocation7 + $0x318] sm:$0xff]  ;;  %v1185_v55 = vunpack.c.h.bf16 %v441_v44  ;;  %v928_v25 = vunpack.c.l.bf16 %v313_v43 }
 0x232   :  { %2773 = vmatpush1.msra.mxu1 %v1000_v56  ;;  %2703 = vmatprep.subr.mxu0 %v737_v59  ;;  %v437_v53 = vld [vmem:[#allocation7 + $0x718] sm:$0xff]  ;;  %v1184_v56 = vunpack.c.l.bf16 %v441_v44  ;;  %v921_v59 = vunpack.c.h.bf16 %v309_v52 }
 0x233   :  { %2774 = vmatprep.subr.mxu1 %v993_v60  ;;  %2704 = vmatpush1.msra.mxu0 %v736_v61  ;;  %v305_v57 = vld [vmem:[#allocation7 + $0x2f8] sm:$0xff]  ;;  %v1177_v60 = vunpack.c.h.bf16 %v437_v53  ;;  %v920_v61 = vunpack.c.l.bf16 %v309_v52 }
 0x234   :  { %2775 = vmatpush1.msra.mxu1 %v992_v62  ;;  %2705 = vmatprep.subr.mxu0 %v729_v2  ;;  %v433_v58 = vld [vmem:[#allocation7 + $0x6f8] sm:$0xff]  ;;  %v1176_v62 = vunpack.c.l.bf16 %v437_v53  ;;  %v913_v2 = vunpack.c.h.bf16 %v305_v57  ;;  %v6644_v53 = vpop.f32.mrf.mxu1 }
 0x235   :  { %2776 = vmatprep.subr.mxu1 %v985_v3  ;;  %2706 = vmatpush1.msra.mxu0 %v728_v4  ;;  %v301_v63 = vld [vmem:[#allocation7 + $0x2d8] sm:$0xff]  ;;  %v1169_v3 = vunpack.c.h.bf16 %v433_v58  ;;  %v912_v4 = vunpack.c.l.bf16 %v305_v57 }
 0x236   :  { %2777 = vmatpush1.msra.mxu1 %v984_v6  ;;  %2707 = vmatprep.subr.mxu0 %v977_v9  ;;  %v429_v1 = vld [vmem:[#allocation7 + $0x6d8] sm:$0xff]  ;;  %v1168_v6 = vunpack.c.l.bf16 %v433_v58  ;;  %v905_v9 = vunpack.c.h.bf16 %v301_v63 }
 0x237   :  { %2778 = vmatprep.subr.mxu1 %v1233_v10  ;;  %2708 = vmatpush2.msra.mxu0 %v976_v11  ;;  %v297_v7 = vld [vmem:[#allocation7 + $0x2b8] sm:$0xff]  ;;  %v1161_v10 = vunpack.c.h.bf16 %v429_v1  ;;  %v904_v11 = vunpack.c.l.bf16 %v301_v63 }
 0x238   :  { %2779 = vmatpush2.msra.mxu1 %v1232_v12  ;;  %2709 = vmatprep.subr.mxu0 %v969_v15  ;;  %v425_v8 = vld [vmem:[#allocation7 + $0x6b8] sm:$0xff]  ;;  %v1160_v12 = vunpack.c.l.bf16 %v429_v1  ;;  %v897_v15 = vunpack.c.h.bf16 %v297_v7 }
 0x239   :  { %2780 = vmatprep.subr.mxu1 %v1225_v17  ;;  %2710 = vmatpush2.msra.mxu0 %v968_v18  ;;  %v293_v13 = vld [vmem:[#allocation7 + $0x298] sm:$0xff]  ;;  %v1153_v17 = vunpack.c.h.bf16 %v425_v8  ;;  %v896_v18 = vunpack.c.l.bf16 %v297_v7 }
 0x23a   :  { %2781 = vmatpush2.msra.mxu1 %v1224_v19  ;;  %2711 = vmatprep.subr.mxu0 %v961_v22  ;;  %v421_v14 = vld [vmem:[#allocation7 + $0x698] sm:$0xff]  ;;  %v1152_v19 = vunpack.c.l.bf16 %v425_v8  ;;  %v889_v22 = vunpack.c.h.bf16 %v293_v13 }
 0x23b   :  { %2782 = vmatprep.subr.mxu1 %v1217_v23  ;;  %2712 = vmatpush2.msra.mxu0 %v960_v24  ;;  %v289_v20 = vld [vmem:[#allocation7 + $0x278] sm:$0xff]  ;;  %v1145_v23 = vunpack.c.h.bf16 %v421_v14  ;;  %v888_v24 = vunpack.c.l.bf16 %v293_v13 }
 0x23c   :  { %2783 = vmatpush2.msra.mxu1 %v1216_v26  ;;  %2713 = vmatprep.subr.mxu0 %v953_v29  ;;  %v417_v21 = vld [vmem:[#allocation7 + $0x678] sm:$0xff]  ;;  %v1144_v26 = vunpack.c.l.bf16 %v421_v14  ;;  %v881_v29 = vunpack.c.h.bf16 %v289_v20 }
 0x23d   :  { %2784 = vmatprep.subr.mxu1 %v1209_v30  ;;  %2714 = vmatpush2.msra.mxu0 %v952_v32  ;;  %v285_v27 = vld [vmem:[#allocation7 + $0x258] sm:$0xff]  ;;  %v1137_v30 = vunpack.c.h.bf16 %v417_v21  ;;  %v880_v32 = vunpack.c.l.bf16 %v289_v20 }
 0x23e   :  { %2785 = vmatpush2.msra.mxu1 %v1208_v35  ;;  %2715 = vmatprep.subr.mxu0 %v945_v39  ;;  %v413_v28 = vld [vmem:[#allocation7 + $0x658] sm:$0xff]  ;;  %v1136_v35 = vunpack.c.l.bf16 %v417_v21  ;;  %v873_v39 = vunpack.c.h.bf16 %v285_v27 }
 0x23f   :  { %2786 = vmatprep.subr.mxu1 %v1201_v40  ;;  %2716 = vmatpush2.msra.mxu0 %v944_v41  ;;  %v281_v36 = vld [vmem:[#allocation7 + $0x238] sm:$0xff]  ;;  %v1129_v40 = vunpack.c.h.bf16 %v413_v28  ;;  %v872_v41 = vunpack.c.l.bf16 %v285_v27 }
 0x240   :  { %2787 = vmatpush2.msra.mxu1 %v1200_v42  ;;  %2717 = vmatprep.subr.mxu0 %v937_v45  ;;  %v409_v38 = vld [vmem:[#allocation7 + $0x638] sm:$0xff]  ;;  %v1128_v42 = vunpack.c.l.bf16 %v413_v28  ;;  %v6642_v45 = vpop.f32.mrf.mxu0 }
 0x241   :  { %2788 = vmatprep.subr.mxu1 %v1193_v46  ;;  %2718 = vmatpush2.msra.mxu0 %v936_v49  ;;  %v277_v43 = vld [vmem:[#allocation7 + $0x218] sm:$0xff]  ;;  %v865_v46 = vunpack.c.h.bf16 %v281_v36  ;;  %v1121_v49 = vunpack.c.h.bf16 %v409_v38  ;;  %v1120_v52 = vunpack.c.l.bf16 %v409_v38 }
 0x242   :  { %2789 = vmatpush2.msra.mxu1 %v1192_v51  ;;  %2719 = vmatprep.subr.mxu0 %v929_v54  ;;  %v405_v44 = vld [vmem:[#allocation7 + $0x618] sm:$0xff]  ;;  %v864_v51 = vunpack.c.l.bf16 %v281_v36  ;;  %v857_v54 = vunpack.c.h.bf16 %v277_v43  ;;  %v856_v57 = vunpack.c.l.bf16 %v277_v43 }
 0x243   :  { %2790 = vmatprep.subr.mxu1 %v1185_v55  ;;  %2720 = vmatpush2.msra.mxu0 %v928_v25  ;;  %v1113_v55 = vunpack.c.h.bf16 %v405_v44  ;;  %v525_v1 = vld [vmem:[#allocation7 + $0x9d8] sm:$0xff] }
 0x244   :  { %2791 = vmatpush2.msra.mxu1 %v1184_v56  ;;  %2721 = vmatprep.subr.mxu0 %v921_v59  ;;  %v529_v56 = vld [vmem:[#allocation7 + $0x9f8] sm:$0xff]  ;;  %v1352_v13 = vunpack.c.l.bf16 %v525_v1 }
 0x245   :  { %2792 = vmatprep.subr.mxu1 %v1177_v60  ;;  %2722 = vmatpush2.msra.mxu0 %v920_v61  ;;  %v657_v59 = vld [vmem:[#allocation7 + $0xdf8] sm:$0xff]  ;;  %v1112_v60 = vunpack.c.l.bf16 %v405_v44 }
 0x246   :  { %2793 = vmatpush2.msra.mxu1 %v1176_v62  ;;  %2723 = vmatprep.subr.mxu0 %v913_v2  ;;  %v1361_v62 = vunpack.c.h.bf16 %v529_v56  ;;  %v653_v2 = vld [vmem:[#allocation7 + $0xdd8] sm:$0xff] }
 0x247   :  { %2794 = vmatprep.subr.mxu1 %v1169_v3  ;;  %2724 = vmatpush2.msra.mxu0 %v912_v4  ;;  %v1617_v3 = vunpack.c.h.bf16 %v657_v59  ;;  %v6228_v4 = vld [vmem:[#allocation5 + $0x8] sm:$0xff]  ;;  %v521_v7 = vld [vmem:[#allocation7 + $0x9b8] sm:$0xff]  ;;  %v1608_v14 = vunpack.c.l.bf16 %v653_v2 }
 0x248   :  { %2795 = vmatpush2.msra.mxu1 %v1168_v6  ;;  %2725 = vmatprep.subr.mxu0 %v905_v9  ;;  %v1360_v6 = vunpack.c.l.bf16 %v529_v56  ;;  %v649_v8 = vld [vmem:[#allocation7 + $0xdb8] sm:$0xff]  ;;  %v6229_v9 = vld [vmem:[#allocation5] sm:$0xff]  ;;  %v1344_v21 = vunpack.c.l.bf16 %v521_v7 }
 0x249   :  { %2796 = vmatprep.subr.mxu1 %v1161_v10  ;;  %2726 = vmatpush2.msra.mxu0 %v904_v11  ;;  %v1353_v10 = vunpack.c.h.bf16 %v525_v1  ;;  %v1609_v11 = vunpack.c.h.bf16 %v653_v2  ;;  %v1601_v20 = vunpack.c.h.bf16 %v649_v8  ;;  %v497_v56 = vld [vmem:[#allocation7 + $0x8f8] sm:$0xff] }
 0x24a   :  { %2797 = vmatpush2.msra.mxu1 %v1160_v12  ;;  %2727 = vmatprep.subr.mxu0 %v897_v15  ;;  %v6230_v12 = vld [vmem:[#allocation5 + $0x18] sm:$0xff]  ;;  %v1297_v2 = vunpack.c.h.bf16 %v497_v56 }
 0x24b   :  { %2798 = vmatprep.subr.mxu1 %v1153_v17  ;;  %2728 = vmatpush2.msra.mxu0 %v896_v18  ;;  %v517_v15 = vld [vmem:[#allocation7 + $0x998] sm:$0xff]  ;;  %v6231_v18 = vld [vmem:[#allocation5 + $0x10] sm:$0xff] }
 0x24c   :  { %2799 = vmatpush2.msra.mxu1 %v1152_v19  ;;  %2729 = vmatprep.subr.mxu0 %v889_v22  ;;  %v645_v17 = vld [vmem:[#allocation7 + $0xd98] sm:$0xff]  ;;  %v1345_v19 = vunpack.c.h.bf16 %v521_v7  ;;  %v1600_v22 = vunpack.c.l.bf16 %v649_v8  ;;  %v1336_v28 = vunpack.c.l.bf16 %v517_v15 }
 0x24d   :  { %2800 = vmatprep.subr.mxu1 %v1145_v23  ;;  %2730 = vmatpush2.msra.mxu0 %v888_v24  ;;  %v513_v23 = vld [vmem:[#allocation7 + $0x978] sm:$0xff]  ;;  %v1593_v27 = vunpack.c.h.bf16 %v645_v17 }
 0x24e   :  { %2801 = vmatpush2.msra.mxu1 %v1144_v26  ;;  %2731 = vmatprep.subr.mxu0 %v881_v29  ;;  %v641_v24 = vld [vmem:[#allocation7 + $0xd78] sm:$0xff]  ;;  %v1337_v26 = vunpack.c.h.bf16 %v517_v15  ;;  %v1592_v29 = vunpack.c.l.bf16 %v645_v17  ;;  %v1328_v38 = vunpack.c.l.bf16 %v513_v23 }
 0x24f   :  { %2802 = vmatprep.subr.mxu1 %v1137_v30  ;;  %2732 = vmatpush2.msra.mxu0 %v880_v32  ;;  %v509_v30 = vld [vmem:[#allocation7 + $0x958] sm:$0xff]  ;;  %v1585_v36 = vunpack.c.h.bf16 %v641_v24 }
 0x250   :  { %2803 = vmatpush2.msra.mxu1 %v1136_v35  ;;  %2733 = vmatprep.subr.mxu0 %v873_v39  ;;  %v637_v32 = vld [vmem:[#allocation7 + $0xd58] sm:$0xff]  ;;  %v1329_v35 = vunpack.c.h.bf16 %v513_v23  ;;  %v1584_v39 = vunpack.c.l.bf16 %v641_v24  ;;  %v1320_v44 = vunpack.c.l.bf16 %v509_v30 }
 0x251   :  { %2804 = vmatprep.subr.mxu1 %v1129_v40  ;;  %v2315_v25 = vpop.f32.mrf.mxu0  ;;  %2734 = vmatpush2.msra.mxu0 %v872_v41  ;;  %v505_v40 = vld [vmem:[#allocation7 + $0x938] sm:$0xff]  ;;  %v1577_v43 = vunpack.c.h.bf16 %v637_v32 }
 0x252   :  { %2805 = vmatpush2.msra.mxu1 %v1128_v42  ;;  %v2316_v58 = vadd.f32 %v2315_v25, %v6640_v16  ;;  %2735 = vmatprep.subr.mxu0 %v865_v46  ;;  %v1616_v16 = vunpack.c.l.bf16 %v657_v59  ;;  %v633_v41 = vld [vmem:[#allocation7 + $0xd38] sm:$0xff]  ;;  %v1321_v42 = vunpack.c.h.bf16 %v509_v30  ;;  %v1576_v46 = vunpack.c.l.bf16 %v637_v32 }
 0x253   :  { %2806 = vmatprep.subr.mxu1 %v1121_v49  ;;  %v2386_v61 = vpop.f32.mrf.mxu1  ;;  %2736 = vmatpush2.msra.mxu0 %v864_v51  ;;  %v501_v49 = vld [vmem:[#allocation7 + $0x918] sm:$0xff]  ;;  %v1568_v25 = vunpack.c.l.bf16 %v633_v41 }
 0x254   :  { %2807 = vmatpush2.msra.mxu1 %v1120_v52  ;;  %v6647_v63 = vadd.f32 %v2386_v61, %v2316_v58  ;;  %2737 = vmatprep.subr.mxu0 %v857_v54  ;;  %v629_v51 = vld [vmem:[#allocation7 + $0xd18] sm:$0xff]  ;;  %v1313_v52 = vunpack.c.h.bf16 %v505_v40  ;;  %v1569_v54 = vunpack.c.h.bf16 %v633_v41  ;;  %v1305_v58 = vunpack.c.h.bf16 %v501_v49 }
 0x255   :  { %2808 = vmatprep.subr.mxu1 %v1113_v55  ;;  %2738 = vmatpush2.msra.mxu0 %v856_v57  ;;  %v1312_v55 = vunpack.c.l.bf16 %v505_v40  ;;  %v625_v57 = vld [vmem:[#allocation7 + $0xcf8] sm:$0xff]  ;;  %v1561_v59 = vunpack.c.h.bf16 %v629_v51  ;;  %v1560_v61 = vunpack.c.l.bf16 %v629_v51 }
 0x256   :  { %2739 = vmatprep.mubr.f32.mxu0 %v6228_v4  ;;  %2809 = vmatpush2.msra.mxu1 %v1112_v60  ;;  %v1304_v60 = vunpack.c.l.bf16 %v501_v49  ;;  %v621_v1 = vld [vmem:[#allocation7 + $0xcd8] sm:$0xff]  ;;  %v1296_v4 = vunpack.c.l.bf16 %v497_v56 }
 0x257   :  { %2740 = vmatmul.mubr.f32.vlgmr.msra.gmra.mxu0 %v6229_v9  ;;  %2810 = vmatprep.mubr.f32.mxu1 %v6230_v12  ;;  %v617_v7 = vld [vmem:[#allocation7 + $0xcb8] sm:$0xff]  ;;  %v1545_v9 = vunpack.c.h.bf16 %v621_v1 }
 0x258   :  { %2817 = vmatprep.subr.mxu0 %v1361_v62  ;;  %2888 = vmatprep.subr.mxu1 %v1617_v3  ;;  %v493_v62 = vld [vmem:[#allocation7 + $0x8d8] sm:$0xff]  ;;  %v1553_v3 = vunpack.c.h.bf16 %v625_v57  ;;  %v1537_v15 = vunpack.c.h.bf16 %v617_v7 }
 0x259   :  { %2811 = vmatmul.mubr.f32.vlgmr.msra.gmra.mxu1 %v6231_v18  ;;  %2818 = vmatpush1.msra.mxu0 %v1360_v6  ;;  %v1552_v6 = vunpack.c.l.bf16 %v625_v57  ;;  %v1289_v8 = vunpack.c.h.bf16 %v493_v62  ;;  %v485_v12 = vld [vmem:[#allocation7 + $0x898] sm:$0xff]  ;;  %v1536_v18 = vunpack.c.l.bf16 %v617_v7 }
 0x25a   :  { %2889 = vmatpush1.msra.mxu1 %v1616_v16  ;;  %2819 = vmatprep.subr.mxu0 %v1353_v10  ;;  %v489_v16 = vld [vmem:[#allocation7 + $0x8b8] sm:$0xff]  ;;  %v1288_v10 = vunpack.c.l.bf16 %v493_v62  ;;  %v1272_v23 = vunpack.c.l.bf16 %v485_v12 }
 0x25b   :  { %2890 = vmatprep.subr.mxu1 %v1609_v11  ;;  %2820 = vmatpush1.msra.mxu0 %v1352_v13  ;;  %v1544_v11 = vunpack.c.l.bf16 %v621_v1  ;;  %v613_v13 = vld [vmem:[#allocation7 + $0xc98] sm:$0xff]  ;;  %v1280_v17 = vunpack.c.l.bf16 %v489_v16 }
 0x25c   :  { %2891 = vmatpush1.msra.mxu1 %v1608_v14  ;;  %2821 = vmatprep.subr.mxu0 %v1345_v19  ;;  %v1281_v14 = vunpack.c.h.bf16 %v489_v16  ;;  %v481_v19 = vld [vmem:[#allocation7 + $0x878] sm:$0xff]  ;;  %v1528_v24 = vunpack.c.l.bf16 %v613_v13 }
 0x25d   :  { %2892 = vmatprep.subr.mxu1 %v1601_v20  ;;  %2822 = vmatpush1.msra.mxu0 %v1344_v21  ;;  %v609_v20 = vld [vmem:[#allocation7 + $0xc78] sm:$0xff]  ;;  %v1273_v21 = vunpack.c.h.bf16 %v485_v12  ;;  %v1264_v30 = vunpack.c.l.bf16 %v481_v19 }
 0x25e   :  { %2893 = vmatpush1.msra.mxu1 %v1600_v22  ;;  %2823 = vmatprep.subr.mxu0 %v1337_v26  ;;  %v1529_v22 = vunpack.c.h.bf16 %v613_v13  ;;  %v477_v26 = vld [vmem:[#allocation7 + $0x858] sm:$0xff]  ;;  %v1520_v32 = vunpack.c.l.bf16 %v609_v20 }
 0x25f   :  { %2894 = vmatprep.subr.mxu1 %v1593_v27  ;;  %2824 = vmatpush1.msra.mxu0 %v1336_v28  ;;  %v605_v27 = vld [vmem:[#allocation7 + $0xc58] sm:$0xff]  ;;  %v1265_v28 = vunpack.c.h.bf16 %v481_v19  ;;  %v1256_v40 = vunpack.c.l.bf16 %v477_v26 }
 0x260   :  { %2895 = vmatpush1.msra.mxu1 %v1592_v29  ;;  %2825 = vmatprep.subr.mxu0 %v1329_v35  ;;  %v1521_v29 = vunpack.c.h.bf16 %v609_v20  ;;  %v473_v35 = vld [vmem:[#allocation7 + $0x838] sm:$0xff]  ;;  %v1512_v41 = vunpack.c.l.bf16 %v605_v27 }
 0x261   :  { %2896 = vmatprep.subr.mxu1 %v1585_v36  ;;  %2826 = vmatpush1.msra.mxu0 %v1328_v38  ;;  %v601_v36 = vld [vmem:[#allocation7 + $0xc38] sm:$0xff]  ;;  %v1257_v38 = vunpack.c.h.bf16 %v477_v26  ;;  %v1248_v49 = vunpack.c.l.bf16 %v473_v35 }
 0x262   :  { %2897 = vmatpush1.msra.mxu1 %v1584_v39  ;;  %2827 = vmatprep.subr.mxu0 %v1321_v42  ;;  %v1513_v39 = vunpack.c.h.bf16 %v605_v27  ;;  %v469_v42 = vld [vmem:[#allocation7 + $0x818] sm:$0xff]  ;;  %v1504_v51 = vunpack.c.l.bf16 %v601_v36 }
 0x263   :  { %2898 = vmatprep.subr.mxu1 %v1577_v43  ;;  %2828 = vmatpush1.msra.mxu0 %v1320_v44  ;;  %v597_v43 = vld [vmem:[#allocation7 + $0xc18] sm:$0xff]  ;;  %v1249_v44 = vunpack.c.h.bf16 %v473_v35  ;;  %v1240_v56 = vunpack.c.l.bf16 %v469_v42 }
 0x264   :  { %2899 = vmatpush1.msra.mxu1 %v1576_v46  ;;  %2829 = vmatprep.subr.mxu0 %v1313_v52  ;;  %v1505_v46 = vunpack.c.h.bf16 %v601_v36  ;;  %v593_v52 = vld [vmem:[#allocation7 + $0xbf8] sm:$0xff]  ;;  %v1496_v57 = vunpack.c.l.bf16 %v597_v43 }
 0x265   :  { %2900 = vmatprep.subr.mxu1 %v1569_v54  ;;  %2830 = vmatpush1.msra.mxu0 %v1312_v55  ;;  %v721_v54 = vld [vmem:[#allocation7 + $0xff8] sm:$0xff]  ;;  %v1241_v55 = vunpack.c.h.bf16 %v469_v42  ;;  %v1488_v62 = vunpack.c.l.bf16 %v593_v52 }
 0x266   :  { %2901 = vmatpush1.msra.mxu1 %v1568_v25  ;;  %2831 = vmatprep.subr.mxu0 %v1305_v58  ;;  %v1497_v25 = vunpack.c.h.bf16 %v597_v43  ;;  %v589_v58 = vld [vmem:[#allocation7 + $0xbd8] sm:$0xff]  ;;  %v1744_v1 = vunpack.c.l.bf16 %v721_v54 }
 0x267   :  { %2902 = vmatprep.subr.mxu1 %v1561_v59  ;;  %2832 = vmatpush1.msra.mxu0 %v1304_v60  ;;  %v717_v59 = vld [vmem:[#allocation7 + $0xfd8] sm:$0xff]  ;;  %v1489_v60 = vunpack.c.h.bf16 %v593_v52  ;;  %v1480_v16 = vunpack.c.l.bf16 %v589_v58  ;;  %v6650_v52 = vsub.s32 2, %v6611_v33 }
 0x268   :  { %2903 = vmatpush1.msra.mxu1 %v1560_v61  ;;  %2833 = vmatprep.subr.mxu0 %v1297_v2  ;;  %v1745_v61 = vunpack.c.h.bf16 %v721_v54  ;;  %v585_v2 = vld [vmem:[#allocation7 + $0xbb8] sm:$0xff]  ;;  %v1736_v7 = vunpack.c.l.bf16 %v717_v59 }
 0x269   :  { %2904 = vmatprep.subr.mxu1 %v1553_v3  ;;  %2834 = vmatpush1.msra.mxu0 %v1296_v4  ;;  %v713_v3 = vld [vmem:[#allocation7 + $0xfb8] sm:$0xff]  ;;  %v1481_v4 = vunpack.c.h.bf16 %v589_v58  ;;  %v1472_v12 = vunpack.c.l.bf16 %v585_v2  ;;  %7274 = vst [vmem:[#allocation30_spill] sm:$0xff] %v6650_v52 }
 0x26a   :  { %2905 = vmatpush1.msra.mxu1 %v1552_v6  ;;  %2835 = vmatprep.subr.mxu0 %v1289_v8  ;;  %v1737_v6 = vunpack.c.h.bf16 %v717_v59  ;;  %v581_v8 = vld [vmem:[#allocation7 + $0xb98] sm:$0xff]  ;;  %v1728_v13 = vunpack.c.l.bf16 %v713_v3 }
 0x26b   :  { %2906 = vmatprep.subr.mxu1 %v1545_v9  ;;  %2836 = vmatpush1.msra.mxu0 %v1288_v10  ;;  %v709_v9 = vld [vmem:[#allocation7 + $0xf98] sm:$0xff]  ;;  %v1473_v10 = vunpack.c.h.bf16 %v585_v2  ;;  %v1464_v19 = vunpack.c.l.bf16 %v581_v8 }
 0x26c   :  { %2907 = vmatpush1.msra.mxu1 %v1544_v11  ;;  %2837 = vmatprep.subr.mxu0 %v1281_v14  ;;  %v1729_v11 = vunpack.c.h.bf16 %v713_v3  ;;  %v577_v14 = vld [vmem:[#allocation7 + $0xb78] sm:$0xff]  ;;  %v1720_v20 = vunpack.c.l.bf16 %v709_v9 }
 0x26d   :  { %2908 = vmatprep.subr.mxu1 %v1537_v15  ;;  %2838 = vmatpush1.msra.mxu0 %v1280_v17  ;;  %v705_v15 = vld [vmem:[#allocation7 + $0xf78] sm:$0xff]  ;;  %v1465_v17 = vunpack.c.h.bf16 %v581_v8  ;;  %v1456_v26 = vunpack.c.l.bf16 %v577_v14  ;;  %v6232_v8 = vld [vmem:[#allocation8] sm:$0xff] }
 0x26e   :  { %2909 = vmatpush1.msra.mxu1 %v1536_v18  ;;  %2839 = vmatprep.subr.mxu0 %v1273_v21  ;;  %v1721_v18 = vunpack.c.h.bf16 %v709_v9  ;;  %v573_v21 = vld [vmem:[#allocation7 + $0xb58] sm:$0xff]  ;;  %v1712_v27 = vunpack.c.l.bf16 %v705_v15  ;;  %v6657_v9 = vunpack.c.h.bf16 %v6232_v8  ;;  %v2987_v8 = vld [vmem:[#allocation10 + $0xe0] sm:$0xff] }
 0x26f   :  { %2910 = vmatprep.subr.mxu1 %v1529_v22  ;;  %2840 = vmatpush1.msra.mxu0 %v1272_v23  ;;  %v701_v22 = vld [vmem:[#allocation7 + $0xf58] sm:$0xff]  ;;  %v1457_v23 = vunpack.c.h.bf16 %v577_v14  ;;  %v1448_v35 = vunpack.c.l.bf16 %v573_v21 }
 0x270   :  { %2911 = vmatpush1.msra.mxu1 %v1528_v24  ;;  %2841 = vmatprep.subr.mxu0 %v1265_v28  ;;  %v1713_v24 = vunpack.c.h.bf16 %v705_v15  ;;  %v569_v28 = vld [vmem:[#allocation7 + $0xb38] sm:$0xff]  ;;  %v1704_v36 = vunpack.c.l.bf16 %v701_v22 }
 0x271   :  { %2912 = vmatprep.subr.mxu1 %v1521_v29  ;;  %2842 = vmatpush1.msra.mxu0 %v1264_v30  ;;  %v697_v29 = vld [vmem:[#allocation7 + $0xf38] sm:$0xff]  ;;  %v1449_v30 = vunpack.c.h.bf16 %v573_v21  ;;  %v1440_v42 = vunpack.c.l.bf16 %v569_v28 }
 0x272   :  { %2913 = vmatpush1.msra.mxu1 %v1520_v32  ;;  %2843 = vmatprep.subr.mxu0 %v1257_v38  ;;  %v1705_v32 = vunpack.c.h.bf16 %v701_v22  ;;  %v565_v38 = vld [vmem:[#allocation7 + $0xb18] sm:$0xff]  ;;  %v1696_v43 = vunpack.c.l.bf16 %v697_v29 }
 0x273   :  { %2914 = vmatprep.subr.mxu1 %v1513_v39  ;;  %2844 = vmatpush1.msra.mxu0 %v1256_v40  ;;  %v693_v39 = vld [vmem:[#allocation7 + $0xf18] sm:$0xff]  ;;  %v1441_v40 = vunpack.c.h.bf16 %v569_v28  ;;  %v1432_v54 = vunpack.c.l.bf16 %v565_v38 }
 0x274   :  { %2915 = vmatpush1.msra.mxu1 %v1512_v41  ;;  %2845 = vmatprep.subr.mxu0 %v1249_v44  ;;  %v1697_v41 = vunpack.c.h.bf16 %v697_v29  ;;  %v561_v44 = vld [vmem:[#allocation7 + $0xaf8] sm:$0xff] }
 0x275   :  { %2916 = vmatprep.subr.mxu1 %v1505_v46  ;;  %2846 = vmatpush1.msra.mxu0 %v1248_v49  ;;  %v689_v46 = vld [vmem:[#allocation7 + $0xef8] sm:$0xff]  ;;  %v1433_v49 = vunpack.c.h.bf16 %v565_v38  ;;  %v1425_v58 = vunpack.c.h.bf16 %v561_v44 }
 0x276   :  { %2917 = vmatpush1.msra.mxu1 %v1504_v51  ;;  %2847 = vmatprep.subr.mxu0 %v1241_v55  ;;  %v1689_v51 = vunpack.c.h.bf16 %v693_v39  ;;  %v1688_v55 = vunpack.c.l.bf16 %v693_v39  ;;  %v1681_v59 = vunpack.c.h.bf16 %v689_v46  ;;  %v545_v15 = vld [vmem:[#allocation7 + $0xa78] sm:$0xff] }
 0x277   :  { %2918 = vmatprep.subr.mxu1 %v1497_v25  ;;  %2848 = vmatpush1.msra.mxu0 %v1240_v56  ;;  %v557_v25 = vld [vmem:[#allocation7 + $0xad8] sm:$0xff]  ;;  %v1392_v29 = vunpack.c.l.bf16 %v545_v15 }
 0x278   :  { %2919 = vmatpush1.msra.mxu1 %v1496_v57  ;;  %2849 = vmatprep.subr.mxu0 %v1489_v60  ;;  %v685_v56 = vld [vmem:[#allocation7 + $0xed8] sm:$0xff]  ;;  %v6653_v57 = vsub.s32 6, %v6611_v33  ;;  %v1424_v60 = vunpack.c.l.bf16 %v561_v44  ;;  %v1417_v2 = vunpack.c.h.bf16 %v557_v25  ;;  %v1416_v33 = vunpack.c.l.bf16 %v557_v25 }
 0x279   :  { %2920 = vmatprep.subr.mxu1 %v1745_v61  ;;  %2850 = vmatpush2.msra.mxu0 %v1488_v62  ;;  %v1680_v61 = vunpack.c.l.bf16 %v689_v46  ;;  %v553_v62 = vld [vmem:[#allocation7 + $0xab8] sm:$0xff]  ;;  %v1673_v3 = vunpack.c.h.bf16 %v685_v56 }
 0x27a   :  { %2921 = vmatpush2.msra.mxu1 %v1744_v1  ;;  %2851 = vmatprep.subr.mxu0 %v1481_v4  ;;  %7275 = vst [vmem:[#allocation31_spill] sm:$0xff] %v6653_v57  ;;  %v681_v1 = vld [vmem:[#allocation7 + $0xeb8] sm:$0xff]  ;;  %v1758_v4 = vrot.slane %v6613_v47, %v6650_v52 }
 0x27b   :  { %2922 = vmatprep.subr.mxu1 %v1737_v6  ;;  %2852 = vmatpush2.msra.mxu0 %v1480_v16  ;;  %v1672_v6 = vunpack.c.l.bf16 %v685_v56  ;;  %v549_v16 = vld [vmem:[#allocation7 + $0xa98] sm:$0xff]  ;;  %v1664_v14 = vunpack.c.l.bf16 %v681_v1 }
 0x27c   :  { %2923 = vmatpush2.msra.mxu1 %v1736_v7  ;;  %2853 = vmatprep.subr.mxu0 %v1473_v10  ;;  %v677_v7 = vld [vmem:[#allocation7 + $0xe98] sm:$0xff]  ;;  %v1766_v10 = vrot.slane %v6613_v47, %v6653_v57  ;;  %v1400_v21 = vunpack.c.l.bf16 %v549_v16 }
 0x27d   :  { %2924 = vmatprep.subr.mxu1 %v1729_v11  ;;  %2854 = vmatpush2.msra.mxu0 %v1472_v12  ;;  %v1409_v11 = vunpack.c.h.bf16 %v553_v62  ;;  %v1665_v12 = vunpack.c.h.bf16 %v681_v1  ;;  %v1656_v47 = vunpack.c.l.bf16 %v677_v7  ;;  %v541_v22 = vld [vmem:[#allocation7 + $0xa58] sm:$0xff] }
 0x27e   :  { %2925 = vmatpush2.msra.mxu1 %v1728_v13  ;;  %2855 = vmatprep.subr.mxu0 %v1465_v17  ;;  %v1408_v13 = vunpack.c.l.bf16 %v553_v62  ;;  %v673_v17 = vld [vmem:[#allocation7 + $0xe78] sm:$0xff] }
 0x27f   :  { %2926 = vmatprep.subr.mxu1 %v1721_v18  ;;  %2856 = vmatpush2.msra.mxu0 %v1464_v19  ;;  %v1401_v18 = vunpack.c.h.bf16 %v549_v16  ;;  %v1657_v19 = vunpack.c.h.bf16 %v677_v7  ;;  %v1649_v28 = vunpack.c.h.bf16 %v673_v17  ;;  %v2989_v62 = vld [vmem:[#allocation10 + $0xf0] sm:$0xff] }
 0x280   :  { %2927 = vmatpush2.msra.mxu1 %v1720_v20  ;;  %2857 = vmatprep.subr.mxu0 %v1457_v23  ;;  %v1798_v20 = vrot.slane %v1758_v4, %v6616_v48  ;;  %v669_v23 = vld [vmem:[#allocation7 + $0xe58] sm:$0xff] }
 0x281   :  { %2928 = vmatprep.subr.mxu1 %v1713_v24  ;;  %2858 = vmatpush2.msra.mxu0 %v1456_v26  ;;  %v1770_v24 = vrot.slane %v6657_v9, %v6616_v48  ;;  %v1806_v26 = vrot.slane %v1766_v10, %v6616_v48  ;;  %v1641_v38 = vunpack.c.h.bf16 %v669_v23  ;;  %v3053_v1 = vld [vmem:[#allocation10 + $0x2f0] sm:$0xff]  ;;  %v3051_v10 = vld [vmem:[#allocation10 + $0x2e0] sm:$0xff] }
 0x282   :  { %2929 = vmatpush2.msra.mxu1 %v1712_v27  ;;  %2859 = vmatprep.subr.mxu0 %v1449_v30  ;;  %v1393_v27 = vunpack.c.h.bf16 %v545_v15  ;;  %v1648_v30 = vunpack.c.l.bf16 %v673_v17  ;;  %v1892_v39 = vadd.f32 %v6623_v31, %v1798_v20  ;;  %v2388_v31 = vpop.f32.mrf.mxu1  ;;  %v3404_v7 = vunpack.c.h.bf16 %v3053_v1  ;;  %v6235_v17 = vld [vmem:[#allocation5 + $0x20] sm:$0xff] }
 0x283   :  { %2930 = vmatprep.subr.mxu1 %v1705_v32  ;;  %2860 = vmatpush2.msra.mxu0 %v1448_v35  ;;  %v537_v32 = vld [vmem:[#allocation7 + $0xa38] sm:$0xff]  ;;  %v1810_v44 = vrot.slane %v1770_v24, %v6616_v48  ;;  %v2176_v46 = vadd.f32 %v6642_v45, %v1806_v26  ;;  %v3400_v20 = vunpack.c.h.bf16 %v3051_v10  ;;  %v3047_v24 = vld [vmem:[#allocation10 + $0x2c0] sm:$0xff] }
 0x284   :  { %2931 = vmatpush2.msra.mxu1 %v1704_v36  ;;  %2861 = vmatprep.subr.mxu0 %v1441_v40  ;;  %v665_v35 = vld [vmem:[#allocation7 + $0xe38] sm:$0xff]  ;;  %v1385_v36 = vunpack.c.h.bf16 %v541_v22  ;;  %v1384_v40 = vunpack.c.l.bf16 %v541_v22  ;;  %v3399_v22 = vunpack.c.l.bf16 %v3051_v10 }
 0x285   :  { %2932 = vmatprep.subr.mxu1 %v1697_v41  ;;  %2862 = vmatpush2.msra.mxu0 %v1440_v42  ;;  %v1640_v41 = vunpack.c.l.bf16 %v669_v23  ;;  %v533_v42 = vld [vmem:[#allocation7 + $0xa18] sm:$0xff]  ;;  %v1632_v25 = vunpack.c.l.bf16 %v665_v35  ;;  %v2983_v23 = vld [vmem:[#allocation10 + $0xc0] sm:$0xff] }
 0x286   :  { %2933 = vmatpush2.msra.mxu1 %v1696_v43  ;;  %2863 = vmatprep.subr.mxu0 %v1433_v49  ;;  %v661_v43 = vld [vmem:[#allocation7 + $0xe18] sm:$0xff]  ;;  %v2317_v49 = vpop.f32.mrf.mxu0  ;;  %v1369_v56 = vunpack.c.h.bf16 %v533_v42  ;;  %v1368_v45 = vunpack.c.l.bf16 %v533_v42 }
 0x287   :  { %2934 = vmatprep.subr.mxu1 %v1689_v51  ;;  %2864 = vmatpush2.msra.mxu0 %v1432_v54  ;;  %v1377_v51 = vunpack.c.h.bf16 %v537_v32  ;;  %v1633_v54 = vunpack.c.h.bf16 %v665_v35  ;;  %v3392_v35 = vunpack.c.h.bf16 %v3047_v24 }
 0x288   :  { %2935 = vmatpush2.msra.mxu1 %v1688_v55  ;;  %2865 = vmatprep.subr.mxu0 %v1425_v58  ;;  %v1376_v55 = vunpack.c.l.bf16 %v537_v32  ;;  %v1625_v58 = vunpack.c.h.bf16 %v661_v43  ;;  %v3264_v32 = vunpack.c.h.bf16 %v2983_v23 }
 0x289   :  { %2936 = vmatprep.subr.mxu1 %v1681_v59  ;;  %2866 = vmatpush2.msra.mxu0 %v1424_v60  ;;  %v1963_v60 = vadd.f32 %v6625_v37, %v1892_v39  ;;  %v3276_v37 = vunpack.c.h.bf16 %v2989_v62  ;;  %v2979_v39 = vld [vmem:[#allocation10 + $0xa0] sm:$0xff] }
 0x28a   :  { %2937 = vmatpush2.msra.mxu1 %v1680_v61  ;;  %2867 = vmatprep.subr.mxu0 %v1417_v2  ;;  %v2247_v2 = vadd.f32 %v6644_v53, %v2176_v46  ;;  %v3275_v53 = vunpack.c.l.bf16 %v2989_v62  ;;  %v2977_v46 = vld [vmem:[#allocation10 + $0x90] sm:$0xff] }
 0x28b   :  { %2938 = vmatprep.subr.mxu1 %v1673_v3  ;;  %2868 = vmatpush2.msra.mxu0 %v1416_v33  ;;  %v1624_v3 = vunpack.c.l.bf16 %v661_v43  ;;  %v2034_v33 = vadd.f32 %v6636_v0, %v1963_v60  ;;  %v2985_v0 = vld [vmem:[#allocation10 + $0xd0] sm:$0xff]  ;;  %v3251_v60 = vunpack.c.l.bf16 %v2977_v46 }
 0x28c   :  { %2939 = vmatpush2.msra.mxu1 %v1672_v6  ;;  %2869 = vmatprep.subr.mxu0 %v1409_v11  ;;  %v2318_v16 = vadd.f32 %v2317_v49, %v2247_v2  ;;  %v6233_v11 = vld [vmem:[#allocation5 + $0x28] sm:$0xff]  ;;  %v3268_v26 = vunpack.c.h.bf16 %v2985_v0  ;;  %v3041_v49 = vld [vmem:[#allocation10 + $0x290] sm:$0xff] }
 0x28d   :  { %2940 = vmatprep.subr.mxu1 %v1665_v12  ;;  %2870 = vmatpush2.msra.mxu0 %v1408_v13  ;;  %v6234_v12 = vld [vmem:[#allocation5 + $0x38] sm:$0xff]  ;;  %v3403_v13 = vunpack.c.l.bf16 %v3053_v1  ;;  %v6674_v15 = vadd.f32 %v6638_v5, %v2034_v33  ;;  %v2971_v33 = vld [vmem:[#allocation10 + $0x60] sm:$0xff] }
 0x28e   :  { %2941 = vmatpush2.msra.mxu1 %v1664_v14  ;;  %2871 = vmatprep.subr.mxu0 %v1401_v18  ;;  %v3049_v14 = vld [vmem:[#allocation10 + $0x2d0] sm:$0xff]  ;;  %v6236_v18 = vld [vmem:[#allocation5 + $0x30] sm:$0xff] }
 0x28f   :  { %2942 = vmatprep.subr.mxu1 %v1657_v19  ;;  %2872 = vmatpush2.msra.mxu0 %v1400_v21  ;;  %v3272_v19 = vunpack.c.h.bf16 %v2987_v8  ;;  %v6676_v21 = vadd.f32 %v2388_v31, %v2318_v16  ;;  %v3396_v5 = vunpack.c.h.bf16 %v3049_v14  ;;  %v2975_v31 = vld [vmem:[#allocation10 + $0x80] sm:$0xff]  ;;  %v3037_v62 = vld [vmem:[#allocation10 + $0x270] sm:$0xff] }
 0x290   :  { %2943 = vmatpush2.msra.mxu1 %v1656_v47  ;;  %2873 = vmatprep.subr.mxu0 %v1393_v27  ;;  %v3271_v47 = vunpack.c.l.bf16 %v2987_v8  ;;  %v3267_v27 = vunpack.c.l.bf16 %v2985_v0  ;;  %v3248_v1 = vunpack.c.h.bf16 %v2975_v31  ;;  %v3035_v16 = vld [vmem:[#allocation10 + $0x260] sm:$0xff]  ;;  %v3371_v10 = vunpack.c.l.bf16 %v3037_v62 }
 0x291   :  { %2944 = vmatprep.subr.mxu1 %v1649_v28  ;;  %2874 = vmatpush2.msra.mxu0 %v1392_v29  ;;  %v3395_v28 = vunpack.c.l.bf16 %v3049_v14  ;;  %v2981_v29 = vld [vmem:[#allocation10 + $0xb0] sm:$0xff]  ;;  %v3239_v0 = vunpack.c.l.bf16 %v2971_v33  ;;  %v3367_v14 = vunpack.c.l.bf16 %v3035_v16 }
 0x292   :  { %2945 = vmatpush2.msra.mxu1 %v1648_v30  ;;  %2875 = vmatprep.subr.mxu0 %v1385_v36  ;;  %v3045_v30 = vld [vmem:[#allocation10 + $0x2b0] sm:$0xff]  ;;  %v3263_v36 = vunpack.c.l.bf16 %v2983_v23  ;;  %v3259_v43 = vunpack.c.l.bf16 %v2981_v29 }
 0x293   :  { %2946 = vmatprep.subr.mxu1 %v1641_v38  ;;  %v2457_v59 = vpop.f32.mrf.mxu0  ;;  %2876 = vmatpush2.msra.mxu0 %v1384_v40  ;;  %v3391_v38 = vunpack.c.l.bf16 %v3047_v24  ;;  %v3043_v40 = vld [vmem:[#allocation10 + $0x2a0] sm:$0xff]  ;;  %v3388_v42 = vunpack.c.h.bf16 %v3045_v30  ;;  %v2965_v23 = vld [vmem:[#allocation10 + $0x30] sm:$0xff] }
 0x294   :  { %2947 = vmatpush2.msra.mxu1 %v1640_v41  ;;  %v2458_v61 = vadd.f32 %v2457_v59, %v1810_v44  ;;  %2877 = vmatprep.subr.mxu0 %v1377_v51  ;;  %v3260_v41 = vunpack.c.h.bf16 %v2981_v29  ;;  %v3387_v44 = vunpack.c.l.bf16 %v3045_v30  ;;  %v3256_v51 = vunpack.c.h.bf16 %v2979_v39  ;;  %v3029_v24 = vld [vmem:[#allocation10 + $0x230] sm:$0xff]  ;;  %v2963_v29 = vld [vmem:[#allocation10 + $0x20] sm:$0xff] }
 0x295   :  { %2948 = vmatprep.subr.mxu1 %v1633_v54  ;;  %v2528_v4 = vpop.f32.mrf.mxu1  ;;  %2878 = vmatpush2.msra.mxu0 %v1376_v55  ;;  %v3384_v54 = vunpack.c.h.bf16 %v3043_v40  ;;  %v3255_v55 = vunpack.c.l.bf16 %v2979_v39  ;;  %v3380_v59 = vunpack.c.h.bf16 %v3041_v49  ;;  %v3027_v30 = vld [vmem:[#allocation10 + $0x220] sm:$0xff]  ;;  %v2961_v39 = vld [vmem:[#allocation10 + $0x10] sm:$0xff] }
 0x296   :  { %2949 = vmatpush2.msra.mxu1 %v1632_v25  ;;  %v6671_v6 = vadd.f32 %v2528_v4, %v2458_v61  ;;  %2879 = vmatprep.subr.mxu0 %v1369_v56  ;;  %v3383_v25 = vunpack.c.l.bf16 %v3043_v40  ;;  %v3039_v56 = vld [vmem:[#allocation10 + $0x280] sm:$0xff]  ;;  %v2973_v61 = vld [vmem:[#allocation10 + $0x70] sm:$0xff] }
 0x297   :  { %2950 = vmatprep.subr.mxu1 %v1625_v58  ;;  %2880 = vmatpush2.msra.mxu0 %v1368_v45  ;;  %v3252_v58 = vunpack.c.h.bf16 %v2977_v46  ;;  %v3379_v45 = vunpack.c.l.bf16 %v3041_v49  ;;  %v3376_v2 = vunpack.c.h.bf16 %v3039_v56  ;;  %v3375_v4 = vunpack.c.l.bf16 %v3039_v56  ;;  %v3025_v40 = vld [vmem:[#allocation10 + $0x210] sm:$0xff]  ;;  %v2959_v46 = vld [vmem:[#allocation10] sm:$0xff] }
 0x298   :  { %2881 = vmatprep.mubr.f32.mxu0 %v6233_v11  ;;  %2951 = vmatpush2.msra.mxu1 %v1624_v3  ;;  %v3247_v3 = vunpack.c.l.bf16 %v2975_v31  ;;  %v3243_v8 = vunpack.c.l.bf16 %v2973_v61  ;;  %v2969_v11 = vld [vmem:[#allocation10 + $0x50] sm:$0xff]  ;;  %v3023_v49 = vld [vmem:[#allocation10 + $0x200] sm:$0xff] }
 0x299   :  { %2952 = vmatprep.mubr.f32.mxu1 %v6234_v12  ;;  %2882 = vmatmul.mubr.f32.vlgmr.msra.gmra.mxu0 %v6235_v17  ;;  %v3240_v12 = vunpack.c.h.bf16 %v2971_v33  ;;  %v2967_v17 = vld [vmem:[#allocation10 + $0x40] sm:$0xff]  ;;  %v3021_v31 = vld [vmem:[#allocation10 + $0x1f0] sm:$0xff] }
 0x29a   :  { %2953 = vmatmul.mubr.f32.vlgmr.msra.gmra.mxu1 %v6236_v18  ;;  %3766 = vmatprep.subr.mxu0 %v3276_v37  ;;  %v3244_v37 = vunpack.c.h.bf16 %v2973_v61  ;;  %v3031_v18 = vld [vmem:[#allocation10 + $0x240] sm:$0xff]  ;;  %v3085_v56 = vld [vmem:[#allocation10 + $0x3f0] sm:$0xff] }
 0x29b   :  { %3837 = vmatprep.subr.mxu1 %v3404_v7  ;;  %3767 = vmatpush1.msra.mxu0 %v3275_v53  ;;  %v3372_v7 = vunpack.c.h.bf16 %v3037_v62  ;;  %v3033_v53 = vld [vmem:[#allocation10 + $0x250] sm:$0xff]  ;;  %v3019_v61 = vld [vmem:[#allocation10 + $0x1e0] sm:$0xff] }
 0x29c   :  { %3830 = vmatprep.mubr.f32.mxu0 %v6674_v15  ;;  %3838 = vmatpush1.msra.mxu1 %v3403_v13  ;;  %v3368_v13 = vunpack.c.h.bf16 %v3035_v16  ;;  %v3083_v62 = vld [vmem:[#allocation10 + $0x3e0] sm:$0xff]  ;;  %v3017_v33 = vld [vmem:[#allocation10 + $0x1d0] sm:$0xff] }
 0x29d   :  { %3901 = vmatprep.mubr.f32.mxu1 %v6676_v21  ;;  %3768 = vmatprep.subr.mxu0 %v3272_v19  ;;  %v3236_v19 = vunpack.c.h.bf16 %v2969_v11  ;;  %v3081_v16 = vld [vmem:[#allocation10 + $0x3d0] sm:$0xff] }
 0x29e   :  { %3839 = vmatprep.subr.mxu1 %v3400_v20  ;;  %3769 = vmatpush1.msra.mxu0 %v3271_v47  ;;  %v3364_v20 = vunpack.c.h.bf16 %v3033_v53  ;;  %v3235_v47 = vunpack.c.l.bf16 %v2969_v11  ;;  %v3015_v11 = vld [vmem:[#allocation10 + $0x1c0] sm:$0xff] }
 0x29f   :  { %3840 = vmatpush1.msra.mxu1 %v3399_v22  ;;  %3770 = vmatprep.subr.mxu0 %v3268_v26  ;;  %v3363_v22 = vunpack.c.l.bf16 %v3033_v53  ;;  %v3232_v26 = vunpack.c.h.bf16 %v2967_v17  ;;  %v3079_v53 = vld [vmem:[#allocation10 + $0x3c0] sm:$0xff] }
 0x2a0   :  { %3841 = vmatprep.subr.mxu1 %v3396_v5  ;;  %3771 = vmatpush1.msra.mxu0 %v3267_v27  ;;  %v3360_v5 = vunpack.c.h.bf16 %v3031_v18  ;;  %v3231_v27 = vunpack.c.l.bf16 %v2967_v17  ;;  %v3013_v17 = vld [vmem:[#allocation10 + $0x1b0] sm:$0xff] }
 0x2a1   :  { %3842 = vmatpush1.msra.mxu1 %v3395_v28  ;;  %3772 = vmatprep.subr.mxu0 %v3264_v32  ;;  %v3359_v28 = vunpack.c.l.bf16 %v3031_v18  ;;  %v3228_v32 = vunpack.c.h.bf16 %v2965_v23  ;;  %v3077_v18 = vld [vmem:[#allocation10 + $0x3b0] sm:$0xff] }
 0x2a2   :  { %3843 = vmatprep.subr.mxu1 %v3392_v35  ;;  %3773 = vmatpush1.msra.mxu0 %v3263_v36  ;;  %v3356_v35 = vunpack.c.h.bf16 %v3029_v24  ;;  %v3227_v36 = vunpack.c.l.bf16 %v2965_v23  ;;  %v3011_v23 = vld [vmem:[#allocation10 + $0x1a0] sm:$0xff] }
 0x2a3   :  { %3844 = vmatpush1.msra.mxu1 %v3391_v38  ;;  %3774 = vmatprep.subr.mxu0 %v3260_v41  ;;  %v3355_v38 = vunpack.c.l.bf16 %v3029_v24  ;;  %v3224_v41 = vunpack.c.h.bf16 %v2963_v29  ;;  %v3075_v24 = vld [vmem:[#allocation10 + $0x3a0] sm:$0xff] }
 0x2a4   :  { %3845 = vmatprep.subr.mxu1 %v3388_v42  ;;  %3775 = vmatpush1.msra.mxu0 %v3259_v43  ;;  %v3352_v42 = vunpack.c.h.bf16 %v3027_v30  ;;  %v3223_v43 = vunpack.c.l.bf16 %v2963_v29  ;;  %v3009_v29 = vld [vmem:[#allocation10 + $0x190] sm:$0xff] }
 0x2a5   :  { %3846 = vmatpush1.msra.mxu1 %v3387_v44  ;;  %3776 = vmatprep.subr.mxu0 %v3256_v51  ;;  %v3351_v44 = vunpack.c.l.bf16 %v3027_v30  ;;  %v3220_v51 = vunpack.c.h.bf16 %v2961_v39  ;;  %v3073_v30 = vld [vmem:[#allocation10 + $0x390] sm:$0xff] }
 0x2a6   :  { %3847 = vmatprep.subr.mxu1 %v3384_v54  ;;  %3777 = vmatpush1.msra.mxu0 %v3255_v55  ;;  %v3348_v54 = vunpack.c.h.bf16 %v3025_v40  ;;  %v3219_v55 = vunpack.c.l.bf16 %v2961_v39  ;;  %v3007_v39 = vld [vmem:[#allocation10 + $0x180] sm:$0xff] }
 0x2a7   :  { %3848 = vmatpush1.msra.mxu1 %v3383_v25  ;;  %3778 = vmatprep.subr.mxu0 %v3252_v58  ;;  %v3347_v25 = vunpack.c.l.bf16 %v3025_v40  ;;  %v3216_v58 = vunpack.c.h.bf16 %v2959_v46  ;;  %v3071_v40 = vld [vmem:[#allocation10 + $0x380] sm:$0xff] }
 0x2a8   :  { %3849 = vmatprep.subr.mxu1 %v3380_v59  ;;  %3779 = vmatpush1.msra.mxu0 %v3251_v60  ;;  %v3344_v59 = vunpack.c.h.bf16 %v3023_v49  ;;  %v3215_v60 = vunpack.c.l.bf16 %v2959_v46  ;;  %v3005_v46 = vld [vmem:[#allocation10 + $0x170] sm:$0xff] }
 0x2a9   :  { %3850 = vmatpush1.msra.mxu1 %v3379_v45  ;;  %3780 = vmatprep.subr.mxu0 %v3248_v1  ;;  %v3343_v45 = vunpack.c.l.bf16 %v3023_v49  ;;  %v3340_v1 = vunpack.c.h.bf16 %v3021_v31  ;;  %v3069_v49 = vld [vmem:[#allocation10 + $0x370] sm:$0xff] }
 0x2aa   :  { %3851 = vmatprep.subr.mxu1 %v3376_v2  ;;  %3781 = vmatpush1.msra.mxu0 %v3247_v3  ;;  %v3468_v2 = vunpack.c.h.bf16 %v3085_v56  ;;  %v3339_v3 = vunpack.c.l.bf16 %v3021_v31  ;;  %v3003_v31 = vld [vmem:[#allocation10 + $0x160] sm:$0xff] }
 0x2ab   :  { %3852 = vmatpush1.msra.mxu1 %v3375_v4  ;;  %3782 = vmatprep.subr.mxu0 %v3244_v37  ;;  %v3467_v4 = vunpack.c.l.bf16 %v3085_v56  ;;  %v3336_v37 = vunpack.c.h.bf16 %v3019_v61  ;;  %v3067_v56 = vld [vmem:[#allocation10 + $0x360] sm:$0xff] }
 0x2ac   :  { %3853 = vmatprep.subr.mxu1 %v3372_v7  ;;  %3783 = vmatpush1.msra.mxu0 %v3243_v8  ;;  %v3464_v7 = vunpack.c.h.bf16 %v3083_v62  ;;  %v3335_v8 = vunpack.c.l.bf16 %v3019_v61  ;;  %v3001_v61 = vld [vmem:[#allocation10 + $0x150] sm:$0xff] }
 0x2ad   :  { %3854 = vmatpush1.msra.mxu1 %v3371_v10  ;;  %3784 = vmatprep.subr.mxu0 %v3240_v12  ;;  %v3463_v10 = vunpack.c.l.bf16 %v3083_v62  ;;  %v3332_v12 = vunpack.c.h.bf16 %v3017_v33  ;;  %v3065_v62 = vld [vmem:[#allocation10 + $0x350] sm:$0xff] }
 0x2ae   :  { %3855 = vmatprep.subr.mxu1 %v3368_v13  ;;  %3785 = vmatpush1.msra.mxu0 %v3239_v0  ;;  %v3460_v13 = vunpack.c.h.bf16 %v3081_v16  ;;  %v3331_v0 = vunpack.c.l.bf16 %v3017_v33  ;;  %v3431_v33 = vunpack.c.l.bf16 %v3067_v56 }
 0x2af   :  { %3856 = vmatpush1.msra.mxu1 %v3367_v14  ;;  %3786 = vmatprep.subr.mxu0 %v3236_v19  ;;  %v3459_v14 = vunpack.c.l.bf16 %v3081_v16  ;;  %v3328_v19 = vunpack.c.h.bf16 %v3015_v11  ;;  %v2999_v16 = vld [vmem:[#allocation10 + $0x140] sm:$0xff] }
 0x2b0   :  { %3857 = vmatprep.subr.mxu1 %v3364_v20  ;;  %3787 = vmatpush1.msra.mxu0 %v3235_v47  ;;  %v3456_v20 = vunpack.c.h.bf16 %v3079_v53  ;;  %v3327_v47 = vunpack.c.l.bf16 %v3015_v11  ;;  %v3427_v11 = vunpack.c.l.bf16 %v3065_v62 }
 0x2b1   :  { %3858 = vmatpush1.msra.mxu1 %v3363_v22  ;;  %3788 = vmatprep.subr.mxu0 %v3232_v26  ;;  %v3455_v22 = vunpack.c.l.bf16 %v3079_v53  ;;  %v3324_v26 = vunpack.c.h.bf16 %v3013_v17  ;;  %v2997_v53 = vld [vmem:[#allocation10 + $0x130] sm:$0xff] }
 0x2b2   :  { %3859 = vmatprep.subr.mxu1 %v3360_v5  ;;  %3789 = vmatpush1.msra.mxu0 %v3231_v27  ;;  %v3452_v5 = vunpack.c.h.bf16 %v3077_v18  ;;  %v3323_v27 = vunpack.c.l.bf16 %v3013_v17  ;;  %v2459_v17 = vpop.f32.mrf.mxu0 }
 0x2b3   :  { %3860 = vmatpush1.msra.mxu1 %v3359_v28  ;;  %3790 = vmatprep.subr.mxu0 %v3228_v32  ;;  %v3451_v28 = vunpack.c.l.bf16 %v3077_v18  ;;  %v3320_v32 = vunpack.c.h.bf16 %v3011_v23  ;;  %v3295_v18 = vunpack.c.l.bf16 %v2999_v16 }
 0x2b4   :  { %3861 = vmatprep.subr.mxu1 %v3356_v35  ;;  %3791 = vmatpush1.msra.mxu0 %v3227_v36  ;;  %v3448_v35 = vunpack.c.h.bf16 %v3075_v24  ;;  %v3319_v36 = vunpack.c.l.bf16 %v3011_v23 }
 0x2b5   :  { %3862 = vmatpush1.msra.mxu1 %v3355_v38  ;;  %3792 = vmatprep.subr.mxu0 %v3224_v41  ;;  %v3447_v38 = vunpack.c.l.bf16 %v3075_v24  ;;  %v3316_v41 = vunpack.c.h.bf16 %v3009_v29  ;;  %v3291_v24 = vunpack.c.l.bf16 %v2997_v53 }
 0x2b6   :  { %3863 = vmatprep.subr.mxu1 %v3352_v42  ;;  %3793 = vmatpush1.msra.mxu0 %v3223_v43  ;;  %v3444_v42 = vunpack.c.h.bf16 %v3073_v30  ;;  %v3315_v43 = vunpack.c.l.bf16 %v3009_v29 }
 0x2b7   :  { %3864 = vmatpush1.msra.mxu1 %v3351_v44  ;;  %3794 = vmatprep.subr.mxu0 %v3220_v51  ;;  %v3443_v44 = vunpack.c.l.bf16 %v3073_v30  ;;  %v3312_v51 = vunpack.c.h.bf16 %v3007_v39 }
 0x2b8   :  { %3865 = vmatprep.subr.mxu1 %v3348_v54  ;;  %3795 = vmatpush1.msra.mxu0 %v3219_v55  ;;  %v3440_v54 = vunpack.c.h.bf16 %v3071_v40  ;;  %v3311_v55 = vunpack.c.l.bf16 %v3007_v39  ;;  %v3055_v39 = vld [vmem:[#allocation10 + $0x300] sm:$0xff] }
 0x2b9   :  { %3866 = vmatpush1.msra.mxu1 %v3347_v25  ;;  %3796 = vmatprep.subr.mxu0 %v3216_v58  ;;  %v3439_v25 = vunpack.c.l.bf16 %v3071_v40  ;;  %v3308_v58 = vunpack.c.h.bf16 %v3005_v46 }
 0x2ba   :  { %3867 = vmatprep.subr.mxu1 %v3344_v59  ;;  %3797 = vmatpush1.msra.mxu0 %v3215_v60  ;;  %v3436_v59 = vunpack.c.h.bf16 %v3069_v49  ;;  %v3307_v60 = vunpack.c.l.bf16 %v3005_v46 }
 0x2bb   :  { %3868 = vmatpush1.msra.mxu1 %v3343_v45  ;;  %3798 = vmatprep.subr.mxu0 %v3340_v1  ;;  %v3435_v45 = vunpack.c.l.bf16 %v3069_v49  ;;  %v1774_v1 = vrot.slane %v6657_v9, %v6650_v52 }
 0x2bc   :  { %3869 = vmatprep.subr.mxu1 %v3468_v2  ;;  %3799 = vmatpush2.msra.mxu0 %v3339_v3  ;;  %v3304_v2 = vunpack.c.h.bf16 %v3003_v31  ;;  %v3432_v3 = vunpack.c.h.bf16 %v3067_v56 }
 0x2bd   :  { %3870 = vmatpush2.msra.mxu1 %v3467_v4  ;;  %3800 = vmatprep.subr.mxu0 %v3336_v37  ;;  %v3303_v4 = vunpack.c.l.bf16 %v3003_v31  ;;  %v3063_v37 = vld [vmem:[#allocation10 + $0x340] sm:$0xff]  ;;  %v3407_v31 = vunpack.c.l.bf16 %v3055_v39 }
 0x2be   :  { %3871 = vmatprep.subr.mxu1 %v3464_v7  ;;  %3801 = vmatpush2.msra.mxu0 %v3335_v8  ;;  %v3300_v7 = vunpack.c.h.bf16 %v3001_v61  ;;  %v3428_v8 = vunpack.c.h.bf16 %v3065_v62 }
 0x2bf   :  { %3872 = vmatpush2.msra.mxu1 %v3463_v10  ;;  %3802 = vmatprep.subr.mxu0 %v3332_v12  ;;  %v3299_v10 = vunpack.c.l.bf16 %v3001_v61  ;;  %v3061_v12 = vld [vmem:[#allocation10 + $0x330] sm:$0xff]  ;;  %v3115_v61 = vld [vmem:[#allocation10 + $0x4e0] sm:$0xff] }
 0x2c0   :  { %3873 = vmatprep.subr.mxu1 %v3460_v13  ;;  %3803 = vmatpush2.msra.mxu0 %v3331_v0  ;;  %v1814_v13 = vrot.slane %v1774_v1, %v6616_v48  ;;  %v3296_v0 = vunpack.c.h.bf16 %v2999_v16  ;;  %v3420_v23 = vunpack.c.h.bf16 %v3061_v12  ;;  %v3528_v16 = vunpack.c.h.bf16 %v3115_v61 }
 0x2c1   :  { %3874 = vmatpush2.msra.mxu1 %v3459_v14  ;;  %3804 = vmatprep.subr.mxu0 %v3328_v19  ;;  %v3424_v14 = vunpack.c.h.bf16 %v3063_v37  ;;  %v3423_v19 = vunpack.c.l.bf16 %v3063_v37 }
 0x2c2   :  { %3875 = vmatprep.subr.mxu1 %v3456_v20  ;;  %3805 = vmatpush2.msra.mxu0 %v3327_v47  ;;  %v2995_v20 = vld [vmem:[#allocation10 + $0x120] sm:$0xff] }
 0x2c3   :  { %3876 = vmatpush2.msra.mxu1 %v3455_v22  ;;  %3806 = vmatprep.subr.mxu0 %v3324_v26  ;;  %v3059_v47 = vld [vmem:[#allocation10 + $0x320] sm:$0xff]  ;;  %v3292_v22 = vunpack.c.h.bf16 %v2997_v53  ;;  %v3419_v26 = vunpack.c.l.bf16 %v3061_v12  ;;  %v3288_v29 = vunpack.c.h.bf16 %v2995_v20 }
 0x2c4   :  { %3877 = vmatprep.subr.mxu1 %v3452_v5  ;;  %3807 = vmatpush2.msra.mxu0 %v3323_v27  ;;  %v2993_v5 = vld [vmem:[#allocation10 + $0x110] sm:$0xff]  ;;  %v3416_v30 = vunpack.c.h.bf16 %v3059_v47 }
 0x2c5   :  { %3878 = vmatpush2.msra.mxu1 %v3451_v28  ;;  %3808 = vmatprep.subr.mxu0 %v3320_v32  ;;  %v3057_v27 = vld [vmem:[#allocation10 + $0x310] sm:$0xff]  ;;  %v2460_v28 = vadd.f32 %v2459_v17, %v1814_v13  ;;  %v2530_v32 = vpop.f32.mrf.mxu1  ;;  %v3284_v40 = vunpack.c.h.bf16 %v2993_v5  ;;  %v3175_v13 = vld [vmem:[#allocation10 + $0x6c0] sm:$0xff] }
 0x2c6   :  { %3879 = vmatprep.subr.mxu1 %v3448_v35  ;;  %3809 = vmatpush2.msra.mxu0 %v3319_v36  ;;  %v3287_v35 = vunpack.c.l.bf16 %v2995_v20  ;;  %v3415_v36 = vunpack.c.l.bf16 %v3059_v47  ;;  %v3173_v20 = vld [vmem:[#allocation10 + $0x6b0] sm:$0xff] }
 0x2c7   :  { %3880 = vmatpush2.msra.mxu1 %v3447_v38  ;;  %3810 = vmatprep.subr.mxu0 %v3316_v41  ;;  %v2991_v38 = vld [vmem:[#allocation10 + $0x100] sm:$0xff]  ;;  %v3412_v41 = vunpack.c.h.bf16 %v3057_v27  ;;  %v2531_v46 = vadd.f32 %v2530_v32, %v2460_v28  ;;  %v3105_v28 = vld [vmem:[#allocation10 + $0x490] sm:$0xff]  ;;  %v3643_v32 = vunpack.c.l.bf16 %v3173_v20 }
 0x2c8   :  { %3881 = vmatprep.subr.mxu1 %v3444_v42  ;;  %3811 = vmatpush2.msra.mxu0 %v3315_v43  ;;  %v3283_v42 = vunpack.c.l.bf16 %v2993_v5  ;;  %v3411_v43 = vunpack.c.l.bf16 %v3057_v27  ;;  %v3280_v49 = vunpack.c.h.bf16 %v2991_v38  ;;  %v3171_v5 = vld [vmem:[#allocation10 + $0x6a0] sm:$0xff] }
 0x2c9   :  { %3882 = vmatpush2.msra.mxu1 %v3443_v44  ;;  %3812 = vmatprep.subr.mxu0 %v3312_v51  ;;  %v3408_v51 = vunpack.c.h.bf16 %v3055_v39  ;;  %v3640_v39 = vunpack.c.h.bf16 %v3171_v5 }
 0x2ca   :  { %3883 = vmatprep.subr.mxu1 %v3440_v54  ;;  %3813 = vmatpush2.msra.mxu0 %v3311_v55  ;;  %v3117_v55 = vld [vmem:[#allocation10 + $0x4f0] sm:$0xff] }
 0x2cb   :  { %3884 = vmatpush2.msra.mxu1 %v3439_v25  ;;  %3814 = vmatprep.subr.mxu0 %v3308_v58  ;;  %v3279_v25 = vunpack.c.l.bf16 %v2991_v38  ;;  %v3532_v62 = vunpack.c.h.bf16 %v3117_v55  ;;  %v3103_v38 = vld [vmem:[#allocation10 + $0x480] sm:$0xff] }
 0x2cc   :  { %3885 = vmatprep.subr.mxu1 %v3436_v59  ;;  %3815 = vmatpush2.msra.mxu0 %v3307_v60  ;;  %v3181_v59 = vld [vmem:[#allocation10 + $0x6f0] sm:$0xff] }
 0x2cd   :  { %3886 = vmatpush2.msra.mxu1 %v3435_v45  ;;  %3816 = vmatprep.subr.mxu0 %v3304_v2  ;;  %v3179_v2 = vld [vmem:[#allocation10 + $0x6e0] sm:$0xff]  ;;  %v3659_v37 = vunpack.c.l.bf16 %v3181_v59 }
 0x2ce   :  { %3887 = vmatprep.subr.mxu1 %v3432_v3  ;;  %3817 = vmatpush2.msra.mxu0 %v3303_v4  ;;  %v3113_v4 = vld [vmem:[#allocation10 + $0x4d0] sm:$0xff]  ;;  %v3655_v12 = vunpack.c.l.bf16 %v3179_v2 }
 0x2cf   :  { %3888 = vmatpush2.msra.mxu1 %v3431_v33  ;;  %3818 = vmatprep.subr.mxu0 %v3300_v7  ;;  %v3660_v33 = vunpack.c.h.bf16 %v3181_v59  ;;  %v3177_v7 = vld [vmem:[#allocation10 + $0x6d0] sm:$0xff]  ;;  %v3524_v53 = vunpack.c.h.bf16 %v3113_v4  ;;  %v3163_v59 = vld [vmem:[#allocation10 + $0x660] sm:$0xff] }
 0x2d0   :  { %3889 = vmatprep.subr.mxu1 %v3428_v8  ;;  %3819 = vmatpush2.msra.mxu0 %v3299_v10  ;;  %v3527_v8 = vunpack.c.l.bf16 %v3115_v61  ;;  %v3111_v10 = vld [vmem:[#allocation10 + $0x4c0] sm:$0xff]  ;;  %v3652_v17 = vunpack.c.h.bf16 %v3177_v7  ;;  %v3097_v61 = vld [vmem:[#allocation10 + $0x450] sm:$0xff] }
 0x2d1   :  { %3890 = vmatpush2.msra.mxu1 %v3427_v11  ;;  %3820 = vmatprep.subr.mxu0 %v3296_v0  ;;  %v3656_v11 = vunpack.c.h.bf16 %v3179_v2  ;;  %v3523_v0 = vunpack.c.l.bf16 %v3113_v4  ;;  %v3519_v47 = vunpack.c.l.bf16 %v3111_v10 }
 0x2d2   :  { %3891 = vmatprep.subr.mxu1 %v3424_v14  ;;  %3821 = vmatpush2.msra.mxu0 %v3295_v18  ;;  %v3109_v14 = vld [vmem:[#allocation10 + $0x4b0] sm:$0xff]  ;;  %v3520_v18 = vunpack.c.h.bf16 %v3111_v10  ;;  %v3491_v10 = vunpack.c.l.bf16 %v3097_v61 }
 0x2d3   :  { %3892 = vmatpush2.msra.mxu1 %v3423_v19  ;;  %3822 = vmatprep.subr.mxu0 %v3292_v22  ;;  %v3651_v19 = vunpack.c.l.bf16 %v3177_v7  ;;  %v3107_v22 = vld [vmem:[#allocation10 + $0x4a0] sm:$0xff]  ;;  %v3515_v27 = vunpack.c.l.bf16 %v3109_v14  ;;  %v3623_v7 = vunpack.c.l.bf16 %v3163_v59 }
 0x2d4   :  { %3893 = vmatprep.subr.mxu1 %v3420_v23  ;;  %3823 = vmatpush2.msra.mxu0 %v3291_v24  ;;  %v3648_v23 = vunpack.c.h.bf16 %v3175_v13  ;;  %v3516_v24 = vunpack.c.h.bf16 %v3109_v14 }
 0x2d5   :  { %3894 = vmatpush2.msra.mxu1 %v3419_v26  ;;  %v2599_v44 = vpop.f32.mrf.mxu0  ;;  %3824 = vmatprep.subr.mxu0 %v3288_v29  ;;  %v3647_v26 = vunpack.c.l.bf16 %v3175_v13  ;;  %v3644_v29 = vunpack.c.h.bf16 %v3173_v20 }
 0x2d6   :  { %3895 = vmatprep.subr.mxu1 %v3416_v30  ;;  %v2600_v54 = vadd.f32 %v2599_v44, %v6671_v6  ;;  %3825 = vmatpush2.msra.mxu0 %v3287_v35  ;;  %v3531_v6 = vunpack.c.l.bf16 %v3117_v55  ;;  %v3512_v30 = vunpack.c.h.bf16 %v3107_v22  ;;  %v3169_v35 = vld [vmem:[#allocation10 + $0x690] sm:$0xff]  ;;  %v3503_v55 = vunpack.c.l.bf16 %v3103_v38 }
 0x2d7   :  { %3896 = vmatpush2.msra.mxu1 %v3415_v36  ;;  %v2670_v56 = vpop.f32.mrf.mxu1  ;;  %v2601_v58 = vpop.f32.mrf.mxu0  ;;  %3826 = vmatprep.subr.mxu0 %v3284_v40  ;;  %v3511_v36 = vunpack.c.l.bf16 %v3107_v22  ;;  %v3508_v40 = vunpack.c.h.bf16 %v3105_v28  ;;  %v3101_v44 = vld [vmem:[#allocation10 + $0x470] sm:$0xff] }
 0x2d8   :  { %3897 = vmatprep.subr.mxu1 %v3412_v41  ;;  %v6684_v60 = vadd.f32 %v2670_v56, %v2600_v54  ;;  %v2602_v45 = vadd.f32 %v2601_v58, %v2531_v46  ;;  %3827 = vmatpush2.msra.mxu0 %v3283_v42  ;;  %v3639_v41 = vunpack.c.l.bf16 %v3171_v5  ;;  %v3167_v42 = vld [vmem:[#allocation10 + $0x680] sm:$0xff]  ;;  %v3636_v46 = vunpack.c.h.bf16 %v3169_v35  ;;  %v3165_v54 = vld [vmem:[#allocation10 + $0x670] sm:$0xff] }
 0x2d9   :  { %3898 = vmatpush2.msra.mxu1 %v3411_v43  ;;  %v2672_v1 = vpop.f32.mrf.mxu1  ;;  %3828 = vmatprep.subr.mxu0 %v3280_v49  ;;  %v3507_v43 = vunpack.c.l.bf16 %v3105_v28  ;;  %v3504_v49 = vunpack.c.h.bf16 %v3103_v38  ;;  %v3500_v56 = vunpack.c.h.bf16 %v3101_v44  ;;  %v3631_v58 = vunpack.c.l.bf16 %v3167_v42 }
 0x2da   :  { %3899 = vmatprep.subr.mxu1 %v3408_v51  ;;  %v6686_v3 = vadd.f32 %v2672_v1, %v2602_v45  ;;  %3829 = vmatpush2.msra.mxu0 %v3279_v25  ;;  %v3635_v51 = vunpack.c.l.bf16 %v3169_v35  ;;  %v3099_v25 = vld [vmem:[#allocation10 + $0x460] sm:$0xff]  ;;  %v3499_v45 = vunpack.c.l.bf16 %v3101_v44  ;;  %v3627_v2 = vunpack.c.l.bf16 %v3165_v54 }
 0x2db   :  { %3900 = vmatpush2.msra.mxu1 %v3407_v31  ;;  %3831 = vmatmul.mubr.f32.vlgmr.msra.gmra.mxu0 %v6628_v50  ;;  %v3632_v31 = vunpack.c.h.bf16 %v3167_v42  ;;  %v3496_v1 = vunpack.c.h.bf16 %v3099_v25  ;;  %v3495_v4 = vunpack.c.l.bf16 %v3099_v25 }
 0x2dc   :  { %3902 = vmatmul.mubr.f32.vlgmr.msra.gmra.mxu1 %v6647_v63  ;;  %3908 = vmatprep.subr.mxu0 %v3532_v62  ;;  %v3628_v62 = vunpack.c.h.bf16 %v3165_v54 }
 0x2dd   :  { %3972 = vmatprep.mubr.f32.mxu0 %v6686_v3  ;;  %3909 = vmatpush1.msra.mxu0 %v3531_v6  ;;  %v3161_v6 = vld [vmem:[#allocation10 + $0x650] sm:$0xff] }
 0x2de   :  { %3979 = vmatprep.subr.mxu1 %v3660_v33  ;;  %3910 = vmatprep.subr.mxu0 %v3528_v16  ;;  %v3095_v33 = vld [vmem:[#allocation10 + $0x440] sm:$0xff]  ;;  %v3624_v16 = vunpack.c.h.bf16 %v3163_v59  ;;  %v3619_v13 = vunpack.c.l.bf16 %v3161_v6 }
 0x2df   :  { %3980 = vmatpush1.msra.mxu1 %v3659_v37  ;;  %3911 = vmatpush1.msra.mxu0 %v3527_v8  ;;  %v3492_v37 = vunpack.c.h.bf16 %v3097_v61  ;;  %v3159_v8 = vld [vmem:[#allocation10 + $0x640] sm:$0xff]  ;;  %v3487_v14 = vunpack.c.l.bf16 %v3095_v33 }
 0x2e0   :  { %3981 = vmatprep.subr.mxu1 %v3656_v11  ;;  %3912 = vmatprep.subr.mxu0 %v3524_v53  ;;  %v3093_v11 = vld [vmem:[#allocation10 + $0x430] sm:$0xff]  ;;  %v3620_v53 = vunpack.c.h.bf16 %v3161_v6  ;;  %v3615_v20 = vunpack.c.l.bf16 %v3159_v8 }
 0x2e1   :  { %3982 = vmatpush1.msra.mxu1 %v3655_v12  ;;  %3913 = vmatpush1.msra.mxu0 %v3523_v0  ;;  %v3488_v12 = vunpack.c.h.bf16 %v3095_v33  ;;  %v3157_v0 = vld [vmem:[#allocation10 + $0x630] sm:$0xff]  ;;  %v3483_v22 = vunpack.c.l.bf16 %v3093_v11 }
 0x2e2   :  { %3983 = vmatprep.subr.mxu1 %v3652_v17  ;;  %3914 = vmatprep.subr.mxu0 %v3520_v18  ;;  %v3091_v17 = vld [vmem:[#allocation10 + $0x420] sm:$0xff]  ;;  %v3616_v18 = vunpack.c.h.bf16 %v3159_v8  ;;  %v3611_v5 = vunpack.c.l.bf16 %v3157_v0 }
 0x2e3   :  { %3984 = vmatpush1.msra.mxu1 %v3651_v19  ;;  %3915 = vmatpush1.msra.mxu0 %v3519_v47  ;;  %v3484_v19 = vunpack.c.h.bf16 %v3093_v11  ;;  %v3155_v47 = vld [vmem:[#allocation10 + $0x620] sm:$0xff]  ;;  %v3479_v28 = vunpack.c.l.bf16 %v3091_v17 }
 0x2e4   :  { %3985 = vmatprep.subr.mxu1 %v3648_v23  ;;  %3916 = vmatprep.subr.mxu0 %v3516_v24  ;;  %v3089_v23 = vld [vmem:[#allocation10 + $0x410] sm:$0xff]  ;;  %v3612_v24 = vunpack.c.h.bf16 %v3157_v0  ;;  %v3607_v35 = vunpack.c.l.bf16 %v3155_v47 }
 0x2e5   :  { %3986 = vmatpush1.msra.mxu1 %v3647_v26  ;;  %3917 = vmatpush1.msra.mxu0 %v3515_v27  ;;  %v3480_v26 = vunpack.c.h.bf16 %v3091_v17  ;;  %v3153_v27 = vld [vmem:[#allocation10 + $0x610] sm:$0xff]  ;;  %v3475_v38 = vunpack.c.l.bf16 %v3089_v23 }
 0x2e6   :  { %3987 = vmatprep.subr.mxu1 %v3644_v29  ;;  %3918 = vmatprep.subr.mxu0 %v3512_v30  ;;  %v3087_v29 = vld [vmem:[#allocation10 + $0x400] sm:$0xff]  ;;  %v3608_v30 = vunpack.c.h.bf16 %v3155_v47  ;;  %v3603_v42 = vunpack.c.l.bf16 %v3153_v27 }
 0x2e7   :  { %3988 = vmatpush1.msra.mxu1 %v3643_v32  ;;  %3919 = vmatpush1.msra.mxu0 %v3511_v36  ;;  %v3476_v32 = vunpack.c.h.bf16 %v3089_v23  ;;  %v3151_v36 = vld [vmem:[#allocation10 + $0x600] sm:$0xff]  ;;  %v3471_v44 = vunpack.c.l.bf16 %v3087_v29 }
 0x2e8   :  { %3989 = vmatprep.subr.mxu1 %v3640_v39  ;;  %3920 = vmatprep.subr.mxu0 %v3508_v40  ;;  %v3149_v39 = vld [vmem:[#allocation10 + $0x5f0] sm:$0xff]  ;;  %v3604_v40 = vunpack.c.h.bf16 %v3153_v27  ;;  %v3599_v54 = vunpack.c.l.bf16 %v3151_v36 }
 0x2e9   :  { %3990 = vmatpush1.msra.mxu1 %v3639_v41  ;;  %3921 = vmatpush1.msra.mxu0 %v3507_v43  ;;  %v3472_v41 = vunpack.c.h.bf16 %v3087_v29  ;;  %v3213_v43 = vld [vmem:[#allocation10 + $0x7f0] sm:$0xff]  ;;  %v3595_v25 = vunpack.c.l.bf16 %v3149_v39 }
 0x2ea   :  { %3991 = vmatprep.subr.mxu1 %v3636_v46  ;;  %3922 = vmatprep.subr.mxu0 %v3504_v49  ;;  %v3147_v46 = vld [vmem:[#allocation10 + $0x5e0] sm:$0xff]  ;;  %v3600_v49 = vunpack.c.h.bf16 %v3151_v36  ;;  %v3723_v59 = vunpack.c.l.bf16 %v3213_v43 }
 0x2eb   :  { %3992 = vmatpush1.msra.mxu1 %v3635_v51  ;;  %3923 = vmatpush1.msra.mxu0 %v3503_v55  ;;  %v3596_v51 = vunpack.c.h.bf16 %v3149_v39  ;;  %v3211_v55 = vld [vmem:[#allocation10 + $0x7e0] sm:$0xff]  ;;  %v3591_v61 = vunpack.c.l.bf16 %v3147_v46 }
 0x2ec   :  { %3993 = vmatprep.subr.mxu1 %v3632_v31  ;;  %3924 = vmatprep.subr.mxu0 %v3500_v56  ;;  %v3145_v31 = vld [vmem:[#allocation10 + $0x5d0] sm:$0xff]  ;;  %v3724_v56 = vunpack.c.h.bf16 %v3213_v43  ;;  %v3719_v6 = vunpack.c.l.bf16 %v3211_v55 }
 0x2ed   :  { %3994 = vmatpush1.msra.mxu1 %v3631_v58  ;;  %3925 = vmatpush1.msra.mxu0 %v3499_v45  ;;  %v3592_v58 = vunpack.c.h.bf16 %v3147_v46  ;;  %v3209_v45 = vld [vmem:[#allocation10 + $0x7d0] sm:$0xff]  ;;  %v3587_v33 = vunpack.c.l.bf16 %v3145_v31 }
 0x2ee   :  { %3995 = vmatprep.subr.mxu1 %v3628_v62  ;;  %3926 = vmatprep.subr.mxu0 %v3496_v1  ;;  %v3143_v62 = vld [vmem:[#allocation10 + $0x5c0] sm:$0xff]  ;;  %v3720_v1 = vunpack.c.h.bf16 %v3211_v55  ;;  %v3715_v8 = vunpack.c.l.bf16 %v3209_v45 }
 0x2ef   :  { %3996 = vmatpush1.msra.mxu1 %v3627_v2  ;;  %3927 = vmatpush1.msra.mxu0 %v3495_v4  ;;  %v3588_v2 = vunpack.c.h.bf16 %v3145_v31  ;;  %v3207_v4 = vld [vmem:[#allocation10 + $0x7c0] sm:$0xff]  ;;  %v3583_v11 = vunpack.c.l.bf16 %v3143_v62 }
 0x2f0   :  { %3997 = vmatprep.subr.mxu1 %v3624_v16  ;;  %3928 = vmatprep.subr.mxu0 %v3492_v37  ;;  %v3141_v16 = vld [vmem:[#allocation10 + $0x5b0] sm:$0xff]  ;;  %v3716_v37 = vunpack.c.h.bf16 %v3209_v45  ;;  %v3711_v0 = vunpack.c.l.bf16 %v3207_v4 }
 0x2f1   :  { %3998 = vmatpush1.msra.mxu1 %v3623_v7  ;;  %3929 = vmatpush1.msra.mxu0 %v3491_v10  ;;  %v3584_v7 = vunpack.c.h.bf16 %v3143_v62  ;;  %v3205_v10 = vld [vmem:[#allocation10 + $0x7b0] sm:$0xff]  ;;  %v3579_v17 = vunpack.c.l.bf16 %v3141_v16 }
 0x2f2   :  { %3999 = vmatprep.subr.mxu1 %v3620_v53  ;;  %3930 = vmatprep.subr.mxu0 %v3488_v12  ;;  %v3139_v53 = vld [vmem:[#allocation10 + $0x5a0] sm:$0xff]  ;;  %v3712_v12 = vunpack.c.h.bf16 %v3207_v4  ;;  %v3707_v47 = vunpack.c.l.bf16 %v3205_v10 }
 0x2f3   :  { %4000 = vmatpush1.msra.mxu1 %v3619_v13  ;;  %3931 = vmatpush1.msra.mxu0 %v3487_v14  ;;  %v3580_v13 = vunpack.c.h.bf16 %v3141_v16  ;;  %v3203_v14 = vld [vmem:[#allocation10 + $0x7a0] sm:$0xff]  ;;  %v3575_v23 = vunpack.c.l.bf16 %v3139_v53 }
 0x2f4   :  { %4001 = vmatprep.subr.mxu1 %v3616_v18  ;;  %3932 = vmatprep.subr.mxu0 %v3484_v19  ;;  %v3137_v18 = vld [vmem:[#allocation10 + $0x590] sm:$0xff]  ;;  %v3708_v19 = vunpack.c.h.bf16 %v3205_v10  ;;  %v3703_v27 = vunpack.c.l.bf16 %v3203_v14 }
 0x2f5   :  { %4002 = vmatpush1.msra.mxu1 %v3615_v20  ;;  %3933 = vmatpush1.msra.mxu0 %v3483_v22  ;;  %v3576_v20 = vunpack.c.h.bf16 %v3139_v53  ;;  %v3201_v22 = vld [vmem:[#allocation10 + $0x790] sm:$0xff]  ;;  %v3571_v29 = vunpack.c.l.bf16 %v3137_v18 }
 0x2f6   :  { %4003 = vmatprep.subr.mxu1 %v3612_v24  ;;  %3934 = vmatprep.subr.mxu0 %v3480_v26  ;;  %v3135_v24 = vld [vmem:[#allocation10 + $0x580] sm:$0xff]  ;;  %v3704_v26 = vunpack.c.h.bf16 %v3203_v14  ;;  %v3699_v36 = vunpack.c.l.bf16 %v3201_v22 }
 0x2f7   :  { %4004 = vmatpush1.msra.mxu1 %v3611_v5  ;;  %3935 = vmatpush1.msra.mxu0 %v3479_v28  ;;  %v3572_v5 = vunpack.c.h.bf16 %v3137_v18  ;;  %v3199_v28 = vld [vmem:[#allocation10 + $0x780] sm:$0xff]  ;;  %v3567_v39 = vunpack.c.l.bf16 %v3135_v24 }
 0x2f8   :  { %4005 = vmatprep.subr.mxu1 %v3608_v30  ;;  %3936 = vmatprep.subr.mxu0 %v3476_v32  ;;  %v3133_v30 = vld [vmem:[#allocation10 + $0x570] sm:$0xff]  ;;  %v3700_v32 = vunpack.c.h.bf16 %v3201_v22  ;;  %v3695_v43 = vunpack.c.l.bf16 %v3199_v28 }
 0x2f9   :  { %4006 = vmatpush1.msra.mxu1 %v3607_v35  ;;  %3937 = vmatpush1.msra.mxu0 %v3475_v38  ;;  %v3568_v35 = vunpack.c.h.bf16 %v3135_v24  ;;  %v3197_v38 = vld [vmem:[#allocation10 + $0x770] sm:$0xff]  ;;  %v3563_v46 = vunpack.c.l.bf16 %v3133_v30 }
 0x2fa   :  { %4007 = vmatprep.subr.mxu1 %v3604_v40  ;;  %3938 = vmatprep.subr.mxu0 %v3472_v41  ;;  %v3131_v40 = vld [vmem:[#allocation10 + $0x560] sm:$0xff]  ;;  %v3696_v41 = vunpack.c.h.bf16 %v3199_v28  ;;  %v3691_v55 = vunpack.c.l.bf16 %v3197_v38 }
 0x2fb   :  { %4008 = vmatpush1.msra.mxu1 %v3603_v42  ;;  %3939 = vmatpush1.msra.mxu0 %v3471_v44  ;;  %v3564_v42 = vunpack.c.h.bf16 %v3133_v30  ;;  %v3195_v44 = vld [vmem:[#allocation10 + $0x760] sm:$0xff]  ;;  %v3559_v31 = vunpack.c.l.bf16 %v3131_v40  ;;  %v2988_v30 = vld [vmem:[#allocation10 + $0xe8] sm:$0xff] }
 0x2fc   :  { %4009 = vmatprep.subr.mxu1 %v3600_v49  ;;  %3940 = vmatprep.subr.mxu0 %v3596_v51  ;;  %v3129_v49 = vld [vmem:[#allocation10 + $0x550] sm:$0xff]  ;;  %v3692_v51 = vunpack.c.h.bf16 %v3197_v38  ;;  %v3687_v45 = vunpack.c.l.bf16 %v3195_v44 }
 0x2fd   :  { %4010 = vmatpush1.msra.mxu1 %v3599_v54  ;;  %3941 = vmatpush2.msra.mxu0 %v3595_v25  ;;  %v3560_v54 = vunpack.c.h.bf16 %v3131_v40  ;;  %v3193_v25 = vld [vmem:[#allocation10 + $0x750] sm:$0xff]  ;;  %v3555_v62 = vunpack.c.l.bf16 %v3129_v49  ;;  %v3274_v40 = vunpack.c.h.bf16 %v2988_v30 }
 0x2fe   :  { %4011 = vmatprep.subr.mxu1 %v3724_v56  ;;  %3942 = vmatprep.subr.mxu0 %v3592_v58  ;;  %v3127_v56 = vld [vmem:[#allocation10 + $0x540] sm:$0xff]  ;;  %v3688_v58 = vunpack.c.h.bf16 %v3195_v44  ;;  %v3683_v4 = vunpack.c.l.bf16 %v3193_v25 }
 0x2ff   :  { %4012 = vmatpush2.msra.mxu1 %v3723_v59  ;;  %3943 = vmatpush2.msra.mxu0 %v3591_v61  ;;  %v3556_v59 = vunpack.c.h.bf16 %v3129_v49  ;;  %v3191_v61 = vld [vmem:[#allocation10 + $0x740] sm:$0xff]  ;;  %v3551_v16 = vunpack.c.l.bf16 %v3127_v56 }
 0x300   :  { %4013 = vmatprep.subr.mxu1 %v3720_v1  ;;  %3944 = vmatprep.subr.mxu0 %v3588_v2  ;;  %v3125_v1 = vld [vmem:[#allocation10 + $0x530] sm:$0xff]  ;;  %v3684_v2 = vunpack.c.h.bf16 %v3193_v25  ;;  %v3679_v10 = vunpack.c.l.bf16 %v3191_v61  ;;  %v2980_v25 = vld [vmem:[#allocation10 + $0xa8] sm:$0xff] }
 0x301   :  { %4014 = vmatpush2.msra.mxu1 %v3719_v6  ;;  %3945 = vmatpush2.msra.mxu0 %v3587_v33  ;;  %v3552_v6 = vunpack.c.h.bf16 %v3127_v56  ;;  %v3189_v33 = vld [vmem:[#allocation10 + $0x730] sm:$0xff]  ;;  %v3547_v53 = vunpack.c.l.bf16 %v3125_v1 }
 0x302   :  { %4015 = vmatprep.subr.mxu1 %v3716_v37  ;;  %3946 = vmatprep.subr.mxu0 %v3584_v7  ;;  %v3123_v37 = vld [vmem:[#allocation10 + $0x520] sm:$0xff]  ;;  %v3680_v7 = vunpack.c.h.bf16 %v3191_v61  ;;  %v3675_v14 = vunpack.c.l.bf16 %v3189_v33  ;;  %v2976_v61 = vld [vmem:[#allocation10 + $0x88] sm:$0xff] }
 0x303   :  { %4016 = vmatpush2.msra.mxu1 %v3715_v8  ;;  %3947 = vmatpush2.msra.mxu0 %v3583_v11  ;;  %v3548_v8 = vunpack.c.h.bf16 %v3125_v1  ;;  %v3187_v11 = vld [vmem:[#allocation10 + $0x720] sm:$0xff]  ;;  %v3543_v18 = vunpack.c.l.bf16 %v3123_v37  ;;  %v2974_v1 = vld [vmem:[#allocation10 + $0x78] sm:$0xff] }
 0x304   :  { %4017 = vmatprep.subr.mxu1 %v3712_v12  ;;  %3948 = vmatprep.subr.mxu0 %v3580_v13  ;;  %v3121_v12 = vld [vmem:[#allocation10 + $0x510] sm:$0xff]  ;;  %v3676_v13 = vunpack.c.h.bf16 %v3189_v33  ;;  %v3671_v22 = vunpack.c.l.bf16 %v3187_v11  ;;  %v3246_v33 = vunpack.c.h.bf16 %v2974_v1 }
 0x305   :  { %4018 = vmatpush2.msra.mxu1 %v3711_v0  ;;  %3949 = vmatpush2.msra.mxu0 %v3579_v17  ;;  %v3544_v0 = vunpack.c.h.bf16 %v3123_v37  ;;  %v3185_v17 = vld [vmem:[#allocation10 + $0x710] sm:$0xff]  ;;  %v3539_v24 = vunpack.c.l.bf16 %v3121_v12  ;;  %v2970_v37 = vld [vmem:[#allocation10 + $0x58] sm:$0xff] }
 0x306   :  { %4019 = vmatprep.subr.mxu1 %v3708_v19  ;;  %3950 = vmatprep.subr.mxu0 %v3576_v20  ;;  %v3119_v19 = vld [vmem:[#allocation10 + $0x500] sm:$0xff]  ;;  %v3672_v20 = vunpack.c.h.bf16 %v3187_v11  ;;  %v3667_v28 = vunpack.c.l.bf16 %v3185_v17  ;;  %v3238_v11 = vunpack.c.h.bf16 %v2970_v37 }
 0x307   :  { %4020 = vmatpush2.msra.mxu1 %v3707_v47  ;;  %3951 = vmatpush2.msra.mxu0 %v3575_v23  ;;  %v3540_v47 = vunpack.c.h.bf16 %v3121_v12  ;;  %v3183_v23 = vld [vmem:[#allocation10 + $0x700] sm:$0xff]  ;;  %v2966_v12 = vld [vmem:[#allocation10 + $0x38] sm:$0xff] }
 0x308   :  { %4021 = vmatprep.subr.mxu1 %v3704_v26  ;;  %3952 = vmatprep.subr.mxu0 %v3572_v5  ;;  %v2990_v26 = vld [vmem:[#allocation10 + $0xf8] sm:$0xff]  ;;  %v3668_v5 = vunpack.c.h.bf16 %v3185_v17  ;;  %v3230_v17 = vunpack.c.h.bf16 %v2966_v12 }
 0x309   :  { %4022 = vmatpush2.msra.mxu1 %v3703_v27  ;;  %3953 = vmatpush2.msra.mxu0 %v3571_v29  ;;  %v3536_v27 = vunpack.c.h.bf16 %v3119_v19  ;;  %v3535_v29 = vunpack.c.l.bf16 %v3119_v19  ;;  %v3277_v38 = vunpack.c.l.bf16 %v2990_v26  ;;  %v2962_v19 = vld [vmem:[#allocation10 + $0x18] sm:$0xff] }
 0x30a   :  { %4023 = vmatprep.subr.mxu1 %v3700_v32  ;;  %3954 = vmatprep.subr.mxu0 %v3568_v35  ;;  %v3664_v32 = vunpack.c.h.bf16 %v3183_v23  ;;  %v3278_v35 = vunpack.c.h.bf16 %v2990_v26  ;;  %v3022_v26 = vld [vmem:[#allocation10 + $0x1f8] sm:$0xff] }
 0x30b   :  { %4024 = vmatpush2.msra.mxu1 %v3699_v36  ;;  %3955 = vmatpush2.msra.mxu0 %v3567_v39  ;;  %v6691_v36 = vld [vmem:[#allocation10 + $0x2f8] sm:$0xff] }
 0x30c   :  { %4025 = vmatprep.subr.mxu1 %v3696_v41  ;;  %3956 = vmatprep.subr.mxu0 %v3564_v42  ;;  %v2986_v39 = vld [vmem:[#allocation10 + $0xd8] sm:$0xff]  ;;  %v3663_v41 = vunpack.c.l.bf16 %v3183_v23  ;;  %v3273_v42 = vunpack.c.l.bf16 %v2988_v30  ;;  %v3406_v44 = vunpack.c.h.bf16 %v6691_v36  ;;  %v3222_v23 = vunpack.c.h.bf16 %v2962_v19 }
 0x30d   :  { %4026 = vmatpush2.msra.mxu1 %v3695_v43  ;;  %3957 = vmatpush2.msra.mxu0 %v3563_v46  ;;  %v2984_v43 = vld [vmem:[#allocation10 + $0xc8] sm:$0xff]  ;;  %v3270_v46 = vunpack.c.h.bf16 %v2986_v39  ;;  %v3269_v49 = vunpack.c.l.bf16 %v2986_v39  ;;  %v3341_v30 = vunpack.c.l.bf16 %v3022_v26 }
 0x30e   :  { %4027 = vmatprep.subr.mxu1 %v3692_v51  ;;  %3958 = vmatprep.subr.mxu0 %v3560_v54  ;;  %v2982_v51 = vld [vmem:[#allocation10 + $0xb8] sm:$0xff]  ;;  %v3266_v54 = vunpack.c.h.bf16 %v2984_v43  ;;  %v3016_v39 = vld [vmem:[#allocation10 + $0x1c8] sm:$0xff] }
 0x30f   :  { %4028 = vmatpush2.msra.mxu1 %v3691_v55  ;;  %3959 = vmatpush2.msra.mxu0 %v3559_v31  ;;  %v3265_v55 = vunpack.c.l.bf16 %v2984_v43  ;;  %v3262_v31 = vunpack.c.h.bf16 %v2982_v51  ;;  %v3261_v56 = vunpack.c.l.bf16 %v2982_v51  ;;  %v3330_v43 = vunpack.c.h.bf16 %v3016_v39 }
 0x310   :  { %4029 = vmatprep.subr.mxu1 %v3688_v58  ;;  %3960 = vmatprep.subr.mxu0 %v3556_v59  ;;  %v2978_v58 = vld [vmem:[#allocation10 + $0x98] sm:$0xff]  ;;  %v3258_v59 = vunpack.c.h.bf16 %v2980_v25 }
 0x311   :  { %4030 = vmatpush2.msra.mxu1 %v3687_v45  ;;  %3961 = vmatpush2.msra.mxu0 %v3555_v62  ;;  %v3257_v45 = vunpack.c.l.bf16 %v2980_v25  ;;  %v3253_v62 = vunpack.c.l.bf16 %v2978_v58 }
 0x312   :  { %4031 = vmatprep.subr.mxu1 %v3684_v2  ;;  %3962 = vmatprep.subr.mxu0 %v3552_v6  ;;  %v3250_v2 = vunpack.c.h.bf16 %v2976_v61  ;;  %v3249_v6 = vunpack.c.l.bf16 %v2976_v61 }
 0x313   :  { %4032 = vmatpush2.msra.mxu1 %v3683_v4  ;;  %3963 = vmatpush2.msra.mxu0 %v3551_v16  ;;  %v2972_v4 = vld [vmem:[#allocation10 + $0x68] sm:$0xff]  ;;  %v3245_v16 = vunpack.c.l.bf16 %v2974_v1 }
 0x314   :  { %4033 = vmatprep.subr.mxu1 %v3680_v7  ;;  %3964 = vmatprep.subr.mxu0 %v3548_v8  ;;  %v3242_v7 = vunpack.c.h.bf16 %v2972_v4  ;;  %v3241_v8 = vunpack.c.l.bf16 %v2972_v4 }
 0x315   :  { %4034 = vmatpush2.msra.mxu1 %v3679_v10  ;;  %3965 = vmatpush2.msra.mxu0 %v3547_v53  ;;  %v2968_v10 = vld [vmem:[#allocation10 + $0x48] sm:$0xff]  ;;  %v3237_v53 = vunpack.c.l.bf16 %v2970_v37  ;;  %v1778_v37 = vrot.slane %v6657_v9, %v6631_v34 }
 0x316   :  { %4035 = vmatprep.subr.mxu1 %v3676_v13  ;;  %3966 = vmatprep.subr.mxu0 %v3544_v0  ;;  %v3234_v13 = vunpack.c.h.bf16 %v2968_v10  ;;  %v3233_v0 = vunpack.c.l.bf16 %v2968_v10  ;;  %v1782_v10 = vrot.slane %v6657_v9, %v6653_v57  ;;  %v6996_v57 = vld [vmem:[#allocation13 + $0x160] sm:$0xff] }
 0x317   :  { %4036 = vmatpush2.msra.mxu1 %v3675_v14  ;;  %3967 = vmatpush2.msra.mxu0 %v3543_v18  ;;  %v2964_v14 = vld [vmem:[#allocation10 + $0x28] sm:$0xff]  ;;  %v3229_v18 = vunpack.c.l.bf16 %v2966_v12 }
 0x318   :  { %4037 = vmatprep.subr.mxu1 %v3672_v20  ;;  %3968 = vmatprep.subr.mxu0 %v3540_v47  ;;  %v3226_v20 = vunpack.c.h.bf16 %v2964_v14  ;;  %v3225_v47 = vunpack.c.l.bf16 %v2964_v14  ;;  %v1818_v14 = vrot.slane %v1778_v37, %v6616_v48  ;;  %v3106_v37 = vld [vmem:[#allocation10 + $0x498] sm:$0xff] }
 0x319   :  { %4038 = vmatpush2.msra.mxu1 %v3671_v22  ;;  %3969 = vmatpush2.msra.mxu0 %v3539_v24  ;;  %v2960_v22 = vld [vmem:[#allocation10 + $0x8] sm:$0xff]  ;;  %v3221_v24 = vunpack.c.l.bf16 %v2962_v19  ;;  %v1822_v19 = vrot.slane %v1782_v10, %v6616_v48 }
 0x31a   :  { %4039 = vmatprep.subr.mxu1 %v3668_v5  ;;  %3970 = vmatprep.subr.mxu0 %v3536_v27  ;;  %v3218_v5 = vunpack.c.h.bf16 %v2960_v22  ;;  %v3217_v27 = vunpack.c.l.bf16 %v2960_v22 }
 0x31b   :  { %4040 = vmatpush2.msra.mxu1 %v3667_v28  ;;  %3971 = vmatpush2.msra.mxu0 %v3535_v29  ;;  %v3020_v28 = vld [vmem:[#allocation10 + $0x1e8] sm:$0xff]  ;;  %v3342_v29 = vunpack.c.h.bf16 %v3022_v26 }
 0x31c   :  { %4041 = vmatprep.subr.mxu1 %v3664_v32  ;;  %3973 = vmatmul.mubr.f32.vlgmr.msra.gmra.mxu0 %v6684_v60  ;;  %v3018_v32 = vld [vmem:[#allocation10 + $0x1d8] sm:$0xff] }
 0x31d   :  { %4050 = vmatprep.subr.mxu0 %v3278_v35  ;;  %4114 = vmatprep.mubr.f32.mxu0 %v6674_v15  ;;  %v3254_v15 = vunpack.c.h.bf16 %v2978_v58  ;;  %v3338_v35 = vunpack.c.h.bf16 %v3020_v28 }
 0x31e   :  { %4051 = vmatpush1.msra.mxu0 %v3277_v38  ;;  %4042 = vmatpush2.msra.mxu1 %v3663_v41  ;;  %v3337_v38 = vunpack.c.l.bf16 %v3020_v28  ;;  %v3333_v41 = vunpack.c.l.bf16 %v3018_v32 }
 0x31f   :  { %4052 = vmatprep.subr.mxu0 %v3274_v40  ;;  %4121 = vmatprep.subr.mxu1 %v3406_v44  ;;  %v3334_v40 = vunpack.c.h.bf16 %v3018_v32  ;;  %v3329_v44 = vunpack.c.l.bf16 %v3016_v39 }
 0x320   :  { %4053 = vmatpush1.msra.mxu0 %v3273_v42  ;;  %v3014_v42 = vld [vmem:[#allocation10 + $0x1b8] sm:$0xff] }
 0x321   :  { %4054 = vmatprep.subr.mxu0 %v3270_v46  ;;  %v3012_v46 = vld [vmem:[#allocation10 + $0x1a8] sm:$0xff]  ;;  %v3325_v51 = vunpack.c.l.bf16 %v3014_v42 }
 0x322   :  { %4055 = vmatpush1.msra.mxu0 %v3269_v49  ;;  %v3326_v49 = vunpack.c.h.bf16 %v3014_v42  ;;  %v3321_v25 = vunpack.c.l.bf16 %v3012_v46 }
 0x323   :  { %4056 = vmatprep.subr.mxu0 %v3266_v54  ;;  %v3010_v54 = vld [vmem:[#allocation10 + $0x198] sm:$0xff] }
 0x324   :  { %4057 = vmatpush1.msra.mxu0 %v3265_v55  ;;  %v3322_v55 = vunpack.c.h.bf16 %v3012_v46  ;;  %v3317_v58 = vunpack.c.l.bf16 %v3010_v54 }
 0x325   :  { %4058 = vmatprep.subr.mxu0 %v3262_v31  ;;  %v3008_v31 = vld [vmem:[#allocation10 + $0x188] sm:$0xff] }
 0x326   :  { %4059 = vmatpush1.msra.mxu0 %v3261_v56  ;;  %v3318_v56 = vunpack.c.h.bf16 %v3010_v54  ;;  %v3313_v61 = vunpack.c.l.bf16 %v3008_v31 }
 0x327   :  { %4060 = vmatprep.subr.mxu0 %v3258_v59  ;;  %v3006_v59 = vld [vmem:[#allocation10 + $0x178] sm:$0xff] }
 0x328   :  { %4061 = vmatpush1.msra.mxu0 %v3257_v45  ;;  %v3314_v45 = vunpack.c.h.bf16 %v3008_v31  ;;  %v3309_v1 = vunpack.c.l.bf16 %v3006_v59 }
 0x329   :  { %4062 = vmatprep.subr.mxu0 %v3254_v15  ;;  %v3004_v15 = vld [vmem:[#allocation10 + $0x168] sm:$0xff] }
 0x32a   :  { %4063 = vmatpush1.msra.mxu0 %v3253_v62  ;;  %v3310_v62 = vunpack.c.h.bf16 %v3006_v59  ;;  %v3305_v4 = vunpack.c.l.bf16 %v3004_v15 }
 0x32b   :  { %4064 = vmatprep.subr.mxu0 %v3250_v2  ;;  %v3002_v2 = vld [vmem:[#allocation10 + $0x158] sm:$0xff] }
 0x32c   :  { %4065 = vmatpush1.msra.mxu0 %v3249_v6  ;;  %v3306_v6 = vunpack.c.h.bf16 %v3004_v15 }
 0x32d   :  { %4066 = vmatprep.subr.mxu0 %v3246_v33  ;;  %v3000_v33 = vld [vmem:[#allocation10 + $0x148] sm:$0xff] }
 0x32e   :  { %4067 = vmatpush1.msra.mxu0 %v3245_v16  ;;  %v3302_v16 = vunpack.c.h.bf16 %v3002_v2  ;;  %v3297_v12 = vunpack.c.l.bf16 %v3000_v33 }
 0x32f   :  { %4068 = vmatprep.subr.mxu0 %v3242_v7  ;;  %v3301_v7 = vunpack.c.l.bf16 %v3002_v2 }
 0x330   :  { %4069 = vmatpush1.msra.mxu0 %v3241_v8  ;;  %v2998_v8 = vld [vmem:[#allocation10 + $0x138] sm:$0xff] }
 0x331   :  { %4070 = vmatprep.subr.mxu0 %v3238_v11  ;;  %v3298_v11 = vunpack.c.h.bf16 %v3000_v33 }
 0x332   :  { %4071 = vmatpush1.msra.mxu0 %v3237_v53  ;;  %v2741_v53 = vpop.f32.mrf.mxu0 }
 0x333   :  { %4072 = vmatprep.subr.mxu0 %v3234_v13  ;;  %v2996_v13 = vld [vmem:[#allocation10 + $0x128] sm:$0xff]  ;;  %v2742_v26 = vadd.f32 %v2741_v53, %v1818_v14  ;;  %v3509_v14 = vunpack.c.l.bf16 %v3106_v37 }
 0x334   :  { %4073 = vmatpush1.msra.mxu0 %v3233_v0  ;;  %v3294_v0 = vunpack.c.h.bf16 %v2998_v8  ;;  %v2743_v22 = vpop.f32.mrf.mxu0  ;;  %v3289_v9 = vunpack.c.l.bf16 %v2996_v13  ;;  %v3104_v53 = vld [vmem:[#allocation10 + $0x488] sm:$0xff] }
 0x335   :  { %4074 = vmatprep.subr.mxu0 %v3230_v17  ;;  %v3293_v17 = vunpack.c.l.bf16 %v2998_v8  ;;  %v2744_v28 = vadd.f32 %v2743_v22, %v1822_v19  ;;  %v3044_v19 = vld [vmem:[#allocation10 + $0x2a8] sm:$0xff]  ;;  %v3505_v22 = vunpack.c.l.bf16 %v3104_v53 }
 0x336   :  { %4075 = vmatpush1.msra.mxu0 %v3229_v18  ;;  %v2994_v18 = vld [vmem:[#allocation10 + $0x118] sm:$0xff] }
 0x337   :  { %4076 = vmatprep.subr.mxu0 %v3226_v20  ;;  %v3290_v20 = vunpack.c.h.bf16 %v2996_v13  ;;  %v3510_v13 = vunpack.c.h.bf16 %v3106_v37 }
 0x338   :  { %4077 = vmatpush1.msra.mxu0 %v3225_v47  ;;  %v2812_v47 = vpop.f32.mrf.mxu1 }
 0x339   :  { %4078 = vmatprep.subr.mxu0 %v3222_v23  ;;  %v2992_v23 = vld [vmem:[#allocation10 + $0x108] sm:$0xff]  ;;  %v2813_v39 = vadd.f32 %v2812_v47, %v2742_v26  ;;  %v3386_v26 = vunpack.c.h.bf16 %v3044_v19 }
 0x33a   :  { %4079 = vmatpush1.msra.mxu0 %v3221_v24  ;;  %v3286_v24 = vunpack.c.h.bf16 %v2994_v18  ;;  %v3281_v32 = vunpack.c.l.bf16 %v2992_v23 }
 0x33b   :  { %4080 = vmatprep.subr.mxu0 %v3218_v5  ;;  %v3285_v5 = vunpack.c.l.bf16 %v2994_v18  ;;  %v3102_v18 = vld [vmem:[#allocation10 + $0x478] sm:$0xff] }
 0x33c   :  { %4081 = vmatpush1.msra.mxu0 %v3217_v27  ;;  %v3118_v27 = vld [vmem:[#allocation10 + $0x4f8] sm:$0xff] }
 0x33d   :  { %4082 = vmatprep.subr.mxu0 %v3342_v29  ;;  %v3282_v29 = vunpack.c.h.bf16 %v2992_v23  ;;  %v3533_v42 = vunpack.c.l.bf16 %v3118_v27  ;;  %v3100_v23 = vld [vmem:[#allocation10 + $0x468] sm:$0xff] }
 0x33e   :  { %4083 = vmatpush2.msra.mxu0 %v3341_v30  ;;  %v2814_v30 = vpop.f32.mrf.mxu1 }
 0x33f   :  { %4084 = vmatprep.subr.mxu0 %v3338_v35  ;;  %v3116_v35 = vld [vmem:[#allocation10 + $0x4e8] sm:$0xff] }
 0x340   :  { %4085 = vmatpush2.msra.mxu0 %v3337_v38  ;;  %v3534_v38 = vunpack.c.h.bf16 %v3118_v27  ;;  %v3530_v46 = vunpack.c.h.bf16 %v3116_v35  ;;  %v3529_v54 = vunpack.c.l.bf16 %v3116_v35  ;;  %v3385_v27 = vunpack.c.l.bf16 %v3044_v19 }
 0x341   :  { %4086 = vmatprep.subr.mxu0 %v3334_v40  ;;  %v3497_v35 = vunpack.c.l.bf16 %v3100_v23 }
 0x342   :  { %4087 = vmatpush2.msra.mxu0 %v3333_v41 }
 0x343   :  { %4088 = vmatprep.subr.mxu0 %v3330_v43  ;;  %v3114_v43 = vld [vmem:[#allocation10 + $0x4d8] sm:$0xff] }
 0x344   :  { %4089 = vmatpush2.msra.mxu0 %v3329_v44  ;;  %v2815_v44 = vadd.f32 %v2814_v30, %v2744_v28  ;;  %v3526_v31 = vunpack.c.h.bf16 %v3114_v43  ;;  %v3525_v59 = vunpack.c.l.bf16 %v3114_v43  ;;  %v3098_v28 = vld [vmem:[#allocation10 + $0x458] sm:$0xff]  ;;  %v3498_v30 = vunpack.c.h.bf16 %v3100_v23 }
 0x345   :  { %4090 = vmatprep.subr.mxu0 %v3326_v49  ;;  %v3493_v43 = vunpack.c.l.bf16 %v3098_v28 }
 0x346   :  { %4091 = vmatpush2.msra.mxu0 %v3325_v51 }
 0x347   :  { %4092 = vmatprep.subr.mxu0 %v3322_v55  ;;  %v3112_v55 = vld [vmem:[#allocation10 + $0x4c8] sm:$0xff] }
 0x348   :  { %4093 = vmatpush2.msra.mxu0 %v3321_v25  ;;  %v3522_v15 = vunpack.c.h.bf16 %v3112_v55 }
 0x349   :  { %4094 = vmatprep.subr.mxu0 %v3318_v56  ;;  %v3052_v56 = vld [vmem:[#allocation10 + $0x2e8] sm:$0xff] }
 0x34a   :  { %4095 = vmatpush2.msra.mxu0 %v3317_v58  ;;  %v3402_v2 = vunpack.c.h.bf16 %v3052_v56 }
 0x34b   :  { %4096 = vmatprep.subr.mxu0 %v3314_v45  ;;  %v3110_v45 = vld [vmem:[#allocation10 + $0x4b8] sm:$0xff] }
 0x34c   :  { %4097 = vmatpush2.msra.mxu0 %v3313_v61  ;;  %v3517_v33 = vunpack.c.l.bf16 %v3110_v45 }
 0x34d   :  { %4098 = vmatprep.subr.mxu0 %v3310_v62  ;;  %v3405_v62 = vunpack.c.l.bf16 %v6691_v36 }
 0x34e   :  { %4099 = vmatpush2.msra.mxu0 %v3309_v1 }
 0x34f   :  { %4100 = vmatprep.subr.mxu0 %v3306_v6  ;;  %v3108_v6 = vld [vmem:[#allocation10 + $0x4a8] sm:$0xff] }
 0x350   :  { %4101 = vmatpush2.msra.mxu0 %v3305_v4  ;;  %v3050_v4 = vld [vmem:[#allocation10 + $0x2d8] sm:$0xff]  ;;  %v3514_v36 = vunpack.c.h.bf16 %v3108_v6  ;;  %v3513_v10 = vunpack.c.l.bf16 %v3108_v6 }
 0x351   :  { %4102 = vmatprep.subr.mxu0 %v3302_v16  ;;  %v3401_v16 = vunpack.c.l.bf16 %v3052_v56  ;;  %v3398_v8 = vunpack.c.h.bf16 %v3050_v4  ;;  %v3034_v56 = vld [vmem:[#allocation10 + $0x258] sm:$0xff] }
 0x352   :  { %4103 = vmatpush2.msra.mxu0 %v3301_v7  ;;  %v3048_v7 = vld [vmem:[#allocation10 + $0x2c8] sm:$0xff]  ;;  %v3366_v6 = vunpack.c.h.bf16 %v3034_v56 }
 0x353   :  { %4104 = vmatprep.subr.mxu0 %v3298_v11  ;;  %v3397_v11 = vunpack.c.l.bf16 %v3050_v4 }
 0x354   :  { %4105 = vmatpush2.msra.mxu0 %v3297_v12  ;;  %v3046_v12 = vld [vmem:[#allocation10 + $0x2b8] sm:$0xff] }
 0x355   :  { %4106 = vmatprep.subr.mxu0 %v3294_v0  ;;  %v3394_v0 = vunpack.c.h.bf16 %v3048_v7  ;;  %v3390_v47 = vunpack.c.h.bf16 %v3046_v12 }
 0x356   :  { %4107 = vmatpush2.msra.mxu0 %v3293_v17  ;;  %v3393_v17 = vunpack.c.l.bf16 %v3048_v7 }
 0x357   :  { %4108 = vmatprep.subr.mxu0 %v3290_v20  ;;  %v3506_v20 = vunpack.c.h.bf16 %v3104_v53 }
 0x358   :  { %4109 = vmatpush2.msra.mxu0 %v3289_v9  ;;  %v3389_v9 = vunpack.c.l.bf16 %v3046_v12 }
 0x359   :  { %4110 = vmatprep.subr.mxu0 %v3286_v24  ;;  %v2883_v40 = vpop.f32.mrf.mxu0  ;;  %v3042_v24 = vld [vmem:[#allocation10 + $0x298] sm:$0xff] }
 0x35a   :  { %4111 = vmatpush2.msra.mxu0 %v3285_v5  ;;  %v2954_v41 = vpop.f32.mrf.mxu1  ;;  %v2884_v49 = vadd.f32 %v2883_v40, %v2813_v39  ;;  %v3501_v5 = vunpack.c.l.bf16 %v3102_v18  ;;  %v3096_v39 = vld [vmem:[#allocation10 + $0x448] sm:$0xff]  ;;  %v3038_v40 = vld [vmem:[#allocation10 + $0x278] sm:$0xff] }
 0x35b   :  { %4112 = vmatprep.subr.mxu0 %v3282_v29  ;;  %v2885_v51 = vpop.f32.mrf.mxu0  ;;  %v3040_v29 = vld [vmem:[#allocation10 + $0x288] sm:$0xff] }
 0x35c   :  { %4113 = vmatpush2.msra.mxu0 %v3281_v32  ;;  %v2886_v25 = vadd.f32 %v2885_v51, %v2815_v44  ;;  %v2956_v58 = vpop.f32.mrf.mxu1  ;;  %v6707_v1 = vadd.f32 %v2954_v41, %v2884_v49  ;;  %v3382_v32 = vunpack.c.h.bf16 %v3042_v24  ;;  %v3494_v41 = vunpack.c.h.bf16 %v3098_v28  ;;  %v3036_v49 = vld [vmem:[#allocation10 + $0x268] sm:$0xff] }
 0x35d   :  { %4115 = vmatmul.mubr.f32.vlgmr.msra.gmra.mxu0 %v6628_v50  ;;  %4192 = vmatprep.subr.mxu0 %v3534_v38  ;;  %v3521_v50 = vunpack.c.l.bf16 %v3112_v55  ;;  %v3381_v38 = vunpack.c.l.bf16 %v3042_v24  ;;  %v3377_v44 = vunpack.c.l.bf16 %v3040_v29  ;;  %v3490_v51 = vunpack.c.h.bf16 %v3096_v39 }
 0x35e   :  { %4193 = vmatpush1.msra.mxu0 %v3533_v42  ;;  %4256 = vmatprep.mubr.f32.mxu0 %v6686_v3  ;;  %v6704_v61 = vadd.f32 %v2956_v58, %v2886_v25  ;;  %7276 = vst [vmem:[#allocation32_spill] sm:$0xff] %v6707_v1  ;;  %v3518_v3 = vunpack.c.h.bf16 %v3110_v45  ;;  %v3378_v42 = vunpack.c.h.bf16 %v3040_v29  ;;  %v3489_v55 = vunpack.c.l.bf16 %v3096_v39 }
 0x35f   :  { %4194 = vmatprep.subr.mxu0 %v3530_v46  ;;  %v3094_v46 = vld [vmem:[#allocation10 + $0x438] sm:$0xff]  ;;  %v3373_v25 = vunpack.c.l.bf16 %v3038_v40 }
 0x360   :  { %4195 = vmatpush1.msra.mxu0 %v3529_v54  ;;  %4043 = vmatprep.mubr.f32.mxu1 %v6704_v61  ;;  %v3374_v54 = vunpack.c.h.bf16 %v3038_v40  ;;  %v3486_v58 = vunpack.c.h.bf16 %v3094_v46  ;;  %v3485_v45 = vunpack.c.l.bf16 %v3094_v46 }
 0x361   :  { %4196 = vmatprep.subr.mxu0 %v3526_v31  ;;  %4044 = vmatmul.mubr.f32.vlgmr.msra.gmra.mxu1 %v6707_v1  ;;  %v3092_v31 = vld [vmem:[#allocation10 + $0x428] sm:$0xff] }
 0x362   :  { %4197 = vmatpush1.msra.mxu0 %v3525_v59  ;;  %4122 = vmatpush1.msra.mxu1 %v3405_v62  ;;  %v3370_v59 = vunpack.c.h.bf16 %v3036_v49  ;;  %v3090_v62 = vld [vmem:[#allocation10 + $0x418] sm:$0xff]  ;;  %v3481_v4 = vunpack.c.l.bf16 %v3092_v31 }
 0x363   :  { %4198 = vmatprep.subr.mxu0 %v3522_v15  ;;  %4123 = vmatprep.subr.mxu1 %v3402_v2  ;;  %v3369_v15 = vunpack.c.l.bf16 %v3036_v49  ;;  %v3482_v2 = vunpack.c.h.bf16 %v3092_v31  ;;  %v3478_v37 = vunpack.c.h.bf16 %v3090_v62 }
 0x364   :  { %4199 = vmatpush1.msra.mxu0 %v3521_v50  ;;  %4185 = vmatprep.mubr.f32.mxu1 %v6676_v21  ;;  %v3502_v21 = vunpack.c.h.bf16 %v3102_v18  ;;  %v3032_v50 = vld [vmem:[#allocation10 + $0x248] sm:$0xff] }
 0x365   :  { %4200 = vmatprep.subr.mxu0 %v3518_v3  ;;  %4124 = vmatpush1.msra.mxu1 %v3401_v16  ;;  %v3365_v3 = vunpack.c.l.bf16 %v3034_v56  ;;  %v3030_v16 = vld [vmem:[#allocation10 + $0x238] sm:$0xff]  ;;  %v3362_v7 = vunpack.c.h.bf16 %v3032_v50 }
 0x366   :  { %4201 = vmatpush1.msra.mxu0 %v3517_v33  ;;  %4125 = vmatprep.subr.mxu1 %v3398_v8  ;;  %v3088_v33 = vld [vmem:[#allocation10 + $0x408] sm:$0xff]  ;;  %v3361_v8 = vunpack.c.l.bf16 %v3032_v50  ;;  %v3358_v12 = vunpack.c.h.bf16 %v3030_v16 }
 0x367   :  { %4202 = vmatprep.subr.mxu0 %v3514_v36  ;;  %4126 = vmatpush1.msra.mxu1 %v3397_v11  ;;  %v3477_v36 = vunpack.c.l.bf16 %v3090_v62  ;;  %v3028_v11 = vld [vmem:[#allocation10 + $0x228] sm:$0xff]  ;;  %v3474_v53 = vunpack.c.h.bf16 %v3088_v33 }
 0x368   :  { %4203 = vmatpush1.msra.mxu0 %v3513_v10  ;;  %4127 = vmatprep.subr.mxu1 %v3394_v0  ;;  %v3150_v10 = vld [vmem:[#allocation10 + $0x5f8] sm:$0xff]  ;;  %v3357_v0 = vunpack.c.l.bf16 %v3030_v16  ;;  %v3354_v19 = vunpack.c.h.bf16 %v3028_v11 }
 0x369   :  { %4204 = vmatprep.subr.mxu0 %v3510_v13  ;;  %4128 = vmatpush1.msra.mxu1 %v3393_v17  ;;  %v3473_v13 = vunpack.c.l.bf16 %v3088_v33  ;;  %v3026_v17 = vld [vmem:[#allocation10 + $0x218] sm:$0xff]  ;;  %v3598_v18 = vunpack.c.h.bf16 %v3150_v10 }
 0x36a   :  { %4205 = vmatpush1.msra.mxu0 %v3509_v14  ;;  %4129 = vmatprep.subr.mxu1 %v3390_v47  ;;  %v3148_v14 = vld [vmem:[#allocation10 + $0x5e8] sm:$0xff]  ;;  %v3353_v47 = vunpack.c.l.bf16 %v3028_v11  ;;  %v3350_v24 = vunpack.c.h.bf16 %v3026_v17 }
 0x36b   :  { %4206 = vmatprep.subr.mxu0 %v3506_v20  ;;  %4130 = vmatpush1.msra.mxu1 %v3389_v9  ;;  %v3597_v20 = vunpack.c.l.bf16 %v3150_v10  ;;  %v3024_v9 = vld [vmem:[#allocation10 + $0x208] sm:$0xff]  ;;  %v3594_v23 = vunpack.c.h.bf16 %v3148_v14 }
 0x36c   :  { %4207 = vmatpush1.msra.mxu0 %v3505_v22  ;;  %4131 = vmatprep.subr.mxu1 %v3386_v26  ;;  %v3146_v22 = vld [vmem:[#allocation10 + $0x5d8] sm:$0xff]  ;;  %v3349_v26 = vunpack.c.l.bf16 %v3026_v17  ;;  %v3346_v29 = vunpack.c.h.bf16 %v3024_v9 }
 0x36d   :  { %4208 = vmatprep.subr.mxu0 %v3502_v21  ;;  %4132 = vmatpush1.msra.mxu1 %v3385_v27  ;;  %v3593_v21 = vunpack.c.l.bf16 %v3148_v14  ;;  %v3086_v27 = vld [vmem:[#allocation10 + $0x3f8] sm:$0xff]  ;;  %v3590_v28 = vunpack.c.h.bf16 %v3146_v22 }
 0x36e   :  { %4209 = vmatpush1.msra.mxu0 %v3501_v5  ;;  %4133 = vmatprep.subr.mxu1 %v3382_v32  ;;  %v3144_v5 = vld [vmem:[#allocation10 + $0x5c8] sm:$0xff]  ;;  %v3345_v32 = vunpack.c.l.bf16 %v3024_v9  ;;  %v3470_v40 = vunpack.c.h.bf16 %v3086_v27 }
 0x36f   :  { %4210 = vmatprep.subr.mxu0 %v3498_v30  ;;  %4134 = vmatpush1.msra.mxu1 %v3381_v38  ;;  %v3589_v30 = vunpack.c.l.bf16 %v3146_v22  ;;  %v3084_v38 = vld [vmem:[#allocation10 + $0x3e8] sm:$0xff]  ;;  %v3586_v39 = vunpack.c.h.bf16 %v3144_v5 }
 0x370   :  { %4211 = vmatpush1.msra.mxu0 %v3497_v35  ;;  %4135 = vmatprep.subr.mxu1 %v3378_v42  ;;  %v3142_v35 = vld [vmem:[#allocation10 + $0x5b8] sm:$0xff]  ;;  %v3469_v42 = vunpack.c.l.bf16 %v3086_v27  ;;  %v3466_v49 = vunpack.c.h.bf16 %v3084_v38 }
 0x371   :  { %4212 = vmatprep.subr.mxu0 %v3494_v41  ;;  %4136 = vmatpush1.msra.mxu1 %v3377_v44  ;;  %v3585_v41 = vunpack.c.l.bf16 %v3144_v5  ;;  %v3082_v44 = vld [vmem:[#allocation10 + $0x3d8] sm:$0xff]  ;;  %v3582_v46 = vunpack.c.h.bf16 %v3142_v35 }
 0x372   :  { %4213 = vmatpush1.msra.mxu0 %v3493_v43  ;;  %4137 = vmatprep.subr.mxu1 %v3374_v54  ;;  %v3140_v43 = vld [vmem:[#allocation10 + $0x5a8] sm:$0xff]  ;;  %v3465_v54 = vunpack.c.l.bf16 %v3084_v38  ;;  %v3462_v56 = vunpack.c.h.bf16 %v3082_v44 }
 0x373   :  { %4214 = vmatprep.subr.mxu0 %v3490_v51  ;;  %4138 = vmatpush1.msra.mxu1 %v3373_v25  ;;  %v3581_v51 = vunpack.c.l.bf16 %v3142_v35  ;;  %v3080_v25 = vld [vmem:[#allocation10 + $0x3c8] sm:$0xff]  ;;  %v3578_v31 = vunpack.c.h.bf16 %v3140_v43 }
 0x374   :  { %4215 = vmatpush1.msra.mxu0 %v3489_v55  ;;  %4139 = vmatprep.subr.mxu1 %v3370_v59  ;;  %v3138_v55 = vld [vmem:[#allocation10 + $0x598] sm:$0xff]  ;;  %v3461_v59 = vunpack.c.l.bf16 %v3082_v44  ;;  %v3458_v50 = vunpack.c.h.bf16 %v3080_v25 }
 0x375   :  { %4216 = vmatprep.subr.mxu0 %v3486_v58  ;;  %4140 = vmatpush1.msra.mxu1 %v3369_v15  ;;  %v3577_v58 = vunpack.c.l.bf16 %v3140_v43  ;;  %v3078_v15 = vld [vmem:[#allocation10 + $0x3b8] sm:$0xff]  ;;  %v3574_v62 = vunpack.c.h.bf16 %v3138_v55 }
 0x376   :  { %4217 = vmatpush1.msra.mxu0 %v3485_v45  ;;  %4141 = vmatprep.subr.mxu1 %v3366_v6  ;;  %v3136_v45 = vld [vmem:[#allocation10 + $0x588] sm:$0xff]  ;;  %v3457_v6 = vunpack.c.l.bf16 %v3080_v25  ;;  %v3454_v16 = vunpack.c.h.bf16 %v3078_v15 }
 0x377   :  { %4218 = vmatprep.subr.mxu0 %v3482_v2  ;;  %4142 = vmatpush1.msra.mxu1 %v3365_v3  ;;  %v3573_v2 = vunpack.c.l.bf16 %v3138_v55  ;;  %v3076_v3 = vld [vmem:[#allocation10 + $0x3a8] sm:$0xff]  ;;  %v3570_v33 = vunpack.c.h.bf16 %v3136_v45 }
 0x378   :  { %4219 = vmatpush1.msra.mxu0 %v3481_v4  ;;  %4143 = vmatprep.subr.mxu1 %v3362_v7  ;;  %v3134_v4 = vld [vmem:[#allocation10 + $0x578] sm:$0xff]  ;;  %v3453_v7 = vunpack.c.l.bf16 %v3078_v15  ;;  %v3450_v11 = vunpack.c.h.bf16 %v3076_v3 }
 0x379   :  { %4220 = vmatprep.subr.mxu0 %v3478_v37  ;;  %4144 = vmatpush1.msra.mxu1 %v3361_v8  ;;  %v3569_v37 = vunpack.c.l.bf16 %v3136_v45  ;;  %v3074_v8 = vld [vmem:[#allocation10 + $0x398] sm:$0xff]  ;;  %v3566_v10 = vunpack.c.h.bf16 %v3134_v4  ;;  %v6716_v45 = vld [vmem:[#allocation10 + $0x308] sm:$0xff] }
 0x37a   :  { %4221 = vmatpush1.msra.mxu0 %v3477_v36  ;;  %4145 = vmatprep.subr.mxu1 %v3358_v12  ;;  %v3132_v36 = vld [vmem:[#allocation10 + $0x568] sm:$0xff]  ;;  %v3449_v12 = vunpack.c.l.bf16 %v3076_v3  ;;  %v3446_v17 = vunpack.c.h.bf16 %v3074_v8  ;;  %v6718_v15 = vld [vmem:[#allocation10 + $0x6f8] sm:$0xff] }
 0x37b   :  { %4222 = vmatprep.subr.mxu0 %v3474_v53  ;;  %4146 = vmatpush1.msra.mxu1 %v3357_v0  ;;  %v3565_v53 = vunpack.c.l.bf16 %v3134_v4  ;;  %v3072_v0 = vld [vmem:[#allocation10 + $0x388] sm:$0xff]  ;;  %v3562_v14 = vunpack.c.h.bf16 %v3132_v36  ;;  %v6722_v3 = vld [vmem:[#allocation10 + $0x6d8] sm:$0xff] }
 0x37c   :  { %4223 = vmatpush1.msra.mxu0 %v3473_v13  ;;  %4147 = vmatprep.subr.mxu1 %v3354_v19  ;;  %v3130_v13 = vld [vmem:[#allocation10 + $0x558] sm:$0xff]  ;;  %v3445_v19 = vunpack.c.l.bf16 %v3074_v8  ;;  %v3442_v9 = vunpack.c.h.bf16 %v3072_v0  ;;  %v6720_v4 = vld [vmem:[#allocation10 + $0x6e8] sm:$0xff] }
 0x37d   :  { %4224 = vmatprep.subr.mxu0 %v3598_v18  ;;  %4148 = vmatpush1.msra.mxu1 %v3353_v47  ;;  %v3561_v18 = vunpack.c.l.bf16 %v3132_v36  ;;  %v3070_v47 = vld [vmem:[#allocation10 + $0x378] sm:$0xff]  ;;  %v3558_v22 = vunpack.c.h.bf16 %v3130_v13  ;;  %v6730_v8 = vld [vmem:[#allocation10 + $0x6c8] sm:$0xff] }
 0x37e   :  { %4225 = vmatpush2.msra.mxu0 %v3597_v20  ;;  %4149 = vmatprep.subr.mxu1 %v3350_v24  ;;  %v3128_v20 = vld [vmem:[#allocation10 + $0x548] sm:$0xff]  ;;  %v3441_v24 = vunpack.c.l.bf16 %v3072_v0  ;;  %v3438_v27 = vunpack.c.h.bf16 %v3070_v47 }
 0x37f   :  { %4226 = vmatprep.subr.mxu0 %v3594_v23  ;;  %4150 = vmatpush1.msra.mxu1 %v3349_v26  ;;  %v3557_v23 = vunpack.c.l.bf16 %v3130_v13  ;;  %v3068_v26 = vld [vmem:[#allocation10 + $0x368] sm:$0xff]  ;;  %v3554_v5 = vunpack.c.h.bf16 %v3128_v20  ;;  %v6736_v13 = vld [vmem:[#allocation10 + $0x6b8] sm:$0xff] }
 0x380   :  { %4227 = vmatpush2.msra.mxu0 %v3593_v21  ;;  %4151 = vmatprep.subr.mxu1 %v3346_v29  ;;  %v3126_v21 = vld [vmem:[#allocation10 + $0x538] sm:$0xff]  ;;  %v3437_v29 = vunpack.c.l.bf16 %v3070_v47  ;;  %v3434_v38 = vunpack.c.h.bf16 %v3068_v26  ;;  %v6738_v0 = vld [vmem:[#allocation10 + $0x6a8] sm:$0xff] }
 0x381   :  { %4228 = vmatprep.subr.mxu0 %v3590_v28  ;;  %4152 = vmatpush1.msra.mxu1 %v3345_v32  ;;  %v3553_v28 = vunpack.c.l.bf16 %v3128_v20  ;;  %v3066_v32 = vld [vmem:[#allocation10 + $0x358] sm:$0xff]  ;;  %v3550_v35 = vunpack.c.h.bf16 %v3126_v21 }
 0x382   :  { %4229 = vmatpush2.msra.mxu0 %v3589_v30  ;;  %4153 = vmatprep.subr.mxu1 %v3470_v40  ;;  %v3124_v30 = vld [vmem:[#allocation10 + $0x528] sm:$0xff]  ;;  %v3433_v40 = vunpack.c.l.bf16 %v3068_v26  ;;  %v3430_v44 = vunpack.c.h.bf16 %v3066_v32  ;;  %v6743_v20 = vld [vmem:[#allocation10 + $0x698] sm:$0xff] }
 0x383   :  { %4230 = vmatprep.subr.mxu0 %v3586_v39  ;;  %4154 = vmatpush2.msra.mxu1 %v3469_v42  ;;  %v3549_v39 = vunpack.c.l.bf16 %v3126_v21  ;;  %v3064_v42 = vld [vmem:[#allocation10 + $0x348] sm:$0xff]  ;;  %v3546_v43 = vunpack.c.h.bf16 %v3124_v30  ;;  %v6751_v21 = vld [vmem:[#allocation10 + $0x678] sm:$0xff] }
 0x384   :  { %4231 = vmatpush2.msra.mxu0 %v3585_v41  ;;  %4155 = vmatprep.subr.mxu1 %v3466_v49  ;;  %v3122_v41 = vld [vmem:[#allocation10 + $0x518] sm:$0xff]  ;;  %v3429_v49 = vunpack.c.l.bf16 %v3066_v32  ;;  %v3426_v25 = vunpack.c.h.bf16 %v3064_v42 }
 0x385   :  { %4232 = vmatprep.subr.mxu0 %v3582_v46  ;;  %4156 = vmatpush2.msra.mxu1 %v3465_v54  ;;  %v3545_v46 = vunpack.c.l.bf16 %v3124_v30  ;;  %v3062_v54 = vld [vmem:[#allocation10 + $0x338] sm:$0xff]  ;;  %v3542_v55 = vunpack.c.h.bf16 %v3122_v41  ;;  %v6759_v30 = vld [vmem:[#allocation10 + $0x668] sm:$0xff] }
 0x386   :  { %4233 = vmatpush2.msra.mxu0 %v3581_v51  ;;  %4157 = vmatprep.subr.mxu1 %v3462_v56  ;;  %v3120_v51 = vld [vmem:[#allocation10 + $0x508] sm:$0xff]  ;;  %v6714_v56 = vld [vmem:[#allocation10 + $0x318] sm:$0xff] }
 0x387   :  { %4234 = vmatprep.subr.mxu0 %v3578_v31  ;;  %4158 = vmatpush2.msra.mxu1 %v3461_v59  ;;  %v6712_v31 = vld [vmem:[#allocation10 + $0x328] sm:$0xff]  ;;  %v3425_v59 = vunpack.c.l.bf16 %v3064_v42  ;;  %v3414_v36 = vunpack.c.h.bf16 %v6714_v56  ;;  %v6761_v32 = vld [vmem:[#allocation10 + $0x658] sm:$0xff] }
 0x388   :  { %4235 = vmatpush2.msra.mxu0 %v3577_v58  ;;  %4159 = vmatprep.subr.mxu1 %v3458_v50  ;;  %v3541_v58 = vunpack.c.l.bf16 %v3122_v41  ;;  %v3538_v50 = vunpack.c.h.bf16 %v3120_v51  ;;  %v6767_v41 = vld [vmem:[#allocation10 + $0x648] sm:$0xff]  ;;  %v6769_v42 = vld [vmem:[#allocation10 + $0x638] sm:$0xff] }
 0x389   :  { %4236 = vmatprep.subr.mxu0 %v3574_v62  ;;  %4160 = vmatpush2.msra.mxu1 %v3457_v6  ;;  %v3537_v62 = vunpack.c.l.bf16 %v3120_v51  ;;  %v3422_v6 = vunpack.c.h.bf16 %v3062_v54  ;;  %v7289_v52 = vunpack.c.h.bf16 %v6769_v42 }
 0x38a   :  { %4237 = vmatpush2.msra.mxu0 %v3573_v2  ;;  %4161 = vmatprep.subr.mxu1 %v3454_v16  ;;  %v3421_v2 = vunpack.c.l.bf16 %v3062_v54  ;;  %v3417_v16 = vunpack.c.l.bf16 %v6712_v31  ;;  %v3630_v54 = vunpack.c.h.bf16 %v6751_v21 }
 0x38b   :  { %4238 = vmatprep.subr.mxu0 %v3570_v33  ;;  %4162 = vmatpush2.msra.mxu1 %v3453_v7  ;;  %v6724_v33 = vld [vmem:[#allocation13 + $0xf0] sm:$0xff]  ;;  %v3413_v7 = vunpack.c.l.bf16 %v6714_v56 }
 0x38c   :  { %4239 = vmatpush2.msra.mxu0 %v3569_v37  ;;  %4163 = vmatprep.subr.mxu1 %v3450_v11  ;;  %v3418_v37 = vunpack.c.h.bf16 %v6712_v31  ;;  %v3410_v11 = vunpack.c.h.bf16 %v6716_v45  ;;  %v4660_v47 = vunpack.c.h.bf16 %v6724_v33  ;;  %v4659_v26 = vunpack.c.l.bf16 %v6724_v33  ;;  %v6781_v56 = vld [vmem:[#allocation10 + $0x618] sm:$0xff] }
 0x38d   :  { %4240 = vmatprep.subr.mxu0 %v3566_v10  ;;  %4164 = vmatpush2.msra.mxu1 %v3449_v12  ;;  %v3409_v10 = vunpack.c.l.bf16 %v6716_v45  ;;  %v3662_v12 = vunpack.c.h.bf16 %v6718_v15  ;;  %v6789_v33 = vld [vmem:[#allocation10 + $0x7f8] sm:$0xff] }
 0x38e   :  { %4241 = vmatpush2.msra.mxu0 %v3565_v53  ;;  %4165 = vmatprep.subr.mxu1 %v3446_v17  ;;  %v3661_v53 = vunpack.c.l.bf16 %v6718_v15  ;;  %v3657_v17 = vunpack.c.l.bf16 %v6720_v4  ;;  %v6822_v45 = vld [vmem:[#allocation13 + $0x90] sm:$0xff]  ;;  %v6837_v15 = vld [vmem:[#allocation10 + $0x788] sm:$0xff] }
 0x38f   :  { %4242 = vmatprep.subr.mxu0 %v3562_v14  ;;  %4166 = vmatpush2.msra.mxu1 %v3445_v19  ;;  %v4531_v14 = vld [vmem:[#allocation13 + $0xe0] sm:$0xff]  ;;  %v3653_v19 = vunpack.c.l.bf16 %v6722_v3  ;;  %v6899_v31 = vld [vmem:[#allocation13 + $0x10] sm:$0xff] }
 0x390   :  { %4243 = vmatpush2.msra.mxu0 %v3561_v18  ;;  %4167 = vmatprep.subr.mxu1 %v3442_v9  ;;  %v3658_v18 = vunpack.c.h.bf16 %v6720_v4  ;;  %v3649_v9 = vunpack.c.l.bf16 %v6730_v8  ;;  %v6857_v4 = vld [vmem:[#allocation10 + $0x768] sm:$0xff]  ;;  %v7292_v48 = vunpack.c.h.bf16 %v6899_v31 }
 0x391   :  { %4244 = vmatprep.subr.mxu0 %v3558_v22  ;;  %4168 = vmatpush2.msra.mxu1 %v3441_v24  ;;  %v3654_v22 = vunpack.c.h.bf16 %v6722_v3  ;;  %v6749_v24 = vld [vmem:[#allocation10 + $0x688] sm:$0xff] }
 0x392   :  { %4245 = vmatpush2.msra.mxu0 %v3557_v23  ;;  %4169 = vmatprep.subr.mxu1 %v3438_v27  ;;  %v3650_v23 = vunpack.c.h.bf16 %v6730_v8  ;;  %v3645_v27 = vunpack.c.l.bf16 %v6736_v13  ;;  %v178_v8 = vld [vmem:[#allocation2] sm:$0xff] }
 0x393   :  { %4246 = vmatprep.subr.mxu0 %v3554_v5  ;;  %4170 = vmatpush2.msra.mxu1 %v3437_v29  ;;  %v6754_v5 = vld [vmem:[#allocation13 + $0xd0] sm:$0xff]  ;;  %v3641_v29 = vunpack.c.l.bf16 %v6738_v0 }
 0x394   :  { %4247 = vmatpush2.msra.mxu0 %v3553_v28  ;;  %4171 = vmatprep.subr.mxu1 %v3434_v38  ;;  %v3646_v28 = vunpack.c.h.bf16 %v6736_v13  ;;  %v3642_v38 = vunpack.c.h.bf16 %v6738_v0  ;;  %v4652_v51 = vunpack.c.h.bf16 %v6754_v5  ;;  %v6912_v13 = vld [vmem:[#allocation13] sm:$0xff] }
 0x395   :  { %4248 = vmatprep.subr.mxu0 %v3550_v35  ;;  %4172 = vmatpush2.msra.mxu1 %v3433_v40  ;;  %v4656_v35 = vunpack.c.h.bf16 %v4531_v14  ;;  %v3638_v40 = vunpack.c.h.bf16 %v6743_v20  ;;  %v188_v0 = vld [vmem:[#allocation2 + $0x50] sm:$0xff] }
 0x396   :  { %4249 = vmatpush2.msra.mxu0 %v3549_v39  ;;  %4173 = vmatprep.subr.mxu1 %v3430_v44  ;;  %v3637_v39 = vunpack.c.l.bf16 %v6743_v20  ;;  %v3633_v44 = vunpack.c.l.bf16 %v6749_v24 }
 0x397   :  { %4250 = vmatprep.subr.mxu0 %v3546_v43  ;;  %4174 = vmatpush2.msra.mxu1 %v3429_v49  ;;  %v4655_v43 = vunpack.c.l.bf16 %v4531_v14  ;;  %v3629_v49 = vunpack.c.l.bf16 %v6751_v21  ;;  %v4651_v14 = vunpack.c.l.bf16 %v6754_v5  ;;  %v6820_v5 = vld [vmem:[#allocation10 + $0x7a8] sm:$0xff] }
 0x398   :  { %4251 = vmatpush2.msra.mxu0 %v3545_v46  ;;  %4175 = vmatprep.subr.mxu1 %v3426_v25  ;;  %v3634_v46 = vunpack.c.h.bf16 %v6749_v24 }
 0x399   :  { %4252 = vmatprep.subr.mxu0 %v3542_v55  ;;  %4176 = vmatpush2.msra.mxu1 %v3425_v59  ;;  %v4527_v59 = vld [vmem:[#allocation13 + $0xc0] sm:$0xff] }
 0x39a   :  { %4253 = vmatpush2.msra.mxu0 %v3541_v58  ;;  %4177 = vmatprep.subr.mxu1 %v3422_v6  ;;  %v6783_v58 = vld [vmem:[#allocation10 + $0x608] sm:$0xff] }
 0x39b   :  { %4254 = vmatprep.subr.mxu0 %v3538_v50  ;;  %4178 = vmatpush2.msra.mxu1 %v3421_v2  ;;  %v179_v50 = vld [vmem:[#allocation2 + $0x8] sm:$0xff]  ;;  %v6897_v2 = vld [vmem:[#allocation10 + $0x728] sm:$0xff] }
 0x39c   :  { %4255 = vmatpush2.msra.mxu0 %v3537_v62  ;;  %4179 = vmatprep.subr.mxu1 %v3418_v37  ;;  %v4648_v37 = vunpack.c.h.bf16 %v4527_v59  ;;  %v182_v62 = vld [vmem:[#allocation2 + $0x20] sm:$0xff] }
 0x39d   :  { %4257 = vmatmul.mubr.f32.vlgmr.msra.gmra.mxu0 %v6684_v60  ;;  %4180 = vmatpush2.msra.mxu1 %v3417_v16  ;;  %v6774_v60 = vld [vmem:[#allocation10 + $0x628] sm:$0xff]  ;;  %v6879_v16 = vld [vmem:[#allocation13 + $0x30] sm:$0xff]  ;;  %v4358_v55 = vrot.slane %v182_v62, 4 }
 0x39e   :  { %4885 = vmatprep.subr.mxu0 %v4660_v47  ;;  %4181 = vmatprep.subr.mxu1 %v3414_v36  ;;  %v6797_v47 = vld [vmem:[#allocation10 + $0x7d8] sm:$0xff]  ;;  %v6804_v36 = vld [vmem:[#allocation10 + $0x7c8] sm:$0xff]  ;;  %v7284_v21 = vunpack.c.h.bf16 %v6879_v16 }
 0x39f   :  { %4886 = vmatpush1.msra.mxu0 %v4659_v26  ;;  %4182 = vmatpush2.msra.mxu1 %v3413_v7  ;;  %v6794_v7 = vld [vmem:[#allocation10 + $0x7e8] sm:$0xff]  ;;  %v4525_v26 = vld [vmem:[#allocation13 + $0xb0] sm:$0xff] }
 0x3a0   :  { %4887 = vmatprep.subr.mxu0 %v4656_v35  ;;  %4183 = vmatprep.subr.mxu1 %v3410_v11  ;;  %v6812_v35 = vld [vmem:[#allocation10 + $0x7b8] sm:$0xff]  ;;  %v4523_v11 = vld [vmem:[#allocation13 + $0xa0] sm:$0xff]  ;;  %v4644_v6 = vunpack.c.h.bf16 %v4525_v26 }
 0x3a1   :  { %4888 = vmatpush1.msra.mxu0 %v4655_v43  ;;  %4184 = vmatpush2.msra.mxu1 %v3409_v10  ;;  %v4647_v43 = vunpack.c.l.bf16 %v4527_v59  ;;  %v4643_v59 = vunpack.c.l.bf16 %v4525_v26  ;;  %v4640_v10 = vunpack.c.h.bf16 %v4523_v11 }
 0x3a2   :  { %4889 = vmatprep.subr.mxu0 %v4652_v51  ;;  %4186 = vmatmul.mubr.f32.vlgmr.msra.gmra.mxu1 %v6647_v63  ;;  %v6829_v63 = vld [vmem:[#allocation10 + $0x798] sm:$0xff]  ;;  %v6831_v51 = vld [vmem:[#allocation13 + $0x80] sm:$0xff] }
 0x3a3   :  { %4263 = vmatprep.subr.mxu1 %v3662_v12  ;;  %4327 = vmatprep.mubr.f32.mxu1 %v6704_v61  ;;  %v6847_v12 = vld [vmem:[#allocation10 + $0x778] sm:$0xff]  ;;  %v4632_v26 = vunpack.c.h.bf16 %v6831_v51 }
 0x3a4   :  { %4264 = vmatpush1.msra.mxu1 %v3661_v53  ;;  %4890 = vmatpush1.msra.mxu0 %v4651_v14  ;;  %v4639_v14 = vunpack.c.l.bf16 %v4523_v11  ;;  %v6839_v53 = vld [vmem:[#allocation13 + $0x70] sm:$0xff] }
 0x3a5   :  { %4265 = vmatprep.subr.mxu1 %v3658_v18  ;;  %4891 = vmatprep.subr.mxu0 %v4648_v37  ;;  %v4636_v37 = vunpack.c.h.bf16 %v6822_v45  ;;  %v6849_v18 = vld [vmem:[#allocation13 + $0x60] sm:$0xff]  ;;  %v6859_v61 = vld [vmem:[#allocation13 + $0x50] sm:$0xff] }
 0x3a6   :  { %4266 = vmatpush1.msra.mxu1 %v3657_v17  ;;  %4892 = vmatpush1.msra.mxu0 %v4647_v43  ;;  %v4635_v17 = vunpack.c.l.bf16 %v6822_v45  ;;  %v4631_v43 = vunpack.c.l.bf16 %v6831_v51  ;;  %v4628_v45 = vunpack.c.h.bf16 %v6839_v53  ;;  %v6867_v11 = vld [vmem:[#allocation10 + $0x758] sm:$0xff]  ;;  %v4624_v3 = vunpack.c.h.bf16 %v6849_v18 }
 0x3a7   :  { %4267 = vmatprep.subr.mxu1 %v3654_v22  ;;  %4893 = vmatprep.subr.mxu0 %v4644_v6  ;;  %v4627_v6 = vunpack.c.l.bf16 %v6839_v53  ;;  %v6869_v22 = vld [vmem:[#allocation13 + $0x40] sm:$0xff]  ;;  %v4620_v53 = vunpack.c.h.bf16 %v6859_v61  ;;  %v6887_v51 = vld [vmem:[#allocation10 + $0x738] sm:$0xff] }
 0x3a8   :  { %4268 = vmatpush1.msra.mxu1 %v3653_v19  ;;  %4894 = vmatpush1.msra.mxu0 %v4643_v59  ;;  %v4623_v59 = vunpack.c.l.bf16 %v6849_v18  ;;  %v6877_v19 = vld [vmem:[#allocation10 + $0x748] sm:$0xff]  ;;  %v191_v18 = vld [vmem:[#allocation2 + $0x68] sm:$0xff] }
 0x3a9   :  { %4269 = vmatprep.subr.mxu1 %v3650_v23  ;;  %4895 = vmatprep.subr.mxu0 %v4640_v10  ;;  %v6889_v23 = vld [vmem:[#allocation13 + $0x20] sm:$0xff] }
 0x3aa   :  { %4270 = vmatpush1.msra.mxu1 %v3649_v9  ;;  %4896 = vmatpush1.msra.mxu0 %v4639_v14  ;;  %v185_v14 = vld [vmem:[#allocation2 + $0x38] sm:$0xff] }
 0x3ab   :  { %4271 = vmatprep.subr.mxu1 %v3646_v28  ;;  %4897 = vmatprep.subr.mxu0 %v4636_v37  ;;  %v181_v9 = vld [vmem:[#allocation2 + $0x18] sm:$0xff]  ;;  %v4340_v37 = vrot.slane %v179_v50, 4  ;;  %v4376_v10 = vrot.slane %v185_v14, 4  ;;  %v187_v28 = vld [vmem:[#allocation2 + $0x48] sm:$0xff] }
 0x3ac   :  { %4272 = vmatpush1.msra.mxu1 %v3645_v27  ;;  %4898 = vmatpush1.msra.mxu0 %v4635_v17  ;;  %v6914_v27 = vld [vmem:[#allocation13 + $0x1f0] sm:$0xff]  ;;  %v4352_v25 = vrot.slane %v181_v9, 4 }
 0x3ad   :  { %4273 = vmatprep.subr.mxu1 %v3642_v38  ;;  %4899 = vmatprep.subr.mxu0 %v4632_v26  ;;  %v6921_v26 = vld [vmem:[#allocation13 + $0x1e0] sm:$0xff]  ;;  %v6926_v17 = vld [vmem:[#allocation13 + $0x1d0] sm:$0xff]  ;;  %v4359_v38 = vadd.f32 %v4358_v55, %v182_v62  ;;  %v7278_v55 = vunpack.c.l.bf16 %v6859_v61 }
 0x3ae   :  { %4274 = vmatpush1.msra.mxu1 %v3641_v29  ;;  %4900 = vmatpush1.msra.mxu0 %v4631_v43  ;;  %v4334_v43 = vrot.slane %v178_v8, 4  ;;  %v4341_v29 = vadd.f32 %v4340_v37, %v179_v50  ;;  %v6956_v50 = vld [vmem:[#allocation13 + $0x190] sm:$0xff]  ;;  %v4353_v24 = vadd.f32 %v4352_v25, %v181_v9  ;;  %v6971_v9 = vld [vmem:[#allocation13 + $0x180] sm:$0xff]  ;;  %v4412_v25 = vrot.slane %v191_v18, 4 }
 0x3af   :  { %4275 = vmatprep.subr.mxu1 %v3638_v40  ;;  %4901 = vmatprep.subr.mxu0 %v4628_v45  ;;  %v184_v40 = vld [vmem:[#allocation2 + $0x30] sm:$0xff] }
 0x3b0   :  { %4276 = vmatpush1.msra.mxu1 %v3637_v39  ;;  %4902 = vmatpush1.msra.mxu0 %v4627_v6  ;;  %v6934_v45 = vld [vmem:[#allocation13 + $0x1c0] sm:$0xff]  ;;  %v6941_v6 = vld [vmem:[#allocation13 + $0x1b0] sm:$0xff]  ;;  %v4370_v39 = vrot.slane %v184_v40, 4  ;;  %v4335_v37 = vadd.f32 %v4334_v43, %v178_v8  ;;  %v4342_v61 = vrot.slane %v4341_v29, 2  ;;  %v4388_v43 = vrot.slane %v187_v28, 4 }
 0x3b1   :  { %4277 = vmatprep.subr.mxu1 %v3634_v46  ;;  %4903 = vmatprep.subr.mxu0 %v4624_v3  ;;  %v6949_v3 = vld [vmem:[#allocation13 + $0x1a0] sm:$0xff]  ;;  %v7283_v8 = vunpack.c.l.bf16 %v6761_v32  ;;  %v7288_v46 = vunpack.c.h.bf16 %v6889_v23 }
 0x3b2   :  { %4278 = vmatpush1.msra.mxu1 %v3633_v44  ;;  %4904 = vmatpush1.msra.mxu0 %v4623_v59  ;;  %v4377_v59 = vadd.f32 %v4376_v10, %v185_v14  ;;  %v7277_v44 = vunpack.c.h.bf16 %v6759_v30  ;;  %v7280_v10 = vunpack.c.h.bf16 %v6869_v22  ;;  %v190_v14 = vld [vmem:[#allocation2 + $0x60] sm:$0xff]  ;;  %v4371_v62 = vadd.f32 %v4370_v39, %v184_v40  ;;  %v193_v39 = vld [vmem:[#allocation2 + $0x78] sm:$0xff] }
 0x3b3   :  { %4279 = vmatprep.subr.mxu1 %v3630_v54  ;;  %4905 = vmatprep.subr.mxu0 %v4620_v53  ;;  %v4394_v53 = vrot.slane %v188_v0, 4  ;;  %v7279_v54 = vunpack.c.l.bf16 %v6759_v30  ;;  %v4336_v20 = vrot.slane %v4335_v37, 2  ;;  %v7286_v30 = vunpack.c.l.bf16 %v6879_v16 }
 0x3b4   :  { %4280 = vmatpush1.msra.mxu1 %v3629_v49  ;;  %4906 = vmatpush1.msra.mxu0 %v7278_v55  ;;  %v7282_v55 = vunpack.c.l.bf16 %v6869_v22  ;;  %v4360_v49 = vrot.slane %v4359_v38, 2  ;;  %v4354_v22 = vrot.slane %v4353_v24, 2  ;;  %v4343_v16 = vadd.f32 %v4342_v61, %v4341_v29  ;;  %v196_v61 = vld [vmem:[#allocation2 + $0x90] sm:$0xff] }
 0x3b5   :  { %4281 = vmatprep.subr.mxu1 %v7277_v44  ;;  %4907 = vmatprep.subr.mxu0 %v7280_v10  ;;  %v7281_v44 = vunpack.c.h.bf16 %v6761_v32  ;;  %v194_v10 = vld [vmem:[#allocation2 + $0x80] sm:$0xff]  ;;  %v4395_v32 = vadd.f32 %v4394_v53, %v188_v0  ;;  %v4389_v34 = vadd.f32 %v4388_v43, %v187_v28  ;;  %v7290_v0 = vunpack.c.l.bf16 %v6889_v23 }
 0x3b6   :  { %4282 = vmatpush1.msra.mxu1 %v7279_v54  ;;  %4908 = vmatpush1.msra.mxu0 %v7282_v55  ;;  %v6978_v54 = vld [vmem:[#allocation13 + $0x170] sm:$0xff]  ;;  %v7285_v55 = vunpack.c.h.bf16 %v6767_v41  ;;  %v4361_v53 = vadd.f32 %v4360_v49, %v4359_v38  ;;  %v4372_v40 = vrot.slane %v4371_v62, 2  ;;  %v4337_v28 = vadd.f32 %v4336_v20, %v4335_v37 }
 0x3b7   :  { %4283 = vmatprep.subr.mxu1 %v7281_v44  ;;  %4909 = vmatprep.subr.mxu0 %v7284_v21  ;;  %v4378_v44 = vrot.slane %v4377_v59, 2  ;;  %v7287_v21 = vunpack.c.l.bf16 %v6767_v41  ;;  %v4355_v43 = vadd.f32 %v4354_v22, %v4353_v24  ;;  %v4424_v1 = vrot.slane %v193_v39, 4  ;;  %v200_v24 = vld [vmem:[#allocation2 + $0xb0] sm:$0xff] }
 0x3b8   :  { %4284 = vmatpush1.msra.mxu1 %v7283_v8  ;;  %4910 = vmatpush1.msra.mxu0 %v7286_v30  ;;  %v4406_v8 = vrot.slane %v190_v14, 4  ;;  %v4430_v30 = vrot.slane %v194_v10, 4  ;;  %v7294_v23 = vunpack.c.l.bf16 %v6899_v31  ;;  %v7297_v31 = vunpack.c.h.bf16 %v6781_v56 }
 0x3b9   :  { %4285 = vmatprep.subr.mxu1 %v7285_v55  ;;  %4911 = vmatprep.subr.mxu0 %v7288_v46  ;;  %v197_v55 = vld [vmem:[#allocation2 + $0x98] sm:$0xff]  ;;  %v7291_v46 = vunpack.c.l.bf16 %v6769_v42  ;;  %v4379_v29 = vadd.f32 %v4378_v44, %v4377_v59  ;;  %v4344_v59 = vrot.slane %v4343_v16, 1  ;;  %v4390_v44 = vrot.slane %v4389_v34, 2 }
 0x3ba   :  { %4286 = vmatpush1.msra.mxu1 %v7287_v21  ;;  %4912 = vmatpush1.msra.mxu0 %v7290_v0  ;;  %v4413_v21 = vadd.f32 %v4412_v25, %v191_v18  ;;  %v4396_v18 = vrot.slane %v4395_v32, 2  ;;  %v4448_v49 = vrot.slane %v197_v55, 4  ;;  %v4407_v42 = vadd.f32 %v4406_v8, %v190_v14  ;;  %v199_v8 = vld [vmem:[#allocation2 + $0xa8] sm:$0xff] }
 0x3bb   :  { %4287 = vmatprep.subr.mxu1 %v7289_v52  ;;  %4913 = vmatprep.subr.mxu0 %v7292_v48  ;;  %v7293_v52 = vunpack.c.h.bf16 %v6774_v60  ;;  %v7295_v25 = vunpack.c.l.bf16 %v6774_v60  ;;  %v7296_v48 = vunpack.c.h.bf16 %v6912_v13  ;;  %v4431_v37 = vadd.f32 %v4430_v30, %v194_v10 }
 0x3bc   :  { %4288 = vmatpush1.msra.mxu1 %v7291_v46  ;;  %4914 = vmatpush1.msra.mxu0 %v7294_v23  ;;  %v7298_v22 = vunpack.c.l.bf16 %v6912_v13  ;;  %v4362_v0 = vrot.slane %v4361_v53, 1  ;;  %v4414_v14 = vrot.slane %v4413_v21, 2  ;;  %v4373_v60 = vadd.f32 %v4372_v40, %v4371_v62 }
 0x3bd   :  { %4289 = vmatprep.subr.mxu1 %v7293_v52  ;;  %4915 = vmatprep.subr.mxu0 %v7296_v48  ;;  %v4442_v46 = vrot.slane %v196_v61, 4  ;;  %v7299_v52 = vunpack.c.l.bf16 %v6781_v56  ;;  %v7300_v23 = vunpack.c.h.bf16 %v6914_v27  ;;  %v4338_v10 = vrot.slane %v4337_v28, 1 }
 0x3be   :  { %4290 = vmatpush1.msra.mxu1 %v7295_v25  ;;  %4916 = vmatpush1.msra.mxu0 %v7298_v22  ;;  %v4380_v25 = vrot.slane %v4379_v29, 1  ;;  %v4356_v30 = vrot.slane %v4355_v43, 1  ;;  %v4425_v48 = vadd.f32 %v4424_v1, %v193_v39  ;;  %v7302_v13 = vunpack.c.l.bf16 %v6914_v27 }
 0x3bf   :  { %4291 = vmatprep.subr.mxu1 %v7297_v31  ;;  %4917 = vmatprep.subr.mxu0 %v7300_v23  ;;  %v7301_v31 = vunpack.c.h.bf16 %v6783_v58  ;;  %v4397_v22 = vadd.f32 %v4396_v18, %v4395_v32  ;;  %v4449_v38 = vadd.f32 %v4448_v49, %v197_v55  ;;  %v4466_v62 = vrot.slane %v200_v24, 4 }
 0x3c0   :  { %4292 = vmatpush1.msra.mxu1 %v7299_v52  ;;  %4918 = vmatpush2.msra.mxu0 %v7302_v13  ;;  %v4408_v40 = vrot.slane %v4407_v42, 2  ;;  %v7303_v56 = vunpack.c.l.bf16 %v6783_v58  ;;  %v7304_v52 = vunpack.c.h.bf16 %v6921_v26  ;;  %v4345_v23 = vadd.f32 %v4344_v59, %v4343_v16 }
 0x3c1   :  { %4293 = vmatprep.subr.mxu1 %v7301_v31  ;;  %v4432_v20 = vrot.slane %v4431_v37, 2  ;;  %v4391_v41 = vadd.f32 %v4390_v44, %v4389_v34  ;;  %v4460_v1 = vrot.slane %v199_v8, 4  ;;  %v7305_v39 = vunpack.c.h.bf16 %v6789_v33 }
 0x3c2   :  { %4294 = vmatpush1.msra.mxu1 %v7303_v56  ;;  %4919 = vmatprep.subr.mxu0 %v7304_v52  ;;  %v7306_v27 = vunpack.c.l.bf16 %v6921_v26  ;;  %v4363_v32 = vadd.f32 %v4362_v0, %v4361_v53  ;;  %v4415_v55 = vadd.f32 %v4414_v14, %v4413_v21  ;;  %v4374_v18 = vrot.slane %v4373_v60, 1  ;;  %v7061_v56 = vld [vmem:[#allocation13 + $0x150] sm:$0xff] }
 0x3c3   :  { %4295 = vmatprep.subr.mxu1 %v7305_v39  ;;  %v4443_v49 = vadd.f32 %v4442_v46, %v196_v61  ;;  %v7307_v58 = vunpack.c.l.bf16 %v6789_v33  ;;  %v7308_v31 = vunpack.c.h.bf16 %v6926_v17  ;;  %v4381_v16 = vadd.f32 %v4380_v25, %v4379_v29 }
 0x3c4   :  { %4920 = vmatpush2.msra.mxu0 %v7306_v27  ;;  %v4339_v59 = vadd.f32 %v4338_v10, %v4337_v28  ;;  %v4357_v34 = vadd.f32 %v4356_v30, %v4355_v43  ;;  %v4426_v44 = vrot.slane %v4425_v48, 2  ;;  %v7309_v13 = vunpack.c.h.bf16 %v6794_v7 }
 0x3c5   :  { %4296 = vmatpush2.msra.mxu1 %v7307_v58  ;;  %4921 = vmatprep.subr.mxu0 %v7308_v31  ;;  %v7310_v26 = vunpack.c.l.bf16 %v6926_v17  ;;  %v4398_v53 = vrot.slane %v4397_v22, 1  ;;  %v4450_v21 = vrot.slane %v4449_v38, 2  ;;  %v4467_v0 = vadd.f32 %v4466_v62, %v200_v24 }
 0x3c6   :  { %4297 = vmatprep.subr.mxu1 %v7309_v13  ;;  %v4409_v61 = vadd.f32 %v4408_v40, %v4407_v42  ;;  %v7311_v33 = vunpack.c.l.bf16 %v6794_v7  ;;  %v7312_v14 = vunpack.c.h.bf16 %v6934_v45  ;;  %v4433_v29 = vadd.f32 %v4432_v20, %v4431_v37 }
 0x3c7   :  { %4922 = vmatpush2.msra.mxu0 %v7310_v26  ;;  %v4480_v28 = vmul.f32 0.125, %v4345_v23  ;;  %v4392_v43 = vrot.slane %v4391_v41, 1  ;;  %v4461_v46 = vadd.f32 %v4460_v1, %v199_v8  ;;  %v7313_v25 = vunpack.c.h.bf16 %v6797_v47 }
 0x3c8   :  { %4298 = vmatpush2.msra.mxu1 %v7311_v33  ;;  %4923 = vmatprep.subr.mxu0 %v7312_v14  ;;  %v7314_v17 = vunpack.c.l.bf16 %v6934_v45  ;;  %v4416_v10 = vrot.slane %v4415_v55, 1  ;;  %v4483_v30 = vmul.f32 0.125, %v4363_v32  ;;  %v4375_v24 = vadd.f32 %v4374_v18, %v4373_v60 }
 0x3c9   :  { %4299 = vmatprep.subr.mxu1 %v7313_v25  ;;  %v4444_v42 = vrot.slane %v4443_v49, 2  ;;  %v7315_v7 = vunpack.c.l.bf16 %v6797_v47  ;;  %v7316_v62 = vunpack.c.h.bf16 %v6941_v6  ;;  %v4427_v20 = vadd.f32 %v4426_v44, %v4425_v48 }
 0x3ca   :  { %4924 = vmatpush2.msra.mxu0 %v7314_v17  ;;  %v4479_v37 = vmul.f32 0.125, %v4339_v59  ;;  %v4482_v8 = vmul.f32 0.125, %v4357_v34  ;;  %v7317_v40 = vunpack.c.h.bf16 %v6804_v36  ;;  %v7318_v45 = vunpack.c.l.bf16 %v6941_v6 }
 0x3cb   :  { %4300 = vmatpush2.msra.mxu1 %v7315_v7  ;;  %4925 = vmatprep.subr.mxu0 %v7316_v62  ;;  %v4399_v60 = vadd.f32 %v4398_v53, %v4397_v22  ;;  %v4451_v52 = vadd.f32 %v4450_v21, %v4449_v38  ;;  %v4468_v23 = vrot.slane %v4467_v0, 2  ;;  %v4410_v47 = vrot.slane %v4409_v61, 1  ;;  %v4541_v7 = vld [vmem:[#allocation13 + $0x130] sm:$0xff] }
 0x3cc   :  { %4301 = vmatprep.subr.mxu1 %v7317_v40  ;;  %4926 = vmatpush2.msra.mxu0 %v7318_v45  ;;  %v7319_v1 = vunpack.c.l.bf16 %v6804_v36  ;;  %v7320_v39 = vunpack.c.h.bf16 %v6949_v3  ;;  %v4434_v48 = vrot.slane %v4433_v29, 1  ;;  %v4486_v27 = vmul.f32 0.125, %v4381_v16 }
 0x3cd   :  { %v4393_v32 = vadd.f32 %v4392_v43, %v4391_v41  ;;  %v4462_v18 = vrot.slane %v4461_v46, 2  ;;  %v7321_v58 = vunpack.c.h.bf16 %v6812_v35  ;;  %v7322_v6 = vunpack.c.l.bf16 %v6949_v3 }
 0x3ce   :  { %4302 = vmatpush2.msra.mxu1 %v7319_v1  ;;  %4927 = vmatprep.subr.mxu0 %v7320_v39  ;;  %v4868_v38 = vsel %vm4854_vm0, %v4483_v30, %v4480_v28  ;;  %v4445_v22 = vadd.f32 %v4444_v42, %v4443_v49  ;;  %v4485_v31 = vmul.f32 0.125, %v4375_v24  ;;  %v7323_v36 = vunpack.c.l.bf16 %v6812_v35  ;;  %v7082_v49 = vld [vmem:[#allocation13 + $0x140] sm:$0xff]  ;;  %v186_v1 = vld [vmem:[#allocation2 + $0x40] sm:$0xff] }
 0x3cf   :  { %4303 = vmatprep.subr.mxu1 %v7321_v58  ;;  %4928 = vmatpush2.msra.mxu0 %v7322_v6  ;;  %v7324_v59 = vunpack.c.h.bf16 %v6956_v50  ;;  %v4683_v41 = vunpack.c.l.bf16 %v7061_v56  ;;  %v4417_v16 = vadd.f32 %v4416_v10, %v4415_v55  ;;  %v4428_v34 = vrot.slane %v4427_v20, 1  ;;  %v180_v10 = vld [vmem:[#allocation2 + $0x10] sm:$0xff]  ;;  %v183_v30 = vld [vmem:[#allocation2 + $0x28] sm:$0xff] }
 0x3d0   :  { %4304 = vmatpush2.msra.mxu1 %v7323_v36  ;;  %v4855_v44 = vsel %vm4854_vm0, %v4482_v8, %v4479_v37  ;;  %v7325_v3 = vunpack.c.h.bf16 %v6820_v5  ;;  %v7326_v13 = vunpack.c.l.bf16 %v6956_v50  ;;  %v4452_v26 = vrot.slane %v4451_v52, 1 }
 0x3d1   :  { %4929 = vmatprep.subr.mxu0 %v7324_v59  ;;  %v4469_v35 = vadd.f32 %v4468_v23, %v4467_v0  ;;  %v4489_v53 = vmul.f32 0.125, %v4399_v60  ;;  %v4411_v21 = vadd.f32 %v4410_v47, %v4409_v61  ;;  %v7327_v33 = vunpack.c.l.bf16 %v6820_v5  ;;  %v7109_v23 = vld [vmem:[#allocation13 + $0x120] sm:$0xff]  ;;  %v4537_v59 = vld [vmem:[#allocation13 + $0x110] sm:$0xff] }
 0x3d2   :  { %4305 = vmatprep.subr.mxu1 %v7325_v3  ;;  %4930 = vmatpush2.msra.mxu0 %v7326_v13  ;;  %v7328_v55 = vunpack.c.h.bf16 %v6971_v9  ;;  %v4869_v14 = vsel %vm4856_vm1, %v4486_v27, %v4868_v38  ;;  %v4463_v28 = vadd.f32 %v4462_v18, %v4461_v46  ;;  %v4488_v43 = vmul.f32 0.125, %v4393_v32  ;;  %v4535_v3 = vld [vmem:[#allocation13 + $0x100] sm:$0xff] }
 0x3d3   :  { %4306 = vmatpush2.msra.mxu1 %v7327_v33  ;;  %v7329_v50 = vunpack.c.h.bf16 %v6829_v63  ;;  %v7330_v25 = vunpack.c.l.bf16 %v6971_v9  ;;  %v4684_v0 = vunpack.c.h.bf16 %v7061_v56  ;;  %v4435_v61 = vadd.f32 %v4434_v48, %v4433_v29 }
 0x3d4   :  { %4931 = vmatprep.subr.mxu0 %v7328_v55  ;;  %v4446_v17 = vrot.slane %v4445_v22, 1  ;;  %v4857_v5 = vsel %vm4856_vm1, %v4485_v31, %v4855_v44  ;;  %v7331_v24 = vunpack.c.l.bf16 %v6829_v63  ;;  %v7332_v46 = vunpack.c.h.bf16 %v6978_v54 }
 0x3d5   :  { %4307 = vmatprep.subr.mxu1 %v7329_v50  ;;  %4932 = vmatpush2.msra.mxu0 %v7330_v25  ;;  %v4680_v42 = vunpack.c.h.bf16 %v7082_v49  ;;  %v4492_v62 = vmul.f32 0.125, %v4417_v16  ;;  %v4429_v9 = vadd.f32 %v4428_v34, %v4427_v20  ;;  %v7333_v37 = vunpack.c.h.bf16 %v6837_v15  ;;  %v192_v50 = vld [vmem:[#allocation2 + $0x70] sm:$0xff] }
 0x3d6   :  { %4308 = vmatpush2.msra.mxu1 %v7331_v24  ;;  %4933 = vmatprep.subr.mxu0 %v7332_v46  ;;  %v7334_v29 = vunpack.c.l.bf16 %v6978_v54  ;;  %v4453_v8 = vadd.f32 %v4452_v26, %v4451_v52  ;;  %v4470_v40 = vrot.slane %v4469_v35, 1  ;;  %v4870_v63 = vsel %vm4858_vm2, %v4489_v53, %v4869_v14  ;;  %v195_v46 = vld [vmem:[#allocation2 + $0x88] sm:$0xff] }
 0x3d7   :  { %4309 = vmatprep.subr.mxu1 %v7333_v37  ;;  %v4491_v45 = vmul.f32 0.125, %v4411_v21  ;;  %v7335_v56 = vunpack.c.l.bf16 %v6837_v15  ;;  %v7336_v60 = vunpack.c.h.bf16 %v6996_v57  ;;  %v4464_v20 = vrot.slane %v4463_v28, 1 }
 0x3d8   :  { %4934 = vmatpush2.msra.mxu0 %v7334_v29  ;;  %v4859_v47 = vsel %vm4858_vm2, %v4488_v43, %v4857_v5  ;;  %v4346_v39 = vrot.slane %v180_v10, 4  ;;  %v4364_v54 = vrot.slane %v183_v30, 4  ;;  %v7337_v52 = vunpack.c.h.bf16 %v6847_v12 }
 0x3d9   :  { %4310 = vmatpush2.msra.mxu1 %v7335_v56  ;;  %4935 = vmatprep.subr.mxu0 %v7336_v60  ;;  %v7338_v48 = vunpack.c.l.bf16 %v6996_v57  ;;  %v4679_v15 = vunpack.c.l.bf16 %v7082_v49  ;;  %v4675_v27 = vunpack.c.l.bf16 %v4541_v7  ;;  %v4495_v32 = vmul.f32 0.125, %v4435_v61  ;;  %v3184_v61 = vld [vmem:[#allocation10 + $0x708] sm:$0xff]  ;;  %v4597_v56 = vld [vmem:[#allocation13 + $0x2f0] sm:$0xff] }
 0x3da   :  { %4311 = vmatprep.subr.mxu1 %v7337_v52  ;;  %v4447_v18 = vadd.f32 %v4446_v17, %v4445_v22  ;;  %v7339_v58 = vunpack.c.l.bf16 %v6847_v12  ;;  %v4676_v6 = vunpack.c.h.bf16 %v4541_v7  ;;  %v4871_v38 = vsel %vm4860_vm3, %v4492_v62, %v4870_v63  ;;  %v189_v22 = vld [vmem:[#allocation2 + $0x58] sm:$0xff] }
 0x3db   :  { %4936 = vmatpush2.msra.mxu0 %v7338_v48  ;;  %v4494_v31 = vmul.f32 0.125, %v4429_v9  ;;  %v7340_v36 = vunpack.c.h.bf16 %v6857_v4  ;;  %v4672_v57 = vunpack.c.h.bf16 %v7109_v23  ;;  %v4471_v16 = vadd.f32 %v4470_v40, %v4469_v35  ;;  %v7141_v40 = vld [vmem:[#allocation13 + $0x2f8] sm:$0xff] }
 0x3dc   :  { %4312 = vmatpush2.msra.mxu1 %v7339_v58  ;;  %4937 = vmatprep.subr.mxu0 %v4684_v0  ;;  %v4861_v34 = vsel %vm4860_vm3, %v4491_v45, %v4859_v47  ;;  %v4382_v44 = vrot.slane %v186_v1, 4  ;;  %v7341_v12 = vunpack.c.l.bf16 %v6857_v4  ;;  %v4498_v13 = vmul.f32 0.125, %v4453_v8  ;;  %v3186_v4 = vld [vmem:[#allocation10 + $0x718] sm:$0xff]  ;;  %v4595_v47 = vld [vmem:[#allocation13 + $0x2e0] sm:$0xff] }
 0x3dd   :  { %4313 = vmatprep.subr.mxu1 %v7340_v36  ;;  %4938 = vmatpush2.msra.mxu0 %v4683_v41  ;;  %v4465_v49 = vadd.f32 %v4464_v20, %v4463_v28  ;;  %v4347_v26 = vadd.f32 %v4346_v39, %v180_v10  ;;  %v4365_v53 = vadd.f32 %v4364_v54, %v183_v30  ;;  %v7342_v21 = vunpack.c.h.bf16 %v6867_v11  ;;  %v198_v48 = vld [vmem:[#allocation2 + $0xa0] sm:$0xff] }
 0x3de   :  { %4314 = vmatpush2.msra.mxu1 %v7341_v12  ;;  %4939 = vmatprep.subr.mxu0 %v4680_v42  ;;  %v4671_v41 = vunpack.c.l.bf16 %v7109_v23  ;;  %v4872_v35 = vsel %vm4862_vm4, %v4495_v32, %v4871_v38  ;;  %v4497_v33 = vmul.f32 0.125, %v4447_v18  ;;  %v7343_v55 = vunpack.c.l.bf16 %v6867_v11  ;;  %v4594_v12 = vld [vmem:[#allocation13 + $0x2d8] sm:$0xff] }
 0x3df   :  { %4315 = vmatprep.subr.mxu1 %v7342_v21  ;;  %4940 = vmatpush2.msra.mxu0 %v4679_v15  ;;  %v4667_v14 = vunpack.c.l.bf16 %v4537_v59  ;;  %v4668_v43 = vunpack.c.h.bf16 %v4537_v59  ;;  %v4863_v28 = vsel %vm4862_vm4, %v4494_v31, %v4861_v34  ;;  %v4400_v25 = vrot.slane %v189_v22, 4  ;;  %v7157_v59 = vld [vmem:[#allocation13 + $0x2c0] sm:$0xff] }
 0x3e0   :  { %4316 = vmatpush2.msra.mxu1 %v7343_v55  ;;  %4941 = vmatprep.subr.mxu0 %v4676_v6  ;;  %v7344_v0 = vunpack.c.h.bf16 %v6877_v19  ;;  %v4664_v17 = vunpack.c.h.bf16 %v4535_v3  ;;  %v4501_v5 = vmul.f32 0.125, %v4471_v16  ;;  %v4383_v10 = vadd.f32 %v4382_v44, %v186_v1  ;;  %v4596_v6 = vld [vmem:[#allocation13 + $0x2e8] sm:$0xff] }
 0x3e1   :  { %4942 = vmatpush2.msra.mxu0 %v4675_v27  ;;  %v7345_v11 = vunpack.c.l.bf16 %v6877_v19  ;;  %v4873_v30 = vsel %vm4864_vm5, %v4498_v13, %v4872_v35  ;;  %v4500_v24 = vmul.f32 0.125, %v4465_v49  ;;  %v4348_v42 = vrot.slane %v4347_v26, 2  ;;  %v201_v16 = vld [vmem:[#allocation2 + $0xb8] sm:$0xff] }
 0x3e2   :  { %4317 = vmatprep.subr.mxu1 %v7344_v0  ;;  %4943 = vmatprep.subr.mxu0 %v4672_v57  ;;  %v4366_v7 = vrot.slane %v4365_v53, 2  ;;  %v7346_v62 = vunpack.c.h.bf16 %v6887_v51  ;;  %v3670_v9 = vunpack.c.h.bf16 %v3186_v4  ;;  %v4663_v37 = vunpack.c.l.bf16 %v4535_v3  ;;  %v4592_v55 = vld [vmem:[#allocation13 + $0x2c8] sm:$0xff] }
 0x3e3   :  { %4318 = vmatpush2.msra.mxu1 %v7345_v11  ;;  %4944 = vmatpush2.msra.mxu0 %v4671_v41  ;;  %v4865_v29 = vsel %vm4864_vm5, %v4497_v33, %v4863_v28  ;;  %v4418_v8 = vrot.slane %v192_v50, 4  ;;  %v7347_v19 = vunpack.c.l.bf16 %v6887_v51  ;;  %v3669_v63 = vunpack.c.l.bf16 %v3186_v4  ;;  %v4590_v11 = vld [vmem:[#allocation13 + $0x2b8] sm:$0xff] }
 0x3e4   :  { %4319 = vmatprep.subr.mxu1 %v7346_v62  ;;  %v3665_v45 = vunpack.c.l.bf16 %v3184_v61  ;;  %4945 = vmatprep.subr.mxu0 %v4668_v43  ;;  %v4401_v60 = vadd.f32 %v4400_v25, %v189_v22  ;;  %v7348_v23 = vunpack.c.h.bf16 %v6897_v2  ;;  %v3666_v20 = vunpack.c.h.bf16 %v3184_v61  ;;  %v4587_v61 = vld [vmem:[#allocation13 + $0x2a0] sm:$0xff] }
 0x3e5   :  { %4320 = vmatpush2.msra.mxu1 %v7347_v19  ;;  %4946 = vmatpush2.msra.mxu0 %v4667_v14  ;;  %v7148_v1 = vsel %vm4866_vm6, %v4501_v5, %v4873_v30  ;;  %v4384_v39 = vrot.slane %v4383_v10, 2  ;;  %v4436_v54 = vrot.slane %v195_v46, 4  ;;  %v7349_v52 = vunpack.c.l.bf16 %v6897_v2  ;;  %v4593_v2 = vld [vmem:[#allocation13 + $0x2d0] sm:$0xff] }
 0x3e6   :  { %4321 = vmatprep.subr.mxu1 %v7348_v23  ;;  %4947 = vmatprep.subr.mxu0 %v4664_v17  ;;  %v7153_v51 = vsel %vm4866_vm6, %v4500_v24, %v4865_v29  ;;  %v4349_v15 = vadd.f32 %v4348_v42, %v4347_v26  ;;  %v4367_v27 = vadd.f32 %v4366_v7, %v4365_v53  ;;  %v4790_v32 = vunpack.c.h.bf16 %v7141_v40  ;;  %v7350_v53 = vld [vmem:[#allocation32_spill] sm:$0xff] }
 0x3e7   :  { %4322 = vmatpush2.msra.mxu1 %v7349_v52  ;;  %v4788_v18 = vunpack.c.h.bf16 %v4597_v56  ;;  %4948 = vmatpush2.msra.mxu0 %v4663_v37  ;;  %v4419_v58 = vadd.f32 %v4418_v8, %v192_v50  ;;  %v4787_v38 = vunpack.c.l.bf16 %v4597_v56  ;;  %v4783_v31 = vunpack.c.l.bf16 %v4595_v47  ;;  %v4589_v14 = vld [vmem:[#allocation13 + $0x2b0] sm:$0xff]  ;;  %v4588_v29 = vld [vmem:[#allocation13 + $0x2a8] sm:$0xff] }
 0x3e8   :  { %4323 = vmatprep.subr.mxu1 %v3670_v9  ;;  %v4784_v36 = vunpack.c.h.bf16 %v4595_v47  ;;  %4949 = vmatprep.mubr.f32.mxu0 %v7148_v1  ;;  %v4402_v57 = vrot.slane %v4401_v60, 2  ;;  %v4385_v34 = vadd.f32 %v4384_v39, %v4383_v10  ;;  %v4454_v22 = vrot.slane %v198_v48, 4  ;;  %v4586_v47 = vld [vmem:[#allocation13 + $0x298] sm:$0xff]  ;;  %v4583_v39 = vld [vmem:[#allocation13 + $0x280] sm:$0xff] }
 0x3e9   :  { %4324 = vmatpush2.msra.mxu1 %v3669_v63  ;;  %4950 = vmatmul.mubr.f32.vlgmr.msra.gmra.mxu0 %v7153_v51  ;;  %v4789_v44 = vunpack.c.l.bf16 %v7141_v40  ;;  %v4350_v3 = vrot.slane %v4349_v15, 1  ;;  %v4368_v13 = vrot.slane %v4367_v27, 1  ;;  %v4437_v49 = vadd.f32 %v4436_v54, %v195_v46  ;;  %v4585_v40 = vld [vmem:[#allocation13 + $0x290] sm:$0xff] }
 0x3ea   :  { %4325 = vmatprep.subr.mxu1 %v3666_v20  ;;  %5098 = vmatprep.subr.mxu0 %v4790_v32  ;;  %v4786_v26 = vunpack.c.h.bf16 %v4596_v6  ;;  %v4779_v21 = vunpack.c.l.bf16 %v4593_v2  ;;  %v4780_v41 = vunpack.c.h.bf16 %v4593_v2  ;;  %v4420_v35 = vrot.slane %v4419_v58, 2 }
 0x3eb   :  { %4326 = vmatpush2.msra.mxu1 %v3665_v45  ;;  %v4785_v33 = vunpack.c.l.bf16 %v4596_v6  ;;  %v4775_v4 = vunpack.c.l.bf16 %v7157_v59  ;;  %v6510_v43 = vmov 0.0   ;;  %v4403_v28 = vadd.f32 %v4402_v57, %v4401_v60  ;;  %5099 = vmatpush1.msra.mxu0 %v4789_v44 }
 0x3ec   :  { %4328 = vmatmul.mubr.f32.vlgmr.msra.gmra.mxu1 %v7350_v53  ;;  %4956 = vmatprep.subr.mxu1 %v4788_v18  ;;  %v4472_v50 = vrot.slane %v201_v16, 4  ;;  %v4782_v25 = vunpack.c.h.bf16 %v4594_v12  ;;  %v4776_v0 = vunpack.c.h.bf16 %v7157_v59  ;;  %v4386_v17 = vrot.slane %v4385_v34, 1 }
 0x3ed   :  { %4957 = vmatpush1.msra.mxu1 %v4787_v38  ;;  %5020 = vmatprep.mubr.f32.mxu1 %v6510_v43  ;;  %v4455_v5 = vadd.f32 %v4454_v22, %v198_v48  ;;  %v4781_v10 = vunpack.c.l.bf16 %v4594_v12  ;;  %v4351_v30 = vadd.f32 %v4350_v3, %v4349_v15  ;;  %v4369_v24 = vadd.f32 %v4368_v13, %v4367_v27  ;;  %v4581_v38 = vld [vmem:[#allocation13 + $0x270] sm:$0xff]  ;;  %v4582_v22 = vld [vmem:[#allocation13 + $0x278] sm:$0xff]  ;;  %v4579_v12 = vld [vmem:[#allocation13 + $0x260] sm:$0xff] }
 0x3ee   :  { %4958 = vmatprep.subr.mxu1 %v4784_v36  ;;  %v4438_v46 = vrot.slane %v4437_v49, 2  ;;  %5100 = vmatprep.subr.mxu0 %v4786_v26  ;;  %v4778_v42 = vunpack.c.h.bf16 %v4592_v55  ;;  %v4771_v7 = vunpack.c.l.bf16 %v4589_v14  ;;  %v4772_v62 = vunpack.c.h.bf16 %v4589_v14 }
 0x3ef   :  { %4959 = vmatpush1.msra.mxu1 %v4783_v31  ;;  %v4421_v9 = vadd.f32 %v4420_v35, %v4419_v58  ;;  %5101 = vmatpush1.msra.mxu0 %v4785_v33  ;;  %v4777_v37 = vunpack.c.l.bf16 %v4592_v55  ;;  %v4767_v8 = vunpack.c.l.bf16 %v4587_v61  ;;  %v4404_v19 = vrot.slane %v4403_v28, 1  ;;  %v4584_v58 = vld [vmem:[#allocation13 + $0x288] sm:$0xff]  ;;  %v4577_v33 = vld [vmem:[#allocation13 + $0x250] sm:$0xff] }
 0x3f0   :  { %4960 = vmatprep.subr.mxu1 %v4780_v41  ;;  %v4473_v63 = vadd.f32 %v4472_v50, %v201_v16  ;;  %5102 = vmatprep.subr.mxu0 %v4782_v25  ;;  %v4774_v45 = vunpack.c.h.bf16 %v4590_v11  ;;  %v4768_v56 = vunpack.c.h.bf16 %v4587_v61  ;;  %v4387_v60 = vadd.f32 %v4386_v17, %v4385_v34  ;;  %v4580_v41 = vld [vmem:[#allocation13 + $0x268] sm:$0xff]  ;;  %v4578_v61 = vld [vmem:[#allocation13 + $0x258] sm:$0xff] }
 0x3f1   :  { %4961 = vmatpush1.msra.mxu1 %v4779_v21  ;;  %v4456_v23 = vrot.slane %v4455_v5, 2  ;;  %5103 = vmatpush1.msra.mxu0 %v4781_v10  ;;  %v4773_v20 = vunpack.c.l.bf16 %v4590_v11  ;;  %v4439_v54 = vadd.f32 %v4438_v46, %v4437_v49  ;;  %v4481_v52 = vmul.f32 0.125, %v4351_v30 }
 0x3f2   :  { %4962 = vmatprep.subr.mxu1 %v4776_v0  ;;  %v4484_v48 = vmul.f32 0.125, %v4369_v24  ;;  %5104 = vmatprep.subr.mxu0 %v4778_v42  ;;  %v4770_v15 = vunpack.c.h.bf16 %v4588_v29  ;;  %v4764_v27 = vunpack.c.h.bf16 %v4585_v40  ;;  %v4422_v32 = vrot.slane %v4421_v9, 1  ;;  %v4576_v42 = vld [vmem:[#allocation13 + $0x248] sm:$0xff] }
 0x3f3   :  { %4963 = vmatpush1.msra.mxu1 %v4775_v4  ;;  %5105 = vmatpush1.msra.mxu0 %v4777_v37  ;;  %v4769_v18 = vunpack.c.l.bf16 %v4588_v29  ;;  %v4763_v6 = vunpack.c.l.bf16 %v4585_v40  ;;  %v4405_v31 = vadd.f32 %v4404_v19, %v4403_v28  ;;  %v4474_v36 = vrot.slane %v4473_v63, 2 }
 0x3f4   :  { %4964 = vmatprep.subr.mxu1 %v4772_v62  ;;  %5106 = vmatprep.subr.mxu0 %v4774_v45  ;;  %v4766_v2 = vunpack.c.h.bf16 %v4586_v47  ;;  %v4760_v57 = vunpack.c.h.bf16 %v4583_v39  ;;  %v4457_v59 = vadd.f32 %v4456_v23, %v4455_v5  ;;  %v4487_v16 = vmul.f32 0.125, %v4387_v60  ;;  %v4575_v5 = vld [vmem:[#allocation13 + $0x240] sm:$0xff]  ;;  %v4573_v62 = vld [vmem:[#allocation13 + $0x230] sm:$0xff] }
 0x3f5   :  { %4965 = vmatpush1.msra.mxu1 %v4771_v7  ;;  %5107 = vmatpush1.msra.mxu0 %v4773_v20  ;;  %v4765_v34 = vunpack.c.l.bf16 %v4586_v47  ;;  %v4759_v44 = vunpack.c.l.bf16 %v4583_v39  ;;  %v4440_v3 = vrot.slane %v4439_v54, 1  ;;  %v4875_v13 = vsel %vm4854_vm0, %v4484_v48, %v4481_v52  ;;  %v4569_v48 = vld [vmem:[#allocation13 + $0x210] sm:$0xff] }
 0x3f6   :  { %4966 = vmatprep.subr.mxu1 %v4768_v56  ;;  %5108 = vmatprep.subr.mxu0 %v4770_v15  ;;  %v4762_v49 = vunpack.c.h.bf16 %v4584_v58  ;;  %v4756_v26 = vunpack.c.h.bf16 %v4581_v38  ;;  %v4423_v53 = vadd.f32 %v4422_v32, %v4421_v9  ;;  %v4761_v21 = vunpack.c.l.bf16 %v4584_v58  ;;  %v4571_v56 = vld [vmem:[#allocation13 + $0x220] sm:$0xff] }
 0x3f7   :  { %4967 = vmatpush1.msra.mxu1 %v4767_v8  ;;  %5109 = vmatpush1.msra.mxu0 %v4769_v18  ;;  %v4755_v35 = vunpack.c.l.bf16 %v4581_v38  ;;  %v4475_v55 = vadd.f32 %v4474_v36, %v4473_v63  ;;  %v4490_v4 = vmul.f32 0.125, %v4405_v31  ;;  %v4758_v14 = vunpack.c.h.bf16 %v4582_v22  ;;  %v4574_v63 = vld [vmem:[#allocation13 + $0x238] sm:$0xff]  ;;  %v4567_v31 = vld [vmem:[#allocation13 + $0x200] sm:$0xff] }
 0x3f8   :  { %4968 = vmatprep.subr.mxu1 %v4764_v27  ;;  %5110 = vmatprep.subr.mxu0 %v4766_v2  ;;  %v4752_v28 = vunpack.c.h.bf16 %v4579_v12  ;;  %v4458_v50 = vrot.slane %v4457_v59, 1  ;;  %v4876_v25 = vsel %vm4856_vm1, %v4487_v16, %v4875_v13  ;;  %v4757_v0 = vunpack.c.l.bf16 %v4582_v22  ;;  %v4568_v16 = vld [vmem:[#allocation13 + $0x208] sm:$0xff] }
 0x3f9   :  { %4969 = vmatpush1.msra.mxu1 %v4763_v6  ;;  %5111 = vmatpush1.msra.mxu0 %v4765_v34  ;;  %v4751_v17 = vunpack.c.l.bf16 %v4579_v12  ;;  %v4441_v10 = vadd.f32 %v4440_v3, %v4439_v54  ;;  %v4754_v11 = vunpack.c.h.bf16 %v4580_v41  ;;  %v4748_v30 = vunpack.c.h.bf16 %v4577_v33  ;;  %v4572_v54 = vld [vmem:[#allocation13 + $0x228] sm:$0xff]  ;;  %v4570_v6 = vld [vmem:[#allocation13 + $0x218] sm:$0xff] }
 0x3fa   :  { %4970 = vmatprep.subr.mxu1 %v4760_v57  ;;  %5112 = vmatprep.subr.mxu0 %v4762_v49  ;;  %v4493_v24 = vmul.f32 0.125, %v4423_v53  ;;  %v4753_v46 = vunpack.c.l.bf16 %v4580_v41  ;;  %v4747_v7 = vunpack.c.l.bf16 %v4577_v33  ;;  %v4476_v9 = vrot.slane %v4475_v55, 1  ;;  %v4532_v53 = vld [vmem:[#allocation13 + $0xe8] sm:$0xff] }
 0x3fb   :  { %4971 = vmatpush1.msra.mxu1 %v4759_v44  ;;  %5113 = vmatpush1.msra.mxu0 %v4761_v21  ;;  %v4877_v37 = vsel %vm4858_vm2, %v4490_v4, %v4876_v25  ;;  %v4750_v29 = vunpack.c.h.bf16 %v4578_v61  ;;  %v4744_v8 = vunpack.c.h.bf16 %v4575_v5  ;;  %v4459_v40 = vadd.f32 %v4458_v50, %v4457_v59  ;;  %v4534_v44 = vld [vmem:[#allocation13 + $0xf8] sm:$0xff]  ;;  %v4528_v50 = vld [vmem:[#allocation13 + $0xc8] sm:$0xff] }
 0x3fc   :  { %4972 = vmatprep.subr.mxu1 %v4756_v26  ;;  %5114 = vmatprep.subr.mxu0 %v4758_v14  ;;  %v4749_v19 = vunpack.c.l.bf16 %v4578_v61  ;;  %v4743_v45 = vunpack.c.l.bf16 %v4575_v5  ;;  %v4496_v60 = vmul.f32 0.125, %v4441_v10  ;;  %v4746_v23 = vunpack.c.h.bf16 %v4576_v42  ;;  %v4526_v61 = vld [vmem:[#allocation13 + $0xb8] sm:$0xff]  ;;  %v4524_v10 = vld [vmem:[#allocation13 + $0xa8] sm:$0xff] }
 0x3fd   :  { %4973 = vmatpush1.msra.mxu1 %v4755_v35  ;;  %5115 = vmatpush1.msra.mxu0 %v4757_v0  ;;  %v4740_v20 = vunpack.c.h.bf16 %v4573_v62  ;;  %v4878_v47 = vsel %vm4860_vm3, %v4493_v24, %v4877_v37  ;;  %v4745_v39 = vunpack.c.l.bf16 %v4576_v42  ;;  %v4739_v52 = vunpack.c.l.bf16 %v4573_v62  ;;  %v4522_v24 = vld [vmem:[#allocation13 + $0x98] sm:$0xff] }
 0x3fe   :  { %4974 = vmatprep.subr.mxu1 %v4752_v28  ;;  %5116 = vmatprep.subr.mxu0 %v4754_v11  ;;  %v4477_v15 = vadd.f32 %v4476_v9, %v4475_v55  ;;  %v4742_v27 = vunpack.c.h.bf16 %v4574_v63  ;;  %v4736_v32 = vunpack.c.h.bf16 %v4571_v56  ;;  %v4499_v18 = vmul.f32 0.125, %v4459_v40  ;;  %v4530_v55 = vld [vmem:[#allocation13 + $0xd8] sm:$0xff] }
 0x3ff   :  { %4975 = vmatpush1.msra.mxu1 %v4751_v17  ;;  %5117 = vmatpush1.msra.mxu0 %v4753_v46  ;;  %v4741_v58 = vunpack.c.l.bf16 %v4574_v63  ;;  %v4735_v38 = vunpack.c.l.bf16 %v4571_v56  ;;  %v4879_v36 = vsel %vm4862_vm4, %v4496_v60, %v4878_v47  ;;  %v4738_v2 = vunpack.c.h.bf16 %v4572_v54  ;;  %v4518_v9 = vld [vmem:[#allocation13 + $0x78] sm:$0xff]  ;;  %v4512_v56 = vld [vmem:[#allocation13 + $0x48] sm:$0xff] }
 0x400   :  { %4976 = vmatprep.subr.mxu1 %v4748_v30  ;;  %5118 = vmatprep.subr.mxu0 %v4750_v29  ;;  %v4732_v57 = vunpack.c.h.bf16 %v4569_v48  ;;  %v4737_v59 = vunpack.c.l.bf16 %v4572_v54  ;;  %v4731_v34 = vunpack.c.l.bf16 %v4569_v48  ;;  %v4502_v22 = vmul.f32 0.125, %v4477_v15  ;;  %v4516_v29 = vld [vmem:[#allocation13 + $0x68] sm:$0xff]  ;;  %v4506_v15 = vld [vmem:[#allocation13 + $0x18] sm:$0xff] }
 0x401   :  { %4977 = vmatpush1.msra.mxu1 %v4747_v7  ;;  %5119 = vmatpush1.msra.mxu0 %v4749_v19  ;;  %v4734_v12 = vunpack.c.h.bf16 %v4570_v6  ;;  %v4728_v3 = vunpack.c.h.bf16 %v4567_v31  ;;  %v4880_v13 = vsel %vm4864_vm5, %v4499_v18, %v4879_v36  ;;  %v4733_v49 = vunpack.c.l.bf16 %v4570_v6  ;;  %v4520_v7 = vld [vmem:[#allocation13 + $0x88] sm:$0xff]  ;;  %v4514_v19 = vld [vmem:[#allocation13 + $0x58] sm:$0xff] }
 0x402   :  { %4978 = vmatprep.subr.mxu1 %v4744_v8  ;;  %5120 = vmatprep.subr.mxu0 %v4746_v23  ;;  %v4727_v26 = vunpack.c.l.bf16 %v4567_v31  ;;  %v4730_v21 = vunpack.c.h.bf16 %v4568_v16  ;;  %v4662_v41 = vunpack.c.h.bf16 %v4534_v44  ;;  %v4881_v35 = vsel %vm4866_vm6, %v4502_v22, %v4880_v13  ;;  %v4508_v54 = vld [vmem:[#allocation13 + $0x28] sm:$0xff]  ;;  %v4558_v13 = vld [vmem:[#allocation13 + $0x1b8] sm:$0xff] }
 0x403   :  { %4979 = vmatpush1.msra.mxu1 %v4743_v45  ;;  %5121 = vmatpush1.msra.mxu0 %v4745_v39  ;;  %v4661_v33 = vunpack.c.l.bf16 %v4534_v44  ;;  %v4658_v4 = vunpack.c.h.bf16 %v4532_v53  ;;  %v4729_v14 = vunpack.c.l.bf16 %v4568_v16  ;;  %v4657_v28 = vunpack.c.l.bf16 %v4532_v53  ;;  %v4504_v18 = vld [vmem:[#allocation13 + $0x8] sm:$0xff]  ;;  %v4562_v16 = vld [vmem:[#allocation13 + $0x1d8] sm:$0xff] }
 0x404   :  { %4980 = vmatprep.subr.mxu1 %v4740_v20  ;;  %5122 = vmatprep.subr.mxu0 %v4742_v27  ;;  %v4654_v25 = vunpack.c.h.bf16 %v4530_v55  ;;  %v4653_v0 = vunpack.c.l.bf16 %v4530_v55  ;;  %v4650_v17 = vunpack.c.h.bf16 %v4528_v50  ;;  %v4649_v5 = vunpack.c.l.bf16 %v4528_v50  ;;  %v4510_v20 = vld [vmem:[#allocation13 + $0x38] sm:$0xff]  ;;  %v4560_v44 = vld [vmem:[#allocation13 + $0x1c8] sm:$0xff] }
 0x405   :  { %4981 = vmatpush1.msra.mxu1 %v4739_v52  ;;  %5123 = vmatpush1.msra.mxu0 %v4741_v58  ;;  %v4646_v11 = vunpack.c.h.bf16 %v4526_v61  ;;  %v4645_v30 = vunpack.c.l.bf16 %v4526_v61  ;;  %v4642_v46 = vunpack.c.h.bf16 %v4524_v10  ;;  %v4641_v42 = vunpack.c.l.bf16 %v4524_v10  ;;  %v4552_v10 = vld [vmem:[#allocation13 + $0x188] sm:$0xff] }
 0x406   :  { %4982 = vmatprep.subr.mxu1 %v4736_v32  ;;  %5124 = vmatprep.subr.mxu0 %v4738_v2  ;;  %v4637_v62 = vunpack.c.l.bf16 %v4522_v24  ;;  %v4634_v37 = vunpack.c.h.bf16 %v4520_v7  ;;  %v4630_v8 = vunpack.c.h.bf16 %v4518_v9  ;;  %v4629_v40 = vunpack.c.l.bf16 %v4518_v9  ;;  %v4564_v2 = vld [vmem:[#allocation13 + $0x1e8] sm:$0xff] }
 0x407   :  { %4983 = vmatpush1.msra.mxu1 %v4735_v38  ;;  %5125 = vmatpush1.msra.mxu0 %v4737_v59  ;;  %v4626_v63 = vunpack.c.h.bf16 %v4516_v29  ;;  %v4625_v45 = vunpack.c.l.bf16 %v4516_v29  ;;  %v4622_v60 = vunpack.c.h.bf16 %v4514_v19  ;;  %v4621_v23 = vunpack.c.l.bf16 %v4514_v19  ;;  %v4566_v38 = vld [vmem:[#allocation13 + $0x1f8] sm:$0xff]  ;;  %v4548_v29 = vld [vmem:[#allocation13 + $0x168] sm:$0xff] }
 0x408   :  { %4984 = vmatprep.subr.mxu1 %v4732_v57  ;;  %5126 = vmatprep.subr.mxu0 %v4734_v12  ;;  %v4618_v47 = vunpack.c.h.bf16 %v4512_v56  ;;  %v4617_v39 = vunpack.c.l.bf16 %v4512_v56  ;;  %v4614_v52 = vunpack.c.h.bf16 %v4510_v20  ;;  %v4613_v48 = vunpack.c.l.bf16 %v4510_v20 }
 0x409   :  { %4985 = vmatpush1.msra.mxu1 %v4731_v34  ;;  %5127 = vmatpush1.msra.mxu0 %v4733_v49  ;;  %v4610_v27 = vunpack.c.h.bf16 %v4508_v54  ;;  %v4609_v32 = vunpack.c.l.bf16 %v4508_v54  ;;  %v4606_v58 = vunpack.c.h.bf16 %v4506_v15  ;;  %v4605_v6 = vunpack.c.l.bf16 %v4506_v15  ;;  %v4544_v54 = vld [vmem:[#allocation13 + $0x148] sm:$0xff] }
 0x40a   :  { %4986 = vmatprep.subr.mxu1 %v4728_v3  ;;  %5128 = vmatprep.subr.mxu0 %v4730_v21  ;;  %v4602_v31 = vunpack.c.h.bf16 %v4504_v18  ;;  %v4601_v36 = vunpack.c.l.bf16 %v4504_v18  ;;  %v4726_v57 = vunpack.c.h.bf16 %v4566_v38  ;;  %v4725_v59 = vunpack.c.l.bf16 %v4566_v38  ;;  %v6034_v21 = vld [vmem:[#allocation17 + $0x78] sm:$0xff]  }
 0x40b   :  { %4987 = vmatpush1.msra.mxu1 %v4727_v26  ;;  %5129 = vmatpush1.msra.mxu0 %v4729_v14  ;;  %v4722_v34 = vunpack.c.h.bf16 %v4564_v2  ;;  %v4721_v22 = vunpack.c.l.bf16 %v4564_v2  ;;  %v4718_v12 = vunpack.c.h.bf16 %v4562_v16  ;;  %v4717_v3 = vunpack.c.l.bf16 %v4562_v16  ;;  %v4556_v26 = vld [vmem:[#allocation13 + $0x1a8] sm:$0xff] }
 0x40c   :  { %5021 = vmatmul.mubr.f32.vlgmr.msra.gmra.mxu1 %v4881_v35  ;;  %5027 = vmatprep.subr.mxu1 %v4662_v41  ;;  %v4714_v49 = vunpack.c.h.bf16 %v4560_v44  ;;  %v4713_v53 = vunpack.c.l.bf16 %v4560_v44  ;;  %v6026_v41 = vld [vmem:[#allocation17 + $0x38] sm:$0xff]   ;;  %v5924_v55 = vunpack.c.h.bf16 %v6034_v21  ;;  %v5923_v14 = vunpack.c.l.bf16 %v6034_v21  ;;  %v4540_v2 = vld [vmem:[#allocation13 + $0x128] sm:$0xff] }
 0x40d   :  { %5028 = vmatpush1.msra.mxu1 %v4661_v33  ;;  %5091 = vmatprep.mubr.f32.mxu1 %v7148_v1  ;;  %v4638_v1 = vunpack.c.h.bf16 %v4522_v24  ;;  %v4710_v33 = vunpack.c.h.bf16 %v4558_v13  ;;  %v4709_v50 = vunpack.c.l.bf16 %v4558_v13  ;;  %v4706_v61 = vunpack.c.h.bf16 %v4556_v26 }
 0x40e   :  { %5029 = vmatprep.subr.mxu1 %v4658_v4  ;;  %5162 = vmatprep.mubr.f32.mxu0 %v6510_v43  ;;  %v4633_v43 = vunpack.c.l.bf16 %v4520_v7  ;;  %v5892_v4 = vunpack.c.h.bf16 %v6026_v41  ;;  %v4698_v9 = vunpack.c.h.bf16 %v4552_v10  ;;  %v4690_v20 = vunpack.c.h.bf16 %v4548_v29 }
 0x40f   :  { %5030 = vmatpush1.msra.mxu1 %v4657_v28  ;;  %5163 = vmatmul.mubr.f32.vlgmr.msra.gmra.mxu0 %v4881_v35  ;;  %v6033_v35 = vld [vmem:[#allocation17 + $0x70] sm:$0xff]   ;;  %v4682_v38 = vunpack.c.h.bf16 %v4544_v54  ;;  %v4674_v13 = vunpack.c.h.bf16 %v4540_v2 }
 0x410   :  { %5031 = vmatprep.subr.mxu1 %v4654_v25  ;;  %v6025_v28 = vld [vmem:[#allocation17 + $0x30] sm:$0xff]   ;;  %6051 = vmatprep.subr.mxu0 %v5924_v55  ;;  %v6020_v55 = vld [vmem:[#allocation17 + $0x8] sm:$0xff]  }
 0x411   :  { %5032 = vmatpush1.msra.mxu1 %v4653_v0  ;;  %v4554_v25 = vld [vmem:[#allocation13 + $0x198] sm:$0xff]  ;;  %v5891_v0 = vunpack.c.l.bf16 %v6026_v41  ;;  %6052 = vmatpush3.msra.mxu0 %v5892_v4  ;;  %v6028_v41 = vld [vmem:[#allocation17 + $0x48] sm:$0xff]  }
 0x412   :  { %5033 = vmatprep.subr.mxu1 %v4650_v17  ;;  %v5920_v17 = vunpack.c.h.bf16 %v6033_v35  ;;  %v4702_v24 = vunpack.c.h.bf16 %v4554_v25  ;;  %6053 = vmatprep.subr.mxu0 %v5923_v14  ;;  %v4701_v7 = vunpack.c.l.bf16 %v4554_v25 }
 0x413   :  { %5034 = vmatpush1.msra.mxu1 %v4649_v5  ;;  %v4705_v5 = vunpack.c.l.bf16 %v4556_v26  ;;  %6054 = vmatpush3.msra.mxu0 %v5891_v0  ;;  %v4673_v26 = vunpack.c.l.bf16 %v4540_v2  ;;  %v5868_v0 = vunpack.c.h.bf16 %v6020_v55 }
 0x414   :  { %5035 = vmatprep.subr.mxu1 %v4646_v11  ;;  %v5888_v11 = vunpack.c.h.bf16 %v6025_v28  ;;  %6055 = vmatprep.subr.mxu0 %v5920_v17  ;;  %v5867_v17 = vunpack.c.l.bf16 %v6020_v55  ;;  %v6039_v55 = vld [vmem:[#allocation17 + $0xa0] sm:$0xff]  }
 0x415   :  { %5036 = vmatpush1.msra.mxu1 %v4645_v30  ;;  %v6032_v30 = vld [vmem:[#allocation17 + $0x68] sm:$0xff]  }
 0x416   :  { %5037 = vmatprep.subr.mxu1 %v4642_v46  ;;  %v5919_v46 = vunpack.c.l.bf16 %v6033_v35  ;;  %6056 = vmatpush3.msra.mxu0 %v5888_v11  ;;  %v5862_v11 = vld [vmem:[#allocation17] sm:$0xff]  }
 0x417   :  { %5038 = vmatpush1.msra.mxu1 %v4641_v42  ;;  %v6024_v42 = vld [vmem:[#allocation17 + $0x28] sm:$0xff]  }
 0x418   :  { %5039 = vmatprep.subr.mxu1 %v4638_v1  ;;  %v4550_v1 = vld [vmem:[#allocation13 + $0x178] sm:$0xff]  ;;  %6057 = vmatprep.subr.mxu0 %v5919_v46  ;;  %v5863_v46 = vunpack.c.l.bf16 %v5862_v11 }
 0x419   :  { %5040 = vmatpush1.msra.mxu1 %v4637_v62  ;;  %v5887_v62 = vunpack.c.l.bf16 %v6025_v28  ;;  %v4694_v19 = vunpack.c.h.bf16 %v4550_v1  ;;  %v4693_v56 = vunpack.c.l.bf16 %v4550_v1  ;;  %v7178_v1 = vpop.f32.mrf.mxu0 }
 0x41a   :  { %5041 = vmatprep.subr.mxu1 %v4634_v37  ;;  %v5916_v37 = vunpack.c.h.bf16 %v6032_v30 }
 0x41b   :  { %5042 = vmatpush1.msra.mxu1 %v4633_v43  ;;  %v4697_v43 = vunpack.c.l.bf16 %v4552_v10  ;;  %6058 = vmatpush3.msra.mxu0 %v5887_v62  ;;  %v3727_v62 = vld [vmem:[#allocation11] sm:$0xf] }
 0x41c   :  { %5043 = vmatprep.subr.mxu1 %v4630_v8  ;;  %v5884_v8 = vunpack.c.h.bf16 %v6024_v42  ;;  %6059 = vmatprep.subr.mxu0 %v5916_v37 }
 0x41d   :  { %5044 = vmatpush1.msra.mxu1 %v4629_v40  ;;  %v6031_v40 = vld [vmem:[#allocation17 + $0x60] sm:$0xff]  }
 0x41e   :  { %5045 = vmatprep.subr.mxu1 %v4626_v63  ;;  %v5915_v63 = vunpack.c.l.bf16 %v6032_v30  ;;  %6060 = vmatpush3.msra.mxu0 %v5884_v8  ;;  %v5864_v30 = vunpack.c.h.bf16 %v5862_v11 }
 0x41f   :  { %5046 = vmatpush1.msra.mxu1 %v4625_v45  ;;  %v6023_v45 = vld [vmem:[#allocation17 + $0x20] sm:$0xff]  }
 0x420   :  { %5047 = vmatprep.subr.mxu1 %v4622_v60  ;;  %v4546_v60 = vld [vmem:[#allocation13 + $0x158] sm:$0xff]  ;;  %6061 = vmatprep.subr.mxu0 %v5915_v63  ;;  %v7352_v63 = vld [vmem:[#allocation31_spill] sm:$0xff] }
 0x421   :  { %5048 = vmatpush1.msra.mxu1 %v4621_v23  ;;  %v5883_v23 = vunpack.c.l.bf16 %v6024_v42  ;;  %v4686_v15 = vunpack.c.h.bf16 %v4546_v60  ;;  %v4685_v18 = vunpack.c.l.bf16 %v4546_v60  ;;  %v7175_v42 = vld [vmem:[#allocation16 + $0x78] sm:$0xff]  }
 0x422   :  { %5049 = vmatprep.subr.mxu1 %v4618_v47  ;;  %v5912_v47 = vunpack.c.h.bf16 %v6031_v40 }
 0x423   :  { %5050 = vmatpush1.msra.mxu1 %v4617_v39  ;;  %v4689_v39 = vunpack.c.l.bf16 %v4548_v29  ;;  %6062 = vmatpush3.msra.mxu0 %v5883_v23  ;;  %v7351_v29 = vld [vmem:[#allocation29_spill] sm:$0xff]  ;;  %v7353_v23 = vld [vmem:[#allocation28_spill] sm:$0xff] }
 0x424   :  { %5051 = vmatprep.subr.mxu1 %v4614_v52  ;;  %v5880_v52 = vunpack.c.h.bf16 %v6023_v45  ;;  %6063 = vmatprep.subr.mxu0 %v5912_v47 }
 0x425   :  { %5052 = vmatpush1.msra.mxu1 %v4613_v48  ;;  %v6030_v48 = vld [vmem:[#allocation17 + $0x58] sm:$0xff]  }
 0x426   :  { %5053 = vmatprep.subr.mxu1 %v4610_v27  ;;  %v5911_v27 = vunpack.c.l.bf16 %v6031_v40  ;;  %6064 = vmatpush3.msra.mxu0 %v5880_v52 }
 0x427   :  { %5054 = vmatpush1.msra.mxu1 %v4609_v32  ;;  %v6022_v32 = vld [vmem:[#allocation17 + $0x18] sm:$0xff]  }
 0x428   :  { %5055 = vmatprep.subr.mxu1 %v4606_v58  ;;  %v4542_v58 = vld [vmem:[#allocation13 + $0x138] sm:$0xff]  ;;  %6065 = vmatprep.subr.mxu0 %v5911_v27 }
 0x429   :  { %5056 = vmatpush1.msra.mxu1 %v4605_v6  ;;  %v5879_v6 = vunpack.c.l.bf16 %v6023_v45  ;;  %v4678_v16 = vunpack.c.h.bf16 %v4542_v58  ;;  %v4677_v44 = vunpack.c.l.bf16 %v4542_v58 }
 0x42a   :  { %5057 = vmatprep.subr.mxu1 %v4602_v31  ;;  %v5908_v31 = vunpack.c.h.bf16 %v6030_v48 }
 0x42b   :  { %5058 = vmatpush1.msra.mxu1 %v4601_v36  ;;  %v4681_v36 = vunpack.c.l.bf16 %v4544_v54  ;;  %6066 = vmatpush3.msra.mxu0 %v5879_v6 }
 0x42c   :  { %5059 = vmatprep.subr.mxu1 %v4726_v57  ;;  %v5876_v57 = vunpack.c.h.bf16 %v6022_v32  ;;  %6067 = vmatprep.subr.mxu0 %v5908_v31 }
 0x42d   :  { %5060 = vmatpush2.msra.mxu1 %v4725_v59  ;;  %v6029_v59 = vld [vmem:[#allocation17 + $0x50] sm:$0xff]  }
 0x42e   :  { %5061 = vmatprep.subr.mxu1 %v4722_v34  ;;  %v5907_v34 = vunpack.c.l.bf16 %v6030_v48  ;;  %6068 = vmatpush3.msra.mxu0 %v5876_v57  ;;  %v6042_v57 = vld [vmem:[#allocation17 + $0xb8] sm:$0xff]  }
 0x42f   :  { %5062 = vmatpush2.msra.mxu1 %v4721_v22  ;;  %v6021_v22 = vld [vmem:[#allocation17 + $0x10] sm:$0xff]  }
 0x430   :  { %5063 = vmatprep.subr.mxu1 %v4718_v12  ;;  %v4538_v12 = vld [vmem:[#allocation13 + $0x118] sm:$0xff]  ;;  %v5872_v21 = vunpack.c.h.bf16 %v6021_v22  ;;  %6069 = vmatprep.subr.mxu0 %v5907_v34  ;;  %v5871_v14 = vunpack.c.l.bf16 %v6021_v22  ;;  %v5956_v22 = vunpack.c.h.bf16 %v6042_v57 }
 0x431   :  { %5064 = vmatpush2.msra.mxu1 %v4717_v3  ;;  %v5875_v3 = vunpack.c.l.bf16 %v6022_v32  ;;  %v4670_v35 = vunpack.c.h.bf16 %v4538_v12  ;;  %v4669_v4 = vunpack.c.l.bf16 %v4538_v12  ;;  %v6041_v34 = vld [vmem:[#allocation17 + $0xb0] sm:$0xff]  }
 0x432   :  { %5065 = vmatprep.subr.mxu1 %v4714_v49  ;;  %v5904_v49 = vunpack.c.h.bf16 %v6029_v59 }
 0x433   :  { %5066 = vmatpush2.msra.mxu1 %v4713_v53  ;;  %v4536_v53 = vld [vmem:[#allocation13 + $0x108] sm:$0xff]  ;;  %6070 = vmatpush3.msra.mxu0 %v5875_v3  ;;  %v5952_v3 = vunpack.c.h.bf16 %v6041_v34 }
 0x434   :  { %5067 = vmatprep.subr.mxu1 %v4710_v33  ;;  %v5903_v33 = vunpack.c.l.bf16 %v6029_v59  ;;  %v4666_v28 = vunpack.c.h.bf16 %v4536_v53  ;;  %6071 = vmatprep.subr.mxu0 %v5904_v49  ;;  %v4665_v25 = vunpack.c.l.bf16 %v4536_v53  ;;  %v5951_v53 = vunpack.c.l.bf16 %v6041_v34  ;;  %v4791_v34 = vld [vmem:[#allocation14] sm:$0xf] }
 0x435   :  { %5068 = vmatpush2.msra.mxu1 %v4709_v50  ;;  %v5900_v50 = vunpack.c.h.bf16 %v6028_v41  ;;  %6072 = vmatpush3.msra.mxu0 %v5872_v21 }
 0x436   :  { %5069 = vmatprep.subr.mxu1 %v4706_v61  ;;  %6073 = vmatprep.subr.mxu0 %v5903_v33  ;;  %v5899_v61 = vunpack.c.l.bf16 %v6028_v41 }
 0x437   :  { %5070 = vmatpush2.msra.mxu1 %v4705_v5  ;;  %6074 = vmatpush3.msra.mxu0 %v5871_v14  ;;  %v6027_v5 = vld [vmem:[#allocation17 + $0x40] sm:$0xff]  }
 0x438   :  { %5071 = vmatprep.subr.mxu1 %v4702_v24  ;;  %6075 = vmatprep.subr.mxu0 %v5900_v50  ;;  %v5896_v10 = vunpack.c.h.bf16 %v6027_v5  ;;  %v5895_v24 = vunpack.c.l.bf16 %v6027_v5  ;;  %v6046_v50 = vld [vmem:[#allocation17 + $0xd8] sm:$0xff]  }
 0x439   :  { %5072 = vmatpush2.msra.mxu1 %v4701_v7  ;;  %6076 = vmatpush3.msra.mxu0 %v5868_v0  ;;  %v5796_v7 = vunpack.c.h.bf16 %v7175_v42  ;;  %v6038_v0 = vld [vmem:[#allocation17 + $0x98] sm:$0xff]   ;;  %v5971_v11 = vunpack.c.l.bf16 %v6046_v50 }
 0x43a   :  { %5073 = vmatprep.subr.mxu1 %v4698_v9  ;;  %6077 = vmatprep.subr.mxu0 %v5899_v61  ;;  %v7182_v9 = vpop.f32.mrf.mxu1  ;;  %v5943_v61 = vunpack.c.l.bf16 %v6039_v55  ;;  %v5940_v5 = vunpack.c.h.bf16 %v6038_v0 }
 0x43b   :  { %5074 = vmatpush2.msra.mxu1 %v4697_v43  ;;  %6078 = vmatpush3.msra.mxu0 %v5867_v17  ;;  %v7186_v43 = vunpack.c.l.bf16 %v3727_v62  ;;  %v5972_v17 = vunpack.c.h.bf16 %v6046_v50  ;;  %v6044_v62 = vld [vmem:[#allocation17 + $0xc8] sm:$0xff]  }
 0x43c   :  { %5075 = vmatprep.subr.mxu1 %v4694_v19  ;;  %6079 = vmatprep.subr.mxu0 %v5896_v10  ;;  %v7190_v40 = vpop.f32.mrf.mxu1  ;;  %v6045_v10 = vld [vmem:[#allocation17 + $0xd0] sm:$0xff]  }
 0x43d   :  { %5076 = vmatpush2.msra.mxu1 %v4693_v56  ;;  %6080 = vmatpush3.msra.mxu0 %v5864_v30  ;;  %v3741_v8 = vrot.slane %v7186_v43, %v7351_v29  ;;  %v3745_v45 = vrot.slane %v7186_v43, %v7352_v63  ;;  %v6037_v30 = vld [vmem:[#allocation17 + $0x90] sm:$0xff]  }
 0x43e   :  { %5077 = vmatprep.subr.mxu1 %v4690_v20  ;;  %6081 = vmatprep.subr.mxu0 %v5895_v24  ;;  %v7196_v60 = vpop.f32.mrf.mxu1  ;;  %v5939_v24 = vunpack.c.l.bf16 %v6038_v0  ;;  %v6002_v0 = vld [vmem:[#allocation16 + $0x70] sm:$0xff]  }
 0x43f   :  { %5078 = vmatpush2.msra.mxu1 %v4689_v39  ;;  %6082 = vmatpush3.msra.mxu0 %v5863_v46  ;;  %v3761_v20 = vrot.slane %v3741_v8, %v7353_v23  ;;  %v3765_v47 = vrot.slane %v3745_v45, %v7353_v23  ;;  %v5968_v46 = vunpack.c.h.bf16 %v6045_v10  ;;  %v5967_v8 = vunpack.c.l.bf16 %v6045_v10 }
 0x440   :  { %5079 = vmatprep.subr.mxu1 %v4686_v15  ;;  %6121 = vmatprep.subr.mxu0 %v5796_v7  ;;  %v7200_v54 = vpop.f32.mrf.mxu1  ;;  %v5936_v7 = vunpack.c.h.bf16 %v6037_v30  ;;  %v5935_v45 = vunpack.c.l.bf16 %v6037_v30 }
 0x441   :  { %5080 = vmatpush2.msra.mxu1 %v4685_v18 }
 0x442   :  { %5081 = vmatprep.subr.mxu1 %v4682_v38 }
 0x443   :  { %5082 = vmatpush2.msra.mxu1 %v4681_v36  ;;  %v6050_v36 = vld [vmem:[#allocation17 + $0xf8] sm:$0xff]  }
 0x444   :  { %5083 = vmatprep.subr.mxu1 %v4678_v16  ;;  %v5988_v2 = vunpack.c.h.bf16 %v6050_v36  ;;  %v5987_v59 = vunpack.c.l.bf16 %v6050_v36  ;;  %v6049_v16 = vld [vmem:[#allocation17 + $0xf0] sm:$0xff]  }
 0x445   :  { %5084 = vmatpush2.msra.mxu1 %v4677_v44  ;;  %v5955_v44 = vunpack.c.l.bf16 %v6042_v57  ;;  %v5984_v12 = vunpack.c.h.bf16 %v6049_v16  ;;  %v5983_v49 = vunpack.c.l.bf16 %v6049_v16 }
 0x446   :  { %5085 = vmatprep.subr.mxu1 %v4674_v13  ;;  %v6048_v13 = vld [vmem:[#allocation17 + $0xe8] sm:$0xff]  }
 0x447   :  { %5086 = vmatpush2.msra.mxu1 %v4673_v26  ;;  %v6040_v26 = vld [vmem:[#allocation17 + $0xa8] sm:$0xff]   ;;  %v5980_v21 = vunpack.c.h.bf16 %v6048_v13  ;;  %v5979_v33 = vunpack.c.l.bf16 %v6048_v13 }
 0x448   :  { %5087 = vmatprep.subr.mxu1 %v4670_v35  ;;  %v5948_v41 = vunpack.c.h.bf16 %v6040_v26  ;;  %v6047_v35 = vld [vmem:[#allocation17 + $0xe0] sm:$0xff]  }
 0x449   :  { %5088 = vmatpush2.msra.mxu1 %v4669_v4  ;;  %v5947_v4 = vunpack.c.l.bf16 %v6040_v26  ;;  %v5976_v14 = vunpack.c.h.bf16 %v6047_v35 }
 0x44a   :  { %5089 = vmatprep.subr.mxu1 %v4666_v28  ;;  %v5944_v28 = vunpack.c.h.bf16 %v6039_v55  ;;  %v5995_v55 = vld [vmem:[#allocation16 + $0x38] sm:$0xff]  }
 0x44b   :  { %5090 = vmatpush2.msra.mxu1 %v4665_v25  ;;  %v5975_v25 = vunpack.c.l.bf16 %v6047_v35 }
 0x44c   :  { %5092 = vmatmul.mubr.f32.vlgmr.msra.gmra.mxu1 %v7153_v51  ;;  %v7180_v51 = vpop.f32.mrf.mxu0  ;;  %6086 = vmatprep.subr.mxu1 %v5988_v2 }
 0x44d   :  { %6087 = vmatpush3.msra.mxu1 %v5956_v22  ;;  %v7215_v22 = vunpack.c.l.bf16 %v4791_v34 }
 0x44e   :  { %v7184_v37 = vpop.f32.mrf.mxu0  ;;  %6088 = vmatprep.subr.mxu1 %v5987_v59 }
 0x44f   :  { %6089 = vmatpush3.msra.mxu1 %v5955_v44  ;;  %v7354_v44 = vld [vmem:[#allocation30_spill] sm:$0xff]  ;;  %v4797_v13 = vrot.slane %v7215_v22, %v7353_v23 }
 0x450   :  { %v7192_v19 = vpop.f32.mrf.mxu0  ;;  %6090 = vmatprep.subr.mxu1 %v5984_v12  ;;  %v3737_v12 = vrot.slane %v7186_v43, %v7354_v44 }
 0x451   :  { %6091 = vmatpush3.msra.mxu1 %v5952_v3  ;;  %v4801_v3 = vrot.slane %v7215_v22, %v7354_v44  ;;  %v5997_v44 = vld [vmem:[#allocation16 + $0x48] sm:$0xff]  }
 0x452   :  { %v4116_v56 = vpop.f32.mrf.mxu0  ;;  %6092 = vmatprep.subr.mxu1 %v5983_v49 }
 0x453   :  { %v4117_v52 = vadd.f32 %v4116_v56, %v3761_v20  ;;  %6093 = vmatpush3.msra.mxu1 %v5951_v53  ;;  %v5964_v56 = vunpack.c.h.bf16 %v6044_v62  ;;  %v6036_v20 = vld [vmem:[#allocation17 + $0x88] sm:$0xff]   ;;  %v4821_v26 = vrot.slane %v4801_v3, %v7353_v23 }
 0x454   :  { %v4118_v39 = vpop.f32.mrf.mxu0  ;;  %6094 = vmatprep.subr.mxu1 %v5980_v21 }
 0x455   :  { %v4119_v27 = vadd.f32 %v4118_v39, %v3765_v47  ;;  %6095 = vmatpush3.msra.mxu1 %v5948_v41  ;;  %v5932_v47 = vunpack.c.h.bf16 %v6036_v20  ;;  %v5963_v39 = vunpack.c.l.bf16 %v6044_v62  ;;  %v6000_v62 = vld [vmem:[#allocation16 + $0x60] sm:$0xff]  }
 0x456   :  { %6096 = vmatprep.subr.mxu1 %v5979_v33 }
 0x457   :  { %6097 = vmatpush3.msra.mxu1 %v5947_v4 }
 0x458   :  { %6098 = vmatprep.subr.mxu1 %v5976_v14 }
 0x459   :  { %6099 = vmatpush3.msra.mxu1 %v5944_v28 }
 0x45a   :  { %6100 = vmatprep.subr.mxu1 %v5975_v25  ;;  %v5764_v25 = vunpack.c.h.bf16 %v5995_v55 }
 0x45b   :  { %6101 = vmatpush3.msra.mxu1 %v5943_v61 }
 0x45c   :  { %6102 = vmatprep.subr.mxu1 %v5972_v17  ;;  %v5795_v17 = vunpack.c.l.bf16 %v7175_v42 }
 0x45d   :  { %v4258_v48 = vpop.f32.mrf.mxu0  ;;  %6103 = vmatpush3.msra.mxu1 %v5940_v5  ;;  %v5994_v5 = vld [vmem:[#allocation16 + $0x30] sm:$0xff]  }
 0x45e   :  { %6104 = vmatprep.subr.mxu1 %v5971_v11  ;;  %v5792_v11 = vunpack.c.h.bf16 %v6002_v0  ;;  %v5760_v30 = vunpack.c.h.bf16 %v5994_v5 }
 0x45f   :  { %v4260_v38 = vpop.f32.mrf.mxu0  ;;  %6105 = vmatpush3.msra.mxu1 %v5939_v24  ;;  %v5791_v24 = vunpack.c.l.bf16 %v6002_v0 }
 0x460   :  { %6106 = vmatprep.subr.mxu1 %v5968_v46  ;;  %v5759_v46 = vunpack.c.l.bf16 %v5994_v5 }
 0x461   :  { %6107 = vmatpush3.msra.mxu1 %v5936_v7 }
 0x462   :  { %v4187_v15 = vpop.f32.mrf.mxu1  ;;  %6108 = vmatprep.subr.mxu1 %v5967_v8  ;;  %v5992_v8 = vld [vmem:[#allocation16 + $0x20] sm:$0xff]  }
 0x463   :  { %v4188_v32 = vadd.f32 %v4187_v15, %v4117_v52  ;;  %6109 = vmatpush3.msra.mxu1 %v5935_v45  ;;  %v5931_v52 = vunpack.c.l.bf16 %v6036_v20  ;;  %v5752_v20 = vunpack.c.h.bf16 %v5992_v8 }
 0x464   :  { %v4189_v18 = vpop.f32.mrf.mxu1  ;;  %6110 = vmatprep.subr.mxu1 %v5964_v56  ;;  %v5784_v56 = vunpack.c.h.bf16 %v6000_v62 }
 0x465   :  { %v4190_v58 = vadd.f32 %v4189_v18, %v4119_v27  ;;  %v7202_v6 = vadd.f32 %v4258_v48, %v4188_v32  ;;  %6111 = vmatpush3.msra.mxu1 %v5932_v47  ;;  %v6043_v48 = vld [vmem:[#allocation17 + $0xc0] sm:$0xff]   ;;  %v5999_v47 = vld [vmem:[#allocation16 + $0x58] sm:$0xff]  }
 0x466   :  { %6112 = vmatprep.subr.mxu1 %v5963_v39  ;;  %v5960_v15 = vunpack.c.h.bf16 %v6043_v48  ;;  %v6035_v27 = vld [vmem:[#allocation17 + $0x80] sm:$0xff]   ;;  %v5959_v18 = vunpack.c.l.bf16 %v6043_v48  ;;  %v5783_v39 = vunpack.c.l.bf16 %v6000_v62  ;;  %v5751_v48 = vunpack.c.l.bf16 %v5992_v8  ;;  %v6009_v62 = vld [vmem:[#allocation16 + $0xa8] sm:$0xff]  }
 0x467   :  { %v7204_v31 = vadd.f32 %v4260_v38, %v4190_v58  ;;  %6113 = vmatpush3.msra.mxu1 %v5931_v52  ;;  %v5928_v32 = vunpack.c.h.bf16 %v6035_v27  ;;  %v5927_v58 = vunpack.c.l.bf16 %v6035_v27  ;;  %v7206_v38 = vld [vmem:[#allocation16 + $0xf8] sm:$0xff]  }
 0x468   :  { %6114 = vmatprep.subr.mxu1 %v5960_v15  ;;  %v5860_v36 = vunpack.c.h.bf16 %v7206_v38  ;;  %v5991_v52 = vld [vmem:[#allocation16 + $0x18] sm:$0xff]   ;;  %v5780_v15 = vunpack.c.h.bf16 %v5999_v47 }
 0x469   :  { %6115 = vmatpush3.msra.mxu1 %v5928_v32  ;;  %v5748_v27 = vunpack.c.h.bf16 %v5991_v52  ;;  %v5998_v32 = vld [vmem:[#allocation16 + $0x50] sm:$0xff]  }
 0x46a   :  { %6116 = vmatprep.subr.mxu1 %v5959_v18  ;;  %v3733_v18 = vrot.slane %v7186_v43, %v7353_v23  ;;  %v5775_v3 = vunpack.c.l.bf16 %v5998_v32 }
 0x46b   :  { %6117 = vmatpush3.msra.mxu1 %v5927_v58  ;;  %v5779_v58 = vunpack.c.l.bf16 %v5999_v47  ;;  %v5819_v47 = vunpack.c.l.bf16 %v6009_v62 }
 0x46c   :  { %6156 = vmatprep.subr.mxu1 %v5860_v36  ;;  %v5990_v36 = vld [vmem:[#allocation16 + $0x10] sm:$0xff]  }
 0x46d   :  { %v5744_v34 = vunpack.c.h.bf16 %v5990_v36 }
 0x4a9   :  { %v4951_v49 = vpop.f32.mrf.mxu0 }
 0x4ab   :  { %v4953_v53 = vpop.f32.mrf.mxu0 }
 0x4ac   :  { %v4329_v2 = vpop.f32.mrf.mxu1  ;;  %v4954_v41 = vadd.f32 %v4953_v53, %v4821_v26  ;;  %v5996_v26 = vld [vmem:[#allocation16 + $0x40] sm:$0xff]   ;;  %v5771_v53 = vunpack.c.l.bf16 %v5997_v44 }
 0x4ad   :  { %v7210_v57 = vadd.f32 %v4329_v2, %v7202_v6  ;;  %v3757_v6 = vrot.slane %v3737_v12, %v7353_v23  ;;  %v5747_v2 = vunpack.c.l.bf16 %v5991_v52  ;;  %v3753_v12 = vrot.slane %v3733_v18, %v7353_v23  ;;  %v6015_v52 = vld [vmem:[#allocation16 + $0xd8] sm:$0xff]  }
 0x4ae   :  { %v4331_v59 = vpop.f32.mrf.mxu1 }
 0x4af   :  { %v7213_v16 = vadd.f32 %v4331_v59, %v7204_v31  ;;  %v4817_v31 = vrot.slane %v4797_v13, %v7353_v23  ;;  %v3835_v21 = vadd.f32 %v7180_v51, %v3757_v6  ;;  %v5763_v51 = vunpack.c.l.bf16 %v5995_v55  ;;  %v5989_v13 = vld [vmem:[#allocation16 + $0x8] sm:$0xff]  }
 0x4b0   :  { %v5776_v59 = vunpack.c.h.bf16 %v5998_v32  ;;  %v5772_v6 = vunpack.c.h.bf16 %v5997_v44  ;;  %v5740_v43 = vunpack.c.h.bf16 %v5989_v13  ;;  %v5844_v32 = vunpack.c.h.bf16 %v6015_v52 }
 0x4b1   :  { %v4952_v35 = vadd.f32 %v4951_v49, %v4817_v31  ;;  %v3906_v4 = vadd.f32 %v7190_v40, %v3835_v21  ;;  %v6001_v40 = vld [vmem:[#allocation16 + $0x68] sm:$0xff]   ;;  %v5743_v49 = vunpack.c.l.bf16 %v5990_v36  ;;  %v3833_v31 = vadd.f32 %v7178_v1, %v3753_v12  ;;  %v5734_v21 = vld [vmem:[#allocation16] sm:$0xff]  }
 0x4b2   :  { %v5788_v7 = vunpack.c.h.bf16 %v6001_v40  ;;  %v5843_v36 = vunpack.c.l.bf16 %v6015_v52  ;;  %v6013_v12 = vld [vmem:[#allocation16 + $0xc8] sm:$0xff]  }
 0x4b3   :  { %v3977_v28 = vadd.f32 %v7192_v19, %v3906_v4  ;;  %v5993_v19 = vld [vmem:[#allocation16 + $0x28] sm:$0xff]   ;;  %v3904_v55 = vadd.f32 %v7182_v9, %v3833_v31  ;;  %v5767_v4 = vunpack.c.l.bf16 %v5996_v26  ;;  %v5835_v31 = vunpack.c.l.bf16 %v6013_v12 }
 0x4b4   :  { %v5756_v42 = vunpack.c.h.bf16 %v5993_v19  ;;  %v5755_v45 = vunpack.c.l.bf16 %v5993_v19  ;;  %v6010_v19 = vld [vmem:[#allocation16 + $0xb0] sm:$0xff]  }
 0x4b5   :  { %v4048_v10 = vadd.f32 %v7200_v54, %v3977_v28  ;;  %v5787_v54 = vunpack.c.l.bf16 %v6001_v40  ;;  %v3975_v28 = vadd.f32 %v7184_v37, %v3904_v55  ;;  %v6018_v40 = vld [vmem:[#allocation16 + $0xf0] sm:$0xff]  }
 0x4b7   :  { %v4046_v1 = vadd.f32 %v7196_v60, %v3975_v28 }
 0x4cc   :  { %v5022_v33 = vpop.f32.mrf.mxu1 }
 0x4cd   :  { %v5023_v61 = vadd.f32 %v5022_v33, %v4952_v35  ;;  %v5768_v35 = vunpack.c.h.bf16 %v5996_v26  ;;  %v5736_v33 = vunpack.c.h.bf16 %v5734_v21  ;;  %v6012_v26 = vld [vmem:[#allocation16 + $0xc0] sm:$0xff]  }
 0x4ce   :  { %v5024_v14 = vpop.f32.mrf.mxu1 }
 0x4cf   :  { %v5025_v50 = vadd.f32 %v5024_v14, %v4954_v41  ;;  %v5739_v41 = vunpack.c.l.bf16 %v5989_v13  ;;  %v5735_v14 = vunpack.c.l.bf16 %v5734_v21  ;;  %v6005_v13 = vld [vmem:[#allocation16 + $0x88] sm:$0xff]  }
 0x4d0   :  { %v5803_v21 = vunpack.c.l.bf16 %v6005_v13 }
 0x4d1   :  { %5489 = vmatprep.mubr.f32.mxu0 %v5025_v50  ;;  %v4805_v50 = vrot.slane %v7215_v22, %v7351_v29  ;;  %v5859_v29 = vunpack.c.l.bf16 %v7206_v38  ;;  %v6016_v38 = vld [vmem:[#allocation16 + $0xe0] sm:$0xff]  }
 0x4d2   :  { %5490 = vmatmul.mubr.f32.vlgmr.msra.gmra.mxu0 %v5023_v61 }
 0x4d3   :  { %6122 = vmatpush3.msra.mxu0 %v5764_v25  ;;  %5629 = vmatprep.mubr.f32.mxu0 %v4048_v10  ;;  %v4809_v25 = vrot.slane %v7215_v22, %v7352_v63  ;;  %v4825_v9 = vrot.slane %v4805_v50, %v7353_v23  ;;  %v6011_v10 = vld [vmem:[#allocation16 + $0xb8] sm:$0xff]   ;;  %v5856_v22 = vunpack.c.h.bf16 %v6018_v40 }
 0x4d4   :  { %6123 = vmatprep.subr.mxu0 %v5795_v17  ;;  %v5164_v17 = vpop.f32.mrf.mxu0  ;;  %v5827_v63 = vunpack.c.l.bf16 %v6011_v10 }
 0x4d5   :  { %6124 = vmatpush3.msra.mxu0 %v5763_v51  ;;  %v4829_v0 = vrot.slane %v4809_v25, %v7353_v23 }
 0x4d6   :  { %6125 = vmatprep.subr.mxu0 %v5792_v11  ;;  %v5166_v60 = vpop.f32.mrf.mxu0 }
 0x4d7   :  { %6126 = vmatpush3.msra.mxu0 %v5760_v30  ;;  %v5828_v30 = vunpack.c.h.bf16 %v6011_v10 }
 0x4d8   :  { %6127 = vmatprep.subr.mxu0 %v5791_v24 }
 0x4d9   :  { %6128 = vmatpush3.msra.mxu0 %v5759_v46  ;;  %v5824_v46 = vunpack.c.h.bf16 %v6010_v19 }
 0x4da   :  { %6129 = vmatprep.subr.mxu0 %v5788_v7  ;;  %v6017_v7 = vld [vmem:[#allocation16 + $0xe8] sm:$0xff]  }
 0x4db   :  { %6130 = vmatpush3.msra.mxu0 %v5756_v42  ;;  %v5855_v42 = vunpack.c.l.bf16 %v6018_v40  ;;  %v5852_v8 = vunpack.c.h.bf16 %v6017_v7 }
 0x4dc   :  { %6131 = vmatprep.subr.mxu0 %v5787_v54  ;;  %v5823_v54 = vunpack.c.l.bf16 %v6010_v19 }
 0x4dd   :  { %6132 = vmatpush3.msra.mxu0 %v5755_v45  ;;  %v5820_v45 = vunpack.c.h.bf16 %v6009_v62 }
 0x4de   :  { %6133 = vmatprep.subr.mxu0 %v5784_v56  ;;  %v5851_v56 = vunpack.c.l.bf16 %v6017_v7 }
 0x4df   :  { %6134 = vmatpush3.msra.mxu0 %v5752_v20  ;;  %v6008_v20 = vld [vmem:[#allocation16 + $0xa0] sm:$0xff]  }
 0x4e0   :  { %6135 = vmatprep.subr.mxu0 %v5783_v39  ;;  %v5848_v39 = vunpack.c.h.bf16 %v6016_v38 }
 0x4e1   :  { %6136 = vmatpush3.msra.mxu0 %v5751_v48  ;;  %v5847_v48 = vunpack.c.l.bf16 %v6016_v38 }
 0x4e2   :  { %6137 = vmatprep.subr.mxu0 %v5780_v15  ;;  %v6007_v15 = vld [vmem:[#allocation16 + $0x98] sm:$0xff]  }
 0x4e3   :  { %6138 = vmatpush3.msra.mxu0 %v5748_v27  ;;  %v5815_v27 = vunpack.c.l.bf16 %v6008_v20  ;;  %v5812_v18 = vunpack.c.h.bf16 %v6007_v15 }
 0x4e4   :  { %6139 = vmatprep.subr.mxu0 %v5779_v58  ;;  %v6014_v58 = vld [vmem:[#allocation16 + $0xd0] sm:$0xff]  }
 0x4e5   :  { %6140 = vmatpush3.msra.mxu0 %v5747_v2  ;;  %v6006_v2 = vld [vmem:[#allocation16 + $0x90] sm:$0xff]  }
 0x4e6   :  { %6141 = vmatprep.subr.mxu0 %v5776_v59  ;;  %v5811_v59 = vunpack.c.l.bf16 %v6007_v15  ;;  %v5808_v44 = vunpack.c.h.bf16 %v6006_v2 }
 0x4e7   :  { %6142 = vmatpush3.msra.mxu0 %v5744_v34  ;;  %v5840_v34 = vunpack.c.h.bf16 %v6014_v58 }
 0x4e8   :  { %6143 = vmatprep.subr.mxu0 %v5775_v3  ;;  %v5839_v3 = vunpack.c.l.bf16 %v6014_v58 }
 0x4e9   :  { %6144 = vmatpush3.msra.mxu0 %v5743_v49  ;;  %v5807_v49 = vunpack.c.l.bf16 %v6006_v2 }
 0x4ea   :  { %6145 = vmatprep.subr.mxu0 %v5772_v6  ;;  %v5836_v6 = vunpack.c.h.bf16 %v6013_v12 }
 0x4eb   :  { %6146 = vmatpush3.msra.mxu0 %v5740_v43  ;;  %v5804_v43 = vunpack.c.h.bf16 %v6005_v13 }
 0x4ec   :  { %6147 = vmatprep.subr.mxu0 %v5771_v53  ;;  %v6004_v53 = vld [vmem:[#allocation16 + $0x80] sm:$0xff]  }
 0x4ed   :  { %6148 = vmatpush3.msra.mxu0 %v5739_v41  ;;  %v5832_v41 = vunpack.c.h.bf16 %v6012_v26  ;;  %v5799_v55 = vunpack.c.l.bf16 %v6004_v53 }
 0x4ee   :  { %6149 = vmatprep.subr.mxu0 %v5768_v35  ;;  %v5800_v35 = vunpack.c.h.bf16 %v6004_v53 }
 0x4ef   :  { %6150 = vmatpush3.msra.mxu0 %v5736_v33  ;;  %v5831_v33 = vunpack.c.l.bf16 %v6012_v26 }
 0x4f0   :  { %6151 = vmatprep.subr.mxu0 %v5767_v4 }
 0x4f1   :  { %6152 = vmatpush3.msra.mxu0 %v5735_v14 }
 0x4f2   :  { %5630 = vmatmul.mubr.f32.vlgmr.msra.gmra.mxu0 %v4046_v1 }
 0x50c   :  { %v5093_v61 = vpop.f32.mrf.mxu1 }
 0x50d   :  { %v5094_v37 = vadd.f32 %v5093_v61, %v4825_v9  ;;  %v5705_v9 = vld [vmem:[#allocation19] sm:$0x1] }
 0x50e   :  { %v5095_v5 = vpop.f32.mrf.mxu1 }
 0x50f   :  { %v5096_v51 = vadd.f32 %v5095_v5, %v4829_v0  ;;  %v5165_v24 = vadd.f32 %v5164_v17, %v5094_v37  ;;  %v5706_v37 = vunpack.c.l.bf16 %v5705_v9 }
 0x511   :  { %v5167_v11 = vadd.f32 %v5166_v60, %v5096_v51 }
 0x513   :  { %5559 = vmatprep.mubr.f32.mxu1 %v5167_v11 }
 0x514   :  { %5560 = vmatmul.mubr.f32.vlgmr.msra.gmra.mxu1 %v5165_v24 }
 0x515   :  { %6157 = vmatpush3.msra.mxu1 %v5828_v30  ;;  %5699 = vmatprep.mubr.f32.mxu1 %v7213_v16  ;;  %v5816_v16 = vunpack.c.h.bf16 %v6008_v20  ;;  %v5710_v30 = vrot.slane %v5706_v37, %v7353_v23 }
 0x516   :  { %6158 = vmatprep.subr.mxu1 %v5859_v29 }
 0x517   :  { %6159 = vmatpush3.msra.mxu1 %v5827_v63 }
 0x518   :  { %6160 = vmatprep.subr.mxu1 %v5856_v22 }
 0x519   :  { %6161 = vmatpush3.msra.mxu1 %v5824_v46 }
 0x51a   :  { %6162 = vmatprep.subr.mxu1 %v5855_v42 }
 0x51b   :  { %6163 = vmatpush3.msra.mxu1 %v5823_v54 }
 0x51c   :  { %6164 = vmatprep.subr.mxu1 %v5852_v8 }
 0x51d   :  { %6165 = vmatpush3.msra.mxu1 %v5820_v45 }
 0x51e   :  { %6166 = vmatprep.subr.mxu1 %v5851_v56 }
 0x51f   :  { %6167 = vmatpush3.msra.mxu1 %v5819_v47 }
 0x520   :  { %6168 = vmatprep.subr.mxu1 %v5848_v39 }
 0x521   :  { %6169 = vmatpush3.msra.mxu1 %v5816_v16 }
 0x522   :  { %6170 = vmatprep.subr.mxu1 %v5847_v48 }
 0x523   :  { %6171 = vmatpush3.msra.mxu1 %v5815_v27 }
 0x524   :  { %6172 = vmatprep.subr.mxu1 %v5844_v32 }
 0x525   :  { %6173 = vmatpush3.msra.mxu1 %v5812_v18 }
 0x526   :  { %6174 = vmatprep.subr.mxu1 %v5843_v36 }
 0x527   :  { %6175 = vmatpush3.msra.mxu1 %v5811_v59 }
 0x528   :  { %6176 = vmatprep.subr.mxu1 %v5840_v34 }
 0x529   :  { %6177 = vmatpush3.msra.mxu1 %v5808_v44 }
 0x52a   :  { %6178 = vmatprep.subr.mxu1 %v5839_v3 }
 0x52b   :  { %6179 = vmatpush3.msra.mxu1 %v5807_v49 }
 0x52c   :  { %6180 = vmatprep.subr.mxu1 %v5836_v6 }
 0x52d   :  { %6181 = vmatpush3.msra.mxu1 %v5804_v43 }
 0x52e   :  { %6182 = vmatprep.subr.mxu1 %v5835_v31 }
 0x52f   :  { %6183 = vmatpush3.msra.mxu1 %v5803_v21 }
 0x530   :  { %6184 = vmatprep.subr.mxu1 %v5832_v41 }
 0x531   :  { %6185 = vmatpush3.msra.mxu1 %v5800_v35 }
 0x532   :  { %6186 = vmatprep.subr.mxu1 %v5831_v33 }
 0x533   :  { %6187 = vmatpush3.msra.mxu1 %v5799_v55 }
 0x534   :  { %5700 = vmatmul.mubr.f32.vlgmr.msra.gmra.mxu1 %v7210_v57 }
 0x592   :  { %v6083_v4 = vpop.f32.mrf.mxu0 }
 0x594   :  { %v6084_v28 = vpop.f32.mrf.mxu0 }
 0x595   :  { %v6085_v0 = vadd.f32 %v6084_v28, %v6083_v4 }
 0x5b2   :  { %v6153_v50 = vpop.f32.mrf.mxu0 }
 0x5b4   :  { %v6154_v61 = vpop.f32.mrf.mxu0 }
 0x5b5   :  { %v6155_v10 = vadd.f32 %v6154_v61, %v6153_v50 }
 0x5d4   :  { %v6118_v14 = vpop.f32.mrf.mxu1 }
 0x5d6   :  { %v6119_v1 = vpop.f32.mrf.mxu1 }
 0x5d7   :  { %v6120_v25 = vadd.f32 %v6119_v1, %v6118_v14 }
 0x5d9   :  { %v5562_v17 = vadd.f32 %v6120_v25, %v6085_v0 }
 0x5db   :  { %v5632_v60 = vadd.f32 %v6155_v10, %v5562_v17 }
 0x5f4   :  { %v6188_v5 = vpop.f32.mrf.mxu1 }
 0x5f6   :  { %v6189_v51 = vpop.f32.mrf.mxu1 }
 0x5f7   :  { %v6190_v11 = vadd.f32 %v6189_v51, %v6188_v5 }
 0x5f9   :  { %v5702_v57 = vadd.f32 %v6190_v11, %v5632_v60 }
 0x5fb   :  { %v5711_v40 = vadd.f32 %v5710_v30, %v5702_v57 }
 0x5fd   :  { %5712 = vst [vmem:[#allocation20] sm:$0xff] %v5711_v40 }
 0x5fe   :  { %6468 = shalt.err (!%p6465_p3)
}
 0x5ff   :  { %5722 = dma.vmem_to_hbm [thread:$0]  %s5720_s10, 128, %s7262_s11, [#allocation4]  }
 0x600   :  { %6489 = dma.done.wait [#allocation4], 128  }
 0x601   :  { %6490 = vsyncadd [#allocation4], 4294967168 }
 0x602   :  { %5726 = vsyncpa [#allocation3], 1 }
 0x603   :  { %5727 = vsyncpa [#allocation6], 1 }
 0x604   :  { %5728 = vsyncpa [#allocation9], 1 }
 0x605   :  { %5729 = vsyncpa [#allocation12], 1 }
 0x606   :  { %5730 = vsyncpa [#allocation15], 1 }
 0x607   :  { %5731 = vsyncpa [#allocation18], 1 }
 0x608   :  { %5732 = vsyncpa [#allocation4], 1 }

</bundles_post_ra>
